<compile_context>
chip_gen: v7x
topology: tpu7x:2x2x1
jax: 0.10.0
libtpu: 0.0.40
codegen_flags: <defaults>
</compile_context>

<pallas_src>
import functools

import numpy as np
import jax
import jax.numpy as jnp
from jax.experimental import pallas as pl
from jax.experimental.pallas import tpu as pltpu

EMB_DIM = 512
_POOL_OUT = 112


# ---------------------------------------------------------------------------
# Host-side precompute: crop + adaptive average pooling as exact linear maps.
# ---------------------------------------------------------------------------
def _adaptive_pool_matrix(in_size: int, out_size: int) -> np.ndarray:
    """Exact matrix P (out, in) such that P @ v == 1D adaptive average pool."""
    p = np.zeros((out_size, in_size), dtype=np.float32)
    for i in range(out_size):
        start = (i * in_size) // out_size
        end = -((-(i + 1) * in_size) // out_size)  # ceil((i+1)*in/out)
        p[i, start:end] = 1.0 / (end - start)
    return p


def _crop_pool_matrix(size: int, crop_start: int, crop_stop: int) -> np.ndarray:
    """(112, size) operator: crop [crop_start:crop_stop] then adaptive-pool to 112."""
    m = np.zeros((_POOL_OUT, size), dtype=np.float32)
    m[:, crop_start:crop_stop] = _adaptive_pool_matrix(crop_stop - crop_start, _POOL_OUT)
    return m


def _build_pool_operators(h: int, w: int):
    """Compose (optional pool-to-256) + crop[35:223, 32:220] + pool-to-112."""
    if w != 256:  # torch checks X.shape[-1] only
        ph = _crop_pool_matrix(256, 35, 223) @ _adaptive_pool_matrix(h, 256)
        pw = _crop_pool_matrix(256, 32, 220) @ _adaptive_pool_matrix(w, 256)
    else:
        ph = _crop_pool_matrix(h, 35, 223)
        pw = _crop_pool_matrix(w, 32, 220)
    return jnp.asarray(ph), jnp.asarray(np.ascontiguousarray(pw.T))  # (112,h), (w,112)


# ---------------------------------------------------------------------------
# Kernel 1: preprocessing (composed crop+pool) + percept L1, for BOTH images.
#   x_pair: (2, N, C, H, W) f32  ->  pooled: (2, N, C, 112, 112) bf16, percept: (1,1) f32
# ---------------------------------------------------------------------------
def _prep_kernel(x_ref, ph_ref, pwt_ref, pooled_ref, percept_ref, acc_ref, *,
                 channels, denom):
    i = pl.program_id(0)

    @pl.when(i == 0)
    def _init():
        acc_ref[...] = jnp.zeros_like(acc_ref)

    ph = ph_ref[...]     # (112, H)
    pwt = pwt_ref[...]   # (W, 112)

    l1 = jnp.zeros((1, 1), jnp.float32)
    for c in range(channels):            # static unroll, channels is small
        planes = []
        for a in range(2):               # a=0 -> img1, a=1 -> img2
            x = x_ref[a, 0, c]                                            # (H, W)
            t = jnp.dot(ph, x, preferred_element_type=jnp.float32)        # (112, W)
            p = jnp.dot(t, pwt, preferred_element_type=jnp.float32)       # (112, 112)
            pooled_ref[a, 0, c] = p.astype(pooled_ref.dtype)
            planes.append(p)
        l1 = l1 + jnp.sum(jnp.abs(planes[0] - planes[1]), keepdims=True)
    acc_ref[...] += l1

    @pl.when(i == pl.num_programs(0) - 1)
    def _finalize():
        # TODO(synk): single pooled-input tap stands in for the 5 backbone feature taps.
        percept_ref[...] = acc_ref[...] * (1.0 / denom)


def _preprocess_and_percept(x_pair, ph, pwt):
    two, n, c, h, w = x_pair.shape
    assert two == 2
    return pl.pallas_call(
        functools.partial(_prep_kernel, channels=c,
                          denom=float(n * c * _POOL_OUT * _POOL_OUT)),
        out_shape=(
            jax.ShapeDtypeStruct((2, n, c, _POOL_OUT, _POOL_OUT), jnp.bfloat16),
            jax.ShapeDtypeStruct((1, 1), jnp.float32),
        ),
        grid=(n,),
        in_specs=[
            pl.BlockSpec((2, 1, c, h, w), lambda i: (0, i, 0, 0, 0)),
            pl.BlockSpec((_POOL_OUT, h), lambda i: (0, 0)),
            pl.BlockSpec((w, _POOL_OUT), lambda i: (0, 0)),
        ],
        out_specs=(
            pl.BlockSpec((2, 1, c, _POOL_OUT, _POOL_OUT), lambda i: (0, i, 0, 0, 0)),
            pl.BlockSpec((1, 1), lambda i: (0, 0)),
        ),
        scratch_shapes=[pltpu.VMEM((1, 1), jnp.float32)],
        compiler_params=pltpu.CompilerParams(
            dimension_semantics=("arbitrary",)),   # percept accumulates across the grid
    )(x_pair.astype(jnp.float32), ph, pwt)


# ---------------------------------------------------------------------------
# Kernel 2: synthetic backbone projection (K-tiled bf16 matmul, fp32 acc)
#           + fused l2_norm + cosine / clamp / mean loss epilogue.
#   x2d: (2N, K) bf16 (rows 0..N-1 = img1, rows N..2N-1 = img2),  w: (K, 512) bf16
#   -> id_loss (1,1), rev_id_loss (1,1)
# ---------------------------------------------------------------------------
def _feat_loss_kernel(x_ref, w_ref, id_ref, rev_ref, acc_ref, *, tk, margin, n_pairs):
    kk = pl.program_id(0)

    @pl.when(kk == 0)
    def _init():
        acc_ref[...] = jnp.zeros_like(acc_ref)

    off = kk * tk
    if tk % 128 == 0:
        off = pl.multiple_of(off, 128)
    xs = x_ref[:, pl.ds(off, tk)]                                   # (2N, tk) bf16
    acc_ref[...] += jnp.dot(xs, w_ref[...],
                            preferred_element_type=jnp.float32)     # fp32 accumulation

    @pl.when(kk == pl.num_programs(0) - 1)
    def _finalize():
        acc = acc_ref[...]                                          # (2N, 512) f32
        # l2_norm (eps guard against zero rows)
        inv = jax.lax.rsqrt(jnp.maximum(
            jnp.sum(acc * acc, axis=-1, keepdims=True), 1e-12))
        feats = acc * inv
        f1 = feats[:n_pairs]                                        # img1 embeddings
        f2 = feats[n_pairs:]                                        # img2 embeddings
        cos = jnp.sum(f1 * f2, axis=-1, keepdims=True)              # (N, 1), unit vectors
        clamped = jnp.maximum(cos, margin)                          # .clamp(min=margin)
        inv_n = 1.0 / n_pairs
        rev_ref[...] = jnp.sum(clamped, axis=0, keepdims=True) * inv_n
        id_ref[...] = jnp.sum(1.0 - clamped, axis=0, keepdims=True) * inv_n


def _pick_tk(k: int) -> int:
    for tk in (5376, 2688, 1792, 896, 448, 112):
        if k % tk == 0:
            return tk
    return k


def _feats_and_cos_losses(x2d, w, *, margin):
    n2, k = x2d.shape
    n = n2 // 2
    tk = _pick_tk(k)
    cost = pl.CostEstimate(
        flops=2 * n2 * k * EMB_DIM,
        transcendentals=0,
        bytes_accessed=int(w.size) * w.dtype.itemsize
        + int(x2d.size) * x2d.dtype.itemsize + 8,
    )
    return pl.pallas_call(
        functools.partial(_feat_loss_kernel, tk=tk, margin=float(margin), n_pairs=n),
        out_shape=(
            jax.ShapeDtypeStruct((1, 1), jnp.float32),   # id_loss
            jax.ShapeDtypeStruct((1, 1), jnp.float32),   # rev_id_loss
        ),
        grid=(k // tk,),
        in_specs=[
            # whole x2d (~300 KB bf16) stays VMEM-resident across the K loop
            pl.BlockSpec((n2, k), lambda kk: (0, 0)),
            # stream W in large bf16 tiles (5376x512 bf16 = 5.25 MiB per tile)
            pl.BlockSpec((tk, EMB_DIM), lambda kk: (kk, 0)),
        ],
        out_specs=(
            pl.BlockSpec((1, 1), lambda kk: (0, 0)),
            pl.BlockSpec((1, 1), lambda kk: (0, 0)),
        ),
        scratch_shapes=[pltpu.VMEM((n2, EMB_DIM), jnp.float32)],
        compiler_params=pltpu.CompilerParams(
            dimension_semantics=("arbitrary",),      # pure K reduction
            vmem_limit_bytes=32 * 1024 * 1024),      # safe on v5e/v6e/v7x with bf16 tiles
        cost_estimate=cost,
    )(x2d, w)


# ---------------------------------------------------------------------------
# Forward: IDLossExtractor.forward(img1, img2) -> (id_loss, rev_id_loss, percept_loss)
# ---------------------------------------------------------------------------
def id_loss_extractor_forward(img1, img2, w_backbone, margin=0.1):
    n, c, h, w = img1.shape
    ph, pwt = _build_pool_operators(h, w)

    # Batch both images through ONE preprocessing call and ONE projection call so the
    # big projection matrix is streamed from HBM once per forward.
    x_pair = jnp.stack([img1, img2], axis=0)              # (2, N, C, H, W)
    pooled, percept = _preprocess_and_percept(x_pair, ph, pwt)

    x2d = pooled.reshape(2 * n, c * _POOL_OUT * _POOL_OUT)  # (2N, K) bf16, [img1; img2]
    w_bf16 = w_backbone.astype(jnp.bfloat16)                 # no-op if already bf16
    id_loss, rev_id_loss = _feats_and_cos_losses(x2d, w_bf16, margin=margin)

    return id_loss[0, 0], rev_id_loss[0, 0], percept[0, 0]


if __name__ == "__main__":
    key = jax.random.PRNGKey(0)
    k1, k2, kw = jax.random.split(key, 3)

    # Crop indices 35:223 / 32:220 in the module imply 256x256 inputs.
    n, c, hw = 2, 3, 256
    img1 = jax.random.normal(k1, (n, c, hw, hw), dtype=jnp.float32)
    img2 = jax.random.normal(k2, (n, c, hw, hw), dtype=jnp.float32)

    # Deterministic synthetic backbone projection (stand-in for ir_se50), stored bf16.
    d_in = c * _POOL_OUT * _POOL_OUT
    w = (jax.random.normal(kw, (d_in, EMB_DIM), dtype=jnp.float32)
         / np.sqrt(d_in)).astype(jnp.bfloat16)

    fwd = jax.jit(id_loss_extractor_forward)
    id_loss, rev_id_loss, percept_loss = fwd(img1, img2, w)  # margin default 0.1
    jax.block_until_ready((id_loss, rev_id_loss, percept_loss))
    print("KERNEL_OK")
</pallas_src>

<mosaic_0001>
module attributes {stable_mosaic.version = 11 : i64} {
  func.func @_feat_loss_kernel(%arg0: i32, %arg1: memref<4x37632xbf16, #tpu.memory_space<vmem>>, %arg2: memref<5376x512xbf16, #tpu.memory_space<vmem>>, %arg3: memref<1x1xf32, #tpu.memory_space<vmem>>, %arg4: memref<1x1xf32, #tpu.memory_space<vmem>>, %arg5: memref<4x512xf32, #tpu.memory_space<vmem>>) attributes {dimension_semantics = [#tpu.dimension_semantics<arbitrary>], iteration_bounds = array<i64: 7>, scalar_prefetch = 0 : i64, scratch_operands = 1 : i64, tpu.core_type = #tpu.core_type<tc>, window_params = [{pipeline_mode = #tpu.pipeline_mode<synchronous>, transform_indices = @transform_0, window_bounds = array<i64: 4, 37632>}, {transform_indices = @transform_1, window_bounds = array<i64: 5376, 512>}, {pipeline_mode = #tpu.pipeline_mode<synchronous>, transform_indices = @transform_2, window_bounds = array<i64: 1, 1>}, {pipeline_mode = #tpu.pipeline_mode<synchronous>, transform_indices = @transform_3, window_bounds = array<i64: 1, 1>}]} {
    %c0_i32 = arith.constant 0 : i32
    %0 = arith.cmpi eq, %arg0, %c0_i32 : i32
    %1 = arith.extui %0 : i1 to i32
    %c0_i32_0 = arith.constant 0 : i32
    %2 = arith.cmpi ne, %1, %c0_i32_0 : i32
    scf.if %2 {
      %cst_8 = arith.constant 0.000000e+00 : f32
      %15 = vector.broadcast %cst_8 : f32 to vector<4x512xf32>
      %c0_9 = arith.constant 0 : index
      %c0_10 = arith.constant 0 : index
      %16 = vector.load %arg5[%c0_9, %c0_10] : memref<4x512xf32, #tpu.memory_space<vmem>>, vector<4x512xf32>
      tpu.vector_store %arg5[%c0_9, %c0_10], %15 {strides = array<i32>} : memref<4x512xf32, #tpu.memory_space<vmem>>, vector<4x512xf32>,
    } else {
    }
    %c5376_i32 = arith.constant 5376 : i32
    %3 = arith.muli %arg0, %c5376_i32 : i32
    %4 = tpu.assume_multiple %3, 128 : i32
    %c0 = arith.constant 0 : index
    %5 = arith.index_cast %4 : i32 to index
    %6 = vector.load %arg1[%c0, %5] : memref<4x37632xbf16, #tpu.memory_space<vmem>>, vector<4x5376xbf16>
    %c0_1 = arith.constant 0 : index
    %c0_2 = arith.constant 0 : index
    %7 = vector.load %arg5[%c0_1, %c0_2] : memref<4x512xf32, #tpu.memory_space<vmem>>, vector<4x512xf32>
    %c0_3 = arith.constant 0 : index
    %c0_4 = arith.constant 0 : index
    %8 = vector.load %arg2[%c0_3, %c0_4] : memref<5376x512xbf16, #tpu.memory_space<vmem>>, vector<5376x512xbf16>
    %cst = arith.constant dense<0.000000e+00> : vector<4x512xf32>
    %9 = tpu.matmul %6, %8, %cst {dimension_numbers = #tpu.dot_dimension_numbers<[1], [0], [0], [1], [0, 0, 1, 1], [], []>} : vector<4x5376xbf16>, vector<5376x512xbf16>, vector<4x512xf32> -> vector<4x512xf32>
    %10 = arith.addf %7, %9 : vector<4x512xf32>
    %c0_5 = arith.constant 0 : index
    %c0_6 = arith.constant 0 : index
    %11 = vector.load %arg5[%c0_5, %c0_6] : memref<4x512xf32, #tpu.memory_space<vmem>>, vector<4x512xf32>
    tpu.vector_store %arg5[%c0_5, %c0_6], %10 {strides = array<i32>} : memref<4x512xf32, #tpu.memory_space<vmem>>, vector<4x512xf32>,
    %c6_i32 = arith.constant 6 : i32
    %12 = arith.cmpi eq, %arg0, %c6_i32 : i32
    %13 = arith.extui %12 : i1 to i32
    %c0_i32_7 = arith.constant 0 : i32
    %14 = arith.cmpi ne, %13, %c0_i32_7 : i32
    scf.if %14 {
      %c0_8 = arith.constant 0 : index
      %c0_9 = arith.constant 0 : index
      %15 = vector.load %arg5[%c0_8, %c0_9] : memref<4x512xf32, #tpu.memory_space<vmem>>, vector<4x512xf32>
      %16 = arith.mulf %15, %15 : vector<4x512xf32>
      %cst_10 = arith.constant dense<0.000000e+00> : vector<4xf32>
      %17 = vector.multi_reduction <add>, %16, %cst_10 [1] : vector<4x512xf32> to vector<4xf32>
      %18 = vector.shape_cast %17 : vector<4xf32> to vector<4x1xf32>
      %cst_11 = arith.constant 9.99999996E-13 : f32
      %19 = vector.broadcast %cst_11 : f32 to vector<4x1xf32>
      %20 = arith.maximumf %18, %19 : vector<4x1xf32>
      %21 = math.rsqrt %20 : vector<4x1xf32>
      %22 = vector.broadcast %21 : vector<4x1xf32> to vector<4x512xf32>
      %23 = arith.mulf %15, %22 : vector<4x512xf32>
      %24 = vector.extract_strided_slice %23 {offsets = [0, 0], sizes = [2, 512], strides = [1, 1]} : vector<4x512xf32> to vector<2x512xf32>
      %25 = vector.extract_strided_slice %23 {offsets = [2, 0], sizes = [2, 512], strides = [1, 1]} : vector<4x512xf32> to vector<2x512xf32>
      %26 = arith.mulf %24, %25 : vector<2x512xf32>
      %cst_12 = arith.constant dense<0.000000e+00> : vector<2xf32>
      %27 = vector.multi_reduction <add>, %26, %cst_12 [1] : vector<2x512xf32> to vector<2xf32>
      %28 = vector.shape_cast %27 : vector<2xf32> to vector<2x1xf32>
      %cst_13 = arith.constant 1.000000e-01 : f32
      %29 = vector.broadcast %cst_13 : f32 to vector<2x1xf32>
      %30 = arith.maximumf %28, %29 : vector<2x1xf32>
      %cst_14 = arith.constant dense<0.000000e+00> : vector<1xf32>
      %31 = vector.multi_reduction <add>, %30, %cst_14 [0] : vector<2x1xf32> to vector<1xf32>
      %32 = vector.shape_cast %31 : vector<1xf32> to vector<1x1xf32>
      %cst_15 = arith.constant 5.000000e-01 : f32
      %33 = vector.broadcast %cst_15 : f32 to vector<1x1xf32>
      %34 = arith.mulf %32, %33 : vector<1x1xf32>
      %c0_16 = arith.constant 0 : index
      %c0_17 = arith.constant 0 : index
      %35 = vector.load %arg4[%c0_16, %c0_17] : memref<1x1xf32, #tpu.memory_space<vmem>>, vector<1x1xf32>
      tpu.vector_store %arg4[%c0_16, %c0_17], %34 {strides = array<i32>} : memref<1x1xf32, #tpu.memory_space<vmem>>, vector<1x1xf32>,
      %cst_18 = arith.constant 1.000000e+00 : f32
      %36 = vector.broadcast %cst_18 : f32 to vector<2x1xf32>
      %37 = arith.subf %36, %30 : vector<2x1xf32>
      %cst_19 = arith.constant dense<0.000000e+00> : vector<1xf32>
      %38 = vector.multi_reduction <add>, %37, %cst_19 [0] : vector<2x1xf32> to vector<1xf32>
      %39 = vector.shape_cast %38 : vector<1xf32> to vector<1x1xf32>
      %cst_20 = arith.constant 5.000000e-01 : f32
      %40 = vector.broadcast %cst_20 : f32 to vector<1x1xf32>
      %41 = arith.mulf %39, %40 : vector<1x1xf32>
      %c0_21 = arith.constant 0 : index
      %c0_22 = arith.constant 0 : index
      %42 = vector.load %arg3[%c0_21, %c0_22] : memref<1x1xf32, #tpu.memory_space<vmem>>, vector<1x1xf32>
      tpu.vector_store %arg3[%c0_21, %c0_22], %41 {strides = array<i32>} : memref<1x1xf32, #tpu.memory_space<vmem>>, vector<1x1xf32>,
    } else {
    }
    return
  }
  func.func @transform_0(%arg0: i32) -> (i32, i32) {
    %c0_i32 = arith.constant 0 : i32
    %c0_i32_0 = arith.constant 0 : i32
    %c0_i32_1 = arith.constant 0 : i32
    return %c0_i32, %c0_i32_0 : i32, i32
  }
  func.func @transform_1(%arg0: i32) -> (i32, i32) {
    %c0_i32 = arith.constant 0 : i32
    %c0_i32_0 = arith.constant 0 : i32
    return %arg0, %c0_i32 : i32, i32
  }
  func.func @transform_2(%arg0: i32) -> (i32, i32) {
    %c0_i32 = arith.constant 0 : i32
    %c0_i32_0 = arith.constant 0 : i32
    %c0_i32_1 = arith.constant 0 : i32
    return %c0_i32, %c0_i32_0 : i32, i32
  }
  func.func @transform_3(%arg0: i32) -> (i32, i32) {
    %c0_i32 = arith.constant 0 : i32
    %c0_i32_0 = arith.constant 0 : i32
    %c0_i32_1 = arith.constant 0 : i32
    return %c0_i32, %c0_i32_0 : i32, i32
  }
}

module attributes {stable_mosaic.version = 11 : i64} {
  func.func @_prep_kernel(%arg0: i32, %arg1: memref<2x1x3x256x256xf32, #tpu.memory_space<vmem>>, %arg2: memref<112x256xf32, #tpu.memory_space<vmem>>, %arg3: memref<256x112xf32, #tpu.memory_space<vmem>>, %arg4: memref<2x1x3x112x112xbf16, #tpu.memory_space<vmem>>, %arg5: memref<1x1xf32, #tpu.memory_space<vmem>>, %arg6: memref<1x1xf32, #tpu.memory_space<vmem>>) attributes {dimension_semantics = [#tpu.dimension_semantics<arbitrary>], iteration_bounds = array<i64: 2>, scalar_prefetch = 0 : i64, scratch_operands = 1 : i64, tpu.core_type = #tpu.core_type<tc>, window_params = [{transform_indices = @transform_0, window_bounds = array<i64: 2, 1, 3, 256, 256>}, {pipeline_mode = #tpu.pipeline_mode<synchronous>, transform_indices = @transform_1, window_bounds = array<i64: 112, 256>}, {pipeline_mode = #tpu.pipeline_mode<synchronous>, transform_indices = @transform_2, window_bounds = array<i64: 256, 112>}, {transform_indices = @transform_3, window_bounds = array<i64: 2, 1, 3, 112, 112>}, {pipeline_mode = #tpu.pipeline_mode<synchronous>, transform_indices = @transform_4, window_bounds = array<i64: 1, 1>}]} {
    %c0_i32 = arith.constant 0 : i32
    %0 = arith.cmpi eq, %arg0, %c0_i32 : i32
    %1 = arith.extui %0 : i1 to i32
    %c0_i32_0 = arith.constant 0 : i32
    %2 = arith.cmpi ne, %1, %c0_i32_0 : i32
    scf.if %2 {
      %cst_82 = arith.constant 0.000000e+00 : f32
      %84 = vector.broadcast %cst_82 : f32 to vector<1x1xf32>
      %c0_83 = arith.constant 0 : index
      %c0_84 = arith.constant 0 : index
      %85 = vector.load %arg6[%c0_83, %c0_84] : memref<1x1xf32, #tpu.memory_space<vmem>>, vector<1x1xf32>
      tpu.vector_store %arg6[%c0_83, %c0_84], %84 {strides = array<i32>} : memref<1x1xf32, #tpu.memory_space<vmem>>, vector<1x1xf32>,
    } else {
    }
    %c0 = arith.constant 0 : index
    %c0_1 = arith.constant 0 : index
    %3 = vector.load %arg2[%c0, %c0_1] : memref<112x256xf32, #tpu.memory_space<vmem>>, vector<112x256xf32>
    %c0_2 = arith.constant 0 : index
    %c0_3 = arith.constant 0 : index
    %4 = vector.load %arg3[%c0_2, %c0_3] : memref<256x112xf32, #tpu.memory_space<vmem>>, vector<256x112xf32>
    %cst = arith.constant 0.000000e+00 : f32
    %5 = vector.broadcast %cst : f32 to vector<1x1xf32>
    %c0_4 = arith.constant 0 : index
    %c0_5 = arith.constant 0 : index
    %c0_6 = arith.constant 0 : index
    %c0_7 = arith.constant 0 : index
    %c0_8 = arith.constant 0 : index
    %6 = vector.load %arg1[%c0_4, %c0_5, %c0_6, %c0_7, %c0_8] : memref<2x1x3x256x256xf32, #tpu.memory_space<vmem>>, vector<1x1x1x256x256xf32>
    %7 = vector.shape_cast %6 : vector<1x1x1x256x256xf32> to vector<256x256xf32>
    %cst_9 = arith.constant dense<0.000000e+00> : vector<112x256xf32>
    %8 = tpu.matmul %3, %7, %cst_9 {dimension_numbers = #tpu.dot_dimension_numbers<[1], [0], [0], [1], [0, 0, 1, 1], [], []>} : vector<112x256xf32>, vector<256x256xf32>, vector<112x256xf32> -> vector<112x256xf32>
    %cst_10 = arith.constant dense<0.000000e+00> : vector<112x112xf32>
    %9 = tpu.matmul %8, %4, %cst_10 {dimension_numbers = #tpu.dot_dimension_numbers<[1], [0], [0], [1], [0, 0, 1, 1], [], []>} : vector<112x256xf32>, vector<256x112xf32>, vector<112x112xf32> -> vector<112x112xf32>
    %10 = arith.truncf %9 : vector<112x112xf32> to vector<112x112xbf16>
    %c0_11 = arith.constant 0 : index
    %c0_12 = arith.constant 0 : index
    %c0_13 = arith.constant 0 : index
    %c0_14 = arith.constant 0 : index
    %c0_15 = arith.constant 0 : index
    %11 = vector.load %arg4[%c0_11, %c0_12, %c0_13, %c0_14, %c0_15] : memref<2x1x3x112x112xbf16, #tpu.memory_space<vmem>>, vector<1x1x1x112x112xbf16>
    %12 = vector.shape_cast %11 : vector<1x1x1x112x112xbf16> to vector<112x112xbf16>
    %13 = vector.shape_cast %10 : vector<112x112xbf16> to vector<1x1x1x112x112xbf16>
    tpu.vector_store %arg4[%c0_11, %c0_12, %c0_13, %c0_14, %c0_15], %13 {strides = array<i32>} : memref<2x1x3x112x112xbf16, #tpu.memory_space<vmem>>, vector<1x1x1x112x112xbf16>,
    %c1 = arith.constant 1 : index
    %c0_16 = arith.constant 0 : index
    %c0_17 = arith.constant 0 : index
    %c0_18 = arith.constant 0 : index
    %c0_19 = arith.constant 0 : index
    %14 = vector.load %arg1[%c1, %c0_16, %c0_17, %c0_18, %c0_19] : memref<2x1x3x256x256xf32, #tpu.memory_space<vmem>>, vector<1x1x1x256x256xf32>
    %15 = vector.shape_cast %14 : vector<1x1x1x256x256xf32> to vector<256x256xf32>
    %cst_20 = arith.constant dense<0.000000e+00> : vector<112x256xf32>
    %16 = tpu.matmul %3, %15, %cst_20 {dimension_numbers = #tpu.dot_dimension_numbers<[1], [0], [0], [1], [0, 0, 1, 1], [], []>} : vector<112x256xf32>, vector<256x256xf32>, vector<112x256xf32> -> vector<112x256xf32>
    %cst_21 = arith.constant dense<0.000000e+00> : vector<112x112xf32>
    %17 = tpu.matmul %16, %4, %cst_21 {dimension_numbers = #tpu.dot_dimension_numbers<[1], [0], [0], [1], [0, 0, 1, 1], [], []>} : vector<112x256xf32>, vector<256x112xf32>, vector<112x112xf32> -> vector<112x112xf32>
    %18 = arith.truncf %17 : vector<112x112xf32> to vector<112x112xbf16>
    %c1_22 = arith.constant 1 : index
    %c0_23 = arith.constant 0 : index
    %c0_24 = arith.constant 0 : index
    %c0_25 = arith.constant 0 : index
    %c0_26 = arith.constant 0 : index
    %19 = vector.load %arg4[%c1_22, %c0_23, %c0_24, %c0_25, %c0_26] : memref<2x1x3x112x112xbf16, #tpu.memory_space<vmem>>, vector<1x1x1x112x112xbf16>
    %20 = vector.shape_cast %19 : vector<1x1x1x112x112xbf16> to vector<112x112xbf16>
    %21 = vector.shape_cast %18 : vector<112x112xbf16> to vector<1x1x1x112x112xbf16>
    tpu.vector_store %arg4[%c1_22, %c0_23, %c0_24, %c0_25, %c0_26], %21 {strides = array<i32>} : memref<2x1x3x112x112xbf16, #tpu.memory_space<vmem>>, vector<1x1x1x112x112xbf16>,
    %22 = arith.subf %9, %17 : vector<112x112xf32>
    %23 = math.absf %22 : vector<112x112xf32>
    %24 = vector.shape_cast %23 : vector<112x112xf32> to vector<1x112x112xf32>
    %cst_27 = arith.constant dense<0.000000e+00> : vector<1xf32>
    %25 = vector.multi_reduction <add>, %24, %cst_27 [1, 2] : vector<1x112x112xf32> to vector<1xf32>
    %26 = vector.shape_cast %25 : vector<1xf32> to vector<1x1x1xf32>
    %27 = vector.extract %26[0, 0, 0] : f32 from vector<1x1x1xf32>
    %28 = vector.broadcast %27 : f32 to vector<1x1xf32>
    %29 = arith.addf %5, %28 : vector<1x1xf32>
    %c0_28 = arith.constant 0 : index
    %c0_29 = arith.constant 0 : index
    %c1_30 = arith.constant 1 : index
    %c0_31 = arith.constant 0 : index
    %c0_32 = arith.constant 0 : index
    %30 = vector.load %arg1[%c0_28, %c0_29, %c1_30, %c0_31, %c0_32] : memref<2x1x3x256x256xf32, #tpu.memory_space<vmem>>, vector<1x1x1x256x256xf32>
    %31 = vector.shape_cast %30 : vector<1x1x1x256x256xf32> to vector<256x256xf32>
    %cst_33 = arith.constant dense<0.000000e+00> : vector<112x256xf32>
    %32 = tpu.matmul %3, %31, %cst_33 {dimension_numbers = #tpu.dot_dimension_numbers<[1], [0], [0], [1], [0, 0, 1, 1], [], []>} : vector<112x256xf32>, vector<256x256xf32>, vector<112x256xf32> -> vector<112x256xf32>
    %cst_34 = arith.constant dense<0.000000e+00> : vector<112x112xf32>
    %33 = tpu.matmul %32, %4, %cst_34 {dimension_numbers = #tpu.dot_dimension_numbers<[1], [0], [0], [1], [0, 0, 1, 1], [], []>} : vector<112x256xf32>, vector<256x112xf32>, vector<112x112xf32> -> vector<112x112xf32>
    %34 = arith.truncf %33 : vector<112x112xf32> to vector<112x112xbf16>
    %c0_35 = arith.constant 0 : index
    %c0_36 = arith.constant 0 : index
    %c1_37 = arith.constant 1 : index
    %c0_38 = arith.constant 0 : index
    %c0_39 = arith.constant 0 : index
    %35 = vector.load %arg4[%c0_35, %c0_36, %c1_37, %c0_38, %c0_39] : memref<2x1x3x112x112xbf16, #tpu.memory_space<vmem>>, vector<1x1x1x112x112xbf16>
    %36 = vector.shape_cast %35 : vector<1x1x1x112x112xbf16> to vector<112x112xbf16>
    %37 = vector.shape_cast %34 : vector<112x112xbf16> to vector<1x1x1x112x112xbf16>
    tpu.vector_store %arg4[%c0_35, %c0_36, %c1_37, %c0_38, %c0_39], %37 {strides = array<i32>} : memref<2x1x3x112x112xbf16, #tpu.memory_space<vmem>>, vector<1x1x1x112x112xbf16>,
    %c1_40 = arith.constant 1 : index
    %c0_41 = arith.constant 0 : index
    %c1_42 = arith.constant 1 : index
    %c0_43 = arith.constant 0 : index
    %c0_44 = arith.constant 0 : index
    %38 = vector.load %arg1[%c1_40, %c0_41, %c1_42, %c0_43, %c0_44] : memref<2x1x3x256x256xf32, #tpu.memory_space<vmem>>, vector<1x1x1x256x256xf32>
    %39 = vector.shape_cast %38 : vector<1x1x1x256x256xf32> to vector<256x256xf32>
    %cst_45 = arith.constant dense<0.000000e+00> : vector<112x256xf32>
    %40 = tpu.matmul %3, %39, %cst_45 {dimension_numbers = #tpu.dot_dimension_numbers<[1], [0], [0], [1], [0, 0, 1, 1], [], []>} : vector<112x256xf32>, vector<256x256xf32>, vector<112x256xf32> -> vector<112x256xf32>
    %cst_46 = arith.constant dense<0.000000e+00> : vector<112x112xf32>
    %41 = tpu.matmul %40, %4, %cst_46 {dimension_numbers = #tpu.dot_dimension_numbers<[1], [0], [0], [1], [0, 0, 1, 1], [], []>} : vector<112x256xf32>, vector<256x112xf32>, vector<112x112xf32> -> vector<112x112xf32>
    %42 = arith.truncf %41 : vector<112x112xf32> to vector<112x112xbf16>
    %c1_47 = arith.constant 1 : index
    %c0_48 = arith.constant 0 : index
    %c1_49 = arith.constant 1 : index
    %c0_50 = arith.constant 0 : index
    %c0_51 = arith.constant 0 : index
    %43 = vector.load %arg4[%c1_47, %c0_48, %c1_49, %c0_50, %c0_51] : memref<2x1x3x112x112xbf16, #tpu.memory_space<vmem>>, vector<1x1x1x112x112xbf16>
    %44 = vector.shape_cast %43 : vector<1x1x1x112x112xbf16> to vector<112x112xbf16>
    %45 = vector.shape_cast %42 : vector<112x112xbf16> to vector<1x1x1x112x112xbf16>
    tpu.vector_store %arg4[%c1_47, %c0_48, %c1_49, %c0_50, %c0_51], %45 {strides = array<i32>} : memref<2x1x3x112x112xbf16, #tpu.memory_space<vmem>>, vector<1x1x1x112x112xbf16>,
    %46 = arith.subf %33, %41 : vector<112x112xf32>
    %47 = math.absf %46 : vector<112x112xf32>
    %48 = vector.shape_cast %47 : vector<112x112xf32> to vector<1x112x112xf32>
    %cst_52 = arith.constant dense<0.000000e+00> : vector<1xf32>
    %49 = vector.multi_reduction <add>, %48, %cst_52 [1, 2] : vector<1x112x112xf32> to vector<1xf32>
    %50 = vector.shape_cast %49 : vector<1xf32> to vector<1x1x1xf32>
    %51 = vector.extract %50[0, 0, 0] : f32 from vector<1x1x1xf32>
    %52 = vector.broadcast %51 : f32 to vector<1x1xf32>
    %53 = arith.addf %29, %52 : vector<1x1xf32>
    %c0_53 = arith.constant 0 : index
    %c0_54 = arith.constant 0 : index
    %c2 = arith.constant 2 : index
    %c0_55 = arith.constant 0 : index
    %c0_56 = arith.constant 0 : index
    %54 = vector.load %arg1[%c0_53, %c0_54, %c2, %c0_55, %c0_56] : memref<2x1x3x256x256xf32, #tpu.memory_space<vmem>>, vector<1x1x1x256x256xf32>
    %55 = vector.shape_cast %54 : vector<1x1x1x256x256xf32> to vector<256x256xf32>
    %cst_57 = arith.constant dense<0.000000e+00> : vector<112x256xf32>
    %56 = tpu.matmul %3, %55, %cst_57 {dimension_numbers = #tpu.dot_dimension_numbers<[1], [0], [0], [1], [0, 0, 1, 1], [], []>} : vector<112x256xf32>, vector<256x256xf32>, vector<112x256xf32> -> vector<112x256xf32>
    %cst_58 = arith.constant dense<0.000000e+00> : vector<112x112xf32>
    %57 = tpu.matmul %56, %4, %cst_58 {dimension_numbers = #tpu.dot_dimension_numbers<[1], [0], [0], [1], [0, 0, 1, 1], [], []>} : vector<112x256xf32>, vector<256x112xf32>, vector<112x112xf32> -> vector<112x112xf32>
    %58 = arith.truncf %57 : vector<112x112xf32> to vector<112x112xbf16>
    %c0_59 = arith.constant 0 : index
    %c0_60 = arith.constant 0 : index
    %c2_61 = arith.constant 2 : index
    %c0_62 = arith.constant 0 : index
    %c0_63 = arith.constant 0 : index
    %59 = vector.load %arg4[%c0_59, %c0_60, %c2_61, %c0_62, %c0_63] : memref<2x1x3x112x112xbf16, #tpu.memory_space<vmem>>, vector<1x1x1x112x112xbf16>
    %60 = vector.shape_cast %59 : vector<1x1x1x112x112xbf16> to vector<112x112xbf16>
    %61 = vector.shape_cast %58 : vector<112x112xbf16> to vector<1x1x1x112x112xbf16>
    tpu.vector_store %arg4[%c0_59, %c0_60, %c2_61, %c0_62, %c0_63], %61 {strides = array<i32>} : memref<2x1x3x112x112xbf16, #tpu.memory_space<vmem>>, vector<1x1x1x112x112xbf16>,
    %c1_64 = arith.constant 1 : index
    %c0_65 = arith.constant 0 : index
    %c2_66 = arith.constant 2 : index
    %c0_67 = arith.constant 0 : index
    %c0_68 = arith.constant 0 : index
    %62 = vector.load %arg1[%c1_64, %c0_65, %c2_66, %c0_67, %c0_68] : memref<2x1x3x256x256xf32, #tpu.memory_space<vmem>>, vector<1x1x1x256x256xf32>
    %63 = vector.shape_cast %62 : vector<1x1x1x256x256xf32> to vector<256x256xf32>
    %cst_69 = arith.constant dense<0.000000e+00> : vector<112x256xf32>
    %64 = tpu.matmul %3, %63, %cst_69 {dimension_numbers = #tpu.dot_dimension_numbers<[1], [0], [0], [1], [0, 0, 1, 1], [], []>} : vector<112x256xf32>, vector<256x256xf32>, vector<112x256xf32> -> vector<112x256xf32>
    %cst_70 = arith.constant dense<0.000000e+00> : vector<112x112xf32>
    %65 = tpu.matmul %64, %4, %cst_70 {dimension_numbers = #tpu.dot_dimension_numbers<[1], [0], [0], [1], [0, 0, 1, 1], [], []>} : vector<112x256xf32>, vector<256x112xf32>, vector<112x112xf32> -> vector<112x112xf32>
    %66 = arith.truncf %65 : vector<112x112xf32> to vector<112x112xbf16>
    %c1_71 = arith.constant 1 : index
    %c0_72 = arith.constant 0 : index
    %c2_73 = arith.constant 2 : index
    %c0_74 = arith.constant 0 : index
    %c0_75 = arith.constant 0 : index
    %67 = vector.load %arg4[%c1_71, %c0_72, %c2_73, %c0_74, %c0_75] : memref<2x1x3x112x112xbf16, #tpu.memory_space<vmem>>, vector<1x1x1x112x112xbf16>
    %68 = vector.shape_cast %67 : vector<1x1x1x112x112xbf16> to vector<112x112xbf16>
    %69 = vector.shape_cast %66 : vector<112x112xbf16> to vector<1x1x1x112x112xbf16>
    tpu.vector_store %arg4[%c1_71, %c0_72, %c2_73, %c0_74, %c0_75], %69 {strides = array<i32>} : memref<2x1x3x112x112xbf16, #tpu.memory_space<vmem>>, vector<1x1x1x112x112xbf16>,
    %70 = arith.subf %57, %65 : vector<112x112xf32>
    %71 = math.absf %70 : vector<112x112xf32>
    %72 = vector.shape_cast %71 : vector<112x112xf32> to vector<1x112x112xf32>
    %cst_76 = arith.constant dense<0.000000e+00> : vector<1xf32>
    %73 = vector.multi_reduction <add>, %72, %cst_76 [1, 2] : vector<1x112x112xf32> to vector<1xf32>
    %74 = vector.shape_cast %73 : vector<1xf32> to vector<1x1x1xf32>
    %75 = vector.extract %74[0, 0, 0] : f32 from vector<1x1x1xf32>
    %76 = vector.broadcast %75 : f32 to vector<1x1xf32>
    %77 = arith.addf %53, %76 : vector<1x1xf32>
    %c0_77 = arith.constant 0 : index
    %c0_78 = arith.constant 0 : index
    %78 = vector.load %arg6[%c0_77, %c0_78] : memref<1x1xf32, #tpu.memory_space<vmem>>, vector<1x1xf32>
    %79 = arith.addf %78, %77 : vector<1x1xf32>
    %c0_79 = arith.constant 0 : index
    %c0_80 = arith.constant 0 : index
    %80 = vector.load %arg6[%c0_79, %c0_80] : memref<1x1xf32, #tpu.memory_space<vmem>>, vector<1x1xf32>
    tpu.vector_store %arg6[%c0_79, %c0_80], %79 {strides = array<i32>} : memref<1x1xf32, #tpu.memory_space<vmem>>, vector<1x1xf32>,
    %c1_i32 = arith.constant 1 : i32
    %81 = arith.cmpi eq, %arg0, %c1_i32 : i32
    %82 = arith.extui %81 : i1 to i32
    %c0_i32_81 = arith.constant 0 : i32
    %83 = arith.cmpi ne, %82, %c0_i32_81 : i32
    scf.if %83 {
      %c0_82 = arith.constant 0 : index
      %c0_83 = arith.constant 0 : index
      %84 = vector.load %arg6[%c0_82, %c0_83] : memref<1x1xf32, #tpu.memory_space<vmem>>, vector<1x1xf32>
      %cst_84 = arith.constant 1.32865644E-5 : f32
      %85 = vector.broadcast %cst_84 : f32 to vector<1x1xf32>
      %86 = arith.mulf %84, %85 : vector<1x1xf32>
      %c0_85 = arith.constant 0 : index
      %c0_86 = arith.constant 0 : index
      %87 = vector.load %arg5[%c0_85, %c0_86] : memref<1x1xf32, #tpu.memory_space<vmem>>, vector<1x1xf32>
      tpu.vector_store %arg5[%c0_85, %c0_86], %86 {strides = array<i32>} : memref<1x1xf32, #tpu.memory_space<vmem>>, vector<1x1xf32>,
    } else {
    }
    return
  }
  func.func @transform_0(%arg0: i32) -> (i32, i32, i32, i32, i32) {
    %c0_i32 = arith.constant 0 : i32
    %c0_i32_0 = arith.constant 0 : i32
    %c0_i32_1 = arith.constant 0 : i32
    %c0_i32_2 = arith.constant 0 : i32
    %c0_i32_3 = arith.constant 0 : i32
    return %c0_i32, %arg0, %c0_i32_0, %c0_i32_1, %c0_i32_2 : i32, i32, i32, i32, i32
  }
  func.func @transform_1(%arg0: i32) -> (i32, i32) {
    %c0_i32 = arith.constant 0 : i32
    %c0_i32_0 = arith.constant 0 : i32
    %c0_i32_1 = arith.constant 0 : i32
    return %c0_i32, %c0_i32_0 : i32, i32
  }
  func.func @transform_2(%arg0: i32) -> (i32, i32) {
    %c0_i32 = arith.constant 0 : i32
    %c0_i32_0 = arith.constant 0 : i32
    %c0_i32_1 = arith.constant 0 : i32
    return %c0_i32, %c0_i32_0 : i32, i32
  }
  func.func @transform_3(%arg0: i32) -> (i32, i32, i32, i32, i32) {
    %c0_i32 = arith.constant 0 : i32
    %c0_i32_0 = arith.constant 0 : i32
    %c0_i32_1 = arith.constant 0 : i32
    %c0_i32_2 = arith.constant 0 : i32
    %c0_i32_3 = arith.constant 0 : i32
    return %c0_i32, %arg0, %c0_i32_0, %c0_i32_1, %c0_i32_2 : i32, i32, i32, i32, i32
  }
  func.func @transform_4(%arg0: i32) -> (i32, i32) {
    %c0_i32 = arith.constant 0 : i32
    %c0_i32_0 = arith.constant 0 : i32
    %c0_i32_1 = arith.constant 0 : i32
    return %c0_i32, %c0_i32_0 : i32, i32
  }
}

</mosaic_0001>

<bundles_post_ra>
// kernel: id_loss_extractor_forward.2
= control target key start
LH: loop header
LB: loop body
LE: loop exit
PB: predicated region body
PF: predicated region fallthrough
CT: control target
= control target key end

     0   :  { %10 = vsyncpa [#allocation6], 0  ;;  %s6004_s15 = smov 0   ;;  %s6006_s16 = smov 0   ;;  %s8484_s0 = inlined_call_operand.vmem [shape: f32[2,2,3,256,256], index: 0, kind: input, shape index: {}]   ;;  %s8485_s1 = inlined_call_operand.vmem [shape: f32[112,256], index: 1, kind: input, shape index: {}]   ;;  %s8486_s2 = inlined_call_operand.vmem [shape: f32[256,112], index: 2, kind: input, shape index: {}]   ;;  %s8487_s3 = inlined_call_operand.vmem [shape: bf16[2,2,3,112,112], index: 3, kind: output, shape index: {0}]   ;;  %s8488_s4 = inlined_call_operand.hbm [shape: f32[1,1], index: 4, kind: output, shape index: {1}]  }
   0x1   :  { %s6008_s17 = smov 0  }
   0x2 LB: > { %s6020_s18 = sadd.s32 4294967295, %s5975_s17   ;;  %s6023_s19 = sadd.s32 1, %s5975_s17   ;;  %s5975_s17 = sphi %s6008_s17, %s8507_s17   ;;  %s5971_s16 = sphi %s6006_s16, %s8506_s16   ;;  %s5967_s15 = sphi %s6004_s15, %s8505_s15  }
   0x3   : > { %s20_s20 = ssub.s32 %s5975_s17, %s6023_s19  ;;  %s23_s21 = sadd.s32 1, %s5971_s16 }
   0x4   : > { %p21_p0 = scmp.eq.s32.totalorder %s20_s20, 0  ;;  %p30_p1 = scmp.ne.s32.totalorder %s5971_s16, %s5967_s15 }
   0x5   : > { %p31_p2 = scmp.eq.s32.totalorder %s5975_s17, 0  ;;  %p102_p3 = scmp.eq.s32.totalorder %s6020_s18, 1 }
   0x6   : > { %s6033_s22 = scalar_select %p21_p0, %s5971_s16, %s23_s21  }
   0x7   : > { %p32_p4 = por %p31_p2, %p30_p1  ;;  %p6037_p5 = por %p102_p3, %p30_p1 }
   0x8   : > { %p4236_p6 = scmp.ge.s32.totalorder %s5975_s17, 2 }
   0xa   : > { %151 = sbr.rel (%p4236_p6) target bundleno = 214 (0xd6), region = 24 }
  0x11   : > { %154 = sbr.rel (!%p32_p4) target bundleno = 214 (0xd6), region = 28  ;;  %s156_s24 = sand.u32 (%p32_p4), 1, %s5971_s16  }
  0x12   : > { %s5825_s25 = smul.u32 (%p32_p4), 1536, %s5975_s17 }
  0x13   : > { %s5824_s26 = smul.u32 (%p32_p4), 3072, %s156_s24 }
  0x14   : > { %s6047_s29 = scalar_lea.vmem (%p32_p4), %s8484_s0, %s5825_s25 }
  0x15   : > { %v174_v0 = vld [vmem:[%s6047_s29] sm:$0xff] (%p32_p4)  ;;  %v176_v1 = vld [vmem:[%s6047_s29 + $0x8] sm:$0xff] (%p32_p4)  ;;  %v178_v2 = vld [vmem:[%s6047_s29 + $0x10] sm:$0xff] (%p32_p4)  ;;  %s6052_s30 = scalar_lea.vmem (%p32_p4), [#allocation3], %s5824_s26 }
  0x16   : > { %175 = vst [vmem:[%s6052_s30] sm:$0xff] (%p32_p4), %v174_v0  ;;  %177 = vst [vmem:[%s6052_s30 + $0x8] sm:$0xff] (%p32_p4), %v176_v1  ;;  %v180_v3 = vld [vmem:[%s6047_s29 + $0x18] sm:$0xff] (%p32_p4)  ;;  %v182_v4 = vld [vmem:[%s6047_s29 + $0x20] sm:$0xff] (%p32_p4) }
  0x17   : > { %179 = vst [vmem:[%s6052_s30 + $0x10] sm:$0xff] (%p32_p4), %v178_v2  ;;  %v184_v5 = vld [vmem:[%s6047_s29 + $0x28] sm:$0xff] (%p32_p4)  ;;  %181 = vst [vmem:[%s6052_s30 + $0x18] sm:$0xff] (%p32_p4), %v180_v3  ;;  %v186_v6 = vld [vmem:[%s6047_s29 + $0x30] sm:$0xff] (%p32_p4) }
  0x18   : > { %183 = vst [vmem:[%s6052_s30 + $0x20] sm:$0xff] %v182_v4  ;;  %185 = vst [vmem:[%s6052_s30 + $0x28] sm:$0xff] %v184_v5  ;;  %v188_v7 = vld [vmem:[%s6047_s29 + $0x38] sm:$0xff]  ;;  %v190_v8 = vld [vmem:[%s6047_s29 + $0x40] sm:$0xff] }
  0x19   : > { %187 = vst [vmem:[%s6052_s30 + $0x30] sm:$0xff] %v186_v6  ;;  %189 = vst [vmem:[%s6052_s30 + $0x38] sm:$0xff] %v188_v7  ;;  %v192_v9 = vld [vmem:[%s6047_s29 + $0x48] sm:$0xff]  ;;  %v194_v10 = vld [vmem:[%s6047_s29 + $0x50] sm:$0xff] }
  0x1a   : > { %191 = vst [vmem:[%s6052_s30 + $0x40] sm:$0xff] %v190_v8  ;;  %v196_v11 = vld [vmem:[%s6047_s29 + $0x58] sm:$0xff]  ;;  %193 = vst [vmem:[%s6052_s30 + $0x48] sm:$0xff] %v192_v9  ;;  %v198_v12 = vld [vmem:[%s6047_s29 + $0x60] sm:$0xff] }
  0x1b   : > { %195 = vst [vmem:[%s6052_s30 + $0x50] sm:$0xff] %v194_v10  ;;  %197 = vst [vmem:[%s6052_s30 + $0x58] sm:$0xff] %v196_v11  ;;  %v200_v13 = vld [vmem:[%s6047_s29 + $0x68] sm:$0xff]  ;;  %v202_v14 = vld [vmem:[%s6047_s29 + $0x70] sm:$0xff] }
  0x1c   : > { %199 = vst [vmem:[%s6052_s30 + $0x60] sm:$0xff] %v198_v12  ;;  %201 = vst [vmem:[%s6052_s30 + $0x68] sm:$0xff] %v200_v13  ;;  %v204_v15 = vld [vmem:[%s6047_s29 + $0x78] sm:$0xff]  ;;  %v206_v16 = vld [vmem:[%s6047_s29 + $0x80] sm:$0xff] }
  0x1d   : > { %203 = vst [vmem:[%s6052_s30 + $0x70] sm:$0xff] %v202_v14  ;;  %v208_v17 = vld [vmem:[%s6047_s29 + $0x88] sm:$0xff]  ;;  %205 = vst [vmem:[%s6052_s30 + $0x78] sm:$0xff] %v204_v15  ;;  %v210_v18 = vld [vmem:[%s6047_s29 + $0x90] sm:$0xff] }
  0x1e   : > { %207 = vst [vmem:[%s6052_s30 + $0x80] sm:$0xff] %v206_v16  ;;  %209 = vst [vmem:[%s6052_s30 + $0x88] sm:$0xff] %v208_v17  ;;  %v212_v19 = vld [vmem:[%s6047_s29 + $0x98] sm:$0xff]  ;;  %v214_v20 = vld [vmem:[%s6047_s29 + $0xa0] sm:$0xff] }
  0x1f   : > { %211 = vst [vmem:[%s6052_s30 + $0x90] sm:$0xff] %v210_v18  ;;  %213 = vst [vmem:[%s6052_s30 + $0x98] sm:$0xff] %v212_v19  ;;  %v216_v21 = vld [vmem:[%s6047_s29 + $0xa8] sm:$0xff]  ;;  %v218_v22 = vld [vmem:[%s6047_s29 + $0xb0] sm:$0xff] }
  0x20   : > { %215 = vst [vmem:[%s6052_s30 + $0xa0] sm:$0xff] %v214_v20  ;;  %v220_v23 = vld [vmem:[%s6047_s29 + $0xb8] sm:$0xff]  ;;  %217 = vst [vmem:[%s6052_s30 + $0xa8] sm:$0xff] %v216_v21  ;;  %v222_v24 = vld [vmem:[%s6047_s29 + $0xc0] sm:$0xff] }
  0x21   : > { %219 = vst [vmem:[%s6052_s30 + $0xb0] sm:$0xff] %v218_v22  ;;  %221 = vst [vmem:[%s6052_s30 + $0xb8] sm:$0xff] %v220_v23  ;;  %v224_v25 = vld [vmem:[%s6047_s29 + $0xc8] sm:$0xff]  ;;  %v226_v26 = vld [vmem:[%s6047_s29 + $0xd0] sm:$0xff] }
  0x22   : > { %223 = vst [vmem:[%s6052_s30 + $0xc0] sm:$0xff] %v222_v24  ;;  %225 = vst [vmem:[%s6052_s30 + $0xc8] sm:$0xff] %v224_v25  ;;  %v228_v27 = vld [vmem:[%s6047_s29 + $0xd8] sm:$0xff]  ;;  %v230_v28 = vld [vmem:[%s6047_s29 + $0xe0] sm:$0xff] }
  0x23   : > { %227 = vst [vmem:[%s6052_s30 + $0xd0] sm:$0xff] %v226_v26  ;;  %v232_v29 = vld [vmem:[%s6047_s29 + $0xe8] sm:$0xff]  ;;  %229 = vst [vmem:[%s6052_s30 + $0xd8] sm:$0xff] %v228_v27  ;;  %v234_v30 = vld [vmem:[%s6047_s29 + $0xf0] sm:$0xff] }
  0x24   : > { %231 = vst [vmem:[%s6052_s30 + $0xe0] sm:$0xff] %v230_v28  ;;  %233 = vst [vmem:[%s6052_s30 + $0xe8] sm:$0xff] %v232_v29  ;;  %v236_v31 = vld [vmem:[%s6047_s29 + $0xf8] sm:$0xff]  ;;  %v238_v32 = vld [vmem:[%s6047_s29 + $0x100] sm:$0xff] }
  0x25   : > { %235 = vst [vmem:[%s6052_s30 + $0xf0] sm:$0xff] %v234_v30  ;;  %237 = vst [vmem:[%s6052_s30 + $0xf8] sm:$0xff] %v236_v31  ;;  %v240_v33 = vld [vmem:[%s6047_s29 + $0x108] sm:$0xff]  ;;  %v242_v34 = vld [vmem:[%s6047_s29 + $0x110] sm:$0xff] }
  0x26   : > { %239 = vst [vmem:[%s6052_s30 + $0x100] sm:$0xff] %v238_v32  ;;  %v244_v35 = vld [vmem:[%s6047_s29 + $0x118] sm:$0xff]  ;;  %241 = vst [vmem:[%s6052_s30 + $0x108] sm:$0xff] %v240_v33  ;;  %v246_v36 = vld [vmem:[%s6047_s29 + $0x120] sm:$0xff] }
  0x27   : > { %243 = vst [vmem:[%s6052_s30 + $0x110] sm:$0xff] %v242_v34  ;;  %245 = vst [vmem:[%s6052_s30 + $0x118] sm:$0xff] %v244_v35  ;;  %v248_v37 = vld [vmem:[%s6047_s29 + $0x128] sm:$0xff]  ;;  %v250_v38 = vld [vmem:[%s6047_s29 + $0x130] sm:$0xff] }
  0x28   : > { %247 = vst [vmem:[%s6052_s30 + $0x120] sm:$0xff] %v246_v36  ;;  %249 = vst [vmem:[%s6052_s30 + $0x128] sm:$0xff] %v248_v37  ;;  %v252_v39 = vld [vmem:[%s6047_s29 + $0x138] sm:$0xff]  ;;  %v254_v40 = vld [vmem:[%s6047_s29 + $0x140] sm:$0xff] }
  0x29   : > { %251 = vst [vmem:[%s6052_s30 + $0x130] sm:$0xff] %v250_v38  ;;  %v256_v41 = vld [vmem:[%s6047_s29 + $0x148] sm:$0xff]  ;;  %253 = vst [vmem:[%s6052_s30 + $0x138] sm:$0xff] %v252_v39  ;;  %v258_v42 = vld [vmem:[%s6047_s29 + $0x150] sm:$0xff] }
  0x2a   : > { %255 = vst [vmem:[%s6052_s30 + $0x140] sm:$0xff] %v254_v40  ;;  %257 = vst [vmem:[%s6052_s30 + $0x148] sm:$0xff] %v256_v41  ;;  %v260_v43 = vld [vmem:[%s6047_s29 + $0x158] sm:$0xff]  ;;  %v262_v44 = vld [vmem:[%s6047_s29 + $0x160] sm:$0xff] }
  0x2b   : > { %259 = vst [vmem:[%s6052_s30 + $0x150] sm:$0xff] %v258_v42  ;;  %261 = vst [vmem:[%s6052_s30 + $0x158] sm:$0xff] %v260_v43  ;;  %v264_v45 = vld [vmem:[%s6047_s29 + $0x168] sm:$0xff]  ;;  %v266_v46 = vld [vmem:[%s6047_s29 + $0x170] sm:$0xff] }
  0x2c   : > { %263 = vst [vmem:[%s6052_s30 + $0x160] sm:$0xff] %v262_v44  ;;  %v268_v47 = vld [vmem:[%s6047_s29 + $0x178] sm:$0xff]  ;;  %265 = vst [vmem:[%s6052_s30 + $0x168] sm:$0xff] %v264_v45  ;;  %v270_v48 = vld [vmem:[%s6047_s29 + $0x180] sm:$0xff] }
  0x2d   : > { %267 = vst [vmem:[%s6052_s30 + $0x170] sm:$0xff] %v266_v46  ;;  %269 = vst [vmem:[%s6052_s30 + $0x178] sm:$0xff] %v268_v47  ;;  %v272_v49 = vld [vmem:[%s6047_s29 + $0x188] sm:$0xff]  ;;  %v274_v50 = vld [vmem:[%s6047_s29 + $0x190] sm:$0xff] }
  0x2e   : > { %271 = vst [vmem:[%s6052_s30 + $0x180] sm:$0xff] %v270_v48  ;;  %273 = vst [vmem:[%s6052_s30 + $0x188] sm:$0xff] %v272_v49  ;;  %v276_v51 = vld [vmem:[%s6047_s29 + $0x198] sm:$0xff]  ;;  %v278_v52 = vld [vmem:[%s6047_s29 + $0x1a0] sm:$0xff] }
  0x2f   : > { %275 = vst [vmem:[%s6052_s30 + $0x190] sm:$0xff] %v274_v50  ;;  %v280_v53 = vld [vmem:[%s6047_s29 + $0x1a8] sm:$0xff]  ;;  %277 = vst [vmem:[%s6052_s30 + $0x198] sm:$0xff] %v276_v51  ;;  %v282_v54 = vld [vmem:[%s6047_s29 + $0x1b0] sm:$0xff] }
  0x30   : > { %279 = vst [vmem:[%s6052_s30 + $0x1a0] sm:$0xff] %v278_v52  ;;  %281 = vst [vmem:[%s6052_s30 + $0x1a8] sm:$0xff] %v280_v53  ;;  %v284_v55 = vld [vmem:[%s6047_s29 + $0x1b8] sm:$0xff]  ;;  %v286_v56 = vld [vmem:[%s6047_s29 + $0x1c0] sm:$0xff] }
  0x31   : > { %283 = vst [vmem:[%s6052_s30 + $0x1b0] sm:$0xff] %v282_v54  ;;  %285 = vst [vmem:[%s6052_s30 + $0x1b8] sm:$0xff] %v284_v55  ;;  %v288_v57 = vld [vmem:[%s6047_s29 + $0x1c8] sm:$0xff]  ;;  %v290_v58 = vld [vmem:[%s6047_s29 + $0x1d0] sm:$0xff] }
  0x32   : > { %287 = vst [vmem:[%s6052_s30 + $0x1c0] sm:$0xff] %v286_v56  ;;  %v292_v59 = vld [vmem:[%s6047_s29 + $0x1d8] sm:$0xff]  ;;  %289 = vst [vmem:[%s6052_s30 + $0x1c8] sm:$0xff] %v288_v57  ;;  %v294_v60 = vld [vmem:[%s6047_s29 + $0x1e0] sm:$0xff] }
  0x33   : > { %291 = vst [vmem:[%s6052_s30 + $0x1d0] sm:$0xff] %v290_v58  ;;  %293 = vst [vmem:[%s6052_s30 + $0x1d8] sm:$0xff] %v292_v59  ;;  %v296_v61 = vld [vmem:[%s6047_s29 + $0x1e8] sm:$0xff]  ;;  %v298_v62 = vld [vmem:[%s6047_s29 + $0x1f0] sm:$0xff] }
  0x34   : > { %295 = vst [vmem:[%s6052_s30 + $0x1e0] sm:$0xff] %v294_v60  ;;  %297 = vst [vmem:[%s6052_s30 + $0x1e8] sm:$0xff] %v296_v61  ;;  %v300_v63 = vld [vmem:[%s6047_s29 + $0x1f8] sm:$0xff]  ;;  %v302_v0 = vld [vmem:[%s6047_s29 + $0x200] sm:$0xff] }
  0x35   : > { %299 = vst [vmem:[%s6052_s30 + $0x1f0] sm:$0xff] %v298_v62  ;;  %v304_v1 = vld [vmem:[%s6047_s29 + $0x208] sm:$0xff]  ;;  %301 = vst [vmem:[%s6052_s30 + $0x1f8] sm:$0xff] %v300_v63  ;;  %v306_v2 = vld [vmem:[%s6047_s29 + $0x210] sm:$0xff] }
  0x36   : > { %303 = vst [vmem:[%s6052_s30 + $0x200] sm:$0xff] %v302_v0  ;;  %305 = vst [vmem:[%s6052_s30 + $0x208] sm:$0xff] %v304_v1  ;;  %v308_v3 = vld [vmem:[%s6047_s29 + $0x218] sm:$0xff]  ;;  %v310_v4 = vld [vmem:[%s6047_s29 + $0x220] sm:$0xff] }
  0x37   : > { %307 = vst [vmem:[%s6052_s30 + $0x210] sm:$0xff] %v306_v2  ;;  %309 = vst [vmem:[%s6052_s30 + $0x218] sm:$0xff] %v308_v3  ;;  %v312_v5 = vld [vmem:[%s6047_s29 + $0x228] sm:$0xff]  ;;  %v314_v6 = vld [vmem:[%s6047_s29 + $0x230] sm:$0xff] }
  0x38   : > { %311 = vst [vmem:[%s6052_s30 + $0x220] sm:$0xff] %v310_v4  ;;  %v316_v7 = vld [vmem:[%s6047_s29 + $0x238] sm:$0xff]  ;;  %313 = vst [vmem:[%s6052_s30 + $0x228] sm:$0xff] %v312_v5  ;;  %v318_v8 = vld [vmem:[%s6047_s29 + $0x240] sm:$0xff] }
  0x39   : > { %315 = vst [vmem:[%s6052_s30 + $0x230] sm:$0xff] %v314_v6  ;;  %317 = vst [vmem:[%s6052_s30 + $0x238] sm:$0xff] %v316_v7  ;;  %v320_v9 = vld [vmem:[%s6047_s29 + $0x248] sm:$0xff]  ;;  %v322_v10 = vld [vmem:[%s6047_s29 + $0x250] sm:$0xff] }
  0x3a   : > { %319 = vst [vmem:[%s6052_s30 + $0x240] sm:$0xff] %v318_v8  ;;  %321 = vst [vmem:[%s6052_s30 + $0x248] sm:$0xff] %v320_v9  ;;  %v324_v11 = vld [vmem:[%s6047_s29 + $0x258] sm:$0xff]  ;;  %v326_v12 = vld [vmem:[%s6047_s29 + $0x260] sm:$0xff] }
  0x3b   : > { %323 = vst [vmem:[%s6052_s30 + $0x250] sm:$0xff] %v322_v10  ;;  %v328_v13 = vld [vmem:[%s6047_s29 + $0x268] sm:$0xff]  ;;  %325 = vst [vmem:[%s6052_s30 + $0x258] sm:$0xff] %v324_v11  ;;  %v330_v14 = vld [vmem:[%s6047_s29 + $0x270] sm:$0xff] }
  0x3c   : > { %327 = vst [vmem:[%s6052_s30 + $0x260] sm:$0xff] %v326_v12  ;;  %329 = vst [vmem:[%s6052_s30 + $0x268] sm:$0xff] %v328_v13  ;;  %v332_v15 = vld [vmem:[%s6047_s29 + $0x278] sm:$0xff]  ;;  %v334_v16 = vld [vmem:[%s6047_s29 + $0x280] sm:$0xff] }
  0x3d   : > { %331 = vst [vmem:[%s6052_s30 + $0x270] sm:$0xff] %v330_v14  ;;  %333 = vst [vmem:[%s6052_s30 + $0x278] sm:$0xff] %v332_v15  ;;  %v336_v17 = vld [vmem:[%s6047_s29 + $0x288] sm:$0xff]  ;;  %v338_v18 = vld [vmem:[%s6047_s29 + $0x290] sm:$0xff] }
  0x3e   : > { %335 = vst [vmem:[%s6052_s30 + $0x280] sm:$0xff] %v334_v16  ;;  %v340_v19 = vld [vmem:[%s6047_s29 + $0x298] sm:$0xff]  ;;  %337 = vst [vmem:[%s6052_s30 + $0x288] sm:$0xff] %v336_v17  ;;  %v342_v20 = vld [vmem:[%s6047_s29 + $0x2a0] sm:$0xff] }
  0x3f   : > { %339 = vst [vmem:[%s6052_s30 + $0x290] sm:$0xff] %v338_v18  ;;  %341 = vst [vmem:[%s6052_s30 + $0x298] sm:$0xff] %v340_v19  ;;  %v344_v21 = vld [vmem:[%s6047_s29 + $0x2a8] sm:$0xff]  ;;  %v346_v22 = vld [vmem:[%s6047_s29 + $0x2b0] sm:$0xff] }
  0x40   : > { %343 = vst [vmem:[%s6052_s30 + $0x2a0] sm:$0xff] %v342_v20  ;;  %345 = vst [vmem:[%s6052_s30 + $0x2a8] sm:$0xff] %v344_v21  ;;  %v348_v23 = vld [vmem:[%s6047_s29 + $0x2b8] sm:$0xff]  ;;  %v350_v24 = vld [vmem:[%s6047_s29 + $0x2c0] sm:$0xff] }
  0x41   : > { %347 = vst [vmem:[%s6052_s30 + $0x2b0] sm:$0xff] %v346_v22  ;;  %v352_v25 = vld [vmem:[%s6047_s29 + $0x2c8] sm:$0xff]  ;;  %349 = vst [vmem:[%s6052_s30 + $0x2b8] sm:$0xff] %v348_v23  ;;  %v354_v26 = vld [vmem:[%s6047_s29 + $0x2d0] sm:$0xff] }
  0x42   : > { %351 = vst [vmem:[%s6052_s30 + $0x2c0] sm:$0xff] %v350_v24  ;;  %353 = vst [vmem:[%s6052_s30 + $0x2c8] sm:$0xff] %v352_v25  ;;  %v356_v27 = vld [vmem:[%s6047_s29 + $0x2d8] sm:$0xff]  ;;  %v358_v28 = vld [vmem:[%s6047_s29 + $0x2e0] sm:$0xff] }
  0x43   : > { %355 = vst [vmem:[%s6052_s30 + $0x2d0] sm:$0xff] %v354_v26  ;;  %357 = vst [vmem:[%s6052_s30 + $0x2d8] sm:$0xff] %v356_v27  ;;  %v360_v29 = vld [vmem:[%s6047_s29 + $0x2e8] sm:$0xff]  ;;  %v362_v30 = vld [vmem:[%s6047_s29 + $0x2f0] sm:$0xff] }
  0x44   : > { %359 = vst [vmem:[%s6052_s30 + $0x2e0] sm:$0xff] %v358_v28  ;;  %v364_v31 = vld [vmem:[%s6047_s29 + $0x2f8] sm:$0xff]  ;;  %361 = vst [vmem:[%s6052_s30 + $0x2e8] sm:$0xff] %v360_v29  ;;  %v366_v32 = vld [vmem:[%s6047_s29 + $0x300] sm:$0xff] }
  0x45   : > { %363 = vst [vmem:[%s6052_s30 + $0x2f0] sm:$0xff] %v362_v30  ;;  %365 = vst [vmem:[%s6052_s30 + $0x2f8] sm:$0xff] %v364_v31  ;;  %v368_v33 = vld [vmem:[%s6047_s29 + $0x308] sm:$0xff]  ;;  %v370_v34 = vld [vmem:[%s6047_s29 + $0x310] sm:$0xff] }
  0x46   : > { %367 = vst [vmem:[%s6052_s30 + $0x300] sm:$0xff] %v366_v32  ;;  %369 = vst [vmem:[%s6052_s30 + $0x308] sm:$0xff] %v368_v33  ;;  %v372_v35 = vld [vmem:[%s6047_s29 + $0x318] sm:$0xff]  ;;  %v374_v36 = vld [vmem:[%s6047_s29 + $0x320] sm:$0xff] }
  0x47   : > { %371 = vst [vmem:[%s6052_s30 + $0x310] sm:$0xff] %v370_v34  ;;  %v376_v37 = vld [vmem:[%s6047_s29 + $0x328] sm:$0xff]  ;;  %373 = vst [vmem:[%s6052_s30 + $0x318] sm:$0xff] %v372_v35  ;;  %v378_v38 = vld [vmem:[%s6047_s29 + $0x330] sm:$0xff] }
  0x48   : > { %375 = vst [vmem:[%s6052_s30 + $0x320] sm:$0xff] %v374_v36  ;;  %377 = vst [vmem:[%s6052_s30 + $0x328] sm:$0xff] %v376_v37  ;;  %v380_v39 = vld [vmem:[%s6047_s29 + $0x338] sm:$0xff]  ;;  %v382_v40 = vld [vmem:[%s6047_s29 + $0x340] sm:$0xff] }
  0x49   : > { %379 = vst [vmem:[%s6052_s30 + $0x330] sm:$0xff] %v378_v38  ;;  %381 = vst [vmem:[%s6052_s30 + $0x338] sm:$0xff] %v380_v39  ;;  %v384_v41 = vld [vmem:[%s6047_s29 + $0x348] sm:$0xff]  ;;  %v386_v42 = vld [vmem:[%s6047_s29 + $0x350] sm:$0xff] }
  0x4a   : > { %383 = vst [vmem:[%s6052_s30 + $0x340] sm:$0xff] %v382_v40  ;;  %v388_v43 = vld [vmem:[%s6047_s29 + $0x358] sm:$0xff]  ;;  %385 = vst [vmem:[%s6052_s30 + $0x348] sm:$0xff] %v384_v41  ;;  %v390_v44 = vld [vmem:[%s6047_s29 + $0x360] sm:$0xff] }
  0x4b   : > { %387 = vst [vmem:[%s6052_s30 + $0x350] sm:$0xff] %v386_v42  ;;  %389 = vst [vmem:[%s6052_s30 + $0x358] sm:$0xff] %v388_v43  ;;  %v392_v45 = vld [vmem:[%s6047_s29 + $0x368] sm:$0xff]  ;;  %v394_v46 = vld [vmem:[%s6047_s29 + $0x370] sm:$0xff] }
  0x4c   : > { %391 = vst [vmem:[%s6052_s30 + $0x360] sm:$0xff] %v390_v44  ;;  %393 = vst [vmem:[%s6052_s30 + $0x368] sm:$0xff] %v392_v45  ;;  %v396_v47 = vld [vmem:[%s6047_s29 + $0x378] sm:$0xff]  ;;  %v398_v48 = vld [vmem:[%s6047_s29 + $0x380] sm:$0xff] }
  0x4d   : > { %395 = vst [vmem:[%s6052_s30 + $0x370] sm:$0xff] %v394_v46  ;;  %v400_v49 = vld [vmem:[%s6047_s29 + $0x388] sm:$0xff]  ;;  %397 = vst [vmem:[%s6052_s30 + $0x378] sm:$0xff] %v396_v47  ;;  %v402_v50 = vld [vmem:[%s6047_s29 + $0x390] sm:$0xff] }
  0x4e   : > { %399 = vst [vmem:[%s6052_s30 + $0x380] sm:$0xff] %v398_v48  ;;  %401 = vst [vmem:[%s6052_s30 + $0x388] sm:$0xff] %v400_v49  ;;  %v404_v51 = vld [vmem:[%s6047_s29 + $0x398] sm:$0xff]  ;;  %v406_v52 = vld [vmem:[%s6047_s29 + $0x3a0] sm:$0xff] }
  0x4f   : > { %403 = vst [vmem:[%s6052_s30 + $0x390] sm:$0xff] %v402_v50  ;;  %405 = vst [vmem:[%s6052_s30 + $0x398] sm:$0xff] %v404_v51  ;;  %v408_v53 = vld [vmem:[%s6047_s29 + $0x3a8] sm:$0xff]  ;;  %v410_v54 = vld [vmem:[%s6047_s29 + $0x3b0] sm:$0xff] }
  0x50   : > { %407 = vst [vmem:[%s6052_s30 + $0x3a0] sm:$0xff] %v406_v52  ;;  %v412_v55 = vld [vmem:[%s6047_s29 + $0x3b8] sm:$0xff]  ;;  %409 = vst [vmem:[%s6052_s30 + $0x3a8] sm:$0xff] %v408_v53  ;;  %v414_v56 = vld [vmem:[%s6047_s29 + $0x3c0] sm:$0xff] }
  0x51   : > { %411 = vst [vmem:[%s6052_s30 + $0x3b0] sm:$0xff] %v410_v54  ;;  %413 = vst [vmem:[%s6052_s30 + $0x3b8] sm:$0xff] %v412_v55  ;;  %v416_v57 = vld [vmem:[%s6047_s29 + $0x3c8] sm:$0xff]  ;;  %v418_v58 = vld [vmem:[%s6047_s29 + $0x3d0] sm:$0xff] }
  0x52   : > { %415 = vst [vmem:[%s6052_s30 + $0x3c0] sm:$0xff] %v414_v56  ;;  %417 = vst [vmem:[%s6052_s30 + $0x3c8] sm:$0xff] %v416_v57  ;;  %v420_v59 = vld [vmem:[%s6047_s29 + $0x3d8] sm:$0xff]  ;;  %v422_v60 = vld [vmem:[%s6047_s29 + $0x3e0] sm:$0xff] }
  0x53   : > { %419 = vst [vmem:[%s6052_s30 + $0x3d0] sm:$0xff] %v418_v58  ;;  %v424_v61 = vld [vmem:[%s6047_s29 + $0x3e8] sm:$0xff]  ;;  %421 = vst [vmem:[%s6052_s30 + $0x3d8] sm:$0xff] %v420_v59  ;;  %v426_v62 = vld [vmem:[%s6047_s29 + $0x3f0] sm:$0xff] }
  0x54   : > { %423 = vst [vmem:[%s6052_s30 + $0x3e0] sm:$0xff] %v422_v60  ;;  %425 = vst [vmem:[%s6052_s30 + $0x3e8] sm:$0xff] %v424_v61  ;;  %v428_v63 = vld [vmem:[%s6047_s29 + $0x3f8] sm:$0xff]  ;;  %v430_v0 = vld [vmem:[%s6047_s29 + $0x400] sm:$0xff] }
  0x55   : > { %427 = vst [vmem:[%s6052_s30 + $0x3f0] sm:$0xff] %v426_v62  ;;  %429 = vst [vmem:[%s6052_s30 + $0x3f8] sm:$0xff] %v428_v63  ;;  %v432_v1 = vld [vmem:[%s6047_s29 + $0x408] sm:$0xff]  ;;  %v434_v2 = vld [vmem:[%s6047_s29 + $0x410] sm:$0xff] }
  0x56   : > { %431 = vst [vmem:[%s6052_s30 + $0x400] sm:$0xff] %v430_v0  ;;  %v436_v3 = vld [vmem:[%s6047_s29 + $0x418] sm:$0xff]  ;;  %433 = vst [vmem:[%s6052_s30 + $0x408] sm:$0xff] %v432_v1  ;;  %v438_v4 = vld [vmem:[%s6047_s29 + $0x420] sm:$0xff] }
  0x57   : > { %435 = vst [vmem:[%s6052_s30 + $0x410] sm:$0xff] %v434_v2  ;;  %437 = vst [vmem:[%s6052_s30 + $0x418] sm:$0xff] %v436_v3  ;;  %v440_v5 = vld [vmem:[%s6047_s29 + $0x428] sm:$0xff]  ;;  %v442_v6 = vld [vmem:[%s6047_s29 + $0x430] sm:$0xff] }
  0x58   : > { %439 = vst [vmem:[%s6052_s30 + $0x420] sm:$0xff] %v438_v4  ;;  %441 = vst [vmem:[%s6052_s30 + $0x428] sm:$0xff] %v440_v5  ;;  %v444_v7 = vld [vmem:[%s6047_s29 + $0x438] sm:$0xff]  ;;  %v446_v8 = vld [vmem:[%s6047_s29 + $0x440] sm:$0xff] }
  0x59   : > { %443 = vst [vmem:[%s6052_s30 + $0x430] sm:$0xff] %v442_v6  ;;  %v448_v9 = vld [vmem:[%s6047_s29 + $0x448] sm:$0xff]  ;;  %445 = vst [vmem:[%s6052_s30 + $0x438] sm:$0xff] %v444_v7  ;;  %v450_v10 = vld [vmem:[%s6047_s29 + $0x450] sm:$0xff] }
  0x5a   : > { %447 = vst [vmem:[%s6052_s30 + $0x440] sm:$0xff] %v446_v8  ;;  %449 = vst [vmem:[%s6052_s30 + $0x448] sm:$0xff] %v448_v9  ;;  %v452_v11 = vld [vmem:[%s6047_s29 + $0x458] sm:$0xff]  ;;  %v454_v12 = vld [vmem:[%s6047_s29 + $0x460] sm:$0xff] }
  0x5b   : > { %451 = vst [vmem:[%s6052_s30 + $0x450] sm:$0xff] %v450_v10  ;;  %453 = vst [vmem:[%s6052_s30 + $0x458] sm:$0xff] %v452_v11  ;;  %v456_v13 = vld [vmem:[%s6047_s29 + $0x468] sm:$0xff]  ;;  %v458_v14 = vld [vmem:[%s6047_s29 + $0x470] sm:$0xff] }
  0x5c   : > { %455 = vst [vmem:[%s6052_s30 + $0x460] sm:$0xff] %v454_v12  ;;  %v460_v15 = vld [vmem:[%s6047_s29 + $0x478] sm:$0xff]  ;;  %457 = vst [vmem:[%s6052_s30 + $0x468] sm:$0xff] %v456_v13  ;;  %v462_v16 = vld [vmem:[%s6047_s29 + $0x480] sm:$0xff] }
  0x5d   : > { %459 = vst [vmem:[%s6052_s30 + $0x470] sm:$0xff] %v458_v14  ;;  %461 = vst [vmem:[%s6052_s30 + $0x478] sm:$0xff] %v460_v15  ;;  %v464_v17 = vld [vmem:[%s6047_s29 + $0x488] sm:$0xff]  ;;  %v466_v18 = vld [vmem:[%s6047_s29 + $0x490] sm:$0xff] }
  0x5e   : > { %463 = vst [vmem:[%s6052_s30 + $0x480] sm:$0xff] %v462_v16  ;;  %465 = vst [vmem:[%s6052_s30 + $0x488] sm:$0xff] %v464_v17  ;;  %v468_v19 = vld [vmem:[%s6047_s29 + $0x498] sm:$0xff]  ;;  %v470_v20 = vld [vmem:[%s6047_s29 + $0x4a0] sm:$0xff] }
  0x5f   : > { %467 = vst [vmem:[%s6052_s30 + $0x490] sm:$0xff] %v466_v18  ;;  %v472_v21 = vld [vmem:[%s6047_s29 + $0x4a8] sm:$0xff]  ;;  %469 = vst [vmem:[%s6052_s30 + $0x498] sm:$0xff] %v468_v19  ;;  %v474_v22 = vld [vmem:[%s6047_s29 + $0x4b0] sm:$0xff] }
  0x60   : > { %471 = vst [vmem:[%s6052_s30 + $0x4a0] sm:$0xff] %v470_v20  ;;  %473 = vst [vmem:[%s6052_s30 + $0x4a8] sm:$0xff] %v472_v21  ;;  %v476_v23 = vld [vmem:[%s6047_s29 + $0x4b8] sm:$0xff]  ;;  %v478_v24 = vld [vmem:[%s6047_s29 + $0x4c0] sm:$0xff] }
  0x61   : > { %475 = vst [vmem:[%s6052_s30 + $0x4b0] sm:$0xff] %v474_v22  ;;  %477 = vst [vmem:[%s6052_s30 + $0x4b8] sm:$0xff] %v476_v23  ;;  %v480_v25 = vld [vmem:[%s6047_s29 + $0x4c8] sm:$0xff]  ;;  %v482_v26 = vld [vmem:[%s6047_s29 + $0x4d0] sm:$0xff] }
  0x62   : > { %479 = vst [vmem:[%s6052_s30 + $0x4c0] sm:$0xff] %v478_v24  ;;  %v484_v27 = vld [vmem:[%s6047_s29 + $0x4d8] sm:$0xff]  ;;  %481 = vst [vmem:[%s6052_s30 + $0x4c8] sm:$0xff] %v480_v25  ;;  %v486_v28 = vld [vmem:[%s6047_s29 + $0x4e0] sm:$0xff] }
  0x63   : > { %483 = vst [vmem:[%s6052_s30 + $0x4d0] sm:$0xff] %v482_v26  ;;  %485 = vst [vmem:[%s6052_s30 + $0x4d8] sm:$0xff] %v484_v27  ;;  %v488_v29 = vld [vmem:[%s6047_s29 + $0x4e8] sm:$0xff]  ;;  %v490_v30 = vld [vmem:[%s6047_s29 + $0x4f0] sm:$0xff] }
  0x64   : > { %487 = vst [vmem:[%s6052_s30 + $0x4e0] sm:$0xff] %v486_v28  ;;  %489 = vst [vmem:[%s6052_s30 + $0x4e8] sm:$0xff] %v488_v29  ;;  %v492_v31 = vld [vmem:[%s6047_s29 + $0x4f8] sm:$0xff]  ;;  %v494_v32 = vld [vmem:[%s6047_s29 + $0x500] sm:$0xff] }
  0x65   : > { %491 = vst [vmem:[%s6052_s30 + $0x4f0] sm:$0xff] %v490_v30  ;;  %v496_v33 = vld [vmem:[%s6047_s29 + $0x508] sm:$0xff]  ;;  %493 = vst [vmem:[%s6052_s30 + $0x4f8] sm:$0xff] %v492_v31  ;;  %v498_v34 = vld [vmem:[%s6047_s29 + $0x510] sm:$0xff] }
  0x66   : > { %495 = vst [vmem:[%s6052_s30 + $0x500] sm:$0xff] %v494_v32  ;;  %497 = vst [vmem:[%s6052_s30 + $0x508] sm:$0xff] %v496_v33  ;;  %v500_v35 = vld [vmem:[%s6047_s29 + $0x518] sm:$0xff]  ;;  %v502_v36 = vld [vmem:[%s6047_s29 + $0x520] sm:$0xff] }
  0x67   : > { %499 = vst [vmem:[%s6052_s30 + $0x510] sm:$0xff] %v498_v34  ;;  %501 = vst [vmem:[%s6052_s30 + $0x518] sm:$0xff] %v500_v35  ;;  %v504_v37 = vld [vmem:[%s6047_s29 + $0x528] sm:$0xff]  ;;  %v506_v38 = vld [vmem:[%s6047_s29 + $0x530] sm:$0xff] }
  0x68   : > { %503 = vst [vmem:[%s6052_s30 + $0x520] sm:$0xff] %v502_v36  ;;  %v508_v39 = vld [vmem:[%s6047_s29 + $0x538] sm:$0xff]  ;;  %505 = vst [vmem:[%s6052_s30 + $0x528] sm:$0xff] %v504_v37  ;;  %v510_v40 = vld [vmem:[%s6047_s29 + $0x540] sm:$0xff] }
  0x69   : > { %507 = vst [vmem:[%s6052_s30 + $0x530] sm:$0xff] %v506_v38  ;;  %509 = vst [vmem:[%s6052_s30 + $0x538] sm:$0xff] %v508_v39  ;;  %v512_v41 = vld [vmem:[%s6047_s29 + $0x548] sm:$0xff]  ;;  %v514_v42 = vld [vmem:[%s6047_s29 + $0x550] sm:$0xff] }
  0x6a   : > { %511 = vst [vmem:[%s6052_s30 + $0x540] sm:$0xff] %v510_v40  ;;  %513 = vst [vmem:[%s6052_s30 + $0x548] sm:$0xff] %v512_v41  ;;  %v516_v43 = vld [vmem:[%s6047_s29 + $0x558] sm:$0xff]  ;;  %v518_v44 = vld [vmem:[%s6047_s29 + $0x560] sm:$0xff] }
  0x6b   : > { %515 = vst [vmem:[%s6052_s30 + $0x550] sm:$0xff] %v514_v42  ;;  %v520_v45 = vld [vmem:[%s6047_s29 + $0x568] sm:$0xff]  ;;  %517 = vst [vmem:[%s6052_s30 + $0x558] sm:$0xff] %v516_v43  ;;  %v522_v46 = vld [vmem:[%s6047_s29 + $0x570] sm:$0xff] }
  0x6c   : > { %519 = vst [vmem:[%s6052_s30 + $0x560] sm:$0xff] %v518_v44  ;;  %521 = vst [vmem:[%s6052_s30 + $0x568] sm:$0xff] %v520_v45  ;;  %v524_v47 = vld [vmem:[%s6047_s29 + $0x578] sm:$0xff]  ;;  %v526_v48 = vld [vmem:[%s6047_s29 + $0x580] sm:$0xff] }
  0x6d   : > { %523 = vst [vmem:[%s6052_s30 + $0x570] sm:$0xff] %v522_v46  ;;  %525 = vst [vmem:[%s6052_s30 + $0x578] sm:$0xff] %v524_v47  ;;  %v528_v49 = vld [vmem:[%s6047_s29 + $0x588] sm:$0xff]  ;;  %v530_v50 = vld [vmem:[%s6047_s29 + $0x590] sm:$0xff] }
  0x6e   : > { %527 = vst [vmem:[%s6052_s30 + $0x580] sm:$0xff] %v526_v48  ;;  %v532_v51 = vld [vmem:[%s6047_s29 + $0x598] sm:$0xff]  ;;  %529 = vst [vmem:[%s6052_s30 + $0x588] sm:$0xff] %v528_v49  ;;  %v534_v52 = vld [vmem:[%s6047_s29 + $0x5a0] sm:$0xff] }
  0x6f   : > { %531 = vst [vmem:[%s6052_s30 + $0x590] sm:$0xff] %v530_v50  ;;  %533 = vst [vmem:[%s6052_s30 + $0x598] sm:$0xff] %v532_v51  ;;  %v536_v53 = vld [vmem:[%s6047_s29 + $0x5a8] sm:$0xff]  ;;  %v538_v54 = vld [vmem:[%s6047_s29 + $0x5b0] sm:$0xff] }
  0x70   : > { %535 = vst [vmem:[%s6052_s30 + $0x5a0] sm:$0xff] %v534_v52  ;;  %537 = vst [vmem:[%s6052_s30 + $0x5a8] sm:$0xff] %v536_v53  ;;  %v540_v55 = vld [vmem:[%s6047_s29 + $0x5b8] sm:$0xff]  ;;  %v542_v56 = vld [vmem:[%s6047_s29 + $0x5c0] sm:$0xff] }
  0x71   : > { %539 = vst [vmem:[%s6052_s30 + $0x5b0] sm:$0xff] %v538_v54  ;;  %v544_v57 = vld [vmem:[%s6047_s29 + $0x5c8] sm:$0xff]  ;;  %541 = vst [vmem:[%s6052_s30 + $0x5b8] sm:$0xff] %v540_v55  ;;  %v546_v58 = vld [vmem:[%s6047_s29 + $0x5d0] sm:$0xff] }
  0x72   : > { %543 = vst [vmem:[%s6052_s30 + $0x5c0] sm:$0xff] %v542_v56  ;;  %545 = vst [vmem:[%s6052_s30 + $0x5c8] sm:$0xff] %v544_v57  ;;  %v548_v59 = vld [vmem:[%s6047_s29 + $0x5d8] sm:$0xff]  ;;  %v550_v60 = vld [vmem:[%s6047_s29 + $0x5e0] sm:$0xff] }
  0x73   : > { %547 = vst [vmem:[%s6052_s30 + $0x5d0] sm:$0xff] %v546_v58  ;;  %549 = vst [vmem:[%s6052_s30 + $0x5d8] sm:$0xff] %v548_v59  ;;  %v552_v61 = vld [vmem:[%s6047_s29 + $0x5e8] sm:$0xff]  ;;  %v554_v62 = vld [vmem:[%s6047_s29 + $0x5f0] sm:$0xff] }
  0x74   : > { %551 = vst [vmem:[%s6052_s30 + $0x5e0] sm:$0xff] %v550_v60  ;;  %v556_v63 = vld [vmem:[%s6047_s29 + $0x5f8] sm:$0xff]  ;;  %553 = vst [vmem:[%s6052_s30 + $0x5e8] sm:$0xff] %v552_v61  ;;  %v558_v0 = vld [vmem:[%s6047_s29 + $0xc00] sm:$0xff] }
  0x75   : > { %555 = vst [vmem:[%s6052_s30 + $0x5f0] sm:$0xff] %v554_v62  ;;  %557 = vst [vmem:[%s6052_s30 + $0x5f8] sm:$0xff] %v556_v63  ;;  %v560_v1 = vld [vmem:[%s6047_s29 + $0xc08] sm:$0xff]  ;;  %v562_v2 = vld [vmem:[%s6047_s29 + $0xc10] sm:$0xff] }
  0x76   : > { %559 = vst [vmem:[%s6052_s30 + $0x600] sm:$0xff] %v558_v0  ;;  %561 = vst [vmem:[%s6052_s30 + $0x608] sm:$0xff] %v560_v1  ;;  %v564_v3 = vld [vmem:[%s6047_s29 + $0xc18] sm:$0xff]  ;;  %v566_v4 = vld [vmem:[%s6047_s29 + $0xc20] sm:$0xff] }
  0x77   : > { %563 = vst [vmem:[%s6052_s30 + $0x610] sm:$0xff] %v562_v2  ;;  %v568_v5 = vld [vmem:[%s6047_s29 + $0xc28] sm:$0xff]  ;;  %565 = vst [vmem:[%s6052_s30 + $0x618] sm:$0xff] %v564_v3  ;;  %v570_v6 = vld [vmem:[%s6047_s29 + $0xc30] sm:$0xff] }
  0x78   : > { %567 = vst [vmem:[%s6052_s30 + $0x620] sm:$0xff] %v566_v4  ;;  %569 = vst [vmem:[%s6052_s30 + $0x628] sm:$0xff] %v568_v5  ;;  %v572_v7 = vld [vmem:[%s6047_s29 + $0xc38] sm:$0xff]  ;;  %v574_v8 = vld [vmem:[%s6047_s29 + $0xc40] sm:$0xff] }
  0x79   : > { %571 = vst [vmem:[%s6052_s30 + $0x630] sm:$0xff] %v570_v6  ;;  %573 = vst [vmem:[%s6052_s30 + $0x638] sm:$0xff] %v572_v7  ;;  %v576_v9 = vld [vmem:[%s6047_s29 + $0xc48] sm:$0xff]  ;;  %v578_v10 = vld [vmem:[%s6047_s29 + $0xc50] sm:$0xff] }
  0x7a   : > { %575 = vst [vmem:[%s6052_s30 + $0x640] sm:$0xff] %v574_v8  ;;  %v580_v11 = vld [vmem:[%s6047_s29 + $0xc58] sm:$0xff]  ;;  %577 = vst [vmem:[%s6052_s30 + $0x648] sm:$0xff] %v576_v9  ;;  %v582_v12 = vld [vmem:[%s6047_s29 + $0xc60] sm:$0xff] }
  0x7b   : > { %579 = vst [vmem:[%s6052_s30 + $0x650] sm:$0xff] %v578_v10  ;;  %581 = vst [vmem:[%s6052_s30 + $0x658] sm:$0xff] %v580_v11  ;;  %v584_v13 = vld [vmem:[%s6047_s29 + $0xc68] sm:$0xff]  ;;  %v586_v14 = vld [vmem:[%s6047_s29 + $0xc70] sm:$0xff] }
  0x7c   : > { %583 = vst [vmem:[%s6052_s30 + $0x660] sm:$0xff] %v582_v12  ;;  %585 = vst [vmem:[%s6052_s30 + $0x668] sm:$0xff] %v584_v13  ;;  %v588_v15 = vld [vmem:[%s6047_s29 + $0xc78] sm:$0xff]  ;;  %v590_v16 = vld [vmem:[%s6047_s29 + $0xc80] sm:$0xff] }
  0x7d   : > { %587 = vst [vmem:[%s6052_s30 + $0x670] sm:$0xff] %v586_v14  ;;  %v592_v17 = vld [vmem:[%s6047_s29 + $0xc88] sm:$0xff]  ;;  %589 = vst [vmem:[%s6052_s30 + $0x678] sm:$0xff] %v588_v15  ;;  %v594_v18 = vld [vmem:[%s6047_s29 + $0xc90] sm:$0xff] }
  0x7e   : > { %591 = vst [vmem:[%s6052_s30 + $0x680] sm:$0xff] %v590_v16  ;;  %593 = vst [vmem:[%s6052_s30 + $0x688] sm:$0xff] %v592_v17  ;;  %v596_v19 = vld [vmem:[%s6047_s29 + $0xc98] sm:$0xff]  ;;  %v598_v20 = vld [vmem:[%s6047_s29 + $0xca0] sm:$0xff] }
  0x7f   : > { %595 = vst [vmem:[%s6052_s30 + $0x690] sm:$0xff] %v594_v18  ;;  %597 = vst [vmem:[%s6052_s30 + $0x698] sm:$0xff] %v596_v19  ;;  %v600_v21 = vld [vmem:[%s6047_s29 + $0xca8] sm:$0xff]  ;;  %v602_v22 = vld [vmem:[%s6047_s29 + $0xcb0] sm:$0xff] }
  0x80   : > { %599 = vst [vmem:[%s6052_s30 + $0x6a0] sm:$0xff] %v598_v20  ;;  %v604_v23 = vld [vmem:[%s6047_s29 + $0xcb8] sm:$0xff]  ;;  %601 = vst [vmem:[%s6052_s30 + $0x6a8] sm:$0xff] %v600_v21  ;;  %v606_v24 = vld [vmem:[%s6047_s29 + $0xcc0] sm:$0xff] }
  0x81   : > { %603 = vst [vmem:[%s6052_s30 + $0x6b0] sm:$0xff] %v602_v22  ;;  %605 = vst [vmem:[%s6052_s30 + $0x6b8] sm:$0xff] %v604_v23  ;;  %v608_v25 = vld [vmem:[%s6047_s29 + $0xcc8] sm:$0xff]  ;;  %v610_v26 = vld [vmem:[%s6047_s29 + $0xcd0] sm:$0xff] }
  0x82   : > { %607 = vst [vmem:[%s6052_s30 + $0x6c0] sm:$0xff] %v606_v24  ;;  %609 = vst [vmem:[%s6052_s30 + $0x6c8] sm:$0xff] %v608_v25  ;;  %v612_v27 = vld [vmem:[%s6047_s29 + $0xcd8] sm:$0xff]  ;;  %v614_v28 = vld [vmem:[%s6047_s29 + $0xce0] sm:$0xff] }
  0x83   : > { %611 = vst [vmem:[%s6052_s30 + $0x6d0] sm:$0xff] %v610_v26  ;;  %v616_v29 = vld [vmem:[%s6047_s29 + $0xce8] sm:$0xff]  ;;  %613 = vst [vmem:[%s6052_s30 + $0x6d8] sm:$0xff] %v612_v27  ;;  %v618_v30 = vld [vmem:[%s6047_s29 + $0xcf0] sm:$0xff] }
  0x84   : > { %615 = vst [vmem:[%s6052_s30 + $0x6e0] sm:$0xff] %v614_v28  ;;  %617 = vst [vmem:[%s6052_s30 + $0x6e8] sm:$0xff] %v616_v29  ;;  %v620_v31 = vld [vmem:[%s6047_s29 + $0xcf8] sm:$0xff]  ;;  %v622_v32 = vld [vmem:[%s6047_s29 + $0xd00] sm:$0xff] }
  0x85   : > { %619 = vst [vmem:[%s6052_s30 + $0x6f0] sm:$0xff] %v618_v30  ;;  %621 = vst [vmem:[%s6052_s30 + $0x6f8] sm:$0xff] %v620_v31  ;;  %v624_v33 = vld [vmem:[%s6047_s29 + $0xd08] sm:$0xff]  ;;  %v626_v34 = vld [vmem:[%s6047_s29 + $0xd10] sm:$0xff] }
  0x86   : > { %623 = vst [vmem:[%s6052_s30 + $0x700] sm:$0xff] %v622_v32  ;;  %v628_v35 = vld [vmem:[%s6047_s29 + $0xd18] sm:$0xff]  ;;  %625 = vst [vmem:[%s6052_s30 + $0x708] sm:$0xff] %v624_v33  ;;  %v630_v36 = vld [vmem:[%s6047_s29 + $0xd20] sm:$0xff] }
  0x87   : > { %627 = vst [vmem:[%s6052_s30 + $0x710] sm:$0xff] %v626_v34  ;;  %629 = vst [vmem:[%s6052_s30 + $0x718] sm:$0xff] %v628_v35  ;;  %v632_v37 = vld [vmem:[%s6047_s29 + $0xd28] sm:$0xff]  ;;  %v634_v38 = vld [vmem:[%s6047_s29 + $0xd30] sm:$0xff] }
  0x88   : > { %631 = vst [vmem:[%s6052_s30 + $0x720] sm:$0xff] %v630_v36  ;;  %633 = vst [vmem:[%s6052_s30 + $0x728] sm:$0xff] %v632_v37  ;;  %v636_v39 = vld [vmem:[%s6047_s29 + $0xd38] sm:$0xff]  ;;  %v638_v40 = vld [vmem:[%s6047_s29 + $0xd40] sm:$0xff] }
  0x89   : > { %635 = vst [vmem:[%s6052_s30 + $0x730] sm:$0xff] %v634_v38  ;;  %v640_v41 = vld [vmem:[%s6047_s29 + $0xd48] sm:$0xff]  ;;  %637 = vst [vmem:[%s6052_s30 + $0x738] sm:$0xff] %v636_v39  ;;  %v642_v42 = vld [vmem:[%s6047_s29 + $0xd50] sm:$0xff] }
  0x8a   : > { %639 = vst [vmem:[%s6052_s30 + $0x740] sm:$0xff] %v638_v40  ;;  %641 = vst [vmem:[%s6052_s30 + $0x748] sm:$0xff] %v640_v41  ;;  %v644_v43 = vld [vmem:[%s6047_s29 + $0xd58] sm:$0xff]  ;;  %v646_v44 = vld [vmem:[%s6047_s29 + $0xd60] sm:$0xff] }
  0x8b   : > { %643 = vst [vmem:[%s6052_s30 + $0x750] sm:$0xff] %v642_v42  ;;  %645 = vst [vmem:[%s6052_s30 + $0x758] sm:$0xff] %v644_v43  ;;  %v648_v45 = vld [vmem:[%s6047_s29 + $0xd68] sm:$0xff]  ;;  %v650_v46 = vld [vmem:[%s6047_s29 + $0xd70] sm:$0xff] }
  0x8c   : > { %647 = vst [vmem:[%s6052_s30 + $0x760] sm:$0xff] %v646_v44  ;;  %v652_v47 = vld [vmem:[%s6047_s29 + $0xd78] sm:$0xff]  ;;  %649 = vst [vmem:[%s6052_s30 + $0x768] sm:$0xff] %v648_v45  ;;  %v654_v48 = vld [vmem:[%s6047_s29 + $0xd80] sm:$0xff] }
  0x8d   : > { %651 = vst [vmem:[%s6052_s30 + $0x770] sm:$0xff] %v650_v46  ;;  %653 = vst [vmem:[%s6052_s30 + $0x778] sm:$0xff] %v652_v47  ;;  %v656_v49 = vld [vmem:[%s6047_s29 + $0xd88] sm:$0xff]  ;;  %v658_v50 = vld [vmem:[%s6047_s29 + $0xd90] sm:$0xff] }
  0x8e   : > { %655 = vst [vmem:[%s6052_s30 + $0x780] sm:$0xff] %v654_v48  ;;  %657 = vst [vmem:[%s6052_s30 + $0x788] sm:$0xff] %v656_v49  ;;  %v660_v51 = vld [vmem:[%s6047_s29 + $0xd98] sm:$0xff]  ;;  %v662_v52 = vld [vmem:[%s6047_s29 + $0xda0] sm:$0xff] }
  0x8f   : > { %659 = vst [vmem:[%s6052_s30 + $0x790] sm:$0xff] %v658_v50  ;;  %v664_v53 = vld [vmem:[%s6047_s29 + $0xda8] sm:$0xff]  ;;  %661 = vst [vmem:[%s6052_s30 + $0x798] sm:$0xff] %v660_v51  ;;  %v666_v54 = vld [vmem:[%s6047_s29 + $0xdb0] sm:$0xff] }
  0x90   : > { %663 = vst [vmem:[%s6052_s30 + $0x7a0] sm:$0xff] %v662_v52  ;;  %665 = vst [vmem:[%s6052_s30 + $0x7a8] sm:$0xff] %v664_v53  ;;  %v668_v55 = vld [vmem:[%s6047_s29 + $0xdb8] sm:$0xff]  ;;  %v670_v56 = vld [vmem:[%s6047_s29 + $0xdc0] sm:$0xff] }
  0x91   : > { %667 = vst [vmem:[%s6052_s30 + $0x7b0] sm:$0xff] %v666_v54  ;;  %669 = vst [vmem:[%s6052_s30 + $0x7b8] sm:$0xff] %v668_v55  ;;  %v672_v57 = vld [vmem:[%s6047_s29 + $0xdc8] sm:$0xff]  ;;  %v674_v58 = vld [vmem:[%s6047_s29 + $0xdd0] sm:$0xff] }
  0x92   : > { %671 = vst [vmem:[%s6052_s30 + $0x7c0] sm:$0xff] %v670_v56  ;;  %v676_v59 = vld [vmem:[%s6047_s29 + $0xdd8] sm:$0xff]  ;;  %673 = vst [vmem:[%s6052_s30 + $0x7c8] sm:$0xff] %v672_v57  ;;  %v678_v60 = vld [vmem:[%s6047_s29 + $0xde0] sm:$0xff] }
  0x93   : > { %675 = vst [vmem:[%s6052_s30 + $0x7d0] sm:$0xff] %v674_v58  ;;  %677 = vst [vmem:[%s6052_s30 + $0x7d8] sm:$0xff] %v676_v59  ;;  %v680_v61 = vld [vmem:[%s6047_s29 + $0xde8] sm:$0xff]  ;;  %v682_v62 = vld [vmem:[%s6047_s29 + $0xdf0] sm:$0xff] }
  0x94   : > { %679 = vst [vmem:[%s6052_s30 + $0x7e0] sm:$0xff] %v678_v60  ;;  %681 = vst [vmem:[%s6052_s30 + $0x7e8] sm:$0xff] %v680_v61  ;;  %v684_v63 = vld [vmem:[%s6047_s29 + $0xdf8] sm:$0xff]  ;;  %v686_v0 = vld [vmem:[%s6047_s29 + $0xe00] sm:$0xff] }
  0x95   : > { %683 = vst [vmem:[%s6052_s30 + $0x7f0] sm:$0xff] %v682_v62  ;;  %v688_v1 = vld [vmem:[%s6047_s29 + $0xe08] sm:$0xff]  ;;  %685 = vst [vmem:[%s6052_s30 + $0x7f8] sm:$0xff] %v684_v63  ;;  %v690_v2 = vld [vmem:[%s6047_s29 + $0xe10] sm:$0xff] }
  0x96   : > { %687 = vst [vmem:[%s6052_s30 + $0x800] sm:$0xff] %v686_v0  ;;  %689 = vst [vmem:[%s6052_s30 + $0x808] sm:$0xff] %v688_v1  ;;  %v692_v3 = vld [vmem:[%s6047_s29 + $0xe18] sm:$0xff]  ;;  %v694_v4 = vld [vmem:[%s6047_s29 + $0xe20] sm:$0xff] }
  0x97   : > { %691 = vst [vmem:[%s6052_s30 + $0x810] sm:$0xff] %v690_v2  ;;  %693 = vst [vmem:[%s6052_s30 + $0x818] sm:$0xff] %v692_v3  ;;  %v696_v5 = vld [vmem:[%s6047_s29 + $0xe28] sm:$0xff]  ;;  %v698_v6 = vld [vmem:[%s6047_s29 + $0xe30] sm:$0xff] }
  0x98   : > { %695 = vst [vmem:[%s6052_s30 + $0x820] sm:$0xff] %v694_v4  ;;  %v700_v7 = vld [vmem:[%s6047_s29 + $0xe38] sm:$0xff]  ;;  %697 = vst [vmem:[%s6052_s30 + $0x828] sm:$0xff] %v696_v5  ;;  %v702_v8 = vld [vmem:[%s6047_s29 + $0xe40] sm:$0xff] }
  0x99   : > { %699 = vst [vmem:[%s6052_s30 + $0x830] sm:$0xff] %v698_v6  ;;  %701 = vst [vmem:[%s6052_s30 + $0x838] sm:$0xff] %v700_v7  ;;  %v704_v9 = vld [vmem:[%s6047_s29 + $0xe48] sm:$0xff]  ;;  %v706_v10 = vld [vmem:[%s6047_s29 + $0xe50] sm:$0xff] }
  0x9a   : > { %703 = vst [vmem:[%s6052_s30 + $0x840] sm:$0xff] %v702_v8  ;;  %705 = vst [vmem:[%s6052_s30 + $0x848] sm:$0xff] %v704_v9  ;;  %v708_v11 = vld [vmem:[%s6047_s29 + $0xe58] sm:$0xff]  ;;  %v710_v12 = vld [vmem:[%s6047_s29 + $0xe60] sm:$0xff] }
  0x9b   : > { %707 = vst [vmem:[%s6052_s30 + $0x850] sm:$0xff] %v706_v10  ;;  %v712_v13 = vld [vmem:[%s6047_s29 + $0xe68] sm:$0xff]  ;;  %709 = vst [vmem:[%s6052_s30 + $0x858] sm:$0xff] %v708_v11  ;;  %v714_v14 = vld [vmem:[%s6047_s29 + $0xe70] sm:$0xff] }
  0x9c   : > { %711 = vst [vmem:[%s6052_s30 + $0x860] sm:$0xff] %v710_v12  ;;  %713 = vst [vmem:[%s6052_s30 + $0x868] sm:$0xff] %v712_v13  ;;  %v716_v15 = vld [vmem:[%s6047_s29 + $0xe78] sm:$0xff]  ;;  %v718_v16 = vld [vmem:[%s6047_s29 + $0xe80] sm:$0xff] }
  0x9d   : > { %715 = vst [vmem:[%s6052_s30 + $0x870] sm:$0xff] %v714_v14  ;;  %717 = vst [vmem:[%s6052_s30 + $0x878] sm:$0xff] %v716_v15  ;;  %v720_v17 = vld [vmem:[%s6047_s29 + $0xe88] sm:$0xff]  ;;  %v722_v18 = vld [vmem:[%s6047_s29 + $0xe90] sm:$0xff] }
  0x9e   : > { %719 = vst [vmem:[%s6052_s30 + $0x880] sm:$0xff] %v718_v16  ;;  %v724_v19 = vld [vmem:[%s6047_s29 + $0xe98] sm:$0xff]  ;;  %721 = vst [vmem:[%s6052_s30 + $0x888] sm:$0xff] %v720_v17  ;;  %v726_v20 = vld [vmem:[%s6047_s29 + $0xea0] sm:$0xff] }
  0x9f   : > { %723 = vst [vmem:[%s6052_s30 + $0x890] sm:$0xff] %v722_v18  ;;  %725 = vst [vmem:[%s6052_s30 + $0x898] sm:$0xff] %v724_v19  ;;  %v728_v21 = vld [vmem:[%s6047_s29 + $0xea8] sm:$0xff]  ;;  %v730_v22 = vld [vmem:[%s6047_s29 + $0xeb0] sm:$0xff] }
  0xa0   : > { %727 = vst [vmem:[%s6052_s30 + $0x8a0] sm:$0xff] %v726_v20  ;;  %729 = vst [vmem:[%s6052_s30 + $0x8a8] sm:$0xff] %v728_v21  ;;  %v732_v23 = vld [vmem:[%s6047_s29 + $0xeb8] sm:$0xff]  ;;  %v734_v24 = vld [vmem:[%s6047_s29 + $0xec0] sm:$0xff] }
  0xa1   : > { %731 = vst [vmem:[%s6052_s30 + $0x8b0] sm:$0xff] %v730_v22  ;;  %v736_v25 = vld [vmem:[%s6047_s29 + $0xec8] sm:$0xff]  ;;  %733 = vst [vmem:[%s6052_s30 + $0x8b8] sm:$0xff] %v732_v23  ;;  %v738_v26 = vld [vmem:[%s6047_s29 + $0xed0] sm:$0xff] }
  0xa2   : > { %735 = vst [vmem:[%s6052_s30 + $0x8c0] sm:$0xff] %v734_v24  ;;  %737 = vst [vmem:[%s6052_s30 + $0x8c8] sm:$0xff] %v736_v25  ;;  %v740_v27 = vld [vmem:[%s6047_s29 + $0xed8] sm:$0xff]  ;;  %v742_v28 = vld [vmem:[%s6047_s29 + $0xee0] sm:$0xff] }
  0xa3   : > { %739 = vst [vmem:[%s6052_s30 + $0x8d0] sm:$0xff] %v738_v26  ;;  %741 = vst [vmem:[%s6052_s30 + $0x8d8] sm:$0xff] %v740_v27  ;;  %v744_v29 = vld [vmem:[%s6047_s29 + $0xee8] sm:$0xff]  ;;  %v746_v30 = vld [vmem:[%s6047_s29 + $0xef0] sm:$0xff] }
  0xa4   : > { %743 = vst [vmem:[%s6052_s30 + $0x8e0] sm:$0xff] %v742_v28  ;;  %v748_v31 = vld [vmem:[%s6047_s29 + $0xef8] sm:$0xff]  ;;  %745 = vst [vmem:[%s6052_s30 + $0x8e8] sm:$0xff] %v744_v29  ;;  %v750_v32 = vld [vmem:[%s6047_s29 + $0xf00] sm:$0xff] }
  0xa5   : > { %747 = vst [vmem:[%s6052_s30 + $0x8f0] sm:$0xff] %v746_v30  ;;  %749 = vst [vmem:[%s6052_s30 + $0x8f8] sm:$0xff] %v748_v31  ;;  %v752_v33 = vld [vmem:[%s6047_s29 + $0xf08] sm:$0xff]  ;;  %v754_v34 = vld [vmem:[%s6047_s29 + $0xf10] sm:$0xff] }
  0xa6   : > { %751 = vst [vmem:[%s6052_s30 + $0x900] sm:$0xff] %v750_v32  ;;  %753 = vst [vmem:[%s6052_s30 + $0x908] sm:$0xff] %v752_v33  ;;  %v756_v35 = vld [vmem:[%s6047_s29 + $0xf18] sm:$0xff]  ;;  %v758_v36 = vld [vmem:[%s6047_s29 + $0xf20] sm:$0xff] }
  0xa7   : > { %755 = vst [vmem:[%s6052_s30 + $0x910] sm:$0xff] %v754_v34  ;;  %v760_v37 = vld [vmem:[%s6047_s29 + $0xf28] sm:$0xff]  ;;  %757 = vst [vmem:[%s6052_s30 + $0x918] sm:$0xff] %v756_v35  ;;  %v762_v38 = vld [vmem:[%s6047_s29 + $0xf30] sm:$0xff] }
  0xa8   : > { %759 = vst [vmem:[%s6052_s30 + $0x920] sm:$0xff] %v758_v36  ;;  %761 = vst [vmem:[%s6052_s30 + $0x928] sm:$0xff] %v760_v37  ;;  %v764_v39 = vld [vmem:[%s6047_s29 + $0xf38] sm:$0xff]  ;;  %v766_v40 = vld [vmem:[%s6047_s29 + $0xf40] sm:$0xff] }
  0xa9   : > { %763 = vst [vmem:[%s6052_s30 + $0x930] sm:$0xff] %v762_v38  ;;  %765 = vst [vmem:[%s6052_s30 + $0x938] sm:$0xff] %v764_v39  ;;  %v768_v41 = vld [vmem:[%s6047_s29 + $0xf48] sm:$0xff]  ;;  %v770_v42 = vld [vmem:[%s6047_s29 + $0xf50] sm:$0xff] }
  0xaa   : > { %767 = vst [vmem:[%s6052_s30 + $0x940] sm:$0xff] %v766_v40  ;;  %v772_v43 = vld [vmem:[%s6047_s29 + $0xf58] sm:$0xff]  ;;  %769 = vst [vmem:[%s6052_s30 + $0x948] sm:$0xff] %v768_v41  ;;  %v774_v44 = vld [vmem:[%s6047_s29 + $0xf60] sm:$0xff] }
  0xab   : > { %771 = vst [vmem:[%s6052_s30 + $0x950] sm:$0xff] %v770_v42  ;;  %773 = vst [vmem:[%s6052_s30 + $0x958] sm:$0xff] %v772_v43  ;;  %v776_v45 = vld [vmem:[%s6047_s29 + $0xf68] sm:$0xff]  ;;  %v778_v46 = vld [vmem:[%s6047_s29 + $0xf70] sm:$0xff] }
  0xac   : > { %775 = vst [vmem:[%s6052_s30 + $0x960] sm:$0xff] %v774_v44  ;;  %777 = vst [vmem:[%s6052_s30 + $0x968] sm:$0xff] %v776_v45  ;;  %v780_v47 = vld [vmem:[%s6047_s29 + $0xf78] sm:$0xff]  ;;  %v782_v48 = vld [vmem:[%s6047_s29 + $0xf80] sm:$0xff] }
  0xad   : > { %779 = vst [vmem:[%s6052_s30 + $0x970] sm:$0xff] %v778_v46  ;;  %v784_v49 = vld [vmem:[%s6047_s29 + $0xf88] sm:$0xff]  ;;  %781 = vst [vmem:[%s6052_s30 + $0x978] sm:$0xff] %v780_v47  ;;  %v786_v50 = vld [vmem:[%s6047_s29 + $0xf90] sm:$0xff] }
  0xae   : > { %783 = vst [vmem:[%s6052_s30 + $0x980] sm:$0xff] %v782_v48  ;;  %785 = vst [vmem:[%s6052_s30 + $0x988] sm:$0xff] %v784_v49  ;;  %v788_v51 = vld [vmem:[%s6047_s29 + $0xf98] sm:$0xff]  ;;  %v790_v52 = vld [vmem:[%s6047_s29 + $0xfa0] sm:$0xff] }
  0xaf   : > { %787 = vst [vmem:[%s6052_s30 + $0x990] sm:$0xff] %v786_v50  ;;  %789 = vst [vmem:[%s6052_s30 + $0x998] sm:$0xff] %v788_v51  ;;  %v792_v53 = vld [vmem:[%s6047_s29 + $0xfa8] sm:$0xff]  ;;  %v794_v54 = vld [vmem:[%s6047_s29 + $0xfb0] sm:$0xff] }
  0xb0   : > { %791 = vst [vmem:[%s6052_s30 + $0x9a0] sm:$0xff] %v790_v52  ;;  %v796_v55 = vld [vmem:[%s6047_s29 + $0xfb8] sm:$0xff]  ;;  %793 = vst [vmem:[%s6052_s30 + $0x9a8] sm:$0xff] %v792_v53  ;;  %v798_v56 = vld [vmem:[%s6047_s29 + $0xfc0] sm:$0xff] }
  0xb1   : > { %795 = vst [vmem:[%s6052_s30 + $0x9b0] sm:$0xff] %v794_v54  ;;  %797 = vst [vmem:[%s6052_s30 + $0x9b8] sm:$0xff] %v796_v55  ;;  %v800_v57 = vld [vmem:[%s6047_s29 + $0xfc8] sm:$0xff]  ;;  %v802_v58 = vld [vmem:[%s6047_s29 + $0xfd0] sm:$0xff] }
  0xb2   : > { %799 = vst [vmem:[%s6052_s30 + $0x9c0] sm:$0xff] %v798_v56  ;;  %801 = vst [vmem:[%s6052_s30 + $0x9c8] sm:$0xff] %v800_v57  ;;  %v804_v59 = vld [vmem:[%s6047_s29 + $0xfd8] sm:$0xff]  ;;  %v806_v60 = vld [vmem:[%s6047_s29 + $0xfe0] sm:$0xff] }
  0xb3   : > { %803 = vst [vmem:[%s6052_s30 + $0x9d0] sm:$0xff] %v802_v58  ;;  %v808_v61 = vld [vmem:[%s6047_s29 + $0xfe8] sm:$0xff]  ;;  %805 = vst [vmem:[%s6052_s30 + $0x9d8] sm:$0xff] %v804_v59  ;;  %v810_v62 = vld [vmem:[%s6047_s29 + $0xff0] sm:$0xff] }
  0xb4   : > { %807 = vst [vmem:[%s6052_s30 + $0x9e0] sm:$0xff] %v806_v60  ;;  %809 = vst [vmem:[%s6052_s30 + $0x9e8] sm:$0xff] %v808_v61  ;;  %v812_v63 = vld [vmem:[%s6047_s29 + $0xff8] sm:$0xff]  ;;  %v814_v0 = vld [vmem:[%s6047_s29 + $0x1000] sm:$0xff] }
  0xb5   : > { %811 = vst [vmem:[%s6052_s30 + $0x9f0] sm:$0xff] %v810_v62  ;;  %813 = vst [vmem:[%s6052_s30 + $0x9f8] sm:$0xff] %v812_v63  ;;  %v816_v1 = vld [vmem:[%s6047_s29 + $0x1008] sm:$0xff]  ;;  %v818_v2 = vld [vmem:[%s6047_s29 + $0x1010] sm:$0xff] }
  0xb6   : > { %815 = vst [vmem:[%s6052_s30 + $0xa00] sm:$0xff] %v814_v0  ;;  %v820_v3 = vld [vmem:[%s6047_s29 + $0x1018] sm:$0xff]  ;;  %817 = vst [vmem:[%s6052_s30 + $0xa08] sm:$0xff] %v816_v1  ;;  %v822_v4 = vld [vmem:[%s6047_s29 + $0x1020] sm:$0xff] }
  0xb7   : > { %819 = vst [vmem:[%s6052_s30 + $0xa10] sm:$0xff] %v818_v2  ;;  %821 = vst [vmem:[%s6052_s30 + $0xa18] sm:$0xff] %v820_v3  ;;  %v824_v5 = vld [vmem:[%s6047_s29 + $0x1028] sm:$0xff]  ;;  %v826_v6 = vld [vmem:[%s6047_s29 + $0x1030] sm:$0xff] }
  0xb8   : > { %823 = vst [vmem:[%s6052_s30 + $0xa20] sm:$0xff] %v822_v4  ;;  %825 = vst [vmem:[%s6052_s30 + $0xa28] sm:$0xff] %v824_v5  ;;  %v828_v7 = vld [vmem:[%s6047_s29 + $0x1038] sm:$0xff]  ;;  %v830_v8 = vld [vmem:[%s6047_s29 + $0x1040] sm:$0xff] }
  0xb9   : > { %827 = vst [vmem:[%s6052_s30 + $0xa30] sm:$0xff] %v826_v6  ;;  %v832_v9 = vld [vmem:[%s6047_s29 + $0x1048] sm:$0xff]  ;;  %829 = vst [vmem:[%s6052_s30 + $0xa38] sm:$0xff] %v828_v7  ;;  %v834_v10 = vld [vmem:[%s6047_s29 + $0x1050] sm:$0xff] }
  0xba   : > { %831 = vst [vmem:[%s6052_s30 + $0xa40] sm:$0xff] %v830_v8  ;;  %833 = vst [vmem:[%s6052_s30 + $0xa48] sm:$0xff] %v832_v9  ;;  %v836_v11 = vld [vmem:[%s6047_s29 + $0x1058] sm:$0xff]  ;;  %v838_v12 = vld [vmem:[%s6047_s29 + $0x1060] sm:$0xff] }
  0xbb   : > { %835 = vst [vmem:[%s6052_s30 + $0xa50] sm:$0xff] %v834_v10  ;;  %837 = vst [vmem:[%s6052_s30 + $0xa58] sm:$0xff] %v836_v11  ;;  %v840_v13 = vld [vmem:[%s6047_s29 + $0x1068] sm:$0xff]  ;;  %v842_v14 = vld [vmem:[%s6047_s29 + $0x1070] sm:$0xff] }
  0xbc   : > { %839 = vst [vmem:[%s6052_s30 + $0xa60] sm:$0xff] %v838_v12  ;;  %v844_v15 = vld [vmem:[%s6047_s29 + $0x1078] sm:$0xff]  ;;  %841 = vst [vmem:[%s6052_s30 + $0xa68] sm:$0xff] %v840_v13  ;;  %v846_v16 = vld [vmem:[%s6047_s29 + $0x1080] sm:$0xff] }
  0xbd   : > { %843 = vst [vmem:[%s6052_s30 + $0xa70] sm:$0xff] %v842_v14  ;;  %845 = vst [vmem:[%s6052_s30 + $0xa78] sm:$0xff] %v844_v15  ;;  %v848_v17 = vld [vmem:[%s6047_s29 + $0x1088] sm:$0xff]  ;;  %v850_v18 = vld [vmem:[%s6047_s29 + $0x1090] sm:$0xff] }
  0xbe   : > { %847 = vst [vmem:[%s6052_s30 + $0xa80] sm:$0xff] %v846_v16  ;;  %849 = vst [vmem:[%s6052_s30 + $0xa88] sm:$0xff] %v848_v17  ;;  %v852_v19 = vld [vmem:[%s6047_s29 + $0x1098] sm:$0xff]  ;;  %v854_v20 = vld [vmem:[%s6047_s29 + $0x10a0] sm:$0xff] }
  0xbf   : > { %851 = vst [vmem:[%s6052_s30 + $0xa90] sm:$0xff] %v850_v18  ;;  %v856_v21 = vld [vmem:[%s6047_s29 + $0x10a8] sm:$0xff]  ;;  %853 = vst [vmem:[%s6052_s30 + $0xa98] sm:$0xff] %v852_v19  ;;  %v858_v22 = vld [vmem:[%s6047_s29 + $0x10b0] sm:$0xff] }
  0xc0   : > { %855 = vst [vmem:[%s6052_s30 + $0xaa0] sm:$0xff] %v854_v20  ;;  %857 = vst [vmem:[%s6052_s30 + $0xaa8] sm:$0xff] %v856_v21  ;;  %v860_v23 = vld [vmem:[%s6047_s29 + $0x10b8] sm:$0xff]  ;;  %v862_v24 = vld [vmem:[%s6047_s29 + $0x10c0] sm:$0xff] }
  0xc1   : > { %859 = vst [vmem:[%s6052_s30 + $0xab0] sm:$0xff] %v858_v22  ;;  %861 = vst [vmem:[%s6052_s30 + $0xab8] sm:$0xff] %v860_v23  ;;  %v864_v25 = vld [vmem:[%s6047_s29 + $0x10c8] sm:$0xff]  ;;  %v866_v26 = vld [vmem:[%s6047_s29 + $0x10d0] sm:$0xff] }
  0xc2   : > { %863 = vst [vmem:[%s6052_s30 + $0xac0] sm:$0xff] %v862_v24  ;;  %v868_v27 = vld [vmem:[%s6047_s29 + $0x10d8] sm:$0xff]  ;;  %865 = vst [vmem:[%s6052_s30 + $0xac8] sm:$0xff] %v864_v25  ;;  %v870_v28 = vld [vmem:[%s6047_s29 + $0x10e0] sm:$0xff] }
  0xc3   : > { %867 = vst [vmem:[%s6052_s30 + $0xad0] sm:$0xff] %v866_v26  ;;  %869 = vst [vmem:[%s6052_s30 + $0xad8] sm:$0xff] %v868_v27  ;;  %v872_v29 = vld [vmem:[%s6047_s29 + $0x10e8] sm:$0xff]  ;;  %v874_v30 = vld [vmem:[%s6047_s29 + $0x10f0] sm:$0xff] }
  0xc4   : > { %871 = vst [vmem:[%s6052_s30 + $0xae0] sm:$0xff] %v870_v28  ;;  %873 = vst [vmem:[%s6052_s30 + $0xae8] sm:$0xff] %v872_v29  ;;  %v876_v31 = vld [vmem:[%s6047_s29 + $0x10f8] sm:$0xff]  ;;  %v878_v32 = vld [vmem:[%s6047_s29 + $0x1100] sm:$0xff] }
  0xc5   : > { %875 = vst [vmem:[%s6052_s30 + $0xaf0] sm:$0xff] %v874_v30  ;;  %v880_v33 = vld [vmem:[%s6047_s29 + $0x1108] sm:$0xff]  ;;  %877 = vst [vmem:[%s6052_s30 + $0xaf8] sm:$0xff] %v876_v31  ;;  %v882_v34 = vld [vmem:[%s6047_s29 + $0x1110] sm:$0xff] }
  0xc6   : > { %879 = vst [vmem:[%s6052_s30 + $0xb00] sm:$0xff] %v878_v32  ;;  %881 = vst [vmem:[%s6052_s30 + $0xb08] sm:$0xff] %v880_v33  ;;  %v884_v35 = vld [vmem:[%s6047_s29 + $0x1118] sm:$0xff]  ;;  %v886_v36 = vld [vmem:[%s6047_s29 + $0x1120] sm:$0xff] }
  0xc7   : > { %883 = vst [vmem:[%s6052_s30 + $0xb10] sm:$0xff] %v882_v34  ;;  %885 = vst [vmem:[%s6052_s30 + $0xb18] sm:$0xff] %v884_v35  ;;  %v888_v37 = vld [vmem:[%s6047_s29 + $0x1128] sm:$0xff]  ;;  %v890_v38 = vld [vmem:[%s6047_s29 + $0x1130] sm:$0xff] }
  0xc8   : > { %887 = vst [vmem:[%s6052_s30 + $0xb20] sm:$0xff] %v886_v36  ;;  %v892_v39 = vld [vmem:[%s6047_s29 + $0x1138] sm:$0xff]  ;;  %889 = vst [vmem:[%s6052_s30 + $0xb28] sm:$0xff] %v888_v37  ;;  %v894_v40 = vld [vmem:[%s6047_s29 + $0x1140] sm:$0xff] }
  0xc9   : > { %891 = vst [vmem:[%s6052_s30 + $0xb30] sm:$0xff] %v890_v38  ;;  %893 = vst [vmem:[%s6052_s30 + $0xb38] sm:$0xff] %v892_v39  ;;  %v896_v41 = vld [vmem:[%s6047_s29 + $0x1148] sm:$0xff]  ;;  %v898_v42 = vld [vmem:[%s6047_s29 + $0x1150] sm:$0xff] }
  0xca   : > { %895 = vst [vmem:[%s6052_s30 + $0xb40] sm:$0xff] %v894_v40  ;;  %897 = vst [vmem:[%s6052_s30 + $0xb48] sm:$0xff] %v896_v41  ;;  %v900_v43 = vld [vmem:[%s6047_s29 + $0x1158] sm:$0xff]  ;;  %v902_v44 = vld [vmem:[%s6047_s29 + $0x1160] sm:$0xff] }
  0xcb   : > { %899 = vst [vmem:[%s6052_s30 + $0xb50] sm:$0xff] %v898_v42  ;;  %v904_v45 = vld [vmem:[%s6047_s29 + $0x1168] sm:$0xff]  ;;  %901 = vst [vmem:[%s6052_s30 + $0xb58] sm:$0xff] %v900_v43  ;;  %v906_v46 = vld [vmem:[%s6047_s29 + $0x1170] sm:$0xff] }
  0xcc   : > { %903 = vst [vmem:[%s6052_s30 + $0xb60] sm:$0xff] %v902_v44  ;;  %905 = vst [vmem:[%s6052_s30 + $0xb68] sm:$0xff] %v904_v45  ;;  %v908_v47 = vld [vmem:[%s6047_s29 + $0x1178] sm:$0xff]  ;;  %v910_v48 = vld [vmem:[%s6047_s29 + $0x1180] sm:$0xff] }
  0xcd   : > { %907 = vst [vmem:[%s6052_s30 + $0xb70] sm:$0xff] %v906_v46  ;;  %909 = vst [vmem:[%s6052_s30 + $0xb78] sm:$0xff] %v908_v47  ;;  %v912_v49 = vld [vmem:[%s6047_s29 + $0x1188] sm:$0xff]  ;;  %v914_v50 = vld [vmem:[%s6047_s29 + $0x1190] sm:$0xff] }
  0xce   : > { %911 = vst [vmem:[%s6052_s30 + $0xb80] sm:$0xff] %v910_v48  ;;  %v916_v51 = vld [vmem:[%s6047_s29 + $0x1198] sm:$0xff]  ;;  %913 = vst [vmem:[%s6052_s30 + $0xb88] sm:$0xff] %v912_v49  ;;  %v918_v52 = vld [vmem:[%s6047_s29 + $0x11a0] sm:$0xff] }
  0xcf   : > { %915 = vst [vmem:[%s6052_s30 + $0xb90] sm:$0xff] %v914_v50  ;;  %917 = vst [vmem:[%s6052_s30 + $0xb98] sm:$0xff] %v916_v51  ;;  %v920_v53 = vld [vmem:[%s6047_s29 + $0x11a8] sm:$0xff]  ;;  %v922_v54 = vld [vmem:[%s6047_s29 + $0x11b0] sm:$0xff] }
  0xd0   : > { %919 = vst [vmem:[%s6052_s30 + $0xba0] sm:$0xff] %v918_v52  ;;  %921 = vst [vmem:[%s6052_s30 + $0xba8] sm:$0xff] %v920_v53  ;;  %v924_v55 = vld [vmem:[%s6047_s29 + $0x11b8] sm:$0xff]  ;;  %v926_v56 = vld [vmem:[%s6047_s29 + $0x11c0] sm:$0xff] }
  0xd1   : > { %923 = vst [vmem:[%s6052_s30 + $0xbb0] sm:$0xff] %v922_v54  ;;  %v928_v57 = vld [vmem:[%s6047_s29 + $0x11c8] sm:$0xff]  ;;  %925 = vst [vmem:[%s6052_s30 + $0xbb8] sm:$0xff] %v924_v55  ;;  %v930_v58 = vld [vmem:[%s6047_s29 + $0x11d0] sm:$0xff] }
  0xd2   : > { %927 = vst [vmem:[%s6052_s30 + $0xbc0] sm:$0xff] %v926_v56  ;;  %929 = vst [vmem:[%s6052_s30 + $0xbc8] sm:$0xff] %v928_v57  ;;  %v932_v59 = vld [vmem:[%s6047_s29 + $0x11d8] sm:$0xff]  ;;  %v934_v60 = vld [vmem:[%s6047_s29 + $0x11e0] sm:$0xff] }
  0xd3   : > { %931 = vst [vmem:[%s6052_s30 + $0xbd0] sm:$0xff] %v930_v58  ;;  %933 = vst [vmem:[%s6052_s30 + $0xbd8] sm:$0xff] %v932_v59  ;;  %v936_v61 = vld [vmem:[%s6047_s29 + $0x11e8] sm:$0xff]  ;;  %v938_v62 = vld [vmem:[%s6047_s29 + $0x11f0] sm:$0xff] }
  0xd4   : > { %935 = vst [vmem:[%s6052_s30 + $0xbe0] sm:$0xff] %v934_v60  ;;  %v940_v63 = vld [vmem:[%s6047_s29 + $0x11f8] sm:$0xff]  ;;  %937 = vst [vmem:[%s6052_s30 + $0xbe8] sm:$0xff] %v936_v61 }
  0xd5   : > { %939 = vst [vmem:[%s6052_s30 + $0xbf0] sm:$0xff] %v938_v62  ;;  %941 = vst [vmem:[%s6052_s30 + $0xbf8] sm:$0xff] %v940_v63 }
  0xd6 PF: > { %p4238_p7 = scmp.ge.s32.totalorder %s5975_s17, 1  ;;  %p946_p8 = scmp.lt.s32.totalorder %s5975_s17, 3 }
  0xd8   : > { %p947_p9 = pnand %p4238_p7, %p946_p8 }
  0xda   : > { %950 = sbr.rel (%p947_p9) target bundleno = 1808 (0x710), region = 51 }
  0xe1   : > { %s953_s5 = sand.u32 1, %s5967_s15   ;;  %p4239_p10 = scmp.ne.s32.totalorder %s6020_s18, 0 }
  0xe2   : > { %s5826_s6 = smul.u32 3072, %s953_s5  ;;  %vm981_vm0 = vcmask (!%p4239_p10), 0   ;;  %v5977_v0 = vmov (!%p4239_p10), 0.0  }
  0xe3   : > { %s5827_s7 = smul.u32 336, %s953_s5  ;;  %982 = vst.msk [vmem:[#allocation2] sm:$0x1] (!%p4239_p10), %vm981_vm0, %v5977_v0 }
  0xe4   : > { %s6822_s8 = scalar_lea.vmem [#allocation3], %s5826_s6  ;;  %980 = sbr.rel (%p4239_p10) target bundleno = 235 (0xeb), region = 59 }
  0xe5   : > { %s6824_s9 = scalar_lea.vmem [#allocation4], %s5827_s7 }
  0xeb PF: > { %v1044_v1 = vld [vmem:[%s6822_s8 + $0x8] sm:$0xff]  ;;  %v1046_v2 = vld [vmem:[%s6822_s8 + $0x18] sm:$0xff]  ;;  %v1043_v3 = vld [vmem:[%s6822_s8] sm:$0xff]  ;;  %vm1447_vm1 = vcmask 912384   ;;  %vm1910_vm2 = vcmask 916480   ;;  %vm3763_vm3 = vcmask 0  }
  0xec   : > { %v5248_v4 = vpack.c.bf16 %v1046_v2, %v1044_v1  ;;  %v1045_v5 = vld [vmem:[%s6822_s8 + $0x10] sm:$0xff]  ;;  %v1048_v6 = vld [vmem:[%s6822_s8 + $0x28] sm:$0xff]  ;;  %v1050_v7 = vld [vmem:[%s6822_s8 + $0x38] sm:$0xff]  ;;  %p4714_p11 = scmp.ne.s32.totalorder %s6020_s18, 1 }
  0xed   : > { %v5250_v8 = vpack.c.bf16 %v1045_v5, %v1043_v3  ;;  %v5252_v9 = vpack.c.bf16 %v1050_v7, %v1048_v6  ;;  %v1047_v10 = vld [vmem:[%s6822_s8 + $0x20] sm:$0xff]  ;;  %v1049_v11 = vld [vmem:[%s6822_s8 + $0x30] sm:$0xff]  ;;  %v1052_v12 = vld [vmem:[%s6822_s8 + $0x48] sm:$0xff] }
  0xee   : > { %5249 = vmatprep.subr.bf16.mxu0 %v5248_v4  ;;  %v1054_v13 = vld [vmem:[%s6822_s8 + $0x58] sm:$0xff]  ;;  %v5254_v14 = vpack.c.bf16 %v1049_v11, %v1047_v10  ;;  %v1051_v16 = vld [vmem:[%s6822_s8 + $0x40] sm:$0xff]  ;;  %v1053_v17 = vld [vmem:[%s6822_s8 + $0x50] sm:$0xff] }
  0xef   : > { %5251 = vmatpush1.bf16.msra.mxu0 %v5250_v8  ;;  %v5256_v15 = vpack.c.bf16 %v1054_v13, %v1052_v12  ;;  %v1056_v18 = vld [vmem:[%s6822_s8 + $0x68] sm:$0xff]  ;;  %v1058_v19 = vld [vmem:[%s6822_s8 + $0x78] sm:$0xff]  ;;  %v5258_v20 = vpack.c.bf16 %v1053_v17, %v1051_v16  ;;  %v1055_v22 = vld [vmem:[%s6822_s8 + $0x60] sm:$0xff] }
  0xf0   : > { %5253 = vmatprep.subr.bf16.mxu0 %v5252_v9  ;;  %v5260_v21 = vpack.c.bf16 %v1058_v19, %v1056_v18  ;;  %v1057_v23 = vld [vmem:[%s6822_s8 + $0x70] sm:$0xff]  ;;  %v1060_v24 = vld [vmem:[%s6822_s8 + $0x88] sm:$0xff]  ;;  %v1062_v25 = vld [vmem:[%s6822_s8 + $0x98] sm:$0xff] }
  0xf1   : > { %v5262_v26 = vpack.c.bf16 %v1057_v23, %v1055_v22  ;;  %v5264_v27 = vpack.c.bf16 %v1062_v25, %v1060_v24  ;;  %v1059_v28 = vld [vmem:[%s6822_s8 + $0x80] sm:$0xff]  ;;  %v1061_v29 = vld [vmem:[%s6822_s8 + $0x90] sm:$0xff]  ;;  %v1064_v30 = vld [vmem:[%s6822_s8 + $0xa8] sm:$0xff] }
  0xf2   : > { %v1066_v31 = vld [vmem:[%s6822_s8 + $0xb8] sm:$0xff]  ;;  %v5266_v32 = vpack.c.bf16 %v1061_v29, %v1059_v28  ;;  %v1063_v34 = vld [vmem:[%s6822_s8 + $0xa0] sm:$0xff]  ;;  %v1065_v35 = vld [vmem:[%s6822_s8 + $0xb0] sm:$0xff] }
  0xf3   : > { %5255 = vmatpush1.bf16.msra.mxu0 %v5254_v14  ;;  %v5268_v33 = vpack.c.bf16 %v1066_v31, %v1064_v30  ;;  %v1068_v36 = vld [vmem:[%s6822_s8 + $0xc8] sm:$0xff]  ;;  %v1070_v37 = vld [vmem:[%s6822_s8 + $0xd8] sm:$0xff]  ;;  %v5270_v38 = vpack.c.bf16 %v1065_v35, %v1063_v34  ;;  %v1067_v40 = vld [vmem:[%s6822_s8 + $0xc0] sm:$0xff] }
  0xf4   : > { %5257 = vmatprep.subr.bf16.mxu0 %v5256_v15  ;;  %v5272_v39 = vpack.c.bf16 %v1070_v37, %v1068_v36  ;;  %v1069_v41 = vld [vmem:[%s6822_s8 + $0xd0] sm:$0xff]  ;;  %v6858_v42 = vld [vmem:[%s8485_s1 + $0x8] sm:$0xff]  ;;  %v1074_v44 = vld [vmem:[%s6822_s8 + $0xf8] sm:$0xff] }
  0xf5   : > { %v1072_v43 = vld [vmem:[%s6822_s8 + $0xe8] sm:$0xff]  ;;  %1171 = vmatprep.mubr.f32.mxu0 %v6858_v42  ;;  %v5274_v45 = vpack.c.bf16 %v1069_v41, %v1067_v40  ;;  %v1071_v47 = vld [vmem:[%s6822_s8 + $0xe0] sm:$0xff]  ;;  %v1073_v48 = vld [vmem:[%s6822_s8 + $0xf0] sm:$0xff] }
  0xf6   : > { %v5276_v46 = vpack.c.bf16 %v1074_v44, %v1072_v43  ;;  %v1076_v49 = vld [vmem:[%s6822_s8 + $0x108] sm:$0xff]  ;;  %v1078_v50 = vld [vmem:[%s6822_s8 + $0x118] sm:$0xff]  ;;  %v5278_v51 = vpack.c.bf16 %v1073_v48, %v1071_v47  ;;  %v1075_v53 = vld [vmem:[%s6822_s8 + $0x100] sm:$0xff] }
  0xf7   : > { %5259 = vmatpush1.bf16.msra.mxu0 %v5258_v20  ;;  %v5280_v52 = vpack.c.bf16 %v1078_v50, %v1076_v49  ;;  %v1077_v54 = vld [vmem:[%s6822_s8 + $0x110] sm:$0xff]  ;;  %v1080_v55 = vld [vmem:[%s6822_s8 + $0x128] sm:$0xff]  ;;  %v1082_v56 = vld [vmem:[%s6822_s8 + $0x138] sm:$0xff] }
  0xf8   : > { %5261 = vmatprep.subr.bf16.mxu0 %v5260_v21  ;;  %v1027_v57 = vld [vmem:[%s8486_s2 + $0x80] sm:$0xff]  ;;  %v1081_v59 = vld [vmem:[%s6822_s8 + $0x130] sm:$0xff]  ;;  %v1028_v60 = vld [vmem:[%s8486_s2 + $0x88] sm:$0xff]  ;;  %v5282_v63 = vpack.c.bf16 %v1077_v54, %v1075_v53  ;;  %v5284_v5 = vpack.c.bf16 %v1082_v56, %v1080_v55 }
  0xf9   : > { %v1079_v58 = vld [vmem:[%s6822_s8 + $0x120] sm:$0xff]  ;;  %v6885_v0 = vpack.c.bf16 %v1028_v60, %v1027_v57  ;;  %v1029_v2 = vld [vmem:[%s8486_s2 + $0x90] sm:$0xff]  ;;  %v1030_v3 = vld [vmem:[%s8486_s2 + $0x98] sm:$0xff] }
  0xfa   : > { %v1011_v61 = vld [vmem:[%s8486_s2] sm:$0xff]  ;;  %v1012_v62 = vld [vmem:[%s8486_s2 + $0x8] sm:$0xff]  ;;  %v1013_v4 = vld [vmem:[%s8486_s2 + $0x10] sm:$0xff]  ;;  %v6898_v6 = vpack.c.bf16 %v1030_v3, %v1029_v2  ;;  %v5286_v13 = vpack.c.bf16 %v1081_v59, %v1079_v58 }
  0xfb   : > { %5263 = vmatpush1.bf16.msra.mxu0 %v5262_v26  ;;  %v6887_v1 = vpack.c.bf16 %v1012_v62, %v1011_v61  ;;  %v1014_v7 = vld [vmem:[%s8486_s2 + $0x18] sm:$0xff]  ;;  %v1031_v8 = vld [vmem:[%s8486_s2 + $0xa0] sm:$0xff]  ;;  %v1032_v9 = vld [vmem:[%s8486_s2 + $0xa8] sm:$0xff]  ;;  %5313 = vmatprep.subr.bf16.mxu1 %v6885_v0 }
  0xfc   : > { %5265 = vmatprep.subr.bf16.mxu0 %v5264_v27  ;;  %v1084_v10 = vld [vmem:[%s6822_s8 + $0x148] sm:$0xff]  ;;  %v1086_v11 = vld [vmem:[%s6822_s8 + $0x158] sm:$0xff]  ;;  %v6913_v12 = vpack.c.bf16 %v1014_v7, %v1013_v4  ;;  %v1083_v14 = vld [vmem:[%s6822_s8 + $0x140] sm:$0xff]  ;;  %v6917_v15 = vpack.c.bf16 %v1032_v9, %v1031_v8 }
  0xfd   : > { %5315 = vmatpush3.bf16.msra.mxu1 %v6887_v1  ;;  %v1015_v16 = vld [vmem:[%s8486_s2 + $0x20] sm:$0xff]  ;;  %v1016_v17 = vld [vmem:[%s8486_s2 + $0x28] sm:$0xff]  ;;  %v5288_v18 = vpack.c.bf16 %v1086_v11, %v1084_v10  ;;  %v1085_v19 = vld [vmem:[%s6822_s8 + $0x150] sm:$0xff] }
  0xfe   : > { %5317 = vmatprep.subr.bf16.mxu1 %v6898_v6  ;;  %v1033_v20 = vld [vmem:[%s8486_s2 + $0xb0] sm:$0xff]  ;;  %v1034_v21 = vld [vmem:[%s8486_s2 + $0xb8] sm:$0xff]  ;;  %v6935_v24 = vpack.c.bf16 %v1016_v17, %v1015_v16  ;;  %v5290_v25 = vpack.c.bf16 %v1085_v19, %v1083_v14  ;;  %v1087_v26 = vld [vmem:[%s6822_s8 + $0x160] sm:$0xff] }
  0xff   : > { %5267 = vmatpush1.bf16.msra.mxu0 %v5266_v32  ;;  %v1088_v22 = vld [vmem:[%s6822_s8 + $0x168] sm:$0xff]  ;;  %v1090_v23 = vld [vmem:[%s6822_s8 + $0x178] sm:$0xff]  ;;  %v6939_v27 = vpack.c.bf16 %v1034_v21, %v1033_v20  ;;  %v1089_v31 = vld [vmem:[%s6822_s8 + $0x170] sm:$0xff] }
 0x100   : > { %5269 = vmatprep.subr.bf16.mxu0 %v5268_v33  ;;  %v1017_v28 = vld [vmem:[%s8486_s2 + $0x30] sm:$0xff]  ;;  %v1018_v29 = vld [vmem:[%s8486_s2 + $0x38] sm:$0xff]  ;;  %v5292_v30 = vpack.c.bf16 %v1090_v23, %v1088_v22  ;;  %v1035_v32 = vld [vmem:[%s8486_s2 + $0xc0] sm:$0xff]  ;;  %v5294_v37 = vpack.c.bf16 %v1089_v31, %v1087_v26 }
 0x101   : > { %5319 = vmatpush3.bf16.msra.mxu1 %v6913_v12  ;;  %v1036_v33 = vld [vmem:[%s8486_s2 + $0xc8] sm:$0xff]  ;;  %v1094_v35 = vld [vmem:[%s6822_s8 + $0x198] sm:$0xff]  ;;  %v6957_v36 = vpack.c.bf16 %v1018_v29, %v1017_v28  ;;  %v1093_v44 = vld [vmem:[%s6822_s8 + $0x190] sm:$0xff] }
 0x102   : > { %5321 = vmatprep.subr.bf16.mxu1 %v6917_v15  ;;  %v1092_v34 = vld [vmem:[%s6822_s8 + $0x188] sm:$0xff]  ;;  %v1019_v40 = vld [vmem:[%s8486_s2 + $0x40] sm:$0xff]  ;;  %v1022_v54 = vld [vmem:[%s8486_s2 + $0x58] sm:$0xff] }
 0x103   : > { %5271 = vmatpush1.bf16.msra.mxu0 %v5270_v38  ;;  %v1091_v38 = vld [vmem:[%s6822_s8 + $0x180] sm:$0xff]  ;;  %v5296_v43 = vpack.c.bf16 %v1094_v35, %v1092_v34  ;;  %v1096_v47 = vld [vmem:[%s6822_s8 + $0x1a8] sm:$0xff]  ;;  %v1098_v48 = vld [vmem:[%s6822_s8 + $0x1b8] sm:$0xff] }
 0x104   : > { %5273 = vmatprep.subr.bf16.mxu0 %v5272_v39  ;;  %v6961_v39 = vpack.c.bf16 %v1036_v33, %v1035_v32  ;;  %v1020_v41 = vld [vmem:[%s8486_s2 + $0x48] sm:$0xff]  ;;  %v5298_v50 = vpack.c.bf16 %v1093_v44, %v1091_v38  ;;  %v1021_v53 = vld [vmem:[%s8486_s2 + $0x50] sm:$0xff]  ;;  %v5300_v55 = vpack.c.bf16 %v1098_v48, %v1096_v47  ;;  %v1039_v57 = vld [vmem:[%s8486_s2 + $0xe0] sm:$0xff] }
 0x105   : > { %5323 = vmatpush3.bf16.msra.mxu1 %v6935_v24  ;;  %v6979_v49 = vpack.c.bf16 %v1020_v41, %v1019_v40  ;;  %v1097_v56 = vld [vmem:[%s6822_s8 + $0x1b0] sm:$0xff]  ;;  %v1040_v58 = vld [vmem:[%s8486_s2 + $0xe8] sm:$0xff]  ;;  %v1102_v60 = vld [vmem:[%s6822_s8 + $0x1d8] sm:$0xff]  ;;  %v7001_v61 = vpack.c.bf16 %v1022_v54, %v1021_v53 }
 0x106   : > { %5325 = vmatprep.subr.bf16.mxu1 %v6939_v27  ;;  %v1100_v59 = vld [vmem:[%s6822_s8 + $0x1c8] sm:$0xff]  ;;  %v7005_v2 = vpack.c.bf16 %v1040_v58, %v1039_v57  ;;  %v1023_v3 = vld [vmem:[%s8486_s2 + $0x60] sm:$0xff]  ;;  %v1101_v7 = vld [vmem:[%s6822_s8 + $0x1d0] sm:$0xff] }
 0x107   : > { %5275 = vmatpush1.bf16.msra.mxu0 %v5274_v45  ;;  %v1037_v45 = vld [vmem:[%s8486_s2 + $0xd0] sm:$0xff]  ;;  %v1024_v4 = vld [vmem:[%s8486_s2 + $0x68] sm:$0xff]  ;;  %v1042_v9 = vld [vmem:[%s8486_s2 + $0xf8] sm:$0xff] }
 0x108   : > { %5277 = vmatprep.subr.bf16.mxu0 %v5276_v46  ;;  %v1038_v46 = vld [vmem:[%s8486_s2 + $0xd8] sm:$0xff]  ;;  %v1041_v8 = vld [vmem:[%s8486_s2 + $0xf0] sm:$0xff]  ;;  %v1103_v20 = vld [vmem:[%s6822_s8 + $0x1e0] sm:$0xff] }
 0x109   : > { %5327 = vmatpush3.bf16.msra.mxu1 %v6957_v36  ;;  %v1104_v10 = vld [vmem:[%s6822_s8 + $0x1e8] sm:$0xff]  ;;  %v1106_v11 = vld [vmem:[%s6822_s8 + $0x1f8] sm:$0xff]  ;;  %v7026_v16 = vpack.c.bf16 %v1042_v9, %v1041_v8  ;;  %v1105_v21 = vld [vmem:[%s6822_s8 + $0x1f0] sm:$0xff] }
 0x10a   : > { %5329 = vmatprep.subr.bf16.mxu1 %v6961_v39  ;;  %v1025_v17 = vld [vmem:[%s8486_s2 + $0x70] sm:$0xff]  ;;  %v5308_v19 = vpack.c.bf16 %v1106_v11, %v1104_v10  ;;  %v5310_v23 = vpack.c.bf16 %v1105_v21, %v1103_v20  ;;  %v7049_v26 = vld [vmem:[%s8485_s1 + $0x18] sm:$0xff]  ;;  %v7063_v29 = vld [vmem:[%s8485_s1 + $0x28] sm:$0xff] }
 0x10b   : > { %5279 = vmatpush1.bf16.msra.mxu0 %v5278_v51  ;;  %v1095_v51 = vld [vmem:[%s6822_s8 + $0x1a0] sm:$0xff]  ;;  %v7057_v28 = vld [vmem:[%s8485_s1 + $0x10] sm:$0xff]  ;;  %v7077_v31 = vld [vmem:[%s8485_s1 + $0x38] sm:$0xff] }
 0x10c   : > { %5281 = vmatprep.subr.bf16.mxu0 %v5280_v52  ;;  %v6983_v52 = vpack.c.bf16 %v1038_v46, %v1037_v45  ;;  %v5302_v62 = vpack.c.bf16 %v1097_v56, %v1095_v51  ;;  %v7085_v32 = vld [vmem:[%s8485_s1 + $0x30] sm:$0xff]  ;;  %v7091_v33 = vld [vmem:[%s8485_s1 + $0x48] sm:$0xff]  ;;  %v7099_v34 = vld [vmem:[%s8485_s1 + $0x40] sm:$0xff] }
 0x10d   : > { %5331 = vmatpush3.bf16.msra.mxu1 %v6979_v49  ;;  %v7105_v35 = vld [vmem:[%s8485_s1 + $0x58] sm:$0xff]  ;;  %v7119_v38 = vld [vmem:[%s8485_s1 + $0x68] sm:$0xff]  ;;  %v7127_v40 = vld [vmem:[%s8485_s1 + $0x60] sm:$0xff] }
 0x10e   : > { %5333 = vmatprep.subr.bf16.mxu1 %v6983_v52  ;;  %v7133_v41 = vld [vmem:[%s8485_s1 + $0x78] sm:$0xff]  ;;  %v7147_v44 = vld [vmem:[%s8485_s1 + $0x88] sm:$0xff]  ;;  %v7155_v45 = vld [vmem:[%s8485_s1 + $0x80] sm:$0xff] }
 0x10f   : > { %5283 = vmatpush1.bf16.msra.mxu0 %v5282_v63  ;;  %v1099_v63 = vld [vmem:[%s6822_s8 + $0x1c0] sm:$0xff]  ;;  %v7161_v46 = vld [vmem:[%s8485_s1 + $0x98] sm:$0xff]  ;;  %v7169_v47 = vld [vmem:[%s8485_s1 + $0x90] sm:$0xff] }
 0x110   : > { %5285 = vmatprep.subr.bf16.mxu0 %v5284_v5  ;;  %v5304_v5 = vpack.c.bf16 %v1102_v60, %v1100_v59  ;;  %v5306_v14 = vpack.c.bf16 %v1101_v7, %v1099_v63  ;;  %v7174_v48 = vld [vmem:[%s8485_s1 + $0xa8] sm:$0xff]  ;;  %v7186_v51 = vld [vmem:[%s8485_s1 + $0xb8] sm:$0xff]  ;;  %v7193_v53 = vld [vmem:[%s8485_s1 + $0xb0] sm:$0xff] }
 0x111   : > { %5335 = vmatpush3.bf16.msra.mxu1 %v7001_v61  ;;  %v7198_v54 = vld [vmem:[%s8485_s1 + $0xc8] sm:$0xff]  ;;  %v7210_v56 = vld [vmem:[%s8485_s1 + $0xd8] sm:$0xff]  ;;  %v7217_v57 = vld [vmem:[%s8485_s1 + $0xd0] sm:$0xff] }
 0x112   : > { %5337 = vmatprep.subr.bf16.mxu1 %v7005_v2  ;;  %v4255_v58 = vld [vmem:[%s6822_s8 + $0x608] sm:$0xff]  ;;  %v4257_v59 = vld [vmem:[%s6822_s8 + $0x618] sm:$0xff]  ;;  %v4256_v63 = vld [vmem:[%s6822_s8 + $0x610] sm:$0xff] }
 0x113   : > { %5287 = vmatpush1.bf16.msra.mxu0 %v5286_v13  ;;  %v7023_v13 = vpack.c.bf16 %v1024_v4, %v1023_v3  ;;  %v5344_v60 = vpack.c.bf16 %v4257_v59, %v4255_v58  ;;  %v4259_v3 = vld [vmem:[%s6822_s8 + $0x628] sm:$0xff]  ;;  %v4261_v4 = vld [vmem:[%s6822_s8 + $0x638] sm:$0xff]  ;;  %v4258_v10 = vld [vmem:[%s6822_s8 + $0x620] sm:$0xff] }
 0x114   : > { %5289 = vmatprep.subr.bf16.mxu0 %v5288_v18  ;;  %v1026_v18 = vld [vmem:[%s8486_s2 + $0x78] sm:$0xff]  ;;  %v5348_v9 = vpack.c.bf16 %v4261_v4, %v4259_v3  ;;  %v4267_v59 = vld [vmem:[%s6822_s8 + $0x668] sm:$0xff] }
 0x115   : > { %5339 = vmatpush3.bf16.msra.mxu1 %v7023_v13  ;;  %v7037_v22 = vpack.c.bf16 %v1026_v18, %v1025_v17  ;;  %v4260_v11 = vld [vmem:[%s6822_s8 + $0x630] sm:$0xff]  ;;  %v4265_v17 = vld [vmem:[%s6822_s8 + $0x658] sm:$0xff] }
 0x116   : > { %5341 = vmatprep.subr.bf16.mxu1 %v7026_v16  ;;  %v5350_v18 = vpack.c.bf16 %v4260_v11, %v4258_v10  ;;  %v4264_v58 = vld [vmem:[%s6822_s8 + $0x650] sm:$0xff] }
 0x117   : > { %5291 = vmatpush1.bf16.msra.mxu0 %v5290_v25  ;;  %v7044_v25 = vld [vmem:[%s8485_s1] sm:$0xff] }
 0x118   : > { %5293 = vmatprep.subr.bf16.mxu0 %v5292_v30  ;;  %v7071_v30 = vld [vmem:[%s8485_s1 + $0x20] sm:$0xff] }
 0x119   : > { %5343 = vmatpush3.bf16.msra.mxu1 %v7037_v22 }
 0x11a   : > { %5345 = vmatprep.subr.bf16.mxu1 %v5344_v60  ;;  %v4269_v60 = vld [vmem:[%s6822_s8 + $0x678] sm:$0xff] }
 0x11b   : > { %5295 = vmatpush1.bf16.msra.mxu0 %v5294_v37  ;;  %v7113_v37 = vld [vmem:[%s8485_s1 + $0x50] sm:$0xff]  ;;  %v5356_v4 = vpack.c.bf16 %v4269_v60, %v4267_v59 }
 0x11c   : > { %5297 = vmatprep.subr.bf16.mxu0 %v5296_v43  ;;  %v7141_v43 = vld [vmem:[%s8485_s1 + $0x70] sm:$0xff] }
 0x11f   : > { %5299 = vmatpush1.bf16.msra.mxu0 %v5298_v50  ;;  %v7181_v50 = vld [vmem:[%s8485_s1 + $0xa0] sm:$0xff] }
 0x120   : > { %5301 = vmatprep.subr.bf16.mxu0 %v5300_v55  ;;  %v7205_v55 = vld [vmem:[%s8485_s1 + $0xc0] sm:$0xff] }
 0x123   : > { %5303 = vmatpush1.bf16.msra.mxu0 %v5302_v62  ;;  %v4254_v62 = vld [vmem:[%s6822_s8 + $0x600] sm:$0xff] }
 0x124   : > { %5305 = vmatprep.subr.bf16.mxu0 %v5304_v5  ;;  %v5346_v7 = vpack.c.bf16 %v4256_v63, %v4254_v62 }
 0x127   : > { %5307 = vmatpush1.bf16.msra.mxu0 %v5306_v14  ;;  %v4263_v14 = vld [vmem:[%s6822_s8 + $0x648] sm:$0xff] }
 0x128   : > { %5309 = vmatprep.subr.bf16.mxu0 %v5308_v19  ;;  %v5352_v21 = vpack.c.bf16 %v4265_v17, %v4263_v14 }
 0x12b   : > { %5311 = vmatpush1.bf16.msra.mxu0 %v5310_v23  ;;  %v4262_v23 = vld [vmem:[%s6822_s8 + $0x640] sm:$0xff] }
 0x12c   : > { %5409 = vmatprep.subr.bf16.mxu0 %v6885_v0  ;;  %v5354_v62 = vpack.c.bf16 %v4264_v58, %v4262_v23 }
 0x12e   : > { %1172 = vmatmul.mubr.f32.vlgmr.msra.gmra.mrb[0].mxu0 %v7044_v25 }
 0x12f   : > { %1177 = vmatprep.mubr.f32.mxu0 %v7049_v26  ;;  %5411 = vmatpush3.bf16.msra.mxu0 %v6887_v1 }
 0x130   : > { %5413 = vmatprep.subr.bf16.mxu0 %v6898_v6 }
 0x132   : > { %1178 = vmatmul.mubr.f32.gmra.mrb[2].mxu0 %v7057_v28 }
 0x133   : > { %1183 = vmatprep.mubr.f32.mxu0 %v7063_v29  ;;  %5415 = vmatpush3.bf16.msra.mxu0 %v6913_v12 }
 0x134   : > { %5417 = vmatprep.subr.bf16.mxu0 %v6917_v15 }
 0x136   : > { %1184 = vmatmul.mubr.f32.gmra.mrb[4].mxu0 %v7071_v30 }
 0x137   : > { %1189 = vmatprep.mubr.f32.mxu0 %v7077_v31  ;;  %5419 = vmatpush3.bf16.msra.mxu0 %v6935_v24 }
 0x138   : > { %5421 = vmatprep.subr.bf16.mxu0 %v6939_v27 }
 0x13a   : > { %1190 = vmatmul.mubr.f32.gmra.mrb[6].mxu0 %v7085_v32 }
 0x13b   : > { %1195 = vmatprep.mubr.f32.mxu0 %v7091_v33  ;;  %5423 = vmatpush3.bf16.msra.mxu0 %v6957_v36 }
 0x13c   : > { %5425 = vmatprep.subr.bf16.mxu0 %v6961_v39 }
 0x13e   : > { %1196 = vmatmul.mubr.f32.gmra.mrb[8].mxu0 %v7099_v34 }
 0x13f   : > { %1201 = vmatprep.mubr.f32.mxu0 %v7105_v35  ;;  %5427 = vmatpush3.bf16.msra.mxu0 %v6979_v49 }
 0x140   : > { %5429 = vmatprep.subr.bf16.mxu0 %v6983_v52 }
 0x142   : > { %1202 = vmatmul.mubr.f32.gmra.mrb[10].mxu0 %v7113_v37 }
 0x143   : > { %1207 = vmatprep.mubr.f32.mxu0 %v7119_v38  ;;  %5431 = vmatpush3.bf16.msra.mxu0 %v7001_v61 }
 0x144   : > { %5433 = vmatprep.subr.bf16.mxu0 %v7005_v2 }
 0x146   : > { %1208 = vmatmul.mubr.f32.gmra.mrb[12].mxu0 %v7127_v40 }
 0x147   : > { %1213 = vmatprep.mubr.f32.mxu0 %v7133_v41  ;;  %5435 = vmatpush3.bf16.msra.mxu0 %v7023_v13 }
 0x148   : > { %5437 = vmatprep.subr.bf16.mxu0 %v7026_v16 }
 0x14a   : > { %1214 = vmatmul.mubr.f32.gmra.mrb[14].mxu0 %v7141_v43 }
 0x14b   : > { %1219 = vmatprep.mubr.f32.mxu0 %v7147_v44  ;;  %5439 = vmatpush3.bf16.msra.mxu0 %v7037_v22 }
 0x14c   : > { %5505 = vmatprep.subr.bf16.mxu0 %v6885_v0 }
 0x14e   : > { %1220 = vmatmul.mubr.f32.gmra.mrb[16].mxu0 %v7155_v45 }
 0x14f   : > { %1225 = vmatprep.mubr.f32.mxu0 %v7161_v46 }
 0x152   : > { %1226 = vmatmul.mubr.f32.gmra.mrb[18].mxu0 %v7169_v47 }
 0x153   : > { %1231 = vmatprep.mubr.f32.mxu0 %v7174_v48 }
 0x156   : > { %1232 = vmatmul.mubr.f32.gmra.mrb[20].mxu0 %v7181_v50 }
 0x157   : > { %1237 = vmatprep.mubr.f32.mxu0 %v7186_v51 }
 0x15a   : > { %1238 = vmatmul.mubr.f32.gmra.mrb[22].mxu0 %v7193_v53 }
 0x15b   : > { %1243 = vmatprep.mubr.f32.mxu0 %v7198_v54 }
 0x15e   : > { %1244 = vmatmul.mubr.f32.gmra.mrb[24].mxu0 %v7205_v55 }
 0x15f   : > { %1249 = vmatprep.mubr.f32.mxu0 %v7210_v56 }
 0x162   : > { %1250 = vmatmul.mubr.f32.gmra.mrb[26].mxu0 %v7217_v57 }
 0x201   : > { %v1173_v5 = vpop.f32.mrb[0].mxu0 }
 0x202   : > { %v1175_v8 = vpop.f32.mrb[1].mxu0 }
 0x203   : > { %1320 = vmatprep.mubr.f32.mxu1 %v1175_v8  ;;  %v4271_v8 = vld [vmem:[%s6822_s8 + $0x688] sm:$0xff] }
 0x204   : > { %1321 = vmatmul.mubr.f32.vlgmr.msra.gmra.mrb[0].mxu1 %v1173_v5  ;;  %v4266_v5 = vld [vmem:[%s6822_s8 + $0x660] sm:$0xff] }
 0x205   : > { %5347 = vmatpush1.bf16.msra.mxu1 %v5346_v7  ;;  %v1179_v19 = vpop.f32.mrb[2].mxu0  ;;  %v4268_v7 = vld [vmem:[%s6822_s8 + $0x670] sm:$0xff] }
 0x206   : > { %5349 = vmatprep.subr.bf16.mxu1 %v5348_v9  ;;  %v1181_v20 = vpop.f32.mrb[3].mxu0  ;;  %v4273_v9 = vld [vmem:[%s6822_s8 + $0x698] sm:$0xff]  ;;  %v5358_v10 = vpack.c.bf16 %v4268_v7, %v4266_v5 }
 0x207   : > { %1325 = vmatprep.mubr.f32.mxu1 %v1181_v20  ;;  %v5360_v17 = vpack.c.bf16 %v4273_v9, %v4271_v8  ;;  %v4275_v20 = vld [vmem:[%s6822_s8 + $0x6a8] sm:$0xff] }
 0x208   : > { %1326 = vmatmul.mubr.f32.gmra.mrb[2].mxu1 %v1179_v19  ;;  %v4272_v19 = vld [vmem:[%s6822_s8 + $0x690] sm:$0xff] }
 0x209   : > { %5351 = vmatpush1.bf16.msra.mxu1 %v5350_v18  ;;  %v1185_v63 = vpop.f32.mrb[4].mxu0  ;;  %v4270_v18 = vld [vmem:[%s6822_s8 + $0x680] sm:$0xff] }
 0x20a   : > { %5353 = vmatprep.subr.bf16.mxu1 %v5352_v21  ;;  %v1187_v3 = vpop.f32.mrb[5].mxu0  ;;  %v4277_v21 = vld [vmem:[%s6822_s8 + $0x6b8] sm:$0xff]  ;;  %v5362_v23 = vpack.c.bf16 %v4272_v19, %v4270_v18 }
 0x20b   : > { %1330 = vmatprep.mubr.f32.mxu1 %v1187_v3  ;;  %v5364_v60 = vpack.c.bf16 %v4277_v21, %v4275_v20  ;;  %v4279_v3 = vld [vmem:[%s6822_s8 + $0x6c8] sm:$0xff] }
 0x20c   : > { %1331 = vmatmul.mubr.f32.gmra.mrb[4].mxu1 %v1185_v63  ;;  %v4276_v63 = vld [vmem:[%s6822_s8 + $0x6b0] sm:$0xff] }
 0x20d   : > { %5355 = vmatpush1.bf16.msra.mxu1 %v5354_v62  ;;  %v1191_v11 = vpop.f32.mrb[6].mxu0  ;;  %v4274_v62 = vld [vmem:[%s6822_s8 + $0x6a0] sm:$0xff] }
 0x20e   : > { %5357 = vmatprep.subr.bf16.mxu1 %v5356_v4  ;;  %v1193_v14 = vpop.f32.mrb[7].mxu0  ;;  %v4281_v4 = vld [vmem:[%s6822_s8 + $0x6d8] sm:$0xff]  ;;  %v5366_v5 = vpack.c.bf16 %v4276_v63, %v4274_v62 }
 0x20f   : > { %1335 = vmatprep.mubr.f32.mxu1 %v1193_v14  ;;  %v5368_v9 = vpack.c.bf16 %v4281_v4, %v4279_v3  ;;  %v4283_v14 = vld [vmem:[%s6822_s8 + $0x6e8] sm:$0xff] }
 0x210   : > { %1336 = vmatmul.mubr.f32.gmra.mrb[6].mxu1 %v1191_v11  ;;  %v4280_v11 = vld [vmem:[%s6822_s8 + $0x6d0] sm:$0xff] }
 0x211   : > { %5359 = vmatpush1.bf16.msra.mxu1 %v5358_v10  ;;  %v1197_v58 = vpop.f32.mrb[8].mxu0  ;;  %v4278_v10 = vld [vmem:[%s6822_s8 + $0x6c0] sm:$0xff] }
 0x212   : > { %5361 = vmatprep.subr.bf16.mxu1 %v5360_v17  ;;  %v1199_v59 = vpop.f32.mrb[9].mxu0  ;;  %v4285_v17 = vld [vmem:[%s6822_s8 + $0x6f8] sm:$0xff]  ;;  %v5370_v18 = vpack.c.bf16 %v4280_v11, %v4278_v10 }
 0x213   : > { %1340 = vmatprep.mubr.f32.mxu1 %v1199_v59  ;;  %v5372_v21 = vpack.c.bf16 %v4285_v17, %v4283_v14  ;;  %v4287_v59 = vld [vmem:[%s6822_s8 + $0x708] sm:$0xff] }
 0x214   : > { %1341 = vmatmul.mubr.f32.gmra.mrb[8].mxu1 %v1197_v58  ;;  %v4284_v58 = vld [vmem:[%s6822_s8 + $0x6f0] sm:$0xff] }
 0x215   : > { %5363 = vmatpush1.bf16.msra.mxu1 %v5362_v23  ;;  %v1203_v7 = vpop.f32.mrb[10].mxu0  ;;  %v4282_v23 = vld [vmem:[%s6822_s8 + $0x6e0] sm:$0xff] }
 0x216   : > { %5365 = vmatprep.subr.bf16.mxu1 %v5364_v60  ;;  %v1205_v8 = vpop.f32.mrb[11].mxu0  ;;  %v4289_v60 = vld [vmem:[%s6822_s8 + $0x718] sm:$0xff]  ;;  %v5374_v62 = vpack.c.bf16 %v4284_v58, %v4282_v23 }
 0x217   : > { %1345 = vmatprep.mubr.f32.mxu1 %v1205_v8  ;;  %v5376_v4 = vpack.c.bf16 %v4289_v60, %v4287_v59  ;;  %v4291_v8 = vld [vmem:[%s6822_s8 + $0x728] sm:$0xff] }
 0x218   : > { %1346 = vmatmul.mubr.f32.gmra.mrb[10].mxu1 %v1203_v7  ;;  %v4288_v7 = vld [vmem:[%s6822_s8 + $0x710] sm:$0xff] }
 0x219   : > { %5367 = vmatpush1.bf16.msra.mxu1 %v5366_v5  ;;  %v1209_v19 = vpop.f32.mrb[12].mxu0  ;;  %v4286_v5 = vld [vmem:[%s6822_s8 + $0x700] sm:$0xff] }
 0x21a   : > { %5369 = vmatprep.subr.bf16.mxu1 %v5368_v9  ;;  %v1211_v20 = vpop.f32.mrb[13].mxu0  ;;  %v4293_v9 = vld [vmem:[%s6822_s8 + $0x738] sm:$0xff]  ;;  %v5378_v10 = vpack.c.bf16 %v4288_v7, %v4286_v5 }
 0x21b   : > { %1350 = vmatprep.mubr.f32.mxu1 %v1211_v20  ;;  %v5380_v17 = vpack.c.bf16 %v4293_v9, %v4291_v8  ;;  %v4295_v20 = vld [vmem:[%s6822_s8 + $0x748] sm:$0xff] }
 0x21c   : > { %1351 = vmatmul.mubr.f32.gmra.mrb[12].mxu1 %v1209_v19  ;;  %v4292_v19 = vld [vmem:[%s6822_s8 + $0x730] sm:$0xff] }
 0x21d   : > { %5371 = vmatpush1.bf16.msra.mxu1 %v5370_v18  ;;  %v1215_v63 = vpop.f32.mrb[14].mxu0  ;;  %v4290_v18 = vld [vmem:[%s6822_s8 + $0x720] sm:$0xff] }
 0x21e   : > { %5373 = vmatprep.subr.bf16.mxu1 %v5372_v21  ;;  %v1217_v3 = vpop.f32.mrb[15].mxu0  ;;  %v4297_v21 = vld [vmem:[%s6822_s8 + $0x758] sm:$0xff]  ;;  %v5382_v23 = vpack.c.bf16 %v4292_v19, %v4290_v18 }
 0x21f   : > { %1355 = vmatprep.mubr.f32.mxu1 %v1217_v3  ;;  %v5384_v60 = vpack.c.bf16 %v4297_v21, %v4295_v20  ;;  %v4299_v3 = vld [vmem:[%s6822_s8 + $0x768] sm:$0xff] }
 0x220   : > { %1356 = vmatmul.mubr.f32.gmra.mrb[14].mxu1 %v1215_v63  ;;  %v4296_v63 = vld [vmem:[%s6822_s8 + $0x750] sm:$0xff] }
 0x221   : > { %5375 = vmatpush1.bf16.msra.mxu1 %v5374_v62  ;;  %v1221_v11 = vpop.f32.mrb[16].mxu0  ;;  %v4294_v62 = vld [vmem:[%s6822_s8 + $0x740] sm:$0xff] }
 0x222   : > { %5377 = vmatprep.subr.bf16.mxu1 %v5376_v4  ;;  %v1223_v14 = vpop.f32.mrb[17].mxu0  ;;  %v4301_v4 = vld [vmem:[%s6822_s8 + $0x778] sm:$0xff]  ;;  %v5386_v5 = vpack.c.bf16 %v4296_v63, %v4294_v62 }
 0x223   : > { %1360 = vmatprep.mubr.f32.mxu1 %v1223_v14  ;;  %v5388_v9 = vpack.c.bf16 %v4301_v4, %v4299_v3  ;;  %v4303_v14 = vld [vmem:[%s6822_s8 + $0x788] sm:$0xff] }
 0x224   : > { %1361 = vmatmul.mubr.f32.gmra.mrb[16].mxu1 %v1221_v11  ;;  %v4300_v11 = vld [vmem:[%s6822_s8 + $0x770] sm:$0xff] }
 0x225   : > { %5379 = vmatpush1.bf16.msra.mxu1 %v5378_v10  ;;  %v1227_v58 = vpop.f32.mrb[18].mxu0  ;;  %v4298_v10 = vld [vmem:[%s6822_s8 + $0x760] sm:$0xff] }
 0x226   : > { %5381 = vmatprep.subr.bf16.mxu1 %v5380_v17  ;;  %v1229_v59 = vpop.f32.mrb[19].mxu0  ;;  %v4305_v17 = vld [vmem:[%s6822_s8 + $0x798] sm:$0xff]  ;;  %v5390_v18 = vpack.c.bf16 %v4300_v11, %v4298_v10 }
 0x227   : > { %1365 = vmatprep.mubr.f32.mxu1 %v1229_v59  ;;  %v5392_v21 = vpack.c.bf16 %v4305_v17, %v4303_v14  ;;  %v4307_v59 = vld [vmem:[%s6822_s8 + $0x7a8] sm:$0xff] }
 0x228   : > { %1366 = vmatmul.mubr.f32.gmra.mrb[18].mxu1 %v1227_v58  ;;  %v4304_v58 = vld [vmem:[%s6822_s8 + $0x790] sm:$0xff] }
 0x229   : > { %5383 = vmatpush1.bf16.msra.mxu1 %v5382_v23  ;;  %v1233_v7 = vpop.f32.mrb[20].mxu0  ;;  %v4302_v23 = vld [vmem:[%s6822_s8 + $0x780] sm:$0xff] }
 0x22a   : > { %5385 = vmatprep.subr.bf16.mxu1 %v5384_v60  ;;  %v1235_v8 = vpop.f32.mrb[21].mxu0  ;;  %v4309_v60 = vld [vmem:[%s6822_s8 + $0x7b8] sm:$0xff]  ;;  %v5394_v62 = vpack.c.bf16 %v4304_v58, %v4302_v23 }
 0x22b   : > { %1370 = vmatprep.mubr.f32.mxu1 %v1235_v8  ;;  %v5396_v4 = vpack.c.bf16 %v4309_v60, %v4307_v59  ;;  %v4311_v8 = vld [vmem:[%s6822_s8 + $0x7c8] sm:$0xff]  ;;  %v4314_v59 = vld [vmem:[%s6822_s8 + $0x7e0] sm:$0xff]  ;;  %v4316_v60 = vld [vmem:[%s6822_s8 + $0x7f0] sm:$0xff] }
 0x22c   : > { %1371 = vmatmul.mubr.f32.gmra.mrb[20].mxu1 %v1233_v7  ;;  %v4308_v7 = vld [vmem:[%s6822_s8 + $0x7b0] sm:$0xff] }
 0x22d   : > { %5387 = vmatpush1.bf16.msra.mxu1 %v5386_v5  ;;  %v1239_v19 = vpop.f32.mrb[22].mxu0  ;;  %v4306_v5 = vld [vmem:[%s6822_s8 + $0x7a0] sm:$0xff] }
 0x22e   : > { %5389 = vmatprep.subr.bf16.mxu1 %v5388_v9  ;;  %v1241_v20 = vpop.f32.mrb[23].mxu0  ;;  %v4313_v9 = vld [vmem:[%s6822_s8 + $0x7d8] sm:$0xff]  ;;  %v5398_v10 = vpack.c.bf16 %v4308_v7, %v4306_v5  ;;  %v4346_v5 = vld [vmem:[%s6822_s8 + $0x200] sm:$0xff]  ;;  %v4348_v7 = vld [vmem:[%s6822_s8 + $0x210] sm:$0xff] }
 0x22f   : > { %1375 = vmatprep.mubr.f32.mxu1 %v1241_v20  ;;  %v5400_v17 = vpack.c.bf16 %v4313_v9, %v4311_v8  ;;  %v4315_v20 = vld [vmem:[%s6822_s8 + $0x7e8] sm:$0xff]  ;;  %v4353_v9 = vld [vmem:[%s6822_s8 + $0x238] sm:$0xff] }
 0x230   : > { %1376 = vmatmul.mubr.f32.gmra.mrb[22].mxu1 %v1239_v19  ;;  %v4312_v19 = vld [vmem:[%s6822_s8 + $0x7d0] sm:$0xff]  ;;  %v4351_v8 = vld [vmem:[%s6822_s8 + $0x228] sm:$0xff] }
 0x231   : > { %5391 = vmatpush1.bf16.msra.mxu1 %v5390_v18  ;;  %v1245_v63 = vpop.f32.mrb[24].mxu0  ;;  %v4310_v18 = vld [vmem:[%s6822_s8 + $0x7c0] sm:$0xff] }
 0x232   : > { %5393 = vmatprep.subr.bf16.mxu1 %v5392_v21  ;;  %v1247_v3 = vpop.f32.mrb[25].mxu0  ;;  %v4317_v21 = vld [vmem:[%s6822_s8 + $0x7f8] sm:$0xff]  ;;  %v5402_v23 = vpack.c.bf16 %v4312_v19, %v4310_v18 }
 0x233   : > { %1380 = vmatprep.mubr.f32.mxu1 %v1247_v3  ;;  %v5404_v58 = vpack.c.bf16 %v4317_v21, %v4315_v20  ;;  %v5406_v3 = vpack.c.bf16 %v4316_v60, %v4314_v59  ;;  %v4357_v18 = vld [vmem:[%s6822_s8 + $0x258] sm:$0xff]  ;;  %v4354_v21 = vld [vmem:[%s6822_s8 + $0x240] sm:$0xff] }
 0x234   : > { %1381 = vmatmul.mubr.f32.gmra.mrb[24].mxu1 %v1245_v63  ;;  %v4349_v63 = vld [vmem:[%s6822_s8 + $0x218] sm:$0xff] }
 0x235   : > { %5395 = vmatpush1.bf16.msra.mxu1 %v5394_v62  ;;  %v1251_v11 = vpop.f32.mrb[26].mxu0  ;;  %v4347_v62 = vld [vmem:[%s6822_s8 + $0x208] sm:$0xff]  ;;  %v4361_v59 = vld [vmem:[%s6822_s8 + $0x278] sm:$0xff] }
 0x236   : > { %5397 = vmatprep.subr.bf16.mxu1 %v5396_v4  ;;  %v1253_v14 = vpop.f32.mrb[27].mxu0  ;;  %v5440_v4 = vpack.c.bf16 %v4349_v63, %v4347_v62  ;;  %v4358_v63 = vld [vmem:[%s6822_s8 + $0x260] sm:$0xff] }
 0x237   : > { %1385 = vmatprep.mubr.f32.mxu1 %v1253_v14  ;;  %v4352_v14 = vld [vmem:[%s6822_s8 + $0x230] sm:$0xff] }
 0x238   : > { %1386 = vmatmul.mubr.f32.gmra.mrb[26].mxu1 %v1251_v11  ;;  %v4350_v11 = vld [vmem:[%s6822_s8 + $0x220] sm:$0xff] }
 0x239   : > { %5399 = vmatpush1.bf16.msra.mxu1 %v5398_v10  ;;  %1591 = vmatprep.mubr.f32.mxu1 %v6858_v42  ;;  %v5442_v42 = vpack.c.bf16 %v4348_v7, %v4346_v5  ;;  %v5444_v10 = vpack.c.bf16 %v4353_v9, %v4351_v8  ;;  %v5446_v19 = vpack.c.bf16 %v4352_v14, %v4350_v11  ;;  %v4365_v5 = vld [vmem:[%s6822_s8 + $0x298] sm:$0xff]  ;;  %v4362_v9 = vld [vmem:[%s6822_s8 + $0x280] sm:$0xff] }
 0x23a   : > { %5401 = vmatprep.subr.bf16.mxu1 %v5400_v17  ;;  %v4355_v17 = vld [vmem:[%s6822_s8 + $0x248] sm:$0xff]  ;;  %v4369_v11 = vld [vmem:[%s6822_s8 + $0x2b8] sm:$0xff] }
 0x23b   : > { %v5448_v20 = vpack.c.bf16 %v4357_v18, %v4355_v17  ;;  %v4366_v18 = vld [vmem:[%s6822_s8 + $0x2a0] sm:$0xff] }
 0x23d   : > { %5403 = vmatpush1.bf16.msra.mxu1 %v5402_v23  ;;  %v4356_v23 = vld [vmem:[%s6822_s8 + $0x250] sm:$0xff] }
 0x23e   : > { %5405 = vmatprep.subr.bf16.mxu1 %v5404_v58  ;;  %v4359_v58 = vld [vmem:[%s6822_s8 + $0x268] sm:$0xff]  ;;  %v5450_v60 = vpack.c.bf16 %v4356_v23, %v4354_v21  ;;  %v4373_v21 = vld [vmem:[%s6822_s8 + $0x2d8] sm:$0xff] }
 0x23f   : > { %v5452_v62 = vpack.c.bf16 %v4361_v59, %v4359_v58  ;;  %v4370_v59 = vld [vmem:[%s6822_s8 + $0x2c0] sm:$0xff] }
 0x241   : > { %5407 = vmatpush1.bf16.msra.mxu1 %v5406_v3  ;;  %v4360_v3 = vld [vmem:[%s6822_s8 + $0x270] sm:$0xff] }
 0x242   : > { %5441 = vmatprep.subr.bf16.mxu1 %v5440_v4  ;;  %v4363_v4 = vld [vmem:[%s6822_s8 + $0x288] sm:$0xff]  ;;  %v5454_v7 = vpack.c.bf16 %v4360_v3, %v4358_v63  ;;  %v4377_v63 = vld [vmem:[%s6822_s8 + $0x2f8] sm:$0xff] }
 0x243   : > { %v5456_v8 = vpack.c.bf16 %v4365_v5, %v4363_v4  ;;  %v4374_v5 = vld [vmem:[%s6822_s8 + $0x2e0] sm:$0xff] }
 0x244   : > { %1592 = vmatmul.mubr.f32.vlgmr.msra.gmra.mrb[28].mxu1 %v7044_v25 }
 0x245   : > { %5443 = vmatpush1.bf16.msra.mxu1 %v5442_v42  ;;  %1597 = vmatprep.mubr.f32.mxu1 %v7049_v26  ;;  %v4364_v42 = vld [vmem:[%s6822_s8 + $0x290] sm:$0xff] }
 0x246   : > { %5445 = vmatprep.subr.bf16.mxu1 %v5444_v10  ;;  %v4367_v10 = vld [vmem:[%s6822_s8 + $0x2a8] sm:$0xff]  ;;  %v5458_v14 = vpack.c.bf16 %v4364_v42, %v4362_v9  ;;  %v4381_v9 = vld [vmem:[%s6822_s8 + $0x318] sm:$0xff] }
 0x247   : > { %v5460_v17 = vpack.c.bf16 %v4369_v11, %v4367_v10  ;;  %v4378_v11 = vld [vmem:[%s6822_s8 + $0x300] sm:$0xff] }
 0x248   : > { %1598 = vmatmul.mubr.f32.gmra.mrb[30].mxu1 %v7057_v28 }
 0x249   : > { %5447 = vmatpush1.bf16.msra.mxu1 %v5446_v19  ;;  %1603 = vmatprep.mubr.f32.mxu1 %v7063_v29  ;;  %v4368_v19 = vld [vmem:[%s6822_s8 + $0x2b0] sm:$0xff] }
 0x24a   : > { %5449 = vmatprep.subr.bf16.mxu1 %v5448_v20  ;;  %v4371_v20 = vld [vmem:[%s6822_s8 + $0x2c8] sm:$0xff]  ;;  %v5462_v23 = vpack.c.bf16 %v4368_v19, %v4366_v18  ;;  %v4385_v18 = vld [vmem:[%s6822_s8 + $0x338] sm:$0xff] }
 0x24b   : > { %v5464_v58 = vpack.c.bf16 %v4373_v21, %v4371_v20  ;;  %v4382_v21 = vld [vmem:[%s6822_s8 + $0x320] sm:$0xff] }
 0x24c   : > { %1604 = vmatmul.mubr.f32.gmra.mrb[32].mxu1 %v7071_v30 }
 0x24d   : > { %5451 = vmatpush1.bf16.msra.mxu1 %v5450_v60  ;;  %1609 = vmatprep.mubr.f32.mxu1 %v7077_v31  ;;  %v4372_v60 = vld [vmem:[%s6822_s8 + $0x2d0] sm:$0xff] }
 0x24e   : > { %5453 = vmatprep.subr.bf16.mxu1 %v5452_v62  ;;  %v4375_v62 = vld [vmem:[%s6822_s8 + $0x2e8] sm:$0xff]  ;;  %v5466_v3 = vpack.c.bf16 %v4372_v60, %v4370_v59  ;;  %v4389_v59 = vld [vmem:[%s6822_s8 + $0x358] sm:$0xff] }
 0x24f   : > { %v5468_v4 = vpack.c.bf16 %v4377_v63, %v4375_v62  ;;  %v4386_v63 = vld [vmem:[%s6822_s8 + $0x340] sm:$0xff] }
 0x250   : > { %1610 = vmatmul.mubr.f32.gmra.mrb[34].mxu1 %v7085_v32 }
 0x251   : > { %5455 = vmatpush1.bf16.msra.mxu1 %v5454_v7  ;;  %1615 = vmatprep.mubr.f32.mxu1 %v7091_v33  ;;  %v4376_v7 = vld [vmem:[%s6822_s8 + $0x2f0] sm:$0xff] }
 0x252   : > { %5457 = vmatprep.subr.bf16.mxu1 %v5456_v8  ;;  %v4379_v8 = vld [vmem:[%s6822_s8 + $0x308] sm:$0xff]  ;;  %v5470_v42 = vpack.c.bf16 %v4376_v7, %v4374_v5  ;;  %v4393_v5 = vld [vmem:[%s6822_s8 + $0x378] sm:$0xff] }
 0x253   : > { %v5472_v10 = vpack.c.bf16 %v4381_v9, %v4379_v8  ;;  %v4390_v9 = vld [vmem:[%s6822_s8 + $0x360] sm:$0xff] }
 0x254   : > { %1616 = vmatmul.mubr.f32.gmra.mrb[36].mxu1 %v7099_v34 }
 0x255   : > { %5459 = vmatpush1.bf16.msra.mxu1 %v5458_v14  ;;  %1621 = vmatprep.mubr.f32.mxu1 %v7105_v35  ;;  %v4380_v14 = vld [vmem:[%s6822_s8 + $0x310] sm:$0xff] }
 0x256   : > { %5461 = vmatprep.subr.bf16.mxu1 %v5460_v17  ;;  %v4383_v17 = vld [vmem:[%s6822_s8 + $0x328] sm:$0xff]  ;;  %v5474_v19 = vpack.c.bf16 %v4380_v14, %v4378_v11  ;;  %v4397_v11 = vld [vmem:[%s6822_s8 + $0x398] sm:$0xff] }
 0x257   : > { %v5476_v20 = vpack.c.bf16 %v4385_v18, %v4383_v17  ;;  %v4394_v18 = vld [vmem:[%s6822_s8 + $0x380] sm:$0xff] }
 0x258   : > { %1622 = vmatmul.mubr.f32.gmra.mrb[38].mxu1 %v7113_v37 }
 0x259   : > { %5463 = vmatpush1.bf16.msra.mxu1 %v5462_v23  ;;  %1627 = vmatprep.mubr.f32.mxu1 %v7119_v38  ;;  %v4384_v23 = vld [vmem:[%s6822_s8 + $0x330] sm:$0xff] }
 0x25a   : > { %5465 = vmatprep.subr.bf16.mxu1 %v5464_v58  ;;  %v4387_v58 = vld [vmem:[%s6822_s8 + $0x348] sm:$0xff]  ;;  %v5478_v60 = vpack.c.bf16 %v4384_v23, %v4382_v21  ;;  %v4401_v21 = vld [vmem:[%s6822_s8 + $0x3b8] sm:$0xff] }
 0x25b   : > { %v5480_v62 = vpack.c.bf16 %v4389_v59, %v4387_v58  ;;  %v4398_v59 = vld [vmem:[%s6822_s8 + $0x3a0] sm:$0xff] }
 0x25c   : > { %1628 = vmatmul.mubr.f32.gmra.mrb[40].mxu1 %v7127_v40 }
 0x25d   : > { %5467 = vmatpush1.bf16.msra.mxu1 %v5466_v3  ;;  %1633 = vmatprep.mubr.f32.mxu1 %v7133_v41  ;;  %v4388_v3 = vld [vmem:[%s6822_s8 + $0x350] sm:$0xff] }
 0x25e   : > { %5469 = vmatprep.subr.bf16.mxu1 %v5468_v4  ;;  %v4391_v4 = vld [vmem:[%s6822_s8 + $0x368] sm:$0xff]  ;;  %v5482_v7 = vpack.c.bf16 %v4388_v3, %v4386_v63  ;;  %v4405_v63 = vld [vmem:[%s6822_s8 + $0x3d8] sm:$0xff] }
 0x25f   : > { %v5484_v8 = vpack.c.bf16 %v4393_v5, %v4391_v4  ;;  %v4402_v5 = vld [vmem:[%s6822_s8 + $0x3c0] sm:$0xff] }
 0x260   : > { %1634 = vmatmul.mubr.f32.gmra.mrb[42].mxu1 %v7141_v43 }
 0x261   : > { %5471 = vmatpush1.bf16.msra.mxu1 %v5470_v42  ;;  %1639 = vmatprep.mubr.f32.mxu1 %v7147_v44  ;;  %v4392_v42 = vld [vmem:[%s6822_s8 + $0x370] sm:$0xff] }
 0x262   : > { %5473 = vmatprep.subr.bf16.mxu1 %v5472_v10  ;;  %v4395_v10 = vld [vmem:[%s6822_s8 + $0x388] sm:$0xff]  ;;  %v5486_v14 = vpack.c.bf16 %v4392_v42, %v4390_v9  ;;  %v4409_v9 = vld [vmem:[%s6822_s8 + $0x3f8] sm:$0xff] }
 0x263   : > { %v5488_v17 = vpack.c.bf16 %v4397_v11, %v4395_v10  ;;  %v7377_v10 = vld [vmem:[%s8485_s1 + $0x8] sm:$0xff] }
 0x264   : > { %1640 = vmatmul.mubr.f32.gmra.mrb[44].mxu1 %v7155_v45 }
 0x265   : > { %5475 = vmatpush1.bf16.msra.mxu1 %v5474_v19  ;;  %1645 = vmatprep.mubr.f32.mxu1 %v7161_v46  ;;  %v4396_v19 = vld [vmem:[%s6822_s8 + $0x390] sm:$0xff] }
 0x266   : > { %5477 = vmatprep.subr.bf16.mxu1 %v5476_v20  ;;  %v4399_v20 = vld [vmem:[%s6822_s8 + $0x3a8] sm:$0xff]  ;;  %v5490_v23 = vpack.c.bf16 %v4396_v19, %v4394_v18  ;;  %v4441_v19 = vld [vmem:[%s6822_s8 + $0x818] sm:$0xff] }
 0x267   : > { %v5492_v58 = vpack.c.bf16 %v4401_v21, %v4399_v20  ;;  %v4439_v18 = vld [vmem:[%s6822_s8 + $0x808] sm:$0xff] }
 0x268   : > { %1646 = vmatmul.mubr.f32.gmra.mrb[46].mxu1 %v7169_v47  ;;  %v5536_v21 = vpack.c.bf16 %v4441_v19, %v4439_v18  ;;  %v4452_v19 = vld [vmem:[%s6822_s8 + $0x870] sm:$0xff] }
 0x269   : > { %5479 = vmatpush1.bf16.msra.mxu1 %v5478_v60  ;;  %1651 = vmatprep.mubr.f32.mxu1 %v7174_v48  ;;  %v4400_v60 = vld [vmem:[%s6822_s8 + $0x3b0] sm:$0xff] }
 0x26a   : > { %5481 = vmatprep.subr.bf16.mxu1 %v5480_v62  ;;  %v4403_v62 = vld [vmem:[%s6822_s8 + $0x3c8] sm:$0xff]  ;;  %v5494_v3 = vpack.c.bf16 %v4400_v60, %v4398_v59  ;;  %v4445_v60 = vld [vmem:[%s6822_s8 + $0x838] sm:$0xff] }
 0x26b   : > { %v5496_v4 = vpack.c.bf16 %v4405_v63, %v4403_v62  ;;  %v4443_v59 = vld [vmem:[%s6822_s8 + $0x828] sm:$0xff] }
 0x26c   : > { %1652 = vmatmul.mubr.f32.gmra.mrb[48].mxu1 %v7181_v50  ;;  %v5540_v63 = vpack.c.bf16 %v4445_v60, %v4443_v59  ;;  %v4459_v59 = vld [vmem:[%s6822_s8 + $0x8a8] sm:$0xff]  ;;  %v4461_v60 = vld [vmem:[%s6822_s8 + $0x8b8] sm:$0xff] }
 0x26d   : > { %5483 = vmatpush1.bf16.msra.mxu1 %v5482_v7  ;;  %1657 = vmatprep.mubr.f32.mxu1 %v7186_v51  ;;  %v4404_v7 = vld [vmem:[%s6822_s8 + $0x3d0] sm:$0xff] }
 0x26e   : > { %5485 = vmatprep.subr.bf16.mxu1 %v5484_v8  ;;  %v4407_v8 = vld [vmem:[%s6822_s8 + $0x3e8] sm:$0xff]  ;;  %v5498_v42 = vpack.c.bf16 %v4404_v7, %v4402_v5  ;;  %v4449_v7 = vld [vmem:[%s6822_s8 + $0x858] sm:$0xff] }
 0x26f   : > { %v5500_v11 = vpack.c.bf16 %v4409_v9, %v4407_v8  ;;  %v4447_v5 = vld [vmem:[%s6822_s8 + $0x848] sm:$0xff] }
 0x270   : > { %1658 = vmatmul.mubr.f32.gmra.mrb[50].mxu1 %v7193_v53  ;;  %v5544_v9 = vpack.c.bf16 %v4449_v7, %v4447_v5  ;;  %v4464_v7 = vld [vmem:[%s6822_s8 + $0x8d0] sm:$0xff] }
 0x271   : > { %5487 = vmatpush1.bf16.msra.mxu1 %v5486_v14  ;;  %1663 = vmatprep.mubr.f32.mxu1 %v7198_v54  ;;  %v4406_v14 = vld [vmem:[%s6822_s8 + $0x3e0] sm:$0xff] }
 0x272   : > { %5489 = vmatprep.subr.bf16.mxu1 %v5488_v17  ;;  %v4408_v17 = vld [vmem:[%s6822_s8 + $0x3f0] sm:$0xff] }
 0x273   : > { %v5502_v20 = vpack.c.bf16 %v4408_v17, %v4406_v14  ;;  %v4451_v14 = vld [vmem:[%s6822_s8 + $0x868] sm:$0xff]  ;;  %v4453_v17 = vld [vmem:[%s6822_s8 + $0x878] sm:$0xff] }
 0x274   : > { %1664 = vmatmul.mubr.f32.gmra.mrb[52].mxu1 %v7205_v55  ;;  %v5548_v18 = vpack.c.bf16 %v4453_v17, %v4451_v14  ;;  %v4471_v14 = vld [vmem:[%s6822_s8 + $0x908] sm:$0xff]  ;;  %v4473_v17 = vld [vmem:[%s6822_s8 + $0x918] sm:$0xff] }
 0x275   : > { %5491 = vmatpush1.bf16.msra.mxu1 %v5490_v23  ;;  %1669 = vmatprep.mubr.f32.mxu1 %v7210_v56  ;;  %v4438_v23 = vld [vmem:[%s6822_s8 + $0x800] sm:$0xff] }
 0x276   : > { %5493 = vmatprep.subr.bf16.mxu1 %v5492_v58  ;;  %v4440_v58 = vld [vmem:[%s6822_s8 + $0x810] sm:$0xff] }
 0x277   : > { %v5538_v62 = vpack.c.bf16 %v4440_v58, %v4438_v23  ;;  %v4456_v58 = vld [vmem:[%s6822_s8 + $0x890] sm:$0xff] }
 0x278   : > { %1670 = vmatmul.mubr.f32.gmra.mrb[54].mxu1 %v7217_v57 }
 0x279   : > { %5495 = vmatpush1.bf16.msra.mxu1 %v5494_v3  ;;  %2078 = vmatprep.mubr.f32.mxu1 %v7377_v10  ;;  %v4442_v3 = vld [vmem:[%s6822_s8 + $0x820] sm:$0xff] }
 0x27a   : > { %5497 = vmatprep.subr.bf16.mxu1 %v5496_v4  ;;  %v4444_v4 = vld [vmem:[%s6822_s8 + $0x830] sm:$0xff] }
 0x27b   : > { %v5542_v8 = vpack.c.bf16 %v4444_v4, %v4442_v3  ;;  %v4463_v3 = vld [vmem:[%s6822_s8 + $0x8c8] sm:$0xff]  ;;  %v4465_v4 = vld [vmem:[%s6822_s8 + $0x8d8] sm:$0xff] }
 0x27c   : > { %v5560_v5 = vpack.c.bf16 %v4465_v4, %v4463_v3  ;;  %v4488_v4 = vld [vmem:[%s6822_s8 + $0x990] sm:$0xff] }
 0x27d   : > { %5499 = vmatpush1.bf16.msra.mxu1 %v5498_v42  ;;  %v4446_v42 = vld [vmem:[%s6822_s8 + $0x840] sm:$0xff] }
 0x27e   : > { %5501 = vmatprep.subr.bf16.mxu1 %v5500_v11  ;;  %v4448_v11 = vld [vmem:[%s6822_s8 + $0x850] sm:$0xff] }
 0x281   : > { %5503 = vmatpush1.bf16.msra.mxu1 %v5502_v20  ;;  %v4455_v20 = vld [vmem:[%s6822_s8 + $0x888] sm:$0xff] }
 0x282   : > { %5537 = vmatprep.subr.bf16.mxu1 %v5536_v21  ;;  %v4457_v21 = vld [vmem:[%s6822_s8 + $0x898] sm:$0xff] }
 0x283   : > { %v5552_v23 = vpack.c.bf16 %v4457_v21, %v4455_v20  ;;  %v4476_v21 = vld [vmem:[%s6822_s8 + $0x930] sm:$0xff] }
 0x284   : > { %2079 = vmatmul.mubr.f32.vlgmr.msra.gmra.mrb[56].mxu1 %v7044_v25  ;;  %v5546_v25 = vpack.c.bf16 %v4448_v11, %v4446_v42  ;;  %v4468_v11 = vld [vmem:[%s6822_s8 + $0x8f0] sm:$0xff] }
 0x285   : > { %5539 = vmatpush1.bf16.msra.mxu1 %v5538_v62  ;;  %2084 = vmatprep.mubr.f32.mxu1 %v7049_v26  ;;  %v4450_v26 = vld [vmem:[%s6822_s8 + $0x860] sm:$0xff]  ;;  %v5556_v62 = vpack.c.bf16 %v4461_v60, %v4459_v59  ;;  %v4483_v59 = vld [vmem:[%s6822_s8 + $0x968] sm:$0xff]  ;;  %v4485_v60 = vld [vmem:[%s6822_s8 + $0x978] sm:$0xff] }
 0x286   : > { %5541 = vmatprep.subr.bf16.mxu1 %v5540_v63  ;;  %v4460_v63 = vld [vmem:[%s6822_s8 + $0x8b0] sm:$0xff] }
 0x288   : > { %2085 = vmatmul.mubr.f32.gmra.mrb[58].mxu1 %v7057_v28  ;;  %v5550_v28 = vpack.c.bf16 %v4452_v19, %v4450_v26  ;;  %v4475_v26 = vld [vmem:[%s6822_s8 + $0x928] sm:$0xff]  ;;  %v4477_v19 = vld [vmem:[%s6822_s8 + $0x938] sm:$0xff] }
 0x289   : > { %5543 = vmatpush1.bf16.msra.mxu1 %v5542_v8  ;;  %2090 = vmatprep.mubr.f32.mxu1 %v7063_v29  ;;  %v4454_v29 = vld [vmem:[%s6822_s8 + $0x880] sm:$0xff]  ;;  %v4467_v8 = vld [vmem:[%s6822_s8 + $0x8e8] sm:$0xff]  ;;  %v5572_v20 = vpack.c.bf16 %v4477_v19, %v4475_v26  ;;  %v4532_v26 = vld [vmem:[%s6822_s8 + $0x410] sm:$0xff] }
 0x28a   : > { %5545 = vmatprep.subr.bf16.mxu1 %v5544_v9  ;;  %v4469_v9 = vld [vmem:[%s6822_s8 + $0x8f8] sm:$0xff]  ;;  %v4535_v19 = vld [vmem:[%s6822_s8 + $0x428] sm:$0xff] }
 0x28b   : > { %v5564_v42 = vpack.c.bf16 %v4469_v9, %v4467_v8  ;;  %v4495_v8 = vld [vmem:[%s6822_s8 + $0x9c8] sm:$0xff]  ;;  %v4497_v9 = vld [vmem:[%s6822_s8 + $0x9d8] sm:$0xff] }
 0x28c   : > { %2091 = vmatmul.mubr.f32.gmra.mrb[60].mxu1 %v7071_v30  ;;  %v5554_v30 = vpack.c.bf16 %v4456_v58, %v4454_v29  ;;  %v4480_v58 = vld [vmem:[%s6822_s8 + $0x950] sm:$0xff] }
 0x28d   : > { %5547 = vmatpush1.bf16.msra.mxu1 %v5546_v25  ;;  %2096 = vmatprep.mubr.f32.mxu1 %v7077_v31  ;;  %v4458_v31 = vld [vmem:[%s6822_s8 + $0x8a0] sm:$0xff]  ;;  %v5568_v25 = vpack.c.bf16 %v4473_v17, %v4471_v14  ;;  %v4500_v17 = vld [vmem:[%s6822_s8 + $0x9f0] sm:$0xff] }
 0x28e   : > { %5549 = vmatprep.subr.bf16.mxu1 %v5548_v18  ;;  %v4472_v18 = vld [vmem:[%s6822_s8 + $0x910] sm:$0xff] }
 0x290   : > { %2097 = vmatmul.mubr.f32.gmra.mrb[62].mxu1 %v7085_v32  ;;  %v5558_v32 = vpack.c.bf16 %v4460_v63, %v4458_v31  ;;  %v4487_v31 = vld [vmem:[%s6822_s8 + $0x988] sm:$0xff]  ;;  %v4489_v63 = vld [vmem:[%s6822_s8 + $0x998] sm:$0xff] }
 0x291   : > { %5551 = vmatpush1.bf16.msra.mxu1 %v5550_v28  ;;  %2102 = vmatprep.mubr.f32.mxu1 %v7091_v33  ;;  %v4462_v33 = vld [vmem:[%s6822_s8 + $0x8c0] sm:$0xff]  ;;  %v4479_v28 = vld [vmem:[%s6822_s8 + $0x948] sm:$0xff]  ;;  %v5584_v3 = vpack.c.bf16 %v4489_v63, %v4487_v31 }
 0x292   : > { %5553 = vmatprep.subr.bf16.mxu1 %v5552_v23  ;;  %v4481_v23 = vld [vmem:[%s6822_s8 + $0x958] sm:$0xff]  ;;  %v7509_v31 = vld [vmem:[%s8485_s1 + $0x28] sm:$0xff] }
 0x293   : > { %v5576_v29 = vpack.c.bf16 %v4481_v23, %v4479_v28  ;;  %v4536_v28 = vld [vmem:[%s6822_s8 + $0x430] sm:$0xff]  ;;  %v4539_v23 = vld [vmem:[%s6822_s8 + $0x448] sm:$0xff] }
 0x294   : > { %2103 = vmatmul.mubr.f32.gmra.mrb[64].mxu1 %v7099_v34  ;;  %v5562_v34 = vpack.c.bf16 %v4464_v7, %v4462_v33  ;;  %v4492_v7 = vld [vmem:[%s6822_s8 + $0x9b0] sm:$0xff] }
 0x295   : > { %5555 = vmatpush1.bf16.msra.mxu1 %v5554_v30  ;;  %2108 = vmatprep.mubr.f32.mxu1 %v7105_v35  ;;  %v4466_v35 = vld [vmem:[%s6822_s8 + $0x8e0] sm:$0xff]  ;;  %v5580_v30 = vpack.c.bf16 %v4485_v60, %v4483_v59 }
 0x296   : > { %5557 = vmatprep.subr.bf16.mxu1 %v5556_v62  ;;  %v4484_v62 = vld [vmem:[%s6822_s8 + $0x970] sm:$0xff]  ;;  %v4538_v60 = vld [vmem:[%s6822_s8 + $0x440] sm:$0xff] }
 0x298   : > { %2109 = vmatmul.mubr.f32.gmra.mrb[66].mxu1 %v7113_v37  ;;  %v5566_v37 = vpack.c.bf16 %v4468_v11, %v4466_v35  ;;  %v4499_v35 = vld [vmem:[%s6822_s8 + $0x9e8] sm:$0xff]  ;;  %v4501_v11 = vld [vmem:[%s6822_s8 + $0x9f8] sm:$0xff] }
 0x299   : > { %5559 = vmatpush1.bf16.msra.mxu1 %v5558_v32  ;;  %2114 = vmatprep.mubr.f32.mxu1 %v7119_v38  ;;  %v4470_v38 = vld [vmem:[%s6822_s8 + $0x900] sm:$0xff]  ;;  %v4491_v32 = vld [vmem:[%s6822_s8 + $0x9a8] sm:$0xff]  ;;  %v5596_v14 = vpack.c.bf16 %v4501_v11, %v4499_v35 }
 0x29a   : > { %5561 = vmatprep.subr.bf16.mxu1 %v5560_v5  ;;  %v4493_v5 = vld [vmem:[%s6822_s8 + $0x9b8] sm:$0xff]  ;;  %v4550_v11 = vld [vmem:[%s6822_s8 + $0x4a0] sm:$0xff] }
 0x29b   : > { %v5588_v33 = vpack.c.bf16 %v4493_v5, %v4491_v32  ;;  %v4549_v32 = vld [vmem:[%s6822_s8 + $0x498] sm:$0xff] }
 0x29c   : > { %2115 = vmatmul.mubr.f32.gmra.mrb[68].mxu1 %v7127_v40  ;;  %v5570_v40 = vpack.c.bf16 %v4472_v18, %v4470_v38  ;;  %v4530_v18 = vld [vmem:[%s6822_s8 + $0x400] sm:$0xff] }
 0x29d   : > { %5563 = vmatpush1.bf16.msra.mxu1 %v5562_v34  ;;  %2120 = vmatprep.mubr.f32.mxu1 %v7133_v41  ;;  %v4474_v41 = vld [vmem:[%s6822_s8 + $0x920] sm:$0xff]  ;;  %v5592_v34 = vpack.c.bf16 %v4497_v9, %v4495_v8  ;;  %v4548_v8 = vld [vmem:[%s6822_s8 + $0x490] sm:$0xff]  ;;  %v4551_v9 = vld [vmem:[%s6822_s8 + $0x4a8] sm:$0xff] }
 0x29e   : > { %5565 = vmatprep.subr.bf16.mxu1 %v5564_v42  ;;  %v4496_v42 = vld [vmem:[%s6822_s8 + $0x9d0] sm:$0xff]  ;;  %v7519_v5 = vld [vmem:[%s8485_s1 + $0x20] sm:$0xff] }
 0x2a0   : > { %2121 = vmatmul.mubr.f32.gmra.mrb[70].mxu1 %v7141_v43  ;;  %v5574_v43 = vpack.c.bf16 %v4476_v21, %v4474_v41  ;;  %v4534_v21 = vld [vmem:[%s6822_s8 + $0x420] sm:$0xff] }
 0x2a1   : > { %5567 = vmatpush1.bf16.msra.mxu1 %v5566_v37  ;;  %2126 = vmatprep.mubr.f32.mxu1 %v7147_v44  ;;  %v4478_v44 = vld [vmem:[%s6822_s8 + $0x940] sm:$0xff]  ;;  %v4531_v37 = vld [vmem:[%s6822_s8 + $0x408] sm:$0xff] }
 0x2a2   : > { %5569 = vmatprep.subr.bf16.mxu1 %v5568_v25  ;;  %v4533_v25 = vld [vmem:[%s6822_s8 + $0x418] sm:$0xff] }
 0x2a4   : > { %2127 = vmatmul.mubr.f32.gmra.mrb[72].mxu1 %v7155_v45  ;;  %v5578_v45 = vpack.c.bf16 %v4480_v58, %v4478_v44  ;;  %v7493_v44 = vld [vmem:[%s8485_s1 + $0x18] sm:$0xff]  ;;  %v5638_v58 = vpack.c.bf16 %v4536_v28, %v4534_v21  ;;  %v7575_v28 = vld [vmem:[%s8485_s1 + $0x68] sm:$0xff] }
 0x2a5   : > { %5571 = vmatpush1.bf16.msra.mxu1 %v5570_v40  ;;  %2132 = vmatprep.mubr.f32.mxu1 %v7161_v46  ;;  %v4482_v46 = vld [vmem:[%s6822_s8 + $0x960] sm:$0xff]  ;;  %v4537_v40 = vld [vmem:[%s6822_s8 + $0x438] sm:$0xff] }
 0x2a6   : > { %5573 = vmatprep.subr.bf16.mxu1 %v5572_v20  ;;  %v5634_v20 = vpack.c.bf16 %v4532_v26, %v4530_v18  ;;  %v5636_v41 = vpack.c.bf16 %v4537_v40, %v4535_v19  ;;  %v4556_v18 = vld [vmem:[%s6822_s8 + $0x4d0] sm:$0xff]  ;;  %v4559_v19 = vld [vmem:[%s6822_s8 + $0x4e8] sm:$0xff]  ;;  %v4561_v40 = vld [vmem:[%s6822_s8 + $0x4f8] sm:$0xff] }
 0x2a8   : > { %2133 = vmatmul.mubr.f32.gmra.mrb[74].mxu1 %v7169_v47  ;;  %v5582_v47 = vpack.c.bf16 %v4484_v62, %v4482_v46  ;;  %v4545_v46 = vld [vmem:[%s6822_s8 + $0x478] sm:$0xff]  ;;  %v7503_v62 = vld [vmem:[%s8485_s1 + $0x10] sm:$0xff] }
 0x2a9   : > { %5575 = vmatpush1.bf16.msra.mxu1 %v5574_v43  ;;  %2138 = vmatprep.mubr.f32.mxu1 %v7174_v48  ;;  %v4486_v48 = vld [vmem:[%s6822_s8 + $0x980] sm:$0xff]  ;;  %v4541_v43 = vld [vmem:[%s6822_s8 + $0x458] sm:$0xff] }
 0x2aa   : > { %5577 = vmatprep.subr.bf16.mxu1 %v5576_v29  ;;  %v7487_v29 = vld [vmem:[%s8485_s1] sm:$0xff]  ;;  %v5640_v59 = vpack.c.bf16 %v4541_v43, %v4539_v23  ;;  %v5660_v43 = vpack.c.bf16 %v4561_v40, %v4559_v19 }
 0x2ab   : > { %v4573_v19 = vld [vmem:[%s6822_s8 + $0x558] sm:$0xff] }
 0x2ac   : > { %2139 = vmatmul.mubr.f32.gmra.mrb[76].mxu1 %v7181_v50  ;;  %v5586_v50 = vpack.c.bf16 %v4488_v4, %v4486_v48  ;;  %v4544_v48 = vld [vmem:[%s6822_s8 + $0x470] sm:$0xff]  ;;  %v4547_v4 = vld [vmem:[%s6822_s8 + $0x488] sm:$0xff]  ;;  %v7631_v40 = vld [vmem:[%s8485_s1 + $0x80] sm:$0xff] }
 0x2ad   : > { %5579 = vmatpush1.bf16.msra.mxu1 %v5578_v45  ;;  %2144 = vmatprep.mubr.f32.mxu1 %v7186_v51  ;;  %v4490_v51 = vld [vmem:[%s6822_s8 + $0x9a0] sm:$0xff]  ;;  %v4540_v45 = vld [vmem:[%s6822_s8 + $0x450] sm:$0xff] }
 0x2ae   : > { %5581 = vmatprep.subr.bf16.mxu1 %v5580_v30  ;;  %v4543_v30 = vld [vmem:[%s6822_s8 + $0x468] sm:$0xff]  ;;  %v5642_v63 = vpack.c.bf16 %v4540_v45, %v4538_v60 }
 0x2b0   : > { %2145 = vmatmul.mubr.f32.gmra.mrb[78].mxu1 %v7193_v53  ;;  %v5590_v53 = vpack.c.bf16 %v4492_v7, %v4490_v51  ;;  %v5648_v51 = vpack.c.bf16 %v4549_v32, %v4547_v4  ;;  %v4546_v7 = vld [vmem:[%s6822_s8 + $0x480] sm:$0xff] }
 0x2b1   : > { %5583 = vmatpush1.bf16.msra.mxu1 %v5582_v47  ;;  %2150 = vmatprep.mubr.f32.mxu1 %v7198_v54  ;;  %v4494_v54 = vld [vmem:[%s6822_s8 + $0x9c0] sm:$0xff]  ;;  %v5644_v47 = vpack.c.bf16 %v4545_v46, %v4543_v30  ;;  %v4563_v30 = vld [vmem:[%s6822_s8 + $0x508] sm:$0xff]  ;;  %v4565_v46 = vld [vmem:[%s6822_s8 + $0x518] sm:$0xff] }
 0x2b2   : > { %5585 = vmatprep.subr.bf16.mxu1 %v5584_v3  ;;  %v4542_v3 = vld [vmem:[%s6822_s8 + $0x460] sm:$0xff]  ;;  %v5664_v32 = vpack.c.bf16 %v4565_v46, %v4563_v30 }
 0x2b4   : > { %2151 = vmatmul.mubr.f32.gmra.mrb[80].mxu1 %v7205_v55  ;;  %v5594_v55 = vpack.c.bf16 %v4496_v42, %v4494_v54  ;;  %v7541_v54 = vld [vmem:[%s8485_s1 + $0x48] sm:$0xff]  ;;  %v5650_v42 = vpack.c.bf16 %v4548_v8, %v4546_v7 }
 0x2b5   : > { %5587 = vmatpush1.bf16.msra.mxu1 %v5586_v50  ;;  %2156 = vmatprep.mubr.f32.mxu1 %v7210_v56  ;;  %v4498_v56 = vld [vmem:[%s6822_s8 + $0x9e0] sm:$0xff]  ;;  %v7525_v50 = vld [vmem:[%s8485_s1 + $0x38] sm:$0xff] }
 0x2b6   : > { %5589 = vmatprep.subr.bf16.mxu1 %v5588_v33  ;;  %v5598_v38 = vpack.c.bf16 %v4500_v17, %v4498_v56  ;;  %v5646_v33 = vpack.c.bf16 %v4544_v48, %v4542_v3  ;;  %v4557_v56 = vld [vmem:[%s6822_s8 + $0x4d8] sm:$0xff] }
 0x2b7   : > { %v7551_v17 = vld [vmem:[%s8485_s1 + $0x40] sm:$0xff]  ;;  %v7595_v3 = vld [vmem:[%s8485_s1 + $0x78] sm:$0xff] }
 0x2b8   : > { %2157 = vmatmul.mubr.f32.gmra.mrb[82].mxu1 %v7217_v57  ;;  %v5632_v57 = vpack.c.bf16 %v4533_v25, %v4531_v37  ;;  %v7557_v37 = vld [vmem:[%s8485_s1 + $0x58] sm:$0xff] }
 0x2b9   : > { %5591 = vmatpush1.bf16.msra.mxu1 %v5590_v53  ;;  %2498 = vmatprep.mubr.f32.mxu1 %v7377_v10  ;;  %v4553_v53 = vld [vmem:[%s6822_s8 + $0x4b8] sm:$0xff] }
 0x2ba   : > { %5593 = vmatprep.subr.bf16.mxu1 %v5592_v34  ;;  %v7535_v34 = vld [vmem:[%s8485_s1 + $0x30] sm:$0xff]  ;;  %v5652_v35 = vpack.c.bf16 %v4553_v53, %v4551_v9  ;;  %v4569_v53 = vld [vmem:[%s6822_s8 + $0x538] sm:$0xff] }
 0x2bb   : > { %v4567_v9 = vld [vmem:[%s6822_s8 + $0x528] sm:$0xff] }
 0x2bd   : > { %5595 = vmatpush1.bf16.msra.mxu1 %v5594_v55  ;;  %v4552_v55 = vld [vmem:[%s6822_s8 + $0x4b0] sm:$0xff] }
 0x2be   : > { %5597 = vmatprep.subr.bf16.mxu1 %v5596_v14  ;;  %v4555_v14 = vld [vmem:[%s6822_s8 + $0x4c8] sm:$0xff]  ;;  %v5654_v25 = vpack.c.bf16 %v4552_v55, %v4550_v11 }
 0x2bf   : > { %v7617_v11 = vld [vmem:[%s8485_s1 + $0x88] sm:$0xff] }
 0x2c1   : > { %5599 = vmatpush1.bf16.msra.mxu1 %v5598_v38  ;;  %v5656_v38 = vpack.c.bf16 %v4557_v56, %v4555_v14  ;;  %v5668_v56 = vpack.c.bf16 %v4569_v53, %v4567_v9  ;;  %v4574_v53 = vld [vmem:[%s6822_s8 + $0x560] sm:$0xff] }
 0x2c2   : > { %5633 = vmatprep.subr.bf16.mxu1 %v5632_v57  ;;  %v4554_v57 = vld [vmem:[%s6822_s8 + $0x4c0] sm:$0xff] }
 0x2c3   : > { %v5658_v23 = vpack.c.bf16 %v4556_v18, %v4554_v57 }
 0x2c4   : > { %2499 = vmatmul.mubr.f32.vlgmr.msra.gmra.mrb[84].mxu1 %v7487_v29 }
 0x2c5   : > { %5635 = vmatpush1.bf16.msra.mxu1 %v5634_v20  ;;  %2504 = vmatprep.mubr.f32.mxu1 %v7493_v44  ;;  %v7567_v20 = vld [vmem:[%s8485_s1 + $0x50] sm:$0xff] }
 0x2c6   : > { %5637 = vmatprep.subr.bf16.mxu1 %v5636_v41 }
 0x2c8   : > { %2505 = vmatmul.mubr.f32.gmra.mrb[86].mxu1 %v7503_v62 }
 0x2c9   : > { %5639 = vmatpush1.bf16.msra.mxu1 %v5638_v58  ;;  %2510 = vmatprep.mubr.f32.mxu1 %v7509_v31  ;;  %v4558_v58 = vld [vmem:[%s6822_s8 + $0x4e0] sm:$0xff] }
 0x2ca   : > { %5641 = vmatprep.subr.bf16.mxu1 %v5640_v59  ;;  %v4560_v59 = vld [vmem:[%s6822_s8 + $0x4f0] sm:$0xff] }
 0x2cb   : > { %v5662_v48 = vpack.c.bf16 %v4560_v59, %v4558_v58 }
 0x2cc   : > { %2511 = vmatmul.mubr.f32.gmra.mrb[88].mxu1 %v7519_v5 }
 0x2cd   : > { %5643 = vmatpush1.bf16.msra.mxu1 %v5642_v63  ;;  %2516 = vmatprep.mubr.f32.mxu1 %v7525_v50  ;;  %v7587_v63 = vld [vmem:[%s8485_s1 + $0x60] sm:$0xff] }
 0x2ce   : > { %5645 = vmatprep.subr.bf16.mxu1 %v5644_v47 }
 0x2d0   : > { %2517 = vmatmul.mubr.f32.gmra.mrb[90].mxu1 %v7535_v34 }
 0x2d1   : > { %5647 = vmatpush1.bf16.msra.mxu1 %v5646_v33  ;;  %2522 = vmatprep.mubr.f32.mxu1 %v7541_v54  ;;  %v4562_v33 = vld [vmem:[%s6822_s8 + $0x500] sm:$0xff] }
 0x2d2   : > { %5649 = vmatprep.subr.bf16.mxu1 %v5648_v51  ;;  %v4564_v51 = vld [vmem:[%s6822_s8 + $0x510] sm:$0xff] }
 0x2d3   : > { %v5666_v55 = vpack.c.bf16 %v4564_v51, %v4562_v33  ;;  %v7661_v51 = vld [vmem:[%s8485_s1 + $0xa8] sm:$0xff] }
 0x2d4   : > { %2523 = vmatmul.mubr.f32.gmra.mrb[92].mxu1 %v7551_v17 }
 0x2d5   : > { %5651 = vmatpush1.bf16.msra.mxu1 %v5650_v42  ;;  %2528 = vmatprep.mubr.f32.mxu1 %v7557_v37  ;;  %v7609_v42 = vld [vmem:[%s8485_s1 + $0x70] sm:$0xff] }
 0x2d6   : > { %5653 = vmatprep.subr.bf16.mxu1 %v5652_v35 }
 0x2d7   : > { %v4836_v26 = vpop.f32.mrb[0].mxu1 }
 0x2d8   : > { %2529 = vmatmul.mubr.f32.gmra.mrb[94].mxu1 %v7567_v20  ;;  %v4837_v41 = vpop.f32.mrb[1].mxu1 }
 0x2d9   : > { %v7570_v21 = vadd.f32 %v4837_v41, %v4836_v26  ;;  %5655 = vmatpush1.bf16.msra.mxu1 %v5654_v25  ;;  %2534 = vmatprep.mubr.f32.mxu1 %v7575_v28  ;;  %v4566_v25 = vld [vmem:[%s6822_s8 + $0x520] sm:$0xff]  ;;  %v4571_v26 = vld [vmem:[%s6822_s8 + $0x548] sm:$0xff] }
 0x2da   : > { %5657 = vmatprep.subr.bf16.mxu1 %v5656_v38  ;;  %v4568_v38 = vld [vmem:[%s6822_s8 + $0x530] sm:$0xff]  ;;  %v5672_v59 = vpack.c.bf16 %v4573_v19, %v4571_v26 }
 0x2db   : > { %v4720_v60 = vpack.c.bf16 %v7570_v21, %v7570_v21  ;;  %v4839_v45 = vpop.f32.mrb[2].mxu1  ;;  %v7683_v26 = vld [vmem:[%s8485_s1 + $0xb8] sm:$0xff] }
 0x2dc   : > { %2535 = vmatmul.mubr.f32.gmra.mrb[96].mxu1 %v7587_v63  ;;  %v4840_v47 = vpop.f32.mrb[3].mxu1 }
 0x2dd   : > { %1448 = vst.msk [vmem:[%s6824_s9] sm:$0xf] %vm1447_vm1, %v4720_v60  ;;  %5659 = vmatpush1.bf16.msra.mxu1 %v5658_v23  ;;  %2540 = vmatprep.mubr.f32.mxu1 %v7595_v3  ;;  %v7598_v4 = vadd.f32 %v4840_v47, %v4839_v45  ;;  %v7639_v23 = vld [vmem:[%s8485_s1 + $0x98] sm:$0xff]  ;;  %v4570_v60 = vld [vmem:[%s6822_s8 + $0x540] sm:$0xff]  ;;  %v4575_v47 = vld [vmem:[%s6822_s8 + $0x568] sm:$0xff] }
 0x2de   : > { %5661 = vmatprep.subr.bf16.mxu1 %v5660_v43  ;;  %v5670_v43 = vpack.c.bf16 %v4568_v38, %v4566_v25  ;;  %v4572_v45 = vld [vmem:[%s6822_s8 + $0x550] sm:$0xff]  ;;  %v4579_v25 = vld [vmem:[%s6822_s8 + $0x588] sm:$0xff]  ;;  %v4581_v38 = vld [vmem:[%s6822_s8 + $0x598] sm:$0xff] }
 0x2df   : > { %v4721_v7 = vpack.c.bf16 %v7598_v4, %v7598_v4  ;;  %v4842_v8 = vpop.f32.mrb[4].mxu1 }
 0x2e0   : > { %2541 = vmatmul.mubr.f32.gmra.mrb[98].mxu1 %v7609_v42  ;;  %v4843_v35 = vpop.f32.mrb[5].mxu1 }
 0x2e1   : > { %5663 = vmatpush1.bf16.msra.mxu1 %v5662_v48  ;;  %1449 = vst.msk [vmem:[%s6824_s9 + $0x4] sm:$0xf] %vm1447_vm1, %v4721_v7  ;;  %2546 = vmatprep.mubr.f32.mxu1 %v7617_v11  ;;  %v7620_v14 = vadd.f32 %v4843_v35, %v4842_v8  ;;  %v4577_v48 = vld [vmem:[%s6822_s8 + $0x578] sm:$0xff]  ;;  %v5674_v7 = vpack.c.bf16 %v4572_v45, %v4570_v60  ;;  %v4576_v35 = vld [vmem:[%s6822_s8 + $0x570] sm:$0xff] }
 0x2e2   : > { %5665 = vmatprep.subr.bf16.mxu1 %v5664_v32  ;;  %v7653_v32 = vld [vmem:[%s8485_s1 + $0x90] sm:$0xff]  ;;  %v5676_v9 = vpack.c.bf16 %v4577_v48, %v4575_v47  ;;  %v5678_v19 = vpack.c.bf16 %v4576_v35, %v4574_v53  ;;  %v4585_v47 = vld [vmem:[%s6822_s8 + $0x5b8] sm:$0xff] }
 0x2e3   : > { %v4722_v57 = vpack.c.bf16 %v7620_v14, %v7620_v14  ;;  %v4845_v18 = vpop.f32.mrb[6].mxu1  ;;  %v4580_v60 = vld [vmem:[%s6822_s8 + $0x590] sm:$0xff] }
 0x2e4   : > { %2547 = vmatmul.mubr.f32.gmra.mrb[100].mxu1 %v7631_v40  ;;  %v4846_v41 = vpop.f32.mrb[7].mxu1  ;;  %v7697_v48 = vld [vmem:[%s8485_s1 + $0xb0] sm:$0xff] }
 0x2e5   : > { %5667 = vmatpush1.bf16.msra.mxu1 %v5666_v55  ;;  %1450 = vst.msk [vmem:[%s6824_s9 + $0x8] sm:$0xf] %vm1447_vm1, %v4722_v57  ;;  %2552 = vmatprep.mubr.f32.mxu1 %v7639_v23  ;;  %v7642_v58 = vadd.f32 %v4846_v41, %v4845_v18  ;;  %v7675_v57 = vld [vmem:[%s8485_s1 + $0xa0] sm:$0xff] }
 0x2e6   : > { %5669 = vmatprep.subr.bf16.mxu1 %v5668_v56 }
 0x2e7   : > { %8495 = vst [vmem:[#allocation8_spill] sm:$0xff] %v7642_v58  ;;  %v4723_v30 = vpack.c.bf16 %v7642_v58, %v7642_v58  ;;  %v4848_v46 = vpop.f32.mrb[8].mxu1 }
 0x2e8   : > { %2553 = vmatmul.mubr.f32.gmra.mrb[102].mxu1 %v7653_v32  ;;  %v4849_v33 = vpop.f32.mrb[9].mxu1 }
 0x2e9   : > { %5671 = vmatpush1.bf16.msra.mxu1 %v5670_v43  ;;  %1451 = vst.msk [vmem:[%s6824_s9 + $0xc] sm:$0xf] %vm1447_vm1, %v4723_v30  ;;  %2558 = vmatprep.mubr.f32.mxu1 %v7661_v51  ;;  %v7664_v8 = vadd.f32 %v4849_v33, %v4848_v46  ;;  %v5680_v43 = vpack.c.bf16 %v4581_v38, %v4579_v25  ;;  %v4583_v46 = vld [vmem:[%s6822_s8 + $0x5a8] sm:$0xff] }
 0x2ea   : > { %5673 = vmatprep.subr.bf16.mxu1 %v5672_v59  ;;  %v4578_v59 = vld [vmem:[%s6822_s8 + $0x580] sm:$0xff]  ;;  %v5684_v35 = vpack.c.bf16 %v4585_v47, %v4583_v46 }
 0x2eb   : > { %8496 = vst [vmem:[#allocation9_spill] sm:$0xff] %v7664_v8  ;;  %v4724_v55 = vpack.c.bf16 %v7664_v8, %v7664_v8  ;;  %v4851_v56 = vpop.f32.mrb[10].mxu1  ;;  %v4586_v47 = vld [vmem:[%s6822_s8 + $0x5c0] sm:$0xff]  ;;  %v7741_v8 = vld [vmem:[%s8485_s1 + $0xd0] sm:$0xff] }
 0x2ec   : > { %2559 = vmatmul.mubr.f32.gmra.mrb[104].mxu1 %v7675_v57  ;;  %v4852_v18 = vpop.f32.mrb[11].mxu1 }
 0x2ed   : > { %5675 = vmatpush1.bf16.msra.mxu1 %v5674_v7  ;;  %1452 = vst.msk [vmem:[%s6824_s9 + $0x10] sm:$0xf] %vm1447_vm1, %v4724_v55  ;;  %2564 = vmatprep.mubr.f32.mxu1 %v7683_v26  ;;  %v7686_v41 = vadd.f32 %v4852_v18, %v4851_v56  ;;  %v7705_v7 = vld [vmem:[%s8485_s1 + $0xc8] sm:$0xff]  ;;  %v4584_v56 = vld [vmem:[%s6822_s8 + $0x5b0] sm:$0xff] }
 0x2ee   : > { %5677 = vmatprep.subr.bf16.mxu1 %v5676_v9  ;;  %v5682_v9 = vpack.c.bf16 %v4580_v60, %v4578_v59  ;;  %v4582_v55 = vld [vmem:[%s6822_s8 + $0x5a0] sm:$0xff]  ;;  %v4587_v18 = vld [vmem:[%s6822_s8 + $0x5c8] sm:$0xff]  ;;  %v7727_v59 = vld [vmem:[%s8485_s1 + $0xd8] sm:$0xff] }
 0x2ef   : > { %8497 = vst [vmem:[#allocation10_spill] sm:$0xff] %v7686_v41  ;;  %v4725_v45 = vpack.c.bf16 %v7686_v41, %v7686_v41  ;;  %v4854_v30 = vpop.f32.mrb[12].mxu1  ;;  %v5686_v60 = vpack.c.bf16 %v4584_v56, %v4582_v55  ;;  %v4593_v41 = vld [vmem:[%s6822_s8 + $0x5f8] sm:$0xff] }
 0x2f0   : > { %2565 = vmatmul.mubr.f32.gmra.mrb[106].mxu1 %v7697_v48  ;;  %v4855_v33 = vpop.f32.mrb[13].mxu1 }
 0x2f1   : > { %5679 = vmatpush1.bf16.msra.mxu1 %v5678_v19  ;;  %1453 = vst.msk [vmem:[%s6824_s9 + $0x14] sm:$0xf] %vm1447_vm1, %v4725_v45  ;;  %2570 = vmatprep.mubr.f32.mxu1 %v7705_v7  ;;  %v7708_v53 = vadd.f32 %v4855_v33, %v4854_v30  ;;  %v4589_v19 = vld [vmem:[%s6822_s8 + $0x5d8] sm:$0xff]  ;;  %v4588_v33 = vld [vmem:[%s6822_s8 + $0x5d0] sm:$0xff] }
 0x2f2   : > { %5681 = vmatprep.subr.bf16.mxu1 %v5680_v43  ;;  %v7719_v45 = vld [vmem:[%s8485_s1 + $0xc0] sm:$0xff]  ;;  %v5688_v46 = vpack.c.bf16 %v4589_v19, %v4587_v18  ;;  %v5690_v55 = vpack.c.bf16 %v4588_v33, %v4586_v47  ;;  %v4592_v19 = vld [vmem:[%s6822_s8 + $0x5f0] sm:$0xff] }
 0x2f3   : > { %8498 = vst [vmem:[#allocation11_spill] sm:$0xff] %v7708_v53  ;;  %v4726_v25 = vpack.c.bf16 %v7708_v53, %v7708_v53  ;;  %v4857_v38 = vpop.f32.mrb[14].mxu1  ;;  %v4591_v53 = vld [vmem:[%s6822_s8 + $0x5e8] sm:$0xff]  ;;  %v4590_v18 = vld [vmem:[%s6822_s8 + $0x5e0] sm:$0xff] }
 0x2f4   : > { %2571 = vmatmul.mubr.f32.gmra.mrb[108].mxu1 %v7719_v45  ;;  %v4858_v43 = vpop.f32.mrb[15].mxu1 }
 0x2f5   : > { %5683 = vmatpush1.bf16.msra.mxu1 %v5682_v9  ;;  %1454 = vst.msk [vmem:[%s6824_s9 + $0x18] sm:$0xf] %vm1447_vm1, %v4726_v25  ;;  %2576 = vmatprep.mubr.f32.mxu1 %v7727_v59  ;;  %v7730_v30 = vadd.f32 %v4858_v43, %v4857_v38  ;;  %v5692_v38 = vpack.c.bf16 %v4593_v41, %v4591_v53 }
 0x2f6   : > { %5685 = vmatprep.subr.bf16.mxu1 %v5684_v35 }
 0x2f7   : > { %8499 = vst [vmem:[#allocation12_spill] sm:$0xff] %v7730_v30  ;;  %v4727_v9 = vpack.c.bf16 %v7730_v30, %v7730_v30  ;;  %v4860_v25 = vpop.f32.mrb[16].mxu1 }
 0x2f8   : > { %2577 = vmatmul.mubr.f32.gmra.mrb[110].mxu1 %v7741_v8  ;;  %v4861_v35 = vpop.f32.mrb[17].mxu1 }
 0x2f9   : > { %5687 = vmatpush1.bf16.msra.mxu1 %v5686_v60  ;;  %1455 = vst.msk [vmem:[%s6824_s9 + $0x1c] sm:$0xf] %vm1447_vm1, %v4727_v9  ;;  %v7746_v56 = vadd.f32 %v4861_v35, %v4860_v25  ;;  %2984 = vmatprep.mubr.f32.mxu1 %v7377_v10  ;;  %v5694_v60 = vpack.c.bf16 %v4592_v19, %v4590_v18 }
 0x2fa   : > { %5689 = vmatprep.subr.bf16.mxu1 %v5688_v46 }
 0x2fb   : > { %v4728_v43 = vpack.c.bf16 %v7746_v56, %v7746_v56  ;;  %v4863_v30 = vpop.f32.mrb[18].mxu1 }
 0x2fc   : > { %v4864_v58 = vpop.f32.mrb[19].mxu1 }
 0x2fd   : > { %5691 = vmatpush1.bf16.msra.mxu1 %v5690_v55  ;;  %1456 = vst.msk [vmem:[%s6824_s9 + $0x20] sm:$0xf] %vm1447_vm1, %v4728_v43  ;;  %v7755_v47 = vadd.f32 %v4864_v58, %v4863_v30 }
 0x2fe   : > { %5693 = vmatprep.subr.bf16.mxu1 %v5692_v38 }
 0x2ff   : > { %v4729_v10 = vpack.c.bf16 %v7755_v47, %v7755_v47  ;;  %v4866_v46 = vpop.f32.mrb[20].mxu1 }
 0x300   : > { %v4867_v41 = vpop.f32.mrb[21].mxu1 }
 0x301   : > { %5695 = vmatpush1.bf16.msra.mxu1 %v5694_v60  ;;  %1457 = vst.msk [vmem:[%s6824_s9 + $0x24] sm:$0xf] %vm1447_vm1, %v4729_v10  ;;  %v7761_v53 = vadd.f32 %v4867_v41, %v4866_v46 }
 0x302   : > { %5793 = vmatprep.subr.bf16.mxu1 %v6885_v0 }
 0x303   : > { %v4730_v33 = vpack.c.bf16 %v7761_v53, %v7761_v53  ;;  %v4869_v9 = vpop.f32.mrb[22].mxu1 }
 0x304   : > { %2985 = vmatmul.mubr.f32.vlgmr.msra.gmra.mrb[112].mxu1 %v7487_v29  ;;  %v4870_v58 = vpop.f32.mrb[23].mxu1 }
 0x305   : > { %1458 = vst.msk [vmem:[%s6824_s9 + $0x28] sm:$0xf] %vm1447_vm1, %v4730_v33  ;;  %v7769_v30 = vadd.f32 %v4870_v58, %v4869_v9  ;;  %2990 = vmatprep.mubr.f32.mxu1 %v7493_v44  ;;  %5795 = vmatpush3.bf16.msra.mxu1 %v6887_v1 }
 0x306   : > { %5797 = vmatprep.subr.bf16.mxu1 %v6898_v6 }
 0x307   : > { %v4731_v25 = vpack.c.bf16 %v7769_v30, %v7769_v30  ;;  %v4872_v35 = vpop.f32.mrb[24].mxu1 }
 0x308   : > { %2991 = vmatmul.mubr.f32.gmra.mrb[114].mxu1 %v7503_v62  ;;  %v4873_v55 = vpop.f32.mrb[25].mxu1 }
 0x309   : > { %1459 = vst.msk [vmem:[%s6824_s9 + $0x2c] sm:$0xf] %vm1447_vm1, %v4731_v25  ;;  %v7779_v29 = vadd.f32 %v4873_v55, %v4872_v35  ;;  %2996 = vmatprep.mubr.f32.mxu1 %v7509_v31  ;;  %5799 = vmatpush3.bf16.msra.mxu1 %v6913_v12 }
 0x30a   : > { %5801 = vmatprep.subr.bf16.mxu1 %v6917_v15 }
 0x30b   : > { %v4732_v44 = vpack.c.bf16 %v7779_v29, %v7779_v29  ;;  %v4875_v38 = vpop.f32.mrb[26].mxu1 }
 0x30c   : > { %2997 = vmatmul.mubr.f32.gmra.mrb[116].mxu1 %v7519_v5  ;;  %v4876_v18 = vpop.f32.mrb[27].mxu1 }
 0x30d   : > { %1460 = vst.msk [vmem:[%s6824_s9 + $0x30] sm:$0xf] %vm1447_vm1, %v4732_v44  ;;  %v7789_v62 = vadd.f32 %v4876_v18, %v4875_v38  ;;  %3002 = vmatprep.mubr.f32.mxu1 %v7525_v50  ;;  %5803 = vmatpush3.bf16.msra.mxu1 %v6935_v24 }
 0x30e   : > { %5805 = vmatprep.subr.bf16.mxu1 %v6939_v27 }
 0x30f   : > { %v4733_v31 = vpack.c.bf16 %v7789_v62, %v7789_v62 }
 0x310   : > { %3003 = vmatmul.mubr.f32.gmra.mrb[118].mxu1 %v7535_v34 }
 0x311   : > { %1461 = vst.msk [vmem:[%s6824_s9 + $0x34] sm:$0xf] %vm1447_vm1, %v4733_v31  ;;  %3008 = vmatprep.mubr.f32.mxu1 %v7541_v54  ;;  %5807 = vmatpush3.bf16.msra.mxu1 %v6957_v36 }
 0x312   : > { %5809 = vmatprep.subr.bf16.mxu1 %v6961_v39 }
 0x314   : > { %3009 = vmatmul.mubr.f32.gmra.mrb[120].mxu1 %v7551_v17 }
 0x315   : > { %3014 = vmatprep.mubr.f32.mxu1 %v7557_v37  ;;  %5811 = vmatpush3.bf16.msra.mxu1 %v6979_v49 }
 0x316   : > { %5813 = vmatprep.subr.bf16.mxu1 %v6983_v52 }
 0x317   : > { %v1593_v5 = vpop.f32.mrb[28].mxu1 }
 0x318   : > { %v1595_v50 = vpop.f32.mrb[29].mxu1  ;;  %3015 = vmatmul.mubr.f32.gmra.mrb[122].mxu1 %v7567_v20 }
 0x319   : > { %1740 = vmatprep.mubr.f32.mxu0 %v1595_v50  ;;  %3020 = vmatprep.mubr.f32.mxu1 %v7575_v28 }
 0x31a   : > { %1741 = vmatmul.mubr.f32.vlgmr.msra.gmra.mrb[28].mxu0 %v1593_v5  ;;  %5815 = vmatpush3.bf16.msra.mxu1 %v7001_v61 }
 0x31b   : > { %v1599_v34 = vpop.f32.mrb[30].mxu1  ;;  %5507 = vmatpush3.bf16.msra.mxu0 %v6887_v1  ;;  %5817 = vmatprep.subr.bf16.mxu1 %v7005_v2 }
 0x31c   : > { %v1601_v54 = vpop.f32.mrb[31].mxu1  ;;  %3021 = vmatmul.mubr.f32.gmra.mrb[124].mxu1 %v7587_v63  ;;  %5509 = vmatprep.subr.bf16.mxu0 %v6898_v6 }
 0x31d   : > { %1745 = vmatprep.mubr.f32.mxu0 %v1601_v54  ;;  %3026 = vmatprep.mubr.f32.mxu1 %v7595_v3 }
 0x31e   : > { %1746 = vmatmul.mubr.f32.gmra.mrb[30].mxu0 %v1599_v34  ;;  %5819 = vmatpush3.bf16.msra.mxu1 %v7023_v13 }
 0x31f   : > { %v1605_v17 = vpop.f32.mrb[32].mxu1  ;;  %5511 = vmatpush3.bf16.msra.mxu0 %v6913_v12  ;;  %5821 = vmatprep.subr.bf16.mxu1 %v7026_v16 }
 0x320   : > { %v1607_v37 = vpop.f32.mrb[33].mxu1  ;;  %3027 = vmatmul.mubr.f32.gmra.mrb[126].mxu1 %v7609_v42  ;;  %5513 = vmatprep.subr.bf16.mxu0 %v6917_v15 }
 0x321   : > { %1750 = vmatprep.mubr.f32.mxu0 %v1607_v37  ;;  %3032 = vmatprep.mubr.f32.mxu1 %v7617_v11 }
 0x322   : > { %1751 = vmatmul.mubr.f32.gmra.mrb[32].mxu0 %v1605_v17  ;;  %5823 = vmatpush3.bf16.msra.mxu1 %v7037_v22 }
 0x323   : > { %v1611_v20 = vpop.f32.mrb[34].mxu1  ;;  %5515 = vmatpush3.bf16.msra.mxu0 %v6935_v24 }
 0x324   : > { %v1613_v28 = vpop.f32.mrb[35].mxu1  ;;  %3033 = vmatmul.mubr.f32.gmra.mrb[128].mxu1 %v7631_v40  ;;  %5517 = vmatprep.subr.bf16.mxu0 %v6939_v27 }
 0x325   : > { %1755 = vmatprep.mubr.f32.mxu0 %v1613_v28  ;;  %3038 = vmatprep.mubr.f32.mxu1 %v7639_v23 }
 0x326   : > { %1756 = vmatmul.mubr.f32.gmra.mrb[34].mxu0 %v1611_v20 }
 0x327   : > { %v1617_v63 = vpop.f32.mrb[36].mxu1  ;;  %5519 = vmatpush3.bf16.msra.mxu0 %v6957_v36 }
 0x328   : > { %v1619_v3 = vpop.f32.mrb[37].mxu1  ;;  %3039 = vmatmul.mubr.f32.gmra.mrb[130].mxu1 %v7653_v32  ;;  %5521 = vmatprep.subr.bf16.mxu0 %v6961_v39 }
 0x329   : > { %1760 = vmatprep.mubr.f32.mxu0 %v1619_v3  ;;  %3044 = vmatprep.mubr.f32.mxu1 %v7661_v51 }
 0x32a   : > { %1761 = vmatmul.mubr.f32.gmra.mrb[36].mxu0 %v1617_v63 }
 0x32b   : > { %v1623_v42 = vpop.f32.mrb[38].mxu1  ;;  %5523 = vmatpush3.bf16.msra.mxu0 %v6979_v49 }
 0x32c   : > { %v1625_v11 = vpop.f32.mrb[39].mxu1  ;;  %3045 = vmatmul.mubr.f32.gmra.mrb[132].mxu1 %v7675_v57  ;;  %5525 = vmatprep.subr.bf16.mxu0 %v6983_v52 }
 0x32d   : > { %1765 = vmatprep.mubr.f32.mxu0 %v1625_v11  ;;  %3050 = vmatprep.mubr.f32.mxu1 %v7683_v26 }
 0x32e   : > { %1766 = vmatmul.mubr.f32.gmra.mrb[38].mxu0 %v1623_v42 }
 0x32f   : > { %v1629_v40 = vpop.f32.mrb[40].mxu1  ;;  %5527 = vmatpush3.bf16.msra.mxu0 %v7001_v61 }
 0x330   : > { %v1631_v23 = vpop.f32.mrb[41].mxu1  ;;  %3051 = vmatmul.mubr.f32.gmra.mrb[134].mxu1 %v7697_v48  ;;  %5529 = vmatprep.subr.bf16.mxu0 %v7005_v2 }
 0x331   : > { %1770 = vmatprep.mubr.f32.mxu0 %v1631_v23  ;;  %3056 = vmatprep.mubr.f32.mxu1 %v7705_v7 }
 0x332   : > { %1771 = vmatmul.mubr.f32.gmra.mrb[40].mxu0 %v1629_v40 }
 0x333   : > { %v1635_v32 = vpop.f32.mrb[42].mxu1  ;;  %5531 = vmatpush3.bf16.msra.mxu0 %v7023_v13 }
 0x334   : > { %v1637_v51 = vpop.f32.mrb[43].mxu1  ;;  %3057 = vmatmul.mubr.f32.gmra.mrb[136].mxu1 %v7719_v45  ;;  %5533 = vmatprep.subr.bf16.mxu0 %v7026_v16 }
 0x335   : > { %1775 = vmatprep.mubr.f32.mxu0 %v1637_v51  ;;  %3062 = vmatprep.mubr.f32.mxu1 %v7727_v59 }
 0x336   : > { %1776 = vmatmul.mubr.f32.gmra.mrb[42].mxu0 %v1635_v32 }
 0x337   : > { %v1641_v57 = vpop.f32.mrb[44].mxu1  ;;  %5535 = vmatpush3.bf16.msra.mxu0 %v7037_v22 }
 0x338   : > { %v1643_v26 = vpop.f32.mrb[45].mxu1  ;;  %3063 = vmatmul.mubr.f32.gmra.mrb[138].mxu1 %v7741_v8  ;;  %5601 = vmatprep.subr.bf16.mxu0 %v6885_v0 }
 0x339   : > { %1780 = vmatprep.mubr.f32.mxu0 %v1643_v26 }
 0x33a   : > { %1781 = vmatmul.mubr.f32.gmra.mrb[44].mxu0 %v1641_v57 }
 0x33b   : > { %v1647_v48 = vpop.f32.mrb[46].mxu1 }
 0x33c   : > { %v1649_v7 = vpop.f32.mrb[47].mxu1 }
 0x33d   : > { %1785 = vmatprep.mubr.f32.mxu0 %v1649_v7 }
 0x33e   : > { %1786 = vmatmul.mubr.f32.gmra.mrb[46].mxu0 %v1647_v48 }
 0x33f   : > { %v1653_v45 = vpop.f32.mrb[48].mxu1 }
 0x340   : > { %v1655_v19 = vpop.f32.mrb[49].mxu1 }
 0x341   : > { %1790 = vmatprep.mubr.f32.mxu0 %v1655_v19 }
 0x342   : > { %1791 = vmatmul.mubr.f32.gmra.mrb[48].mxu0 %v1653_v45 }
 0x343   : > { %v1659_v59 = vpop.f32.mrb[50].mxu1 }
 0x344   : > { %v1661_v43 = vpop.f32.mrb[51].mxu1 }
 0x345   : > { %1795 = vmatprep.mubr.f32.mxu0 %v1661_v43 }
 0x346   : > { %1796 = vmatmul.mubr.f32.gmra.mrb[50].mxu0 %v1659_v59 }
 0x347   : > { %v1665_v60 = vpop.f32.mrb[52].mxu1 }
 0x348   : > { %v1667_v10 = vpop.f32.mrb[53].mxu1 }
 0x349   : > { %1800 = vmatprep.mubr.f32.mxu0 %v1667_v10 }
 0x34a   : > { %1801 = vmatmul.mubr.f32.gmra.mrb[52].mxu0 %v1665_v60  ;;  %v4625_v60 = vld [vmem:[%s6822_s8 + $0xa18] sm:$0xff] }
 0x34b   : > { %v1671_v8 = vpop.f32.mrb[54].mxu1 }
 0x34c   : > { %v1673_v46 = vpop.f32.mrb[55].mxu1 }
 0x34d   : > { %1805 = vmatprep.mubr.f32.mxu0 %v1673_v46 }
 0x34e   : > { %1806 = vmatmul.mubr.f32.gmra.mrb[54].mxu0 %v1671_v8 }
 0x357   : > { %v2080_v41 = vpop.f32.mrb[56].mxu1 }
 0x358   : > { %v2082_v33 = vpop.f32.mrb[57].mxu1 }
 0x359   : > { %2227 = vmatprep.mubr.f32.mxu0 %v2082_v33 }
 0x35a   : > { %2228 = vmatmul.mubr.f32.vlgmr.msra.gmra.mrb[56].mxu0 %v2080_v41 }
 0x35b   : > { %v2086_v9 = vpop.f32.mrb[58].mxu1  ;;  %5603 = vmatpush3.bf16.msra.mxu0 %v6887_v1 }
 0x35c   : > { %v2088_v58 = vpop.f32.mrb[59].mxu1  ;;  %5605 = vmatprep.subr.bf16.mxu0 %v6898_v6 }
 0x35d   : > { %2232 = vmatprep.mubr.f32.mxu0 %v2088_v58 }
 0x35e   : > { %2233 = vmatmul.mubr.f32.gmra.mrb[58].mxu0 %v2086_v9 }
 0x35f   : > { %v2092_v25 = vpop.f32.mrb[60].mxu1  ;;  %5607 = vmatpush3.bf16.msra.mxu0 %v6913_v12 }
 0x360   : > { %v2094_v35 = vpop.f32.mrb[61].mxu1  ;;  %5609 = vmatprep.subr.bf16.mxu0 %v6917_v15 }
 0x361   : > { %2237 = vmatprep.mubr.f32.mxu0 %v2094_v35  ;;  %v4624_v35 = vld [vmem:[%s6822_s8 + $0xa10] sm:$0xff] }
 0x362   : > { %2238 = vmatmul.mubr.f32.gmra.mrb[60].mxu0 %v2092_v25  ;;  %v4622_v25 = vld [vmem:[%s6822_s8 + $0xa00] sm:$0xff] }
 0x363   : > { %v2098_v55 = vpop.f32.mrb[62].mxu1  ;;  %5611 = vmatpush3.bf16.msra.mxu0 %v6935_v24 }
 0x364   : > { %v2100_v44 = vpop.f32.mrb[63].mxu1  ;;  %5613 = vmatprep.subr.bf16.mxu0 %v6939_v27 }
 0x365   : > { %2242 = vmatprep.mubr.f32.mxu0 %v2100_v44  ;;  %v4629_v44 = vld [vmem:[%s6822_s8 + $0xa38] sm:$0xff] }
 0x366   : > { %2243 = vmatmul.mubr.f32.gmra.mrb[62].mxu0 %v2098_v55  ;;  %v4627_v55 = vld [vmem:[%s6822_s8 + $0xa28] sm:$0xff] }
 0x367   : > { %v2104_v38 = vpop.f32.mrb[64].mxu1  ;;  %5615 = vmatpush3.bf16.msra.mxu0 %v6957_v36 }
 0x368   : > { %v2106_v18 = vpop.f32.mrb[65].mxu1  ;;  %5617 = vmatprep.subr.bf16.mxu0 %v6961_v39 }
 0x369   : > { %2247 = vmatprep.mubr.f32.mxu0 %v2106_v18  ;;  %v5730_v18 = vpack.c.bf16 %v4624_v35, %v4622_v25 }
 0x36a   : > { %2248 = vmatmul.mubr.f32.gmra.mrb[64].mxu0 %v2104_v38 }
 0x36b   : > { %v2110_v31 = vpop.f32.mrb[66].mxu1  ;;  %5619 = vmatpush3.bf16.msra.mxu0 %v6979_v49 }
 0x36c   : > { %v2112_v5 = vpop.f32.mrb[67].mxu1  ;;  %5621 = vmatprep.subr.bf16.mxu0 %v6983_v52 }
 0x36d   : > { %2252 = vmatprep.mubr.f32.mxu0 %v2112_v5  ;;  %v5732_v5 = vpack.c.bf16 %v4629_v44, %v4627_v55 }
 0x36e   : > { %2253 = vmatmul.mubr.f32.gmra.mrb[66].mxu0 %v2110_v31 }
 0x36f   : > { %v2116_v50 = vpop.f32.mrb[68].mxu1  ;;  %5623 = vmatpush3.bf16.msra.mxu0 %v7001_v61 }
 0x370   : > { %v2118_v34 = vpop.f32.mrb[69].mxu1  ;;  %5625 = vmatprep.subr.bf16.mxu0 %v7005_v2 }
 0x371   : > { %2257 = vmatprep.mubr.f32.mxu0 %v2118_v34  ;;  %v4628_v34 = vld [vmem:[%s6822_s8 + $0xa30] sm:$0xff] }
 0x372   : > { %2258 = vmatmul.mubr.f32.gmra.mrb[68].mxu0 %v2116_v50  ;;  %v4626_v50 = vld [vmem:[%s6822_s8 + $0xa20] sm:$0xff] }
 0x373   : > { %v2122_v54 = vpop.f32.mrb[70].mxu1  ;;  %5627 = vmatpush3.bf16.msra.mxu0 %v7023_v13 }
 0x374   : > { %v2124_v17 = vpop.f32.mrb[71].mxu1  ;;  %5629 = vmatprep.subr.bf16.mxu0 %v7026_v16 }
 0x375   : > { %2262 = vmatprep.mubr.f32.mxu0 %v2124_v17  ;;  %v4633_v17 = vld [vmem:[%s6822_s8 + $0xa58] sm:$0xff] }
 0x376   : > { %2263 = vmatmul.mubr.f32.gmra.mrb[70].mxu0 %v2122_v54  ;;  %v4631_v54 = vld [vmem:[%s6822_s8 + $0xa48] sm:$0xff] }
 0x377   : > { %v2128_v37 = vpop.f32.mrb[72].mxu1  ;;  %5631 = vmatpush3.bf16.msra.mxu0 %v7037_v22 }
 0x378   : > { %v2130_v20 = vpop.f32.mrb[73].mxu1  ;;  %5697 = vmatprep.subr.bf16.mxu0 %v6885_v0 }
 0x379   : > { %2267 = vmatprep.mubr.f32.mxu0 %v2130_v20 }
 0x37a   : > { %2268 = vmatmul.mubr.f32.gmra.mrb[72].mxu0 %v2128_v37  ;;  %v5734_v37 = vpack.c.bf16 %v4628_v34, %v4626_v50  ;;  %v4655_v34 = vld [vmem:[%s6822_s8 + $0xb08] sm:$0xff] }
 0x37b   : > { %v2134_v28 = vpop.f32.mrb[74].mxu1 }
 0x37c   : > { %v2136_v63 = vpop.f32.mrb[75].mxu1 }
 0x37d   : > { %2272 = vmatprep.mubr.f32.mxu0 %v2136_v63  ;;  %v5736_v63 = vpack.c.bf16 %v4633_v17, %v4631_v54  ;;  %v4657_v54 = vld [vmem:[%s6822_s8 + $0xb18] sm:$0xff] }
 0x37e   : > { %2273 = vmatmul.mubr.f32.gmra.mrb[74].mxu0 %v2134_v28 }
 0x37f   : > { %v2140_v3 = vpop.f32.mrb[76].mxu1 }
 0x380   : > { %v2142_v42 = vpop.f32.mrb[77].mxu1 }
 0x381   : > { %2277 = vmatprep.mubr.f32.mxu0 %v2142_v42  ;;  %v4632_v42 = vld [vmem:[%s6822_s8 + $0xa50] sm:$0xff] }
 0x382   : > { %2278 = vmatmul.mubr.f32.gmra.mrb[76].mxu0 %v2140_v3  ;;  %v4630_v3 = vld [vmem:[%s6822_s8 + $0xa40] sm:$0xff] }
 0x383   : > { %v2146_v11 = vpop.f32.mrb[78].mxu1 }
 0x384   : > { %v2148_v40 = vpop.f32.mrb[79].mxu1 }
 0x385   : > { %2282 = vmatprep.mubr.f32.mxu0 %v2148_v40  ;;  %v4637_v40 = vld [vmem:[%s6822_s8 + $0xa78] sm:$0xff] }
 0x386   : > { %2283 = vmatmul.mubr.f32.gmra.mrb[78].mxu0 %v2146_v11  ;;  %v4635_v11 = vld [vmem:[%s6822_s8 + $0xa68] sm:$0xff] }
 0x387   : > { %v2152_v23 = vpop.f32.mrb[80].mxu1 }
 0x388   : > { %v2154_v32 = vpop.f32.mrb[81].mxu1 }
 0x389   : > { %2287 = vmatprep.mubr.f32.mxu0 %v2154_v32 }
 0x38a   : > { %2288 = vmatmul.mubr.f32.gmra.mrb[80].mxu0 %v2152_v23  ;;  %v5738_v23 = vpack.c.bf16 %v4632_v42, %v4630_v3  ;;  %v5760_v3 = vpack.c.bf16 %v4657_v54, %v4655_v34  ;;  %v4656_v42 = vld [vmem:[%s6822_s8 + $0xb10] sm:$0xff] }
 0x38b   : > { %v2158_v51 = vpop.f32.mrb[82].mxu1  ;;  %v4668_v34 = vld [vmem:[%s6822_s8 + $0xb70] sm:$0xff] }
 0x38c   : > { %v2160_v0 = vpop.f32.mrb[83].mxu1 }
 0x38d   : > { %2292 = vmatprep.mubr.f32.mxu0 %v2160_v0  ;;  %v5740_v0 = vpack.c.bf16 %v4637_v40, %v4635_v11 }
 0x38e   : > { %2293 = vmatmul.mubr.f32.gmra.mrb[82].mxu0 %v2158_v51 }
 0x397   : > { %v2500_v57 = vpop.f32.mrb[84].mxu1 }
 0x398   : > { %v2502_v26 = vpop.f32.mrb[85].mxu1 }
 0x399   : > { %2647 = vmatprep.mubr.f32.mxu0 %v2502_v26  ;;  %v4636_v26 = vld [vmem:[%s6822_s8 + $0xa70] sm:$0xff] }
 0x39a   : > { %2648 = vmatmul.mubr.f32.vlgmr.msra.gmra.mrb[84].mxu0 %v2500_v57  ;;  %v4634_v57 = vld [vmem:[%s6822_s8 + $0xa60] sm:$0xff] }
 0x39b   : > { %v2506_v48 = vpop.f32.mrb[86].mxu1  ;;  %5699 = vmatpush3.bf16.msra.mxu0 %v6887_v1 }
 0x39c   : > { %v2508_v7 = vpop.f32.mrb[87].mxu1  ;;  %5701 = vmatprep.subr.bf16.mxu0 %v6898_v6 }
 0x39d   : > { %2652 = vmatprep.mubr.f32.mxu0 %v2508_v7  ;;  %v4641_v7 = vld [vmem:[%s6822_s8 + $0xa98] sm:$0xff] }
 0x39e   : > { %2653 = vmatmul.mubr.f32.gmra.mrb[86].mxu0 %v2506_v48  ;;  %v4639_v48 = vld [vmem:[%s6822_s8 + $0xa88] sm:$0xff] }
 0x39f   : > { %v2512_v45 = vpop.f32.mrb[88].mxu1  ;;  %5703 = vmatpush3.bf16.msra.mxu0 %v6913_v12 }
 0x3a0   : > { %v2514_v19 = vpop.f32.mrb[89].mxu1  ;;  %5705 = vmatprep.subr.bf16.mxu0 %v6917_v15 }
 0x3a1   : > { %2657 = vmatprep.mubr.f32.mxu0 %v2514_v19 }
 0x3a2   : > { %2658 = vmatmul.mubr.f32.gmra.mrb[88].mxu0 %v2512_v45  ;;  %v5742_v45 = vpack.c.bf16 %v4636_v26, %v4634_v57 }
 0x3a3   : > { %v2518_v59 = vpop.f32.mrb[90].mxu1  ;;  %5707 = vmatpush3.bf16.msra.mxu0 %v6935_v24 }
 0x3a4   : > { %v2520_v43 = vpop.f32.mrb[91].mxu1  ;;  %5709 = vmatprep.subr.bf16.mxu0 %v6939_v27 }
 0x3a5   : > { %2662 = vmatprep.mubr.f32.mxu0 %v2520_v43  ;;  %v5744_v43 = vpack.c.bf16 %v4641_v7, %v4639_v48 }
 0x3a6   : > { %2663 = vmatmul.mubr.f32.gmra.mrb[90].mxu0 %v2518_v59 }
 0x3a7   : > { %v2524_v1 = vpop.f32.mrb[92].mxu1  ;;  %5711 = vmatpush3.bf16.msra.mxu0 %v6957_v36  ;;  %v4623_v36 = vld [vmem:[%s6822_s8 + $0xa08] sm:$0xff] }
 0x3a8   : > { %v2526_v6 = vpop.f32.mrb[93].mxu1  ;;  %5713 = vmatprep.subr.bf16.mxu0 %v6961_v39 }
 0x3a9   : > { %2667 = vmatprep.mubr.f32.mxu0 %v2526_v6  ;;  %v4640_v6 = vld [vmem:[%s6822_s8 + $0xa90] sm:$0xff] }
 0x3aa   : > { %2668 = vmatmul.mubr.f32.gmra.mrb[92].mxu0 %v2524_v1  ;;  %v4638_v1 = vld [vmem:[%s6822_s8 + $0xa80] sm:$0xff] }
 0x3ab   : > { %v2530_v12 = vpop.f32.mrb[94].mxu1  ;;  %5715 = vmatpush3.bf16.msra.mxu0 %v6979_v49  ;;  %v5728_v49 = vpack.c.bf16 %v4625_v60, %v4623_v36 }
 0x3ac   : > { %v2532_v15 = vpop.f32.mrb[95].mxu1  ;;  %5717 = vmatprep.subr.bf16.mxu0 %v6983_v52 }
 0x3ad   : > { %2672 = vmatprep.mubr.f32.mxu0 %v2532_v15  ;;  %v4645_v15 = vld [vmem:[%s6822_s8 + $0xab8] sm:$0xff] }
 0x3ae   : > { %2673 = vmatmul.mubr.f32.gmra.mrb[94].mxu0 %v2530_v12  ;;  %v4643_v12 = vld [vmem:[%s6822_s8 + $0xaa8] sm:$0xff] }
 0x3af   : > { %v2536_v24 = vpop.f32.mrb[96].mxu1  ;;  %5719 = vmatpush3.bf16.msra.mxu0 %v7001_v61  ;;  %v5748_v60 = vpack.c.bf16 %v4645_v15, %v4643_v12 }
 0x3b0   : > { %v2538_v27 = vpop.f32.mrb[97].mxu1  ;;  %5721 = vmatprep.subr.bf16.mxu0 %v7005_v2 }
 0x3b1   : > { %2677 = vmatprep.mubr.f32.mxu0 %v2538_v27 }
 0x3b2   : > { %2678 = vmatmul.mubr.f32.gmra.mrb[96].mxu0 %v2536_v24  ;;  %v5746_v24 = vpack.c.bf16 %v4640_v6, %v4638_v1 }
 0x3b3   : > { %v2542_v39 = vpop.f32.mrb[98].mxu1  ;;  %5723 = vmatpush3.bf16.msra.mxu0 %v7023_v13 }
 0x3b4   : > { %v2544_v10 = vpop.f32.mrb[99].mxu1  ;;  %5725 = vmatprep.subr.bf16.mxu0 %v7026_v16 }
 0x3b5   : > { %2682 = vmatprep.mubr.f32.mxu0 %v2544_v10  ;;  %v4644_v10 = vld [vmem:[%s6822_s8 + $0xab0] sm:$0xff] }
 0x3b6   : > { %2683 = vmatmul.mubr.f32.gmra.mrb[98].mxu0 %v2542_v39  ;;  %v4642_v39 = vld [vmem:[%s6822_s8 + $0xaa0] sm:$0xff] }
 0x3b7   : > { %v2548_v52 = vpop.f32.mrb[100].mxu1  ;;  %5727 = vmatpush3.bf16.msra.mxu0 %v7037_v22 }
 0x3b8   : > { %v2550_v61 = vpop.f32.mrb[101].mxu1  ;;  %5729 = vmatprep.subr.bf16.mxu0 %v5728_v49  ;;  %v4647_v49 = vld [vmem:[%s6822_s8 + $0xac8] sm:$0xff] }
 0x3b9   : > { %2687 = vmatprep.mubr.f32.mxu0 %v2550_v61  ;;  %v5750_v61 = vpack.c.bf16 %v4644_v10, %v4642_v39 }
 0x3ba   : > { %2688 = vmatmul.mubr.f32.gmra.mrb[100].mxu0 %v2548_v52  ;;  %v4649_v52 = vld [vmem:[%s6822_s8 + $0xad8] sm:$0xff] }
 0x3bb   : > { %v2554_v2 = vpop.f32.mrb[102].mxu1 }
 0x3bc   : > { %v2556_v8 = vpop.f32.mrb[103].mxu1 }
 0x3bd   : > { %2692 = vmatprep.mubr.f32.mxu0 %v2556_v8 }
 0x3be   : > { %2693 = vmatmul.mubr.f32.gmra.mrb[102].mxu0 %v2554_v2 }
 0x3bf   : > { %v2560_v46 = vpop.f32.mrb[104].mxu1 }
 0x3c0   : > { %v2562_v13 = vpop.f32.mrb[105].mxu1 }
 0x3c1   : > { %2697 = vmatprep.mubr.f32.mxu0 %v2562_v13  ;;  %v4646_v13 = vld [vmem:[%s6822_s8 + $0xac0] sm:$0xff] }
 0x3c2   : > { %2698 = vmatmul.mubr.f32.gmra.mrb[104].mxu0 %v2560_v46  ;;  %v5752_v46 = vpack.c.bf16 %v4649_v52, %v4647_v49 }
 0x3c3   : > { %v2566_v16 = vpop.f32.mrb[106].mxu1 }
 0x3c4   : > { %v2568_v41 = vpop.f32.mrb[107].mxu1 }
 0x3c5   : > { %2702 = vmatprep.mubr.f32.mxu0 %v2568_v41 }
 0x3c6   : > { %2703 = vmatmul.mubr.f32.gmra.mrb[106].mxu0 %v2566_v16  ;;  %v4648_v16 = vld [vmem:[%s6822_s8 + $0xad0] sm:$0xff] }
 0x3c7   : > { %v2572_v22 = vpop.f32.mrb[108].mxu1  ;;  %v5754_v25 = vpack.c.bf16 %v4648_v16, %v4646_v13 }
 0x3c8   : > { %v2574_v33 = vpop.f32.mrb[109].mxu1 }
 0x3c9   : > { %2707 = vmatprep.mubr.f32.mxu0 %v2574_v33  ;;  %v4653_v33 = vld [vmem:[%s6822_s8 + $0xaf8] sm:$0xff] }
 0x3ca   : > { %2708 = vmatmul.mubr.f32.gmra.mrb[108].mxu0 %v2572_v22  ;;  %v4651_v22 = vld [vmem:[%s6822_s8 + $0xae8] sm:$0xff] }
 0x3cb   : > { %v2578_v9 = vpop.f32.mrb[110].mxu1  ;;  %v5756_v44 = vpack.c.bf16 %v4653_v33, %v4651_v22 }
 0x3cc   : > { %v2580_v58 = vpop.f32.mrb[111].mxu1 }
 0x3cd   : > { %2712 = vmatprep.mubr.f32.mxu0 %v2580_v58 }
 0x3ce   : > { %2713 = vmatmul.mubr.f32.gmra.mrb[110].mxu0 %v2578_v9 }
 0x3d7   : > { %v2986_v38 = vpop.f32.mrb[112].mxu1 }
 0x3d8   : > { %v2988_v31 = vpop.f32.mrb[113].mxu1 }
 0x3d9   : > { %3133 = vmatprep.mubr.f32.mxu0 %v2988_v31 }
 0x3da   : > { %3134 = vmatmul.mubr.f32.vlgmr.msra.gmra.mrb[112].mxu0 %v2986_v38  ;;  %v4650_v38 = vld [vmem:[%s6822_s8 + $0xae0] sm:$0xff] }
 0x3db   : > { %5731 = vmatpush1.bf16.msra.mxu0 %v5730_v18  ;;  %v2992_v20 = vpop.f32.mrb[114].mxu1  ;;  %v4652_v18 = vld [vmem:[%s6822_s8 + $0xaf0] sm:$0xff] }
 0x3dc   : > { %5733 = vmatprep.subr.bf16.mxu0 %v5732_v5  ;;  %v2994_v28 = vpop.f32.mrb[115].mxu1 }
 0x3dd   : > { %3138 = vmatprep.mubr.f32.mxu0 %v2994_v28 }
 0x3de   : > { %3139 = vmatmul.mubr.f32.gmra.mrb[114].mxu0 %v2992_v20  ;;  %v5758_v20 = vpack.c.bf16 %v4652_v18, %v4650_v38 }
 0x3df   : > { %5735 = vmatpush1.bf16.msra.mxu0 %v5734_v37  ;;  %v2998_v32 = vpop.f32.mrb[116].mxu1 }
 0x3e0   : > { %5737 = vmatprep.subr.bf16.mxu0 %v5736_v63  ;;  %v3000_v51 = vpop.f32.mrb[117].mxu1 }
 0x3e1   : > { %3143 = vmatprep.mubr.f32.mxu0 %v3000_v51  ;;  %v4659_v51 = vld [vmem:[%s6822_s8 + $0xb28] sm:$0xff] }
 0x3e2   : > { %3144 = vmatmul.mubr.f32.gmra.mrb[116].mxu0 %v2998_v32 }
 0x3e3   : > { %5739 = vmatpush1.bf16.msra.mxu0 %v5738_v23  ;;  %v3004_v19 = vpop.f32.mrb[118].mxu1 }
 0x3e4   : > { %5741 = vmatprep.subr.bf16.mxu0 %v5740_v0  ;;  %v3006_v59 = vpop.f32.mrb[119].mxu1  ;;  %v4661_v0 = vld [vmem:[%s6822_s8 + $0xb38] sm:$0xff] }
 0x3e5   : > { %3148 = vmatprep.mubr.f32.mxu0 %v3006_v59  ;;  %v4658_v59 = vld [vmem:[%s6822_s8 + $0xb20] sm:$0xff] }
 0x3e6   : > { %3149 = vmatmul.mubr.f32.gmra.mrb[118].mxu0 %v3004_v19  ;;  %v5764_v19 = vpack.c.bf16 %v4661_v0, %v4659_v51 }
 0x3e7   : > { %5743 = vmatpush1.bf16.msra.mxu0 %v5742_v45  ;;  %v3010_v27 = vpop.f32.mrb[120].mxu1 }
 0x3e8   : > { %5745 = vmatprep.subr.bf16.mxu0 %v5744_v43  ;;  %v3012_v36 = vpop.f32.mrb[121].mxu1  ;;  %v4660_v43 = vld [vmem:[%s6822_s8 + $0xb30] sm:$0xff] }
 0x3e9   : > { %3153 = vmatprep.mubr.f32.mxu0 %v3012_v36  ;;  %v4665_v36 = vld [vmem:[%s6822_s8 + $0xb58] sm:$0xff]  ;;  %v5766_v52 = vpack.c.bf16 %v4660_v43, %v4658_v59  ;;  %v4675_v59 = vld [vmem:[%s6822_s8 + $0xba8] sm:$0xff] }
 0x3ea   : > { %3154 = vmatmul.mubr.f32.gmra.mrb[120].mxu0 %v3010_v27  ;;  %v4663_v27 = vld [vmem:[%s6822_s8 + $0xb48] sm:$0xff]  ;;  %v4677_v43 = vld [vmem:[%s6822_s8 + $0xbb8] sm:$0xff] }
 0x3eb   : > { %5747 = vmatpush1.bf16.msra.mxu0 %v5746_v24  ;;  %v3016_v2 = vpop.f32.mrb[122].mxu1 }
 0x3ec   : > { %5749 = vmatprep.subr.bf16.mxu0 %v5748_v60  ;;  %v3018_v8 = vpop.f32.mrb[123].mxu1 }
 0x3ed   : > { %v4910_v41 = vpop.f32.mrb[28].mxu0  ;;  %3158 = vmatprep.mubr.f32.mxu0 %v3018_v8  ;;  %v4662_v8 = vld [vmem:[%s6822_s8 + $0xb40] sm:$0xff] }
 0x3ee   : > { %v4911_v9 = vpop.f32.mrb[29].mxu0  ;;  %3159 = vmatmul.mubr.f32.gmra.mrb[122].mxu0 %v3016_v2  ;;  %v5768_v2 = vpack.c.bf16 %v4665_v36, %v4663_v27 }
 0x3ef   : > { %v4912_v58 = vadd.f32 %v4911_v9, %v4910_v41  ;;  %5751 = vmatpush1.bf16.msra.mxu0 %v5750_v61  ;;  %v3022_v35 = vpop.f32.mrb[124].mxu1  ;;  %v8500_v41 = vld [vmem:[#allocation8_spill] sm:$0xff] }
 0x3f0   : > { %5753 = vmatprep.subr.bf16.mxu0 %v5752_v46  ;;  %v3024_v55 = vpop.f32.mrb[125].mxu1  ;;  %v4664_v46 = vld [vmem:[%s6822_s8 + $0xb50] sm:$0xff]  ;;  %v4667_v9 = vld [vmem:[%s6822_s8 + $0xb68] sm:$0xff] }
 0x3f1   : > { %v4734_v31 = vpack.c.bf16 %v4912_v58, %v4912_v58  ;;  %v1882_v5 = vsub.f32 %v7570_v21, %v4912_v58  ;;  %v4913_v50 = vpop.f32.mrb[30].mxu0  ;;  %3163 = vmatprep.mubr.f32.mxu0 %v3024_v55  ;;  %v4654_v21 = vld [vmem:[%s6822_s8 + $0xb00] sm:$0xff]  ;;  %v4669_v58 = vld [vmem:[%s6822_s8 + $0xb78] sm:$0xff]  ;;  %v5770_v38 = vpack.c.bf16 %v4664_v46, %v4662_v8  ;;  %v4679_v8 = vld [vmem:[%s6822_s8 + $0xbc8] sm:$0xff] }
 0x3f2   : > { %v4914_v17 = vpop.f32.mrb[31].mxu0  ;;  %3164 = vmatmul.mubr.f32.gmra.mrb[124].mxu0 %v3022_v35  ;;  %v5762_v7 = vpack.c.bf16 %v4656_v42, %v4654_v21  ;;  %v4681_v46 = vld [vmem:[%s6822_s8 + $0xbd8] sm:$0xff] }
 0x3f3   : > { %4332 = vst.msk [vmem:[%s6824_s9 + $0xa8] sm:$0xf] %vm1447_vm1, %v4734_v31  ;;  %v4915_v37 = vadd.f32 %v4914_v17, %v4913_v50  ;;  %5755 = vmatpush1.bf16.msra.mxu0 %v5754_v25  ;;  %v3028_v28 = vpop.f32.mrb[126].mxu1  ;;  %v1896_v11 = vand.u32 2147483647, %v1882_v5  ;;  %v5772_v5 = vpack.c.bf16 %v4669_v58, %v4667_v9  ;;  %v4666_v50 = vld [vmem:[%s6822_s8 + $0xb60] sm:$0xff] }
 0x3f4   : > { %5757 = vmatprep.subr.bf16.mxu0 %v5756_v44  ;;  %v3030_v63 = vpop.f32.mrb[127].mxu1 }
 0x3f5   : > { %v4735_v40 = vpack.c.bf16 %v4915_v37, %v4915_v37  ;;  %v1883_v23 = vsub.f32 %v7598_v4, %v4915_v37  ;;  %v4916_v32 = vpop.f32.mrb[32].mxu0  ;;  %3168 = vmatprep.mubr.f32.mxu0 %v3030_v63  ;;  %v1911_v1 = vsel %vm1910_vm2, %v1896_v11, 0.0  ;;  %v8501_v37 = vld [vmem:[#allocation9_spill] sm:$0xff] }
 0x3f6   : > { %v4917_v57 = vpop.f32.mrb[33].mxu0  ;;  %3169 = vmatmul.mubr.f32.gmra.mrb[126].mxu0 %v3028_v28  ;;  %v4671_v63 = vld [vmem:[%s6822_s8 + $0xb88] sm:$0xff] }
 0x3f7   : > { %4333 = vst.msk [vmem:[%s6824_s9 + $0xac] sm:$0xf] %vm1447_vm1, %v4735_v40  ;;  %v1897_v26 = vand.u32 2147483647, %v1883_v23  ;;  %v4918_v48 = vadd.f32 %v4917_v57, %v4916_v32  ;;  %5759 = vmatpush1.bf16.msra.mxu0 %v5758_v20  ;;  %v3034_v45 = vpop.f32.mrb[128].mxu1  ;;  %v5774_v23 = vpack.c.bf16 %v4668_v34, %v4666_v50  ;;  %v4670_v57 = vld [vmem:[%s6822_s8 + $0xb80] sm:$0xff] }
 0x3f8   : > { %5761 = vmatprep.subr.bf16.mxu0 %v5760_v3  ;;  %v3036_v4 = vpop.f32.mrb[129].mxu1  ;;  %v4673_v3 = vld [vmem:[%s6822_s8 + $0xb98] sm:$0xff]  ;;  %v4683_v50 = vld [vmem:[%s6822_s8 + $0xbe8] sm:$0xff] }
 0x3f9   : > { %v1912_v6 = vsel %vm1910_vm2, %v1897_v26, 0.0  ;;  %v4736_v12 = vpack.c.bf16 %v4918_v48, %v4918_v48  ;;  %v1884_v15 = vsub.f32 %v7620_v14, %v4918_v48  ;;  %v4919_v24 = vpop.f32.mrb[34].mxu0  ;;  %3173 = vmatprep.mubr.f32.mxu0 %v3036_v4  ;;  %v5776_v0 = vpack.c.bf16 %v4673_v3, %v4671_v63  ;;  %v4672_v26 = vld [vmem:[%s6822_s8 + $0xb90] sm:$0xff]  ;;  %v4685_v34 = vld [vmem:[%s6822_s8 + $0xbf8] sm:$0xff]  ;;  %v5895_v63 = vld [vmem:[%s8485_s1 + $0x8] sm:$0xff] }
 0x3fa   : > { %v1913_v60 = vadd.f32 %v1912_v6, %v1911_v1  ;;  %v4920_v39 = vpop.f32.mrb[35].mxu0  ;;  %3174 = vmatmul.mubr.f32.gmra.mrb[128].mxu0 %v3034_v45  ;;  %v8502_v45 = vld [vmem:[#allocation10_spill] sm:$0xff]  ;;  %v5788_v3 = vpack.c.bf16 %v4685_v34, %v4683_v50  ;;  %v5903_v50 = vld [vmem:[%s8485_s1 + $0x48] sm:$0xff] }
 0x3fb   : > { %4334 = vst.msk [vmem:[%s6824_s9 + $0xb0] sm:$0xf] %vm1447_vm1, %v4736_v12  ;;  %v1898_v10 = vand.u32 2147483647, %v1884_v15  ;;  %v4921_v49 = vadd.f32 %v4920_v39, %v4919_v24  ;;  %5763 = vmatpush1.bf16.msra.mxu0 %v5762_v7  ;;  %v3040_v61 = vpop.f32.mrb[130].mxu1  ;;  %v5778_v24 = vpack.c.bf16 %v4672_v26, %v4670_v57  ;;  %v4674_v39 = vld [vmem:[%s6822_s8 + $0xba0] sm:$0xff] }
 0x3fc   : > { %5765 = vmatprep.subr.bf16.mxu0 %v5764_v19  ;;  %v3042_v14 = vpop.f32.mrb[131].mxu1 }
 0x3fd   : > { %v1914_v13 = vsel %vm1910_vm2, %v1898_v10, 0.0  ;;  %v4737_v16 = vpack.c.bf16 %v4921_v49, %v4921_v49  ;;  %v1885_v22 = vsub.f32 %v8500_v41, %v4921_v49  ;;  %v4922_v33 = vpop.f32.mrb[36].mxu0  ;;  %3178 = vmatprep.mubr.f32.mxu0 %v3042_v14  ;;  %v4676_v10 = vld [vmem:[%s6822_s8 + $0xbb0] sm:$0xff] }
 0x3fe   : > { %v1915_v25 = vadd.f32 %v1914_v13, %v1913_v60  ;;  %v4923_v35 = vpop.f32.mrb[37].mxu0  ;;  %3179 = vmatmul.mubr.f32.gmra.mrb[130].mxu0 %v3040_v61  ;;  %v5780_v60 = vpack.c.bf16 %v4677_v43, %v4675_v59  ;;  %v8503_v61 = vld [vmem:[#allocation11_spill] sm:$0xff] }
 0x3ff   : > { %4335 = vst.msk [vmem:[%s6824_s9 + $0xb4] sm:$0xf] %vm1447_vm1, %v4737_v16  ;;  %v1899_v55 = vand.u32 2147483647, %v1885_v22  ;;  %v4924_v44 = vadd.f32 %v4923_v35, %v4922_v33  ;;  %5767 = vmatpush1.bf16.msra.mxu0 %v5766_v52  ;;  %v3046_v18 = vpop.f32.mrb[132].mxu1  ;;  %v5782_v33 = vpack.c.bf16 %v4676_v10, %v4674_v39  ;;  %v4678_v35 = vld [vmem:[%s6822_s8 + $0xbc0] sm:$0xff] }
 0x400   : > { %5769 = vmatprep.subr.bf16.mxu0 %v5768_v2  ;;  %v3048_v31 = vpop.f32.mrb[133].mxu1  ;;  %v5897_v10 = vld [vmem:[%s8485_s1 + $0x18] sm:$0xff] }
 0x401   : > { %v1916_v54 = vsel %vm1910_vm2, %v1899_v55, 0.0  ;;  %v4738_v17 = vpack.c.bf16 %v4924_v44, %v4924_v44  ;;  %v1886_v20 = vsub.f32 %v8501_v37, %v4924_v44  ;;  %v4925_v28 = vpop.f32.mrb[38].mxu0  ;;  %3183 = vmatprep.mubr.f32.mxu0 %v3048_v31  ;;  %v4680_v55 = vld [vmem:[%s6822_s8 + $0xbd0] sm:$0xff] }
 0x402   : > { %v1917_v21 = vadd.f32 %v1916_v54, %v1915_v25  ;;  %v4926_v42 = vpop.f32.mrb[39].mxu0  ;;  %3184 = vmatmul.mubr.f32.gmra.mrb[132].mxu0 %v3046_v18  ;;  %v5784_v25 = vpack.c.bf16 %v4681_v46, %v4679_v8  ;;  %v8504_v18 = vld [vmem:[#allocation12_spill] sm:$0xff] }
 0x403   : > { %4336 = vst.msk [vmem:[%s6824_s9 + $0xb8] sm:$0xf] %vm1447_vm1, %v4738_v17  ;;  %v1900_v11 = vand.u32 2147483647, %v1886_v20  ;;  %v4927_v40 = vadd.f32 %v4926_v42, %v4925_v28  ;;  %5771 = vmatpush1.bf16.msra.mxu0 %v5770_v38  ;;  %v3052_v32 = vpop.f32.mrb[134].mxu1  ;;  %v5786_v28 = vpack.c.bf16 %v4680_v55, %v4678_v35  ;;  %v4684_v42 = vld [vmem:[%s6822_s8 + $0xbf0] sm:$0xff] }
 0x404   : > { %5773 = vmatprep.subr.bf16.mxu0 %v5772_v5  ;;  %v3054_v51 = vpop.f32.mrb[135].mxu1 }
 0x405   : > { %v1918_v48 = vsel %vm1910_vm2, %v1900_v11, 0.0  ;;  %v4739_v7 = vpack.c.bf16 %v4927_v40, %v4927_v40  ;;  %v1887_v4 = vsub.f32 %v8502_v45, %v4927_v40  ;;  %v4928_v19 = vpop.f32.mrb[40].mxu0  ;;  %3188 = vmatprep.mubr.f32.mxu0 %v3054_v51 }
 0x406   : > { %v1919_v1 = vadd.f32 %v1918_v48, %v1917_v21  ;;  %v4929_v6 = vpop.f32.mrb[41].mxu0  ;;  %3189 = vmatmul.mubr.f32.gmra.mrb[134].mxu0 %v3052_v32  ;;  %v4682_v21 = vld [vmem:[%s6822_s8 + $0xbe0] sm:$0xff] }
 0x407   : > { %4337 = vst.msk [vmem:[%s6824_s9 + $0xbc] sm:$0xf] %vm1447_vm1, %v4739_v7  ;;  %v1901_v12 = vand.u32 2147483647, %v1887_v4  ;;  %v4930_v15 = vadd.f32 %v4929_v6, %v4928_v19  ;;  %5775 = vmatpush1.bf16.msra.mxu0 %v5774_v23  ;;  %v3058_v27 = vpop.f32.mrb[136].mxu1  ;;  %v5790_v48 = vpack.c.bf16 %v4684_v42, %v4682_v21  ;;  %v5907_v21 = vld [vmem:[%s8485_s1 + $0x68] sm:$0xff] }
 0x408   : > { %5777 = vmatprep.subr.bf16.mxu0 %v5776_v0  ;;  %v3060_v36 = vpop.f32.mrb[137].mxu1 }
 0x409   : > { %v1920_v49 = vsel %vm1910_vm2, %v1901_v12, 0.0  ;;  %v4740_v52 = vpack.c.bf16 %v4930_v15, %v4930_v15  ;;  %v1888_v14 = vsub.f32 %v8503_v61, %v4930_v15  ;;  %v4931_v2 = vpop.f32.mrb[42].mxu0  ;;  %3193 = vmatprep.mubr.f32.mxu0 %v3060_v36 }
 0x40a   : > { %v1921_v13 = vadd.f32 %v1920_v49, %v1919_v1  ;;  %v4932_v16 = vpop.f32.mrb[43].mxu0  ;;  %3194 = vmatmul.mubr.f32.gmra.mrb[136].mxu0 %v3058_v27 }
 0x40b   : > { %4338 = vst.msk [vmem:[%s6824_s9 + $0xc0] sm:$0xf] %vm1447_vm1, %v4740_v52  ;;  %v1902_v41 = vand.u32 2147483647, %v1888_v14  ;;  %v4933_v22 = vadd.f32 %v4932_v16, %v4931_v2  ;;  %5779 = vmatpush1.bf16.msra.mxu0 %v5778_v24  ;;  %v3064_v9 = vpop.f32.mrb[138].mxu1  ;;  %v5898_v14 = vld [vmem:[%s8485_s1 + $0x10] sm:$0xff] }
 0x40c   : > { %5781 = vmatprep.subr.bf16.mxu0 %v5780_v60  ;;  %v3066_v58 = vpop.f32.mrb[139].mxu1  ;;  %v5899_v16 = vld [vmem:[%s8485_s1 + $0x28] sm:$0xff] }
 0x40d   : > { %v1922_v44 = vsel %vm1910_vm2, %v1902_v41, 0.0  ;;  %v4741_v38 = vpack.c.bf16 %v4933_v22, %v4933_v22  ;;  %v1889_v31 = vsub.f32 %v8504_v18, %v4933_v22  ;;  %v4934_v5 = vpop.f32.mrb[44].mxu0  ;;  %3198 = vmatprep.mubr.f32.mxu0 %v3066_v58 }
 0x40e   : > { %v1923_v54 = vadd.f32 %v1922_v44, %v1921_v13  ;;  %v4935_v17 = vpop.f32.mrb[45].mxu0  ;;  %3199 = vmatmul.mubr.f32.gmra.mrb[138].mxu0 %v3064_v9  ;;  %v5900_v9 = vld [vmem:[%s8485_s1 + $0x20] sm:$0xff]  ;;  %v5901_v44 = vld [vmem:[%s8485_s1 + $0x38] sm:$0xff] }
 0x40f   : > { %4339 = vst.msk [vmem:[%s6824_s9 + $0xc4] sm:$0xf] %vm1447_vm1, %v4741_v38  ;;  %v1903_v37 = vand.u32 2147483647, %v1889_v31  ;;  %v4936_v20 = vadd.f32 %v4935_v17, %v4934_v5  ;;  %5783 = vmatpush1.bf16.msra.mxu0 %v5782_v33  ;;  %3404 = vmatprep.mubr.f32.mxu0 %v5895_v63  ;;  %v5902_v31 = vld [vmem:[%s8485_s1 + $0x30] sm:$0xff] }
 0x410   : > { %5785 = vmatprep.subr.bf16.mxu0 %v5784_v25 }
 0x411   : > { %v1924_v11 = vsel %vm1910_vm2, %v1903_v37, 0.0  ;;  %v4742_v40 = vpack.c.bf16 %v4936_v20, %v4936_v20  ;;  %v1890_v23 = vsub.f32 %v7746_v56, %v4936_v20  ;;  %v4937_v32 = vpop.f32.mrb[46].mxu0  ;;  %v5905_v37 = vld [vmem:[%s8485_s1 + $0x58] sm:$0xff] }
 0x412   : > { %v1925_v51 = vadd.f32 %v1924_v11, %v1923_v54  ;;  %v4938_v0 = vpop.f32.mrb[47].mxu0 }
 0x413   : > { %4340 = vst.msk [vmem:[%s6824_s9 + $0xc8] sm:$0xf] %vm1447_vm1, %v4742_v40  ;;  %v1904_v57 = vand.u32 2147483647, %v1890_v23  ;;  %v4939_v26 = vadd.f32 %v4938_v0, %v4937_v32  ;;  %5787 = vmatpush1.bf16.msra.mxu0 %v5786_v28  ;;  %v5906_v28 = vld [vmem:[%s8485_s1 + $0x50] sm:$0xff]  ;;  %v5908_v40 = vld [vmem:[%s8485_s1 + $0x60] sm:$0xff] }
 0x414   : > { %5789 = vmatprep.subr.bf16.mxu0 %v5788_v3  ;;  %v5909_v32 = vld [vmem:[%s8485_s1 + $0x78] sm:$0xff] }
 0x415   : > { %v1926_v7 = vsel %vm1910_vm2, %v1904_v57, 0.0  ;;  %v4743_v45 = vpack.c.bf16 %v4939_v26, %v4939_v26  ;;  %v1891_v4 = vsub.f32 %v7755_v47, %v4939_v26  ;;  %v4940_v19 = vpop.f32.mrb[48].mxu0  ;;  %v5896_v47 = vld [vmem:[%s8485_s1] sm:$0xff]  ;;  %v5910_v26 = vld [vmem:[%s8485_s1 + $0x70] sm:$0xff] }
 0x416   : > { %v1927_v59 = vadd.f32 %v1926_v7, %v1925_v51  ;;  %v4941_v56 = vpop.f32.mrb[49].mxu0  ;;  %v5911_v7 = vld [vmem:[%s8485_s1 + $0x88] sm:$0xff] }
 0x417   : > { %4341 = vst.msk [vmem:[%s6824_s9 + $0xcc] sm:$0xf] %vm1447_vm1, %v4743_v45  ;;  %v1905_v43 = vand.u32 2147483647, %v1891_v4  ;;  %v4942_v1 = vadd.f32 %v4941_v56, %v4940_v19  ;;  %5791 = vmatpush1.bf16.msra.mxu0 %v5790_v48 }
 0x419   : > { %v1928_v6 = vsel %vm1910_vm2, %v1905_v43, 0.0  ;;  %v4744_v12 = vpack.c.bf16 %v4942_v1, %v4942_v1  ;;  %v1892_v15 = vsub.f32 %v7761_v53, %v4942_v1  ;;  %v4943_v24 = vpop.f32.mrb[50].mxu0  ;;  %v5913_v43 = vld [vmem:[%s8485_s1 + $0x98] sm:$0xff] }
 0x41a   : > { %v1929_v27 = vadd.f32 %v1928_v6, %v1927_v59  ;;  %3405 = vmatmul.mubr.f32.vlgmr.msra.gmra.mrb[140].mxu0 %v5896_v47  ;;  %v4944_v36 = vpop.f32.mrb[51].mxu0  ;;  %v5912_v59 = vld [vmem:[%s8485_s1 + $0x80] sm:$0xff] }
 0x41b   : > { %4342 = vst.msk [vmem:[%s6824_s9 + $0xd0] sm:$0xf] %vm1447_vm1, %v4744_v12  ;;  %v1906_v60 = vand.u32 2147483647, %v1892_v15  ;;  %v4945_v39 = vadd.f32 %v4944_v36, %v4943_v24  ;;  %3410 = vmatprep.mubr.f32.mxu0 %v5897_v10  ;;  %v5914_v15 = vld [vmem:[%s8485_s1 + $0x90] sm:$0xff] }
 0x41d   : > { %v1930_v53 = vsel %vm1910_vm2, %v1906_v60, 0.0  ;;  %v4745_v49 = vpack.c.bf16 %v4945_v39, %v4945_v39  ;;  %v1893_v52 = vsub.f32 %v7769_v30, %v4945_v39  ;;  %v4946_v61 = vpop.f32.mrb[52].mxu0  ;;  %v5916_v39 = vld [vmem:[%s8485_s1 + $0xa0] sm:$0xff] }
 0x41e   : > { %3411 = vmatmul.mubr.f32.gmra.mrb[142].mxu0 %v5898_v14  ;;  %v4947_v2 = vpop.f32.mrb[53].mxu0  ;;  %v1931_v8 = vadd.f32 %v1930_v53, %v1929_v27  ;;  %v5915_v27 = vld [vmem:[%s8485_s1 + $0xa8] sm:$0xff]  ;;  %v5917_v53 = vld [vmem:[%s8485_s1 + $0xb8] sm:$0xff]  ;;  %v5918_v14 = vld [vmem:[%s8485_s1 + $0xb0] sm:$0xff] }
 0x41f   : > { %4343 = vst.msk [vmem:[%s6824_s9 + $0xd4] sm:$0xf] %vm1447_vm1, %v4745_v49  ;;  %v1907_v46 = vand.u32 2147483647, %v1893_v52  ;;  %v4948_v13 = vadd.f32 %v4947_v2, %v4946_v61  ;;  %3416 = vmatprep.mubr.f32.mxu0 %v5899_v16 }
 0x421   : > { %v4746_v41 = vpack.c.bf16 %v4948_v13, %v4948_v13  ;;  %v1894_v30 = vsub.f32 %v7779_v29, %v4948_v13  ;;  %v4949_v22 = vpop.f32.mrb[54].mxu0  ;;  %v1932_v33 = vsel %vm1910_vm2, %v1907_v46, 0.0 }
 0x422   : > { %3417 = vmatmul.mubr.f32.gmra.mrb[144].mxu0 %v5900_v9  ;;  %v4950_v58 = vpop.f32.mrb[55].mxu0  ;;  %v1933_v25 = vadd.f32 %v1932_v33, %v1931_v8  ;;  %v5919_v8 = vld [vmem:[%s8485_s1 + $0xc8] sm:$0xff] }
 0x423   : > { %4344 = vst.msk [vmem:[%s6824_s9 + $0xd8] sm:$0xf] %vm1447_vm1, %v4746_v41  ;;  %v1908_v35 = vand.u32 2147483647, %v1894_v30  ;;  %v4951_v55 = vadd.f32 %v4950_v58, %v4949_v22  ;;  %3422 = vmatprep.mubr.f32.mxu0 %v5901_v44  ;;  %v5920_v41 = vld [vmem:[%s8485_s1 + $0xc0] sm:$0xff]  ;;  %v5921_v22 = vld [vmem:[%s8485_s1 + $0xd8] sm:$0xff] }
 0x425   : > { %v4747_v29 = vpack.c.bf16 %v4951_v55, %v4951_v55  ;;  %v1895_v38 = vsub.f32 %v7789_v62, %v4951_v55  ;;  %v1934_v18 = vsel %vm1910_vm2, %v1908_v35, 0.0  ;;  %v5904_v62 = vld [vmem:[%s8485_s1 + $0x40] sm:$0xff] }
 0x426   : > { %3423 = vmatmul.mubr.f32.gmra.mrb[146].mxu0 %v5902_v31  ;;  %v1935_v5 = vadd.f32 %v1934_v18, %v1933_v25  ;;  %v5922_v25 = vld [vmem:[%s8485_s1 + $0xd0] sm:$0xff] }
 0x427   : > { %4345 = vst.msk [vmem:[%s6824_s9 + $0xdc] sm:$0xf] %vm1447_vm1, %v4747_v29  ;;  %3428 = vmatprep.mubr.f32.mxu0 %v5903_v50  ;;  %v1909_v34 = vand.u32 2147483647, %v1895_v38 }
 0x429   : > { %v1936_v54 = vsel %vm1910_vm2, %v1909_v34, 0.0 }
 0x42a   : > { %3429 = vmatmul.mubr.f32.gmra.mrb[148].mxu0 %v5904_v62  ;;  %v1937_v17 = vadd.f32 %v1936_v54, %v1935_v5 }
 0x42b   : > { %3434 = vmatprep.mubr.f32.mxu0 %v5905_v37 }
 0x42c   : > { %1938 = vadd.xlane.f32.xlu0 %v1937_v17 }
 0x42d   : > { %v4984_v20 = vpop.f32.mrb[56].mxu0 }
 0x42e   : > { %3435 = vmatmul.mubr.f32.gmra.mrb[150].mxu0 %v5906_v28  ;;  %v4985_v63 = vpop.f32.mrb[57].mxu0 }
 0x42f   : > { %v8031_v3 = vadd.f32 %v4985_v63, %v4984_v20  ;;  %3440 = vmatprep.mubr.f32.mxu0 %v5907_v21 }
 0x431   : > { %v4748_v42 = vpack.c.bf16 %v8031_v3, %v8031_v3  ;;  %v4987_v11 = vpop.f32.mrb[58].mxu0 }
 0x432   : > { %3441 = vmatmul.mubr.f32.gmra.mrb[152].mxu0 %v5908_v40  ;;  %v4988_v23 = vpop.f32.mrb[59].mxu0 }
 0x433   : > { %4424 = vst.msk [vmem:[%s6824_s9 + $0x38] sm:$0xf] %vm1447_vm1, %v4748_v42  ;;  %3446 = vmatprep.mubr.f32.mxu0 %v5909_v32  ;;  %v8046_v51 = vadd.f32 %v4988_v23, %v4987_v11 }
 0x435   : > { %v4749_v0 = vpack.c.bf16 %v8046_v51, %v8046_v51  ;;  %v4990_v57 = vpop.f32.mrb[60].mxu0 }
 0x436   : > { %3447 = vmatmul.mubr.f32.gmra.mrb[154].mxu0 %v5910_v26  ;;  %v4991_v48 = vpop.f32.mrb[61].mxu0 }
 0x437   : > { %4425 = vst.msk [vmem:[%s6824_s9 + $0x3c] sm:$0xf] %vm1447_vm1, %v4749_v0  ;;  %3452 = vmatprep.mubr.f32.mxu0 %v5911_v7  ;;  %v8058_v45 = vadd.f32 %v4991_v48, %v4990_v57 }
 0x439   : > { %v4750_v4 = vpack.c.bf16 %v8058_v45, %v8058_v45  ;;  %v4993_v19 = vpop.f32.mrb[62].mxu0 }
 0x43a   : > { %3453 = vmatmul.mubr.f32.gmra.mrb[156].mxu0 %v5912_v59  ;;  %v4994_v56 = vpop.f32.mrb[63].mxu0 }
 0x43b   : > { %4426 = vst.msk [vmem:[%s6824_s9 + $0x40] sm:$0xf] %vm1447_vm1, %v4750_v4  ;;  %3458 = vmatprep.mubr.f32.mxu0 %v5913_v43  ;;  %v8070_v1 = vadd.f32 %v4994_v56, %v4993_v19 }
 0x43d   : > { %v4751_v6 = vpack.c.bf16 %v8070_v1, %v8070_v1  ;;  %v4996_v12 = vpop.f32.mrb[64].mxu0 }
 0x43e   : > { %3459 = vmatmul.mubr.f32.gmra.mrb[158].mxu0 %v5914_v15  ;;  %v4997_v24 = vpop.f32.mrb[65].mxu0 }
 0x43f   : > { %4427 = vst.msk [vmem:[%s6824_s9 + $0x44] sm:$0xf] %vm1447_vm1, %v4751_v6  ;;  %3464 = vmatprep.mubr.f32.mxu0 %v5915_v27  ;;  %v8082_v47 = vadd.f32 %v4997_v24, %v4996_v12 }
 0x441   : > { %v4752_v36 = vpack.c.bf16 %v8082_v47, %v8082_v47  ;;  %v4999_v60 = vpop.f32.mrb[66].mxu0 }
 0x442   : > { %3465 = vmatmul.mubr.f32.gmra.mrb[160].mxu0 %v5916_v39  ;;  %v5000_v10 = vpop.f32.mrb[67].mxu0 }
 0x443   : > { %4428 = vst.msk [vmem:[%s6824_s9 + $0x48] sm:$0xf] %vm1447_vm1, %v4752_v36  ;;  %3470 = vmatprep.mubr.f32.mxu0 %v5917_v53  ;;  %v8094_v49 = vadd.f32 %v5000_v10, %v4999_v60 }
 0x445   : > { %v4753_v52 = vpack.c.bf16 %v8094_v49, %v8094_v49  ;;  %v5002_v61 = vpop.f32.mrb[68].mxu0 }
 0x446   : > { %3471 = vmatmul.mubr.f32.gmra.mrb[162].mxu0 %v5918_v14  ;;  %v5003_v2 = vpop.f32.mrb[69].mxu0 }
 0x447   : > { %4429 = vst.msk [vmem:[%s6824_s9 + $0x4c] sm:$0xf] %vm1447_vm1, %v4753_v52  ;;  %3476 = vmatprep.mubr.f32.mxu0 %v5919_v8  ;;  %v8106_v46 = vadd.f32 %v5003_v2, %v5002_v61 }
 0x449   : > { %v4754_v13 = vpack.c.bf16 %v8106_v46, %v8106_v46  ;;  %v5005_v16 = vpop.f32.mrb[70].mxu0 }
 0x44a   : > { %3477 = vmatmul.mubr.f32.gmra.mrb[164].mxu0 %v5920_v41  ;;  %v5006_v30 = vpop.f32.mrb[71].mxu0 }
 0x44b   : > { %4430 = vst.msk [vmem:[%s6824_s9 + $0x50] sm:$0xf] %vm1447_vm1, %v4754_v13  ;;  %3482 = vmatprep.mubr.f32.mxu0 %v5921_v22  ;;  %v8118_v33 = vadd.f32 %v5006_v30, %v5005_v16 }
 0x44d   : > { %v4755_v9 = vpack.c.bf16 %v8118_v33, %v8118_v33  ;;  %v5008_v58 = vpop.f32.mrb[72].mxu0 }
 0x44e   : > { %3483 = vmatmul.mubr.f32.gmra.mrb[166].mxu0 %v5922_v25  ;;  %v5009_v35 = vpop.f32.mrb[73].mxu0 }
 0x44f   : > { %4431 = vst.msk [vmem:[%s6824_s9 + $0x54] sm:$0xf] %vm1447_vm1, %v4755_v9  ;;  %v8127_v55 = vadd.f32 %v5009_v35, %v5008_v58 }
 0x451   : > { %v4756_v44 = vpack.c.bf16 %v8127_v55, %v8127_v55  ;;  %v5011_v29 = vpop.f32.mrb[74].mxu0 }
 0x452   : > { %v5012_v38 = vpop.f32.mrb[75].mxu0 }
 0x453   : > { %4432 = vst.msk [vmem:[%s6824_s9 + $0x58] sm:$0xf] %vm1447_vm1, %v4756_v44  ;;  %v8133_v18 = vadd.f32 %v5012_v38, %v5011_v29 }
 0x455   : > { %v4757_v31 = vpack.c.bf16 %v8133_v18, %v8133_v18  ;;  %v5014_v5 = vpop.f32.mrb[76].mxu0 }
 0x456   : > { %v5015_v50 = vpop.f32.mrb[77].mxu0 }
 0x457   : > { %4433 = vst.msk [vmem:[%s6824_s9 + $0x5c] sm:$0xf] %vm1447_vm1, %v4757_v31  ;;  %v8139_v34 = vadd.f32 %v5015_v50, %v5014_v5 }
 0x459   : > { %v4758_v54 = vpack.c.bf16 %v8139_v34, %v8139_v34  ;;  %v5017_v62 = vpop.f32.mrb[78].mxu0 }
 0x45a   : > { %v5018_v17 = vpop.f32.mrb[79].mxu0 }
 0x45b   : > { %4434 = vst.msk [vmem:[%s6824_s9 + $0x60] sm:$0xf] %vm1447_vm1, %v4758_v54  ;;  %v8145_v37 = vadd.f32 %v5018_v17, %v5017_v62 }
 0x45d   : > { %v4759_v20 = vpack.c.bf16 %v8145_v37, %v8145_v37  ;;  %v5020_v28 = vpop.f32.mrb[80].mxu0 }
 0x45e   : > { %v5021_v63 = vpop.f32.mrb[81].mxu0 }
 0x45f   : > { %4435 = vst.msk [vmem:[%s6824_s9 + $0x64] sm:$0xf] %vm1447_vm1, %v4759_v20  ;;  %v8151_v21 = vadd.f32 %v5021_v63, %v5020_v28 }
 0x461   : > { %v4760_v42 = vpack.c.bf16 %v8151_v21, %v8151_v21  ;;  %v5023_v11 = vpop.f32.mrb[82].mxu0 }
 0x462   : > { %v5024_v40 = vpop.f32.mrb[83].mxu0 }
 0x463   : > { %4436 = vst.msk [vmem:[%s6824_s9 + $0x68] sm:$0xf] %vm1447_vm1, %v4760_v42  ;;  %v8157_v23 = vadd.f32 %v5024_v40, %v5023_v11 }
 0x465   : > { %v4761_v32 = vpack.c.bf16 %v8157_v23, %v8157_v23 }
 0x467   : > { %4437 = vst.msk [vmem:[%s6824_s9 + $0x6c] sm:$0xf] %vm1447_vm1, %v4761_v32 }
 0x46d   : > { %v5058_v0 = vpop.f32.mrb[84].mxu0 }
 0x46e   : > { %v5059_v57 = vpop.f32.mrb[85].mxu0 }
 0x46f   : > { %v5060_v26 = vadd.f32 %v5059_v57, %v5058_v0 }
 0x471   : > { %v4762_v48 = vpack.c.bf16 %v5060_v26, %v5060_v26  ;;  %v2789_v7 = vsub.f32 %v8031_v3, %v5060_v26  ;;  %v5061_v4 = vpop.f32.mrb[86].mxu0 }
 0x472   : > { %v5062_v19 = vpop.f32.mrb[87].mxu0 }
 0x473   : > { %4516 = vst.msk [vmem:[%s6824_s9 + $0xe0] sm:$0xf] %vm1447_vm1, %v4762_v48  ;;  %v5063_v59 = vadd.f32 %v5062_v19, %v5061_v4  ;;  %v2803_v56 = vand.u32 2147483647, %v2789_v7 }
 0x475   : > { %v4763_v43 = vpack.c.bf16 %v5063_v59, %v5063_v59  ;;  %v2790_v6 = vsub.f32 %v8046_v51, %v5063_v59  ;;  %v5064_v12 = vpop.f32.mrb[88].mxu0  ;;  %v2817_v36 = vsel %vm1910_vm2, %v2803_v56, 0.0 }
 0x476   : > { %v5065_v15 = vpop.f32.mrb[89].mxu0 }
 0x477   : > { %4517 = vst.msk [vmem:[%s6824_s9 + $0xe4] sm:$0xf] %vm1447_vm1, %v4763_v43  ;;  %v2804_v24 = vand.u32 2147483647, %v2790_v6  ;;  %v5066_v27 = vadd.f32 %v5065_v15, %v5064_v12 }
 0x479   : > { %v2818_v3 = vsel %vm1910_vm2, %v2804_v24, 0.0  ;;  %v4764_v60 = vpack.c.bf16 %v5066_v27, %v5066_v27  ;;  %v2791_v39 = vsub.f32 %v8058_v45, %v5066_v27  ;;  %v5067_v10 = vpop.f32.mrb[90].mxu0 }
 0x47a   : > { %v2819_v53 = vadd.f32 %v2818_v3, %v2817_v36  ;;  %v5068_v52 = vpop.f32.mrb[91].mxu0 }
 0x47b   : > { %4518 = vst.msk [vmem:[%s6824_s9 + $0xe8] sm:$0xf] %vm1447_vm1, %v4764_v60  ;;  %v2805_v51 = vand.u32 2147483647, %v2791_v39  ;;  %v5069_v61 = vadd.f32 %v5068_v52, %v5067_v10 }
 0x47d   : > { %v2820_v14 = vsel %vm1910_vm2, %v2805_v51, 0.0  ;;  %v4765_v2 = vpack.c.bf16 %v5069_v61, %v5069_v61  ;;  %v2792_v8 = vsub.f32 %v8070_v1, %v5069_v61  ;;  %v5070_v13 = vpop.f32.mrb[92].mxu0 }
 0x47e   : > { %v2821_v16 = vadd.f32 %v2820_v14, %v2819_v53  ;;  %v5071_v41 = vpop.f32.mrb[93].mxu0 }
 0x47f   : > { %4519 = vst.msk [vmem:[%s6824_s9 + $0xec] sm:$0xf] %vm1447_vm1, %v4765_v2  ;;  %v2806_v30 = vand.u32 2147483647, %v2792_v8  ;;  %v5072_v45 = vadd.f32 %v5071_v41, %v5070_v13 }
 0x481   : > { %v2822_v22 = vsel %vm1910_vm2, %v2806_v30, 0.0  ;;  %v4766_v9 = vpack.c.bf16 %v5072_v45, %v5072_v45  ;;  %v2793_v58 = vsub.f32 %v8082_v47, %v5072_v45  ;;  %v5073_v25 = vpop.f32.mrb[94].mxu0 }
 0x482   : > { %v2823_v35 = vadd.f32 %v2822_v22, %v2821_v16  ;;  %v5074_v44 = vpop.f32.mrb[95].mxu0 }
 0x483   : > { %4520 = vst.msk [vmem:[%s6824_s9 + $0xf0] sm:$0xf] %vm1447_vm1, %v4766_v9  ;;  %v2807_v29 = vand.u32 2147483647, %v2793_v58  ;;  %v5075_v1 = vadd.f32 %v5074_v44, %v5073_v25 }
 0x485   : > { %v2824_v38 = vsel %vm1910_vm2, %v2807_v29, 0.0  ;;  %v4767_v31 = vpack.c.bf16 %v5075_v1, %v5075_v1  ;;  %v2794_v5 = vsub.f32 %v8094_v49, %v5075_v1  ;;  %v5076_v50 = vpop.f32.mrb[96].mxu0 }
 0x486   : > { %v2825_v54 = vadd.f32 %v2824_v38, %v2823_v35  ;;  %v5077_v62 = vpop.f32.mrb[97].mxu0 }
 0x487   : > { %4521 = vst.msk [vmem:[%s6824_s9 + $0xf4] sm:$0xf] %vm1447_vm1, %v4767_v31  ;;  %v2808_v17 = vand.u32 2147483647, %v2794_v5  ;;  %v5078_v47 = vadd.f32 %v5077_v62, %v5076_v50 }
 0x489   : > { %v2826_v20 = vsel %vm1910_vm2, %v2808_v17, 0.0  ;;  %v4768_v28 = vpack.c.bf16 %v5078_v47, %v5078_v47  ;;  %v2795_v63 = vsub.f32 %v8106_v46, %v5078_v47  ;;  %v5079_v42 = vpop.f32.mrb[98].mxu0 }
 0x48a   : > { %v2827_v11 = vadd.f32 %v2826_v20, %v2825_v54  ;;  %v5080_v40 = vpop.f32.mrb[99].mxu0 }
 0x48b   : > { %4522 = vst.msk [vmem:[%s6824_s9 + $0xf8] sm:$0xf] %vm1447_vm1, %v4768_v28  ;;  %v2809_v32 = vand.u32 2147483647, %v2795_v63  ;;  %v5081_v49 = vadd.f32 %v5080_v40, %v5079_v42 }
 0x48d   : > { %v2828_v0 = vsel %vm1910_vm2, %v2809_v32, 0.0  ;;  %v4769_v57 = vpack.c.bf16 %v5081_v49, %v5081_v49  ;;  %v2796_v26 = vsub.f32 %v8118_v33, %v5081_v49  ;;  %v5082_v48 = vpop.f32.mrb[100].mxu0 }
 0x48e   : > { %v2829_v7 = vadd.f32 %v2828_v0, %v2827_v11  ;;  %v5083_v4 = vpop.f32.mrb[101].mxu0 }
 0x48f   : > { %4523 = vst.msk [vmem:[%s6824_s9 + $0xfc] sm:$0xf] %vm1447_vm1, %v4769_v57  ;;  %v2810_v19 = vand.u32 2147483647, %v2796_v26  ;;  %v5084_v46 = vadd.f32 %v5083_v4, %v5082_v48 }
 0x491   : > { %v2830_v59 = vsel %vm1910_vm2, %v2810_v19, 0.0  ;;  %v4770_v56 = vpack.c.bf16 %v5084_v46, %v5084_v46  ;;  %v2797_v43 = vsub.f32 %v8127_v55, %v5084_v46  ;;  %v5085_v6 = vpop.f32.mrb[102].mxu0 }
 0x492   : > { %v2831_v12 = vadd.f32 %v2830_v59, %v2829_v7  ;;  %v5086_v15 = vpop.f32.mrb[103].mxu0 }
 0x493   : > { %4524 = vst.msk [vmem:[%s6824_s9 + $0x100] sm:$0xf] %vm1447_vm1, %v4770_v56  ;;  %v2811_v24 = vand.u32 2147483647, %v2797_v43  ;;  %v5087_v33 = vadd.f32 %v5086_v15, %v5085_v6 }
 0x495   : > { %v2832_v27 = vsel %vm1910_vm2, %v2811_v24, 0.0  ;;  %v4771_v36 = vpack.c.bf16 %v5087_v33, %v5087_v33  ;;  %v2798_v3 = vsub.f32 %v8133_v18, %v5087_v33  ;;  %v5088_v60 = vpop.f32.mrb[104].mxu0 }
 0x496   : > { %v2833_v39 = vadd.f32 %v2832_v27, %v2831_v12  ;;  %v5089_v10 = vpop.f32.mrb[105].mxu0 }
 0x497   : > { %4525 = vst.msk [vmem:[%s6824_s9 + $0x104] sm:$0xf] %vm1447_vm1, %v4771_v36  ;;  %v2812_v53 = vand.u32 2147483647, %v2798_v3  ;;  %v5090_v55 = vadd.f32 %v5089_v10, %v5088_v60 }
 0x499   : > { %v2834_v52 = vsel %vm1910_vm2, %v2812_v53, 0.0  ;;  %v4772_v51 = vpack.c.bf16 %v5090_v55, %v5090_v55  ;;  %v2799_v61 = vsub.f32 %v8139_v34, %v5090_v55  ;;  %v5091_v14 = vpop.f32.mrb[106].mxu0 }
 0x49a   : > { %v2835_v2 = vadd.f32 %v2834_v52, %v2833_v39  ;;  %v5092_v8 = vpop.f32.mrb[107].mxu0 }
 0x49b   : > { %4526 = vst.msk [vmem:[%s6824_s9 + $0x108] sm:$0xf] %vm1447_vm1, %v4772_v51  ;;  %v2813_v13 = vand.u32 2147483647, %v2799_v61  ;;  %v5093_v18 = vadd.f32 %v5092_v8, %v5091_v14 }
 0x49d   : > { %v2836_v16 = vsel %vm1910_vm2, %v2813_v13, 0.0  ;;  %v4773_v41 = vpack.c.bf16 %v5093_v18, %v5093_v18  ;;  %v2800_v30 = vsub.f32 %v8145_v37, %v5093_v18  ;;  %v5094_v45 = vpop.f32.mrb[108].mxu0 }
 0x49e   : > { %v2837_v22 = vadd.f32 %v2836_v16, %v2835_v2  ;;  %v5095_v9 = vpop.f32.mrb[109].mxu0 }
 0x49f   : > { %4527 = vst.msk [vmem:[%s6824_s9 + $0x10c] sm:$0xf] %vm1447_vm1, %v4773_v41  ;;  %v2814_v34 = vand.u32 2147483647, %v2800_v30  ;;  %v5096_v58 = vadd.f32 %v5095_v9, %v5094_v45 }
 0x4a1   : > { %v2838_v25 = vsel %vm1910_vm2, %v2814_v34, 0.0  ;;  %v4774_v35 = vpack.c.bf16 %v5096_v58, %v5096_v58  ;;  %v2801_v44 = vsub.f32 %v8151_v21, %v5096_v58  ;;  %v5097_v29 = vpop.f32.mrb[110].mxu0 }
 0x4a2   : > { %v5098_v1 = vpop.f32.mrb[111].mxu0  ;;  %v2839_v38 = vadd.f32 %v2838_v25, %v2837_v22 }
 0x4a3   : > { %4528 = vst.msk [vmem:[%s6824_s9 + $0x110] sm:$0xf] %vm1447_vm1, %v4774_v35  ;;  %v2815_v31 = vand.u32 2147483647, %v2801_v44  ;;  %v5099_v37 = vadd.f32 %v5098_v1, %v5097_v29 }
 0x4a5   : > { %v4775_v5 = vpack.c.bf16 %v5099_v37, %v5099_v37  ;;  %v2802_v50 = vsub.f32 %v8157_v23, %v5099_v37  ;;  %v2840_v54 = vsel %vm1910_vm2, %v2815_v31, 0.0 }
 0x4a6   : > { %v2841_v62 = vadd.f32 %v2840_v54, %v2839_v38 }
 0x4a7   : > { %4529 = vst.msk [vmem:[%s6824_s9 + $0x114] sm:$0xf] %vm1447_vm1, %v4775_v5  ;;  %v2816_v17 = vand.u32 2147483647, %v2802_v50 }
 0x4a9   : > { %v2842_v21 = vsel %vm1910_vm2, %v2816_v17, 0.0 }
 0x4aa   : > { %v2843_v47 = vadd.f32 %v2842_v21, %v2841_v62 }
 0x4ac   : > { %2844 = vadd.xlane.f32.xlu0 %v2843_v47 }
 0x4ad   : > { %v5132_v20 = vpop.f32.mrb[112].mxu0 }
 0x4ae   : > { %v5133_v28 = vpop.f32.mrb[113].mxu0 }
 0x4af   : > { %v8219_v63 = vadd.f32 %v5133_v28, %v5132_v20 }
 0x4b1   : > { %v4776_v42 = vpack.c.bf16 %v8219_v63, %v8219_v63  ;;  %v5135_v23 = vpop.f32.mrb[114].mxu0 }
 0x4b2   : > { %v5136_v11 = vpop.f32.mrb[115].mxu0 }
 0x4b3   : > { %4608 = vst.msk [vmem:[%s6824_s9 + $0x70] sm:$0xf] %vm1447_vm1, %v4776_v42  ;;  %v8225_v40 = vadd.f32 %v5136_v11, %v5135_v23 }
 0x4b5   : > { %v4777_v32 = vpack.c.bf16 %v8225_v40, %v8225_v40  ;;  %v5138_v49 = vpop.f32.mrb[116].mxu0 }
 0x4b6   : > { %v5139_v0 = vpop.f32.mrb[117].mxu0 }
 0x4b7   : > { %4609 = vst.msk [vmem:[%s6824_s9 + $0x74] sm:$0xf] %vm1447_vm1, %v4777_v32  ;;  %v8231_v57 = vadd.f32 %v5139_v0, %v5138_v49 }
 0x4b9   : > { %v1939_v26 = vpop.xlane.xlu0 %1938  ;;  %v4778_v48 = vpack.c.bf16 %v8231_v57, %v8231_v57  ;;  %v5141_v7 = vpop.f32.mrb[118].mxu0 }
 0x4ba   : > { %v1940_v4 = vrot.slane %v1939_v26, 4  ;;  %v5142_v19 = vpop.f32.mrb[119].mxu0 }
 0x4bb   : > { %4610 = vst.msk [vmem:[%s6824_s9 + $0x78] sm:$0xf] %vm1447_vm1, %v4778_v48  ;;  %v8237_v46 = vadd.f32 %v5142_v19, %v5141_v7 }
 0x4bc   : > { %v1941_v59 = vadd.f32 %v1940_v4, %v1939_v26 }
 0x4bd   : > { %v4779_v56 = vpack.c.bf16 %v8237_v46, %v8237_v46  ;;  %v5144_v43 = vpop.f32.mrb[120].mxu0 }
 0x4be   : > { %v1942_v6 = vrot.slane %v1941_v59, 2  ;;  %v5145_v12 = vpop.f32.mrb[121].mxu0 }
 0x4bf   : > { %4611 = vst.msk [vmem:[%s6824_s9 + $0x7c] sm:$0xf] %vm1447_vm1, %v4779_v56  ;;  %v8243_v15 = vadd.f32 %v5145_v12, %v5144_v43 }
 0x4c0   : > { %v1943_v24 = vadd.f32 %v1942_v6, %v1941_v59 }
 0x4c1   : > { %v4780_v33 = vpack.c.bf16 %v8243_v15, %v8243_v15  ;;  %v5147_v27 = vpop.f32.mrb[122].mxu0 }
 0x4c2   : > { %v1944_v36 = vrot.slane %v1943_v24, 1  ;;  %v5148_v3 = vpop.f32.mrb[123].mxu0 }
 0x4c3   : > { %4612 = vst.msk [vmem:[%s6824_s9 + $0x80] sm:$0xf] %vm1447_vm1, %v4780_v33  ;;  %v8249_v60 = vadd.f32 %v5148_v3, %v5147_v27 }
 0x4c4   : > { %v1945_v39 = vadd.f32 %v1944_v36, %v1943_v24 }
 0x4c5   : > { %v4781_v10 = vpack.c.bf16 %v8249_v60, %v8249_v60  ;;  %v5150_v53 = vpop.f32.mrb[124].mxu0 }
 0x4c6   : > { %5828 = vpush %v1945_v39  ;;  %v5151_v55 = vpop.f32.mrb[125].mxu0 }
 0x4c7   : > { %4613 = vst.msk [vmem:[%s6824_s9 + $0x84] sm:$0xf] %vm1447_vm1, %v4781_v10  ;;  %v8255_v52 = vadd.f32 %v5151_v55, %v5150_v53 }
 0x4c9   : > { %v4782_v51 = vpack.c.bf16 %v8255_v52, %v8255_v52  ;;  %v5153_v61 = vpop.f32.mrb[126].mxu0 }
 0x4ca   : > { %v5154_v14 = vpop.f32.mrb[127].mxu0 }
 0x4cb   : > { %4614 = vst.msk [vmem:[%s6824_s9 + $0x88] sm:$0xf] %vm1447_vm1, %v4782_v51  ;;  %v8261_v2 = vadd.f32 %v5154_v14, %v5153_v61 }
 0x4cd   : > { %v4783_v8 = vpack.c.bf16 %v8261_v2, %v8261_v2  ;;  %v5156_v13 = vpop.f32.mrb[128].mxu0 }
 0x4ce   : > { %v5157_v18 = vpop.f32.mrb[129].mxu0 }
 0x4cf   : > { %4615 = vst.msk [vmem:[%s6824_s9 + $0x8c] sm:$0xf] %vm1447_vm1, %v4783_v8  ;;  %v8267_v16 = vadd.f32 %v5157_v18, %v5156_v13 }
 0x4d1   : > { %v4784_v41 = vpack.c.bf16 %v8267_v16, %v8267_v16  ;;  %v5159_v30 = vpop.f32.mrb[130].mxu0 }
 0x4d2   : > { %v5160_v45 = vpop.f32.mrb[131].mxu0 }
 0x4d3   : > { %4616 = vst.msk [vmem:[%s6824_s9 + $0x90] sm:$0xf] %vm1447_vm1, %v4784_v41  ;;  %v8273_v22 = vadd.f32 %v5160_v45, %v5159_v30 }
 0x4d5   : > { %v4785_v9 = vpack.c.bf16 %v8273_v22, %v8273_v22  ;;  %v5162_v34 = vpop.f32.mrb[132].mxu0 }
 0x4d6   : > { %v5163_v58 = vpop.f32.mrb[133].mxu0 }
 0x4d7   : > { %4617 = vst.msk [vmem:[%s6824_s9 + $0x94] sm:$0xf] %vm1447_vm1, %v4785_v9  ;;  %v8279_v25 = vadd.f32 %v5163_v58, %v5162_v34 }
 0x4d9   : > { %v4786_v35 = vpack.c.bf16 %v8279_v25, %v8279_v25  ;;  %v5165_v44 = vpop.f32.mrb[134].mxu0 }
 0x4da   : > { %v5166_v29 = vpop.f32.mrb[135].mxu0 }
 0x4db   : > { %4618 = vst.msk [vmem:[%s6824_s9 + $0x98] sm:$0xf] %vm1447_vm1, %v4786_v35  ;;  %v8285_v1 = vadd.f32 %v5166_v29, %v5165_v44 }
 0x4dd   : > { %v4787_v38 = vpack.c.bf16 %v8285_v1, %v8285_v1  ;;  %v5168_v31 = vpop.f32.mrb[136].mxu0 }
 0x4de   : > { %v5169_v37 = vpop.f32.mrb[137].mxu0 }
 0x4df   : > { %4619 = vst.msk [vmem:[%s6824_s9 + $0x9c] sm:$0xf] %vm1447_vm1, %v4787_v38  ;;  %v8291_v5 = vadd.f32 %v5169_v37, %v5168_v31 }
 0x4e1   : > { %v4788_v50 = vpack.c.bf16 %v8291_v5, %v8291_v5  ;;  %v5171_v54 = vpop.f32.mrb[138].mxu0 }
 0x4e2   : > { %v5172_v62 = vpop.f32.mrb[139].mxu0 }
 0x4e3   : > { %4620 = vst.msk [vmem:[%s6824_s9 + $0xa0] sm:$0xf] %vm1447_vm1, %v4788_v50  ;;  %v8297_v17 = vadd.f32 %v5172_v62, %v5171_v54 }
 0x4e5   : > { %v4789_v21 = vpack.c.bf16 %v8297_v17, %v8297_v17 }
 0x4e7   : > { %4621 = vst.msk [vmem:[%s6824_s9 + $0xa4] sm:$0xf] %vm1447_vm1, %v4789_v21 }
 0x4ed   : > { %v3406_v47 = vpop.f32.mrb[140].mxu0 }
 0x4ee   : > { %v3408_v20 = vpop.f32.mrb[141].mxu0 }
 0x4ef   : > { %3553 = vmatprep.mubr.f32.mxu1 %v3408_v20 }
 0x4f0   : > { %3554 = vmatmul.mubr.f32.vlgmr.msra.gmra.mrb[140].mxu1 %v3406_v47 }
 0x4f1   : > { %v3412_v28 = vpop.f32.mrb[142].mxu0 }
 0x4f2   : > { %v3414_v42 = vpop.f32.mrb[143].mxu0 }
 0x4f3   : > { %3558 = vmatprep.mubr.f32.mxu1 %v3414_v42 }
 0x4f4   : > { %3559 = vmatmul.mubr.f32.gmra.mrb[142].mxu1 %v3412_v28 }
 0x4f5   : > { %v3418_v23 = vpop.f32.mrb[144].mxu0 }
 0x4f6   : > { %v3420_v11 = vpop.f32.mrb[145].mxu0 }
 0x4f7   : > { %3563 = vmatprep.mubr.f32.mxu1 %v3420_v11  ;;  %s5829_s11 = spop %5828 }
 0x4f8   : > { %3564 = vmatmul.mubr.f32.gmra.mrb[144].mxu1 %v3418_v23 }
 0x4f9   : > { %v3424_v32 = vpop.f32.mrb[146].mxu0 }
 0x4fa   : > { %v3426_v49 = vpop.f32.mrb[147].mxu0 }
 0x4fb   : > { %3568 = vmatprep.mubr.f32.mxu1 %v3426_v49 }
 0x4fc   : > { %3569 = vmatmul.mubr.f32.gmra.mrb[146].mxu1 %v3424_v32 }
 0x4fd   : > { %v3430_v0 = vpop.f32.mrb[148].mxu0 }
 0x4fe   : > { %v3432_v26 = vpop.f32.mrb[149].mxu0 }
 0x4ff   : > { %3573 = vmatprep.mubr.f32.mxu1 %v3432_v26 }
 0x500   : > { %3574 = vmatmul.mubr.f32.gmra.mrb[148].mxu1 %v3430_v0 }
 0x501   : > { %v3436_v48 = vpop.f32.mrb[150].mxu0 }
 0x502   : > { %v3438_v7 = vpop.f32.mrb[151].mxu0 }
 0x503   : > { %3578 = vmatprep.mubr.f32.mxu1 %v3438_v7 }
 0x504   : > { %3579 = vmatmul.mubr.f32.gmra.mrb[150].mxu1 %v3436_v48 }
 0x505   : > { %v3442_v4 = vpop.f32.mrb[152].mxu0 }
 0x506   : > { %v3444_v19 = vpop.f32.mrb[153].mxu0 }
 0x507   : > { %3583 = vmatprep.mubr.f32.mxu1 %v3444_v19 }
 0x508   : > { %3584 = vmatmul.mubr.f32.gmra.mrb[152].mxu1 %v3442_v4 }
 0x509   : > { %v3448_v59 = vpop.f32.mrb[154].mxu0 }
 0x50a   : > { %v3450_v56 = vpop.f32.mrb[155].mxu0 }
 0x50b   : > { %3588 = vmatprep.mubr.f32.mxu1 %v3450_v56 }
 0x50c   : > { %3589 = vmatmul.mubr.f32.gmra.mrb[154].mxu1 %v3448_v59 }
 0x50d   : > { %v3454_v43 = vpop.f32.mrb[156].mxu0 }
 0x50e   : > { %v3456_v6 = vpop.f32.mrb[157].mxu0 }
 0x50f   : > { %3593 = vmatprep.mubr.f32.mxu1 %v3456_v6 }
 0x510   : > { %3594 = vmatmul.mubr.f32.gmra.mrb[156].mxu1 %v3454_v43 }
 0x511   : > { %v3460_v12 = vpop.f32.mrb[158].mxu0 }
 0x512   : > { %v3462_v24 = vpop.f32.mrb[159].mxu0 }
 0x513   : > { %3598 = vmatprep.mubr.f32.mxu1 %v3462_v24 }
 0x514   : > { %3599 = vmatmul.mubr.f32.gmra.mrb[158].mxu1 %v3460_v12 }
 0x515   : > { %v3466_v33 = vpop.f32.mrb[160].mxu0 }
 0x516   : > { %v3468_v27 = vpop.f32.mrb[161].mxu0 }
 0x517   : > { %3603 = vmatprep.mubr.f32.mxu1 %v3468_v27 }
 0x518   : > { %3604 = vmatmul.mubr.f32.gmra.mrb[160].mxu1 %v3466_v33 }
 0x519   : > { %v3472_v36 = vpop.f32.mrb[162].mxu0 }
 0x51a   : > { %v3474_v3 = vpop.f32.mrb[163].mxu0 }
 0x51b   : > { %3608 = vmatprep.mubr.f32.mxu1 %v3474_v3 }
 0x51c   : > { %3609 = vmatmul.mubr.f32.gmra.mrb[162].mxu1 %v3472_v36 }
 0x51d   : > { %v3478_v39 = vpop.f32.mrb[164].mxu0 }
 0x51e   : > { %v3480_v10 = vpop.f32.mrb[165].mxu0 }
 0x51f   : > { %3613 = vmatprep.mubr.f32.mxu1 %v3480_v10 }
 0x520   : > { %3614 = vmatmul.mubr.f32.gmra.mrb[164].mxu1 %v3478_v39 }
 0x521   : > { %v3484_v53 = vpop.f32.mrb[166].mxu0 }
 0x522   : > { %v3486_v55 = vpop.f32.mrb[167].mxu0 }
 0x523   : > { %3618 = vmatprep.mubr.f32.mxu1 %v3486_v55 }
 0x524   : > { %3619 = vmatmul.mubr.f32.gmra.mrb[166].mxu1 %v3484_v53 }
 0x539   : > { %v2845_v51 = vpop.xlane.xlu0 %2844 }
 0x53a   : > { %v2846_v61 = vrot.slane %v2845_v51, 4 }
 0x53c   : > { %v2847_v14 = vadd.f32 %v2846_v61, %v2845_v51 }
 0x53e   : > { %v2848_v8 = vrot.slane %v2847_v14, 2 }
 0x540   : > { %v2849_v13 = vadd.f32 %v2848_v8, %v2847_v14 }
 0x542   : > { %v2850_v18 = vrot.slane %v2849_v13, 1 }
 0x544   : > { %v2851_v41 = vadd.f32 %v2850_v18, %v2849_v13 }
 0x546   : > { %5830 = vpush %v2851_v41 }
 0x577   : > { %s5831_s12 = spop %5830 }
 0x5c3   : > { %v5206_v30 = vpop.f32.mrb[140].mxu1 }
 0x5c4   : > { %v5207_v45 = vpop.f32.mrb[141].mxu1 }
 0x5c5   : > { %v5208_v9 = vadd.f32 %v5207_v45, %v5206_v30 }
 0x5c7   : > { %v4790_v34 = vpack.c.bf16 %v5208_v9, %v5208_v9  ;;  %v3695_v58 = vsub.f32 %v8219_v63, %v5208_v9  ;;  %v5209_v35 = vpop.f32.mrb[142].mxu1 }
 0x5c8   : > { %v5210_v44 = vpop.f32.mrb[143].mxu1 }
 0x5c9   : > { %4700 = vst.msk [vmem:[%s6824_s9 + $0x118] sm:$0xf] %vm1447_vm1, %v4790_v34  ;;  %v5211_v29 = vadd.f32 %v5210_v44, %v5209_v35  ;;  %v3709_v38 = vand.u32 2147483647, %v3695_v58 }
 0x5cb   : > { %v4791_v31 = vpack.c.bf16 %v5211_v29, %v5211_v29  ;;  %v3696_v37 = vsub.f32 %v8225_v40, %v5211_v29  ;;  %v5212_v50 = vpop.f32.mrb[144].mxu1  ;;  %v3723_v47 = vsel %vm1910_vm2, %v3709_v38, 0.0 }
 0x5cc   : > { %v5213_v54 = vpop.f32.mrb[145].mxu1 }
 0x5cd   : > { %4701 = vst.msk [vmem:[%s6824_s9 + $0x11c] sm:$0xf] %vm1447_vm1, %v4791_v31  ;;  %v3710_v62 = vand.u32 2147483647, %v3696_v37  ;;  %v5214_v21 = vadd.f32 %v5213_v54, %v5212_v50 }
 0x5cf   : > { %v3724_v63 = vsel %vm1910_vm2, %v3710_v62, 0.0  ;;  %v4792_v20 = vpack.c.bf16 %v5214_v21, %v5214_v21  ;;  %v3697_v28 = vsub.f32 %v8231_v57, %v5214_v21  ;;  %v5215_v42 = vpop.f32.mrb[146].mxu1 }
 0x5d0   : > { %v3725_v23 = vadd.f32 %v3724_v63, %v3723_v47  ;;  %v5216_v11 = vpop.f32.mrb[147].mxu1 }
 0x5d1   : > { %4702 = vst.msk [vmem:[%s6824_s9 + $0x120] sm:$0xf] %vm1447_vm1, %v4792_v20  ;;  %v3711_v40 = vand.u32 2147483647, %v3697_v28  ;;  %v5217_v32 = vadd.f32 %v5216_v11, %v5215_v42 }
 0x5d3   : > { %v3726_v49 = vsel %vm1910_vm2, %v3711_v40, 0.0  ;;  %v4793_v0 = vpack.c.bf16 %v5217_v32, %v5217_v32  ;;  %v3698_v26 = vsub.f32 %v8237_v46, %v5217_v32  ;;  %v5218_v48 = vpop.f32.mrb[148].mxu1 }
 0x5d4   : > { %v3727_v7 = vadd.f32 %v3726_v49, %v3725_v23  ;;  %v5219_v4 = vpop.f32.mrb[149].mxu1 }
 0x5d5   : > { %4703 = vst.msk [vmem:[%s6824_s9 + $0x124] sm:$0xf] %vm1447_vm1, %v4793_v0  ;;  %v3712_v19 = vand.u32 2147483647, %v3698_v26  ;;  %v5220_v57 = vadd.f32 %v5219_v4, %v5218_v48 }
 0x5d7   : > { %v3728_v59 = vsel %vm1910_vm2, %v3712_v19, 0.0  ;;  %v4794_v56 = vpack.c.bf16 %v5220_v57, %v5220_v57  ;;  %v3699_v43 = vsub.f32 %v8243_v15, %v5220_v57  ;;  %v5221_v6 = vpop.f32.mrb[150].mxu1 }
 0x5d8   : > { %v3729_v12 = vadd.f32 %v3728_v59, %v3727_v7  ;;  %v5222_v24 = vpop.f32.mrb[151].mxu1 }
 0x5d9   : > { %4704 = vst.msk [vmem:[%s6824_s9 + $0x128] sm:$0xf] %vm1447_vm1, %v4794_v56  ;;  %v3713_v33 = vand.u32 2147483647, %v3699_v43  ;;  %v5223_v46 = vadd.f32 %v5222_v24, %v5221_v6 }
 0x5db   : > { %v3730_v27 = vsel %vm1910_vm2, %v3713_v33, 0.0  ;;  %v4795_v36 = vpack.c.bf16 %v5223_v46, %v5223_v46  ;;  %v3700_v3 = vsub.f32 %v8249_v60, %v5223_v46  ;;  %v5224_v39 = vpop.f32.mrb[152].mxu1 }
 0x5dc   : > { %v3731_v10 = vadd.f32 %v3730_v27, %v3729_v12  ;;  %v5225_v53 = vpop.f32.mrb[153].mxu1 }
 0x5dd   : > { %4705 = vst.msk [vmem:[%s6824_s9 + $0x12c] sm:$0xf] %vm1447_vm1, %v4795_v36  ;;  %v3714_v55 = vand.u32 2147483647, %v3700_v3  ;;  %v5226_v15 = vadd.f32 %v5225_v53, %v5224_v39 }
 0x5df   : > { %v3732_v51 = vsel %vm1910_vm2, %v3714_v55, 0.0  ;;  %v4796_v61 = vpack.c.bf16 %v5226_v15, %v5226_v15  ;;  %v3701_v14 = vsub.f32 %v8255_v52, %v5226_v15  ;;  %v5227_v8 = vpop.f32.mrb[154].mxu1 }
 0x5e0   : > { %v3733_v13 = vadd.f32 %v3732_v51, %v3731_v10  ;;  %v5228_v18 = vpop.f32.mrb[155].mxu1 }
 0x5e1   : > { %4706 = vst.msk [vmem:[%s6824_s9 + $0x130] sm:$0xf] %vm1447_vm1, %v4796_v61  ;;  %v3715_v41 = vand.u32 2147483647, %v3701_v14  ;;  %v5229_v60 = vadd.f32 %v5228_v18, %v5227_v8 }
 0x5e3   : > { %v3734_v30 = vsel %vm1910_vm2, %v3715_v41, 0.0  ;;  %v4797_v45 = vpack.c.bf16 %v5229_v60, %v5229_v60  ;;  %v3702_v9 = vsub.f32 %v8261_v2, %v5229_v60  ;;  %v5230_v34 = vpop.f32.mrb[156].mxu1  ;;  %v1947_v60 = vstv %s5829_s11 }
 0x5e4   : > { %v3735_v58 = vadd.f32 %v3734_v30, %v3733_v13  ;;  %v5231_v35 = vpop.f32.mrb[157].mxu1 }
 0x5e5   : > { %4707 = vst.msk [vmem:[%s6824_s9 + $0x134] sm:$0xf] %vm1447_vm1, %v4797_v45  ;;  %v3716_v44 = vand.u32 2147483647, %v3702_v9  ;;  %v5232_v52 = vadd.f32 %v5231_v35, %v5230_v34  ;;  %v3761_v9 = vld [vmem:[#allocation2] sm:$0x1] }
 0x5e7   : > { %v3736_v29 = vsel %vm1910_vm2, %v3716_v44, 0.0  ;;  %v4798_v38 = vpack.c.bf16 %v5232_v52, %v5232_v52  ;;  %v3703_v31 = vsub.f32 %v8267_v16, %v5232_v52  ;;  %v5233_v37 = vpop.f32.mrb[158].mxu1 }
 0x5e8   : > { %v3737_v50 = vadd.f32 %v3736_v29, %v3735_v58  ;;  %v5234_v54 = vpop.f32.mrb[159].mxu1 }
 0x5e9   : > { %4708 = vst.msk [vmem:[%s6824_s9 + $0x138] sm:$0xf] %vm1447_vm1, %v4798_v38  ;;  %v3717_v62 = vand.u32 2147483647, %v3703_v31  ;;  %v5235_v2 = vadd.f32 %v5234_v54, %v5233_v37 }
 0x5eb   : > { %v3738_v21 = vsel %vm1910_vm2, %v3717_v62, 0.0  ;;  %v4799_v47 = vpack.c.bf16 %v5235_v2, %v5235_v2  ;;  %v3704_v63 = vsub.f32 %v8273_v22, %v5235_v2  ;;  %v5236_v20 = vpop.f32.mrb[160].mxu1 }
 0x5ec   : > { %v3739_v28 = vadd.f32 %v3738_v21, %v3737_v50  ;;  %v5237_v42 = vpop.f32.mrb[161].mxu1 }
 0x5ed   : > { %4709 = vst.msk [vmem:[%s6824_s9 + $0x13c] sm:$0xf] %vm1447_vm1, %v4799_v47  ;;  %v3718_v23 = vand.u32 2147483647, %v3704_v63  ;;  %v5238_v16 = vadd.f32 %v5237_v42, %v5236_v20 }
 0x5ef   : > { %v3740_v11 = vsel %vm1910_vm2, %v3718_v23, 0.0  ;;  %v4800_v40 = vpack.c.bf16 %v5238_v16, %v5238_v16  ;;  %v3705_v32 = vsub.f32 %v8279_v25, %v5238_v16  ;;  %v5239_v49 = vpop.f32.mrb[162].mxu1 }
 0x5f0   : > { %v3741_v0 = vadd.f32 %v3740_v11, %v3739_v28  ;;  %v5240_v26 = vpop.f32.mrb[163].mxu1 }
 0x5f1   : > { %4710 = vst.msk [vmem:[%s6824_s9 + $0x140] sm:$0xf] %vm1447_vm1, %v4800_v40  ;;  %v3719_v48 = vand.u32 2147483647, %v3705_v32  ;;  %v5241_v22 = vadd.f32 %v5240_v26, %v5239_v49 }
 0x5f3   : > { %v3742_v7 = vsel %vm1910_vm2, %v3719_v48, 0.0  ;;  %v4801_v4 = vpack.c.bf16 %v5241_v22, %v5241_v22  ;;  %v3706_v19 = vsub.f32 %v8285_v1, %v5241_v22  ;;  %v5242_v57 = vpop.f32.mrb[164].mxu1 }
 0x5f4   : > { %v5243_v59 = vpop.f32.mrb[165].mxu1  ;;  %v3743_v56 = vadd.f32 %v3742_v7, %v3741_v0 }
 0x5f5   : > { %4711 = vst.msk [vmem:[%s6824_s9 + $0x144] sm:$0xf] %vm1447_vm1, %v4801_v4  ;;  %v3720_v25 = vand.u32 2147483647, %v3706_v19  ;;  %v5244_v43 = vadd.f32 %v5243_v59, %v5242_v57 }
 0x5f7   : > { %v4802_v6 = vpack.c.bf16 %v5244_v43, %v5244_v43  ;;  %v3707_v12 = vsub.f32 %v8291_v5, %v5244_v43  ;;  %v5245_v24 = vpop.f32.mrb[166].mxu1  ;;  %v3744_v33 = vsel %vm1910_vm2, %v3720_v25, 0.0 }
 0x5f8   : > { %v5246_v46 = vpop.f32.mrb[167].mxu1  ;;  %v3745_v27 = vadd.f32 %v3744_v33, %v3743_v56 }
 0x5f9   : > { %4712 = vst.msk [vmem:[%s6824_s9 + $0x148] sm:$0xf] %vm1447_vm1, %v4802_v6  ;;  %v3721_v36 = vand.u32 2147483647, %v3707_v12  ;;  %v5247_v1 = vadd.f32 %v5246_v46, %v5245_v24 }
 0x5fb   : > { %v4803_v3 = vpack.c.bf16 %v5247_v1, %v5247_v1  ;;  %v3708_v39 = vsub.f32 %v8297_v17, %v5247_v1  ;;  %v3746_v10 = vsel %vm1910_vm2, %v3721_v36, 0.0  ;;  %v2853_v17 = vstv %s5831_s12 }
 0x5fc   : > { %v3747_v53 = vadd.f32 %v3746_v10, %v3745_v27  ;;  %v2854_v30 = vadd.f32 %v2853_v17, %v1947_v60 }
 0x5fd   : > { %4713 = vst.msk [vmem:[%s6824_s9 + $0x14c] sm:$0xf] %vm1447_vm1, %v4803_v3  ;;  %v3722_v55 = vand.u32 2147483647, %v3708_v39 }
 0x5ff   : > { %v3748_v5 = vsel %vm1910_vm2, %v3722_v55, 0.0 }
 0x600   : > { %v3749_v15 = vadd.f32 %v3748_v5, %v3747_v53 }
 0x602   : > { %3750 = vadd.xlane.f32.xlu1 %v3749_v15 }
 0x68f   : > { %v3751_v51 = vpop.xlane.xlu1 %3750 }
 0x690   : > { %v3752_v61 = vrot.slane %v3751_v51, 4 }
 0x692   : > { %v3753_v14 = vadd.f32 %v3752_v61, %v3751_v51 }
 0x694   : > { %v3754_v8 = vrot.slane %v3753_v14, 2 }
 0x696   : > { %v3755_v13 = vadd.f32 %v3754_v8, %v3753_v14 }
 0x698   : > { %v3756_v18 = vrot.slane %v3755_v13, 1 }
 0x69a   : > { %v3757_v41 = vadd.f32 %v3756_v18, %v3755_v13 }
 0x69c   : > { %5832 = vpush %v3757_v41 }
 0x6cd   : > { %s5833_s13 = spop %5832  ;;  %3768 = sbr.rel (%p4714_p11) target bundleno = 1758 (0x6de), region = 63 }
 0x6ce   : > { %v3759_v45 = vstv %s5833_s13 }
 0x6cf   : > { %v3760_v34 = vadd.f32 %v3759_v45, %v2854_v30 }
 0x6d1   : > { %v3762_v58 = vadd.f32 %v3761_v9, %v3760_v34 }
 0x6d3   : > { %3764 = vst.msk [vmem:[#allocation2] sm:$0x1] %vm3763_vm3, %v3762_v58 }
 0x6da   : > { %v3769_v35 = vld [vmem:[#allocation2] sm:$0x1] }
 0x6db   : > { %v3770_v44 = vmul.f32 1.3286564e-05, %v3769_v35 }
 0x6dd   : > { %3771 = vst.msk [vmem:[#allocation5] sm:$0x1] %vm3763_vm3, %v3770_v44 }
 0x6de PF: > { %3778 = sbr.rel (!%p6037_p5) target bundleno = 1783 (0x6f7), region = 67  ;;  %v3797_v52 = vld [vmem:[%s6824_s9] sm:$0xff] (%p6037_p5)   ;;  %v3801_v29 = vld [vmem:[%s6824_s9 + $0x8] sm:$0xff] (%p6037_p5)   ;;  %v3805_v38 = vld [vmem:[%s6824_s9 + $0x10] sm:$0xff] (%p6037_p5)  }
 0x6df   : > { %s5834_s14 = smul.u32 (%p6037_p5), 168, %s6020_s18  ;;  %v3809_v31 = vld [vmem:[%s6824_s9 + $0x18] sm:$0xff] (%p6037_p5)   ;;  %v3813_v37 = vld [vmem:[%s6824_s9 + $0x20] sm:$0xff] (%p6037_p5)   ;;  %v3817_v50 = vld [vmem:[%s6824_s9 + $0x28] sm:$0xff] (%p6037_p5)  }
 0x6e0   : > { %v3821_v54 = vld [vmem:[%s6824_s9 + $0x30] sm:$0xff] (%p6037_p5)   ;;  %v3825_v62 = vld [vmem:[%s6824_s9 + $0x38] sm:$0xff] (%p6037_p5)   ;;  %v3829_v2 = vld [vmem:[%s6824_s9 + $0x40] sm:$0xff] (%p6037_p5)  }
 0x6e1   : > { %s8372_s17 = scalar_lea.vmem (%p6037_p5), %s8487_s3, %s5834_s14  ;;  %v3833_v21 = vld [vmem:[%s6824_s9 + $0x48] sm:$0xff] (%p6037_p5)   ;;  %v3837_v47 = vld [vmem:[%s6824_s9 + $0x50] sm:$0xff] (%p6037_p5)   ;;  %v3841_v63 = vld [vmem:[%s6824_s9 + $0x58] sm:$0xff] (%p6037_p5)  }
 0x6e2   : > { %3798 = vst [vmem:[%s8372_s17] sm:$0xff] (%p6037_p5), %v3797_v52   ;;  %3802 = vst [vmem:[%s8372_s17 + $0x8] sm:$0xff] (%p6037_p5), %v3801_v29   ;;  %v3845_v20 = vld [vmem:[%s6824_s9 + $0x60] sm:$0xff] (%p6037_p5)   ;;  %v3849_v28 = vld [vmem:[%s6824_s9 + $0x68] sm:$0xff] (%p6037_p5)  }
 0x6e3   : > { %3806 = vst [vmem:[%s8372_s17 + $0x10] sm:$0xff] (%p6037_p5), %v3805_v38   ;;  %3810 = vst [vmem:[%s8372_s17 + $0x18] sm:$0xff] (%p6037_p5), %v3809_v31   ;;  %v3853_v42 = vld [vmem:[%s6824_s9 + $0x70] sm:$0xff] (%p6037_p5)   ;;  %v3857_v23 = vld [vmem:[%s6824_s9 + $0x78] sm:$0xff] (%p6037_p5)  }
 0x6e4   : > { %3814 = vst [vmem:[%s8372_s17 + $0x20] sm:$0xff] (%p6037_p5), %v3813_v37   ;;  %3818 = vst [vmem:[%s8372_s17 + $0x28] sm:$0xff] (%p6037_p5), %v3817_v50   ;;  %v3861_v16 = vld [vmem:[%s6824_s9 + $0x80] sm:$0xff] (%p6037_p5)   ;;  %v3865_v11 = vld [vmem:[%s6824_s9 + $0x88] sm:$0xff] (%p6037_p5)  }
 0x6e5   : > { %3822 = vst [vmem:[%s8372_s17 + $0x30] sm:$0xff] %v3821_v54   ;;  %3826 = vst [vmem:[%s8372_s17 + $0x38] sm:$0xff] %v3825_v62   ;;  %v3869_v40 = vld [vmem:[%s6824_s9 + $0x90] sm:$0xff]   ;;  %v3873_v32 = vld [vmem:[%s6824_s9 + $0x98] sm:$0xff]  }
 0x6e6   : > { %3830 = vst [vmem:[%s8372_s17 + $0x40] sm:$0xff] %v3829_v2   ;;  %3834 = vst [vmem:[%s8372_s17 + $0x48] sm:$0xff] %v3833_v21   ;;  %v3877_v49 = vld [vmem:[%s6824_s9 + $0xa0] sm:$0xff]   ;;  %v3881_v0 = vld [vmem:[%s6824_s9 + $0xa8] sm:$0xff]  }
 0x6e7   : > { %3838 = vst [vmem:[%s8372_s17 + $0x50] sm:$0xff] %v3837_v47   ;;  %3842 = vst [vmem:[%s8372_s17 + $0x58] sm:$0xff] %v3841_v63   ;;  %v3885_v26 = vld [vmem:[%s6824_s9 + $0xb0] sm:$0xff]   ;;  %v3889_v48 = vld [vmem:[%s6824_s9 + $0xb8] sm:$0xff]  }
 0x6e8   : > { %3846 = vst [vmem:[%s8372_s17 + $0x60] sm:$0xff] %v3845_v20   ;;  %3850 = vst [vmem:[%s8372_s17 + $0x68] sm:$0xff] %v3849_v28   ;;  %v3893_v22 = vld [vmem:[%s6824_s9 + $0xc0] sm:$0xff]   ;;  %v3897_v7 = vld [vmem:[%s6824_s9 + $0xc8] sm:$0xff]  }
 0x6e9   : > { %3854 = vst [vmem:[%s8372_s17 + $0x70] sm:$0xff] %v3853_v42   ;;  %3858 = vst [vmem:[%s8372_s17 + $0x78] sm:$0xff] %v3857_v23   ;;  %v3901_v4 = vld [vmem:[%s6824_s9 + $0xd0] sm:$0xff]   ;;  %v3905_v19 = vld [vmem:[%s6824_s9 + $0xd8] sm:$0xff]  }
 0x6ea   : > { %3862 = vst [vmem:[%s8372_s17 + $0x80] sm:$0xff] %v3861_v16   ;;  %3866 = vst [vmem:[%s8372_s17 + $0x88] sm:$0xff] %v3865_v11   ;;  %v3909_v57 = vld [vmem:[%s6824_s9 + $0xe0] sm:$0xff]   ;;  %v3913_v59 = vld [vmem:[%s6824_s9 + $0xe8] sm:$0xff]  }
 0x6eb   : > { %3870 = vst [vmem:[%s8372_s17 + $0x90] sm:$0xff] %v3869_v40   ;;  %3874 = vst [vmem:[%s8372_s17 + $0x98] sm:$0xff] %v3873_v32   ;;  %v3917_v56 = vld [vmem:[%s6824_s9 + $0xf0] sm:$0xff]   ;;  %v3921_v25 = vld [vmem:[%s6824_s9 + $0xf8] sm:$0xff]  }
 0x6ec   : > { %3878 = vst [vmem:[%s8372_s17 + $0xa0] sm:$0xff] %v3877_v49   ;;  %3882 = vst [vmem:[%s8372_s17 + $0x150] sm:$0xff] %v3881_v0   ;;  %v3925_v43 = vld [vmem:[%s6824_s9 + $0x100] sm:$0xff]   ;;  %v3929_v6 = vld [vmem:[%s6824_s9 + $0x108] sm:$0xff]  }
 0x6ed   : > { %3886 = vst [vmem:[%s8372_s17 + $0x158] sm:$0xff] %v3885_v26   ;;  %3890 = vst [vmem:[%s8372_s17 + $0x160] sm:$0xff] %v3889_v48   ;;  %v3933_v12 = vld [vmem:[%s6824_s9 + $0x110] sm:$0xff]   ;;  %v3937_v24 = vld [vmem:[%s6824_s9 + $0x118] sm:$0xff]  }
 0x6ee   : > { %3894 = vst [vmem:[%s8372_s17 + $0x168] sm:$0xff] %v3893_v22   ;;  %3898 = vst [vmem:[%s8372_s17 + $0x170] sm:$0xff] %v3897_v7   ;;  %v3941_v33 = vld [vmem:[%s6824_s9 + $0x120] sm:$0xff]   ;;  %v3945_v46 = vld [vmem:[%s6824_s9 + $0x128] sm:$0xff]  }
 0x6ef   : > { %3902 = vst [vmem:[%s8372_s17 + $0x178] sm:$0xff] %v3901_v4   ;;  %3906 = vst [vmem:[%s8372_s17 + $0x180] sm:$0xff] %v3905_v19   ;;  %v3949_v27 = vld [vmem:[%s6824_s9 + $0x130] sm:$0xff]   ;;  %v3953_v36 = vld [vmem:[%s6824_s9 + $0x138] sm:$0xff]  }
 0x6f0   : > { %3910 = vst [vmem:[%s8372_s17 + $0x188] sm:$0xff] %v3909_v57   ;;  %3914 = vst [vmem:[%s8372_s17 + $0x190] sm:$0xff] %v3913_v59   ;;  %v3957_v1 = vld [vmem:[%s6824_s9 + $0x140] sm:$0xff]   ;;  %v3961_v3 = vld [vmem:[%s6824_s9 + $0x148] sm:$0xff]  }
 0x6f1   : > { %3918 = vst [vmem:[%s8372_s17 + $0x198] sm:$0xff] %v3917_v56   ;;  %3922 = vst [vmem:[%s8372_s17 + $0x1a0] sm:$0xff] %v3921_v25  }
 0x6f2   : > { %3926 = vst [vmem:[%s8372_s17 + $0x1a8] sm:$0xff] %v3925_v43   ;;  %3930 = vst [vmem:[%s8372_s17 + $0x1b0] sm:$0xff] %v3929_v6  }
 0x6f3   : > { %3934 = vst [vmem:[%s8372_s17 + $0x1b8] sm:$0xff] %v3933_v12   ;;  %3938 = vst [vmem:[%s8372_s17 + $0x1c0] sm:$0xff] %v3937_v24  }
 0x6f4   : > { %3942 = vst [vmem:[%s8372_s17 + $0x1c8] sm:$0xff] %v3941_v33   ;;  %3946 = vst [vmem:[%s8372_s17 + $0x1d0] sm:$0xff] %v3945_v46  }
 0x6f5   : > { %3950 = vst [vmem:[%s8372_s17 + $0x1d8] sm:$0xff] %v3949_v27   ;;  %3954 = vst [vmem:[%s8372_s17 + $0x1e0] sm:$0xff] %v3953_v36  }
 0x6f6   : > { %3958 = vst [vmem:[%s8372_s17 + $0x1e8] sm:$0xff] %v3957_v1   ;;  %3962 = vst [vmem:[%s8372_s17 + $0x1f0] sm:$0xff] %v3961_v3  }
 0x6f7 PF: > { %s5978_s8 = smov [#allocation5]  }
 0x6f8   : > { %s4160_s20 = sshll.u32 %s5978_s8, 4  ;;  %s4161_s20 = int_to_ptr.vmem [resolvable:$true] %s4160_s20 }
 0x6f9   : > { %s5923_s21 = scalar_lea.vmem %s4161_s20, 16  ;;  %s5929_s24 = scalar_lea.vmem %s4161_s20, 32 }
 0x6fa   : > { %p5924_p12 = scmp.ne.s32.totalorder %s4161_s20, %s5923_s21  ;;  %p5930_p1 = scmp.lt.s32.totalorder %s4161_s20, %s4161_s20 }
 0x6fb   : > { %p5931_p2 = scmp.lt.s32.totalorder %s5929_s24, %s5923_s21 }
 0x6fc   : > { %p5925_p13 = pnand %p5924_p12, %p102_p3 }
 0x6fd   : > { %p5932_p4 = por %p5931_p2, %p5930_p1 }
 0x6fe   : > { %p5926_p0 = pneg %p5925_p13 }
 0x700   : > { %p5933_p5 = pnand %p5932_p4, %p5926_p0 }
 0x702   : > { %5936 = shalt.err (!%p5933_p5)
}
 0x703   : > { %s5937_s26 = scalar_lea.hbm %s8488_s4, 16 }
 0x704   : > { %p5938_p6 = scmp.ne.s32.totalorder %s8488_s4, %s5937_s26  ;;  %p5943_p9 = scmp.lt.u32.totalorder %s5937_s26, %s8488_s4 }
 0x706   : > { %p5939_p7 = pnand %p5938_p6, %p102_p3 }
 0x708   : > { %p5940_p8 = pneg %p5939_p7 }
 0x70a   : > { %p5945_p10 = pnand %p5943_p9, %p5940_p8 }
 0x70c   : > { %5948 = shalt.err (!%p5945_p10)
}
 0x70d   : > { %5836 = dma.vmem_to_hbm [thread:$0]  (%p102_p3), %s4161_s20, 16, %s8488_s4, [#allocation6]  }
 0x70e   : > { %5962 = dma.done.wait (%p102_p3), [#allocation6], 16  }
 0x70f   : > { %5964 = vsyncadd (%p102_p3), [#allocation6], 4294967280 }
 0x710 PF: > { %p13_p11 = scmp.ge.s32.totalorder %s6023_s19, 4   ;;  %s8505_s15 = smov %s5971_s16 }
 0x711   : > { %s8506_s16 = smov %s6033_s22  ;;  %s8507_s17 = smov %s6023_s19 }
 0x712   :  { %15 = sbr.rel (!%p13_p11) target bundleno = 2 (0x2), region = 158 }
 0x719   :  { %4180 = vsyncpa [#allocation6], 1 }
 0x71a   :  { %4182 = vsyncpa [#allocation6 + $0x1], 1 }

// kernel: id_loss_extractor_forward.3
= control target key start
LH: loop header
LB: loop body
LE: loop exit
PB: predicated region body
PF: predicated region fallthrough
CT: control target
= control target key end

     0   :  { %9 = vsyncpa [#allocation4], 0  ;;  %s15873_s0 = inlined_call_operand.vmem [shape: bf16[4,37632], index: 0, kind: input, shape index: {}]   ;;  %s15874_s1 = inlined_call_operand.hbm [shape: bf16[37632,512], index: 1, kind: input, shape index: {}]   ;;  %s15875_s2 = inlined_call_operand.hbm [shape: f32[1,1], index: 2, kind: output, shape index: {0}]   ;;  %s15876_s3 = inlined_call_operand.hbm [shape: f32[1,1], index: 3, kind: output, shape index: {1}]  }
   0x1   :  { %11 = vsyncpa [#allocation4 + $0x1], 0 }
   0x2   :  { %12 = vsyncpa [#allocation5], 0 }
   0x3   :  { %13 = vsyncpa [#allocation8], 0  ;;  %s14163_s12 = smov 0   ;;  %s14165_s13 = smov 0  }
   0x4   :  { %s14167_s14 = smov 0   ;;  %s14169_s15 = smov 0  }
   0x5 LB: > { %s14182_s16 = sadd.s32 4294967295, %s14133_s15   ;;  %s14185_s17 = sadd.s32 1, %s14133_s15   ;;  %s14133_s15 = sphi %s14169_s15, %s15883_s15   ;;  %s14129_s14 = sphi %s14167_s14, %s15882_s14   ;;  %s14125_s13 = sphi %s14165_s13, %s15881_s13   ;;  %s14121_s12 = sphi %s14163_s12, %s15880_s12  }
   0x6   : > { %s44_s18 = ssub.s32 %s14133_s15, %s14185_s17  ;;  %s47_s19 = sadd.s32 1, %s14129_s14 }
   0x7   : > { %p45_p0 = scmp.eq.s32.totalorder %s44_s18, 0  ;;  %p54_p1 = scmp.ne.s32.totalorder %s14129_s14, %s14125_s13 }
   0x8   : > { %p55_p2 = scmp.eq.s32.totalorder %s14133_s15, 0  ;;  %p60_p3 = scmp.ne.s32.totalorder %s14125_s13, %s14121_s12 }
   0x9   : > { %s14195_s20 = scalar_select %p45_p0, %s14129_s14, %s47_s19  }
   0xa   : > { %p56_p4 = por %p55_p2, %p54_p1  ;;  %p61_p5 = scmp.eq.s32.totalorder %s14182_s16, 0 }
   0xb   : > { %p11937_p6 = scmp.lt.s32.totalorder %s14133_s15, 7  ;;  %s129_s22 = sand.u32 1, %s14129_s14  }
   0xc   : > { %p14199_p7 = por %p61_p5, %p60_p3  ;;  %s11921_s23 = smul.u32 10752, %s129_s22 }
   0xd   : > { %s11760_s24 = smul.u32 172032, %s14133_s15  ;;  %p14205_p8 = pnand %p11937_p6, %p56_p4 }
   0xe   : > { %s133_s29 = scalar_lea.vmem [#allocation3], %s11921_s23  ;;  %s14217_s4 = scalar_lea.sflag [#allocation4], %s129_s22 }
   0xf   : > { %s14212_s28 = scalar_lea.hbm %s15874_s1, %s11760_s24  ;;  %s141_s30 = sshll.u32 %s133_s29, 4  ;;  %s14214_s30 = int_to_ptr.vmem [resolvable:$true] %s141_s30 }
  0x10   : > { %s14009_s5 = scalar_lea.hbm %s14212_s28, 172032  ;;  %p14011_p11 = pneg %p14205_p8 }
  0x11   : > { %p14010_p10 = scmp.ne.s32.totalorder %s14212_s28, %s14009_s5  ;;  %s14014_s8 = scalar_lea.hbm %s15874_s1, 1204224 }
  0x12   : > { %p14015_p0 = scmp.lt.u32.totalorder %s14212_s28, %s15874_s1  ;;  %p14016_p1 = scmp.lt.u32.totalorder %s14014_s8, %s14009_s5 }
  0x13   : > { %p14012_p12 = pnand %p14011_p11, %p14010_p10  ;;  %p14018_p3 = scmp.lt.u32.totalorder %s14009_s5, %s14212_s28 }
  0x14   : > { %p14017_p2 = por %p14016_p1, %p14015_p0 }
  0x15   : > { %p14013_p13 = pneg %p14012_p12 }
  0x16   : > { %p14019_p4 = por %p14018_p3, %p14017_p2 }
  0x18   : > { %p14020_p5 = pnand %p14019_p4, %p14013_p13 }
  0x1a   : > { %14023 = shalt.err (!%p14020_p5)
}
  0x1b   : > { %s14024_s11 = scalar_lea.vmem %s14214_s30, 172032  ;;  %s14135_s12 = smov [#allocation3]  }
  0x1c   : > { %p14025_p6 = scmp.ne.s32.totalorder %s14214_s30, %s14024_s11  ;;  %s14029_s18 = sshll.u32 %s14135_s12, 4  ;;  %s14030_s18 = int_to_ptr.vmem [resolvable:$false] %s14029_s18 }
  0x1d   : > { %s14031_s19 = scalar_lea.vmem %s14030_s18, 344064  ;;  %p14032_p9 = scmp.lt.s32.totalorder %s14214_s30, %s14030_s18 }
  0x1e   : > { %p14027_p10 = pnand %p14025_p6, %p14011_p11  ;;  %p14033_p0 = scmp.lt.s32.totalorder %s14031_s19, %s14024_s11 }
  0x20   : > { %p14028_p12 = pneg %p14027_p10  ;;  %p14034_p1 = por %p14033_p0, %p14032_p9 }
  0x22   : > { %p14035_p2 = pnand %p14034_p1, %p14028_p12 }
  0x24   : > { %14038 = shalt.err (!%p14035_p2)
}
  0x25   : > { %s14136_s22 = smov 256   ;;  %s14137_s23 = smov 16  }
  0x26   : > { %11936 = dma.hbm_to_vmem [thread:$0]  (!%p14205_p8), %s14212_s28, 172032, %s14214_s30, %s14217_s4, %s14136_s22, %s14136_s22, %s14137_s23  }
  0x27   : > { %p149_p11 = scmp.lt.s32.totalorder %s14133_s15, 8  ;;  %p15879_p13 = scmp.ge.s32.totalorder %s14133_s15, 1 }
  0x29   : > { %p150_p3 = pnand %p15879_p13, %p149_p11 }
  0x2a   : > { %s155_s24 = sand.u32 (!%p150_p3), 1, %s14125_s13  }
  0x2b   : > { %153 = sbr.rel (%p150_p3) target bundleno = 2023 (0x7e7), region = 28  ;;  %s156_s27 = scalar_lea.sflag (!%p150_p3), [#allocation4], %s155_s24 }
  0x2c   : > { %s11922_s26 = smul.u32 (!%p150_p3), 10752, %s155_s24 }
  0x2e   : > { %s14249_s29 = scalar_lea.vmem (!%p150_p3), [#allocation3], %s11922_s26 }
  0x32   : > { %14108 = dma.done.wait (%p14199_p7), %s156_s27, 172032  }
  0x33   : > { %14110 = vsyncadd (%p14199_p7), %s156_s27, 4294795264  ;;  %p10402_p9 = scmp.ne.s32.totalorder %s14182_s16, 0 }
  0x34   : > { %v14138_v0 = vmov (!%p10402_p9), 0.0  }
  0x35   : > { %181 = sbr.rel (%p10402_p9) target bundleno = 60 (0x3c), region = 36  ;;  %182 = vst [vmem:[#allocation2] sm:$0xff] (!%p10402_p9), %v14138_v0  ;;  %183 = vst [vmem:[#allocation2 + $0x8] sm:$0xff] (!%p10402_p9), %v14138_v0 }
  0x3c PF: > { %v11981_v1 = vld [vmem:[%s14249_s29 + $0x4] ss:$16 sps:$4 sm:$0xff]   ;;  %v11983_v2 = vld [vmem:[%s14249_s29 + $0xc] ss:$16 sps:$4 sm:$0xff]   ;;  %v11985_v3 = vld [vmem:[%s14249_s29] ss:$16 sps:$4 sm:$0xff]   ;;  %v1561_v39 = vlaneseq }
  0x3d   : > { %8497 = vmatprep.subr.bf16.mxu0 %v11981_v1  ;;  %v11986_v4 = vld [vmem:[%s14249_s29 + $0x8] ss:$16 sps:$4 sm:$0xff]   ;;  %9358 = vmatprep.subr.bf16.mxu1 %v11983_v2  ;;  %v11987_v5 = vld [vmem:[%s14249_s29 + $0x24] ss:$16 sps:$4 sm:$0xff]   ;;  %v11989_v6 = vld [vmem:[%s14249_s29 + $0x2c] ss:$16 sps:$4 sm:$0xff]  }
  0x3e   : > { %8498 = vmatpush1.bf16.msra.mxu0 %v11985_v3  ;;  %9359 = vmatpush1.bf16.msra.mxu1 %v11986_v4  ;;  %v11991_v7 = vld [vmem:[%s14249_s29 + $0x20] ss:$16 sps:$4 sm:$0xff]   ;;  %v11992_v8 = vld [vmem:[%s14249_s29 + $0x28] ss:$16 sps:$4 sm:$0xff]   ;;  %v11993_v9 = vld [vmem:[%s14249_s29 + $0x44] ss:$16 sps:$4 sm:$0xff]  }
  0x3f   : > { %8499 = vmatprep.subr.bf16.mxu0 %v11987_v5  ;;  %9360 = vmatprep.subr.bf16.mxu1 %v11989_v6  ;;  %v11995_v10 = vld [vmem:[%s14249_s29 + $0x4c] ss:$16 sps:$4 sm:$0xff]   ;;  %v11997_v11 = vld [vmem:[%s14249_s29 + $0x40] ss:$16 sps:$4 sm:$0xff]   ;;  %v11998_v12 = vld [vmem:[%s14249_s29 + $0x48] ss:$16 sps:$4 sm:$0xff]  }
  0x40   : > { %v11999_v13 = vld [vmem:[%s14249_s29 + $0x64] ss:$16 sps:$4 sm:$0xff]   ;;  %v12001_v14 = vld [vmem:[%s14249_s29 + $0x6c] ss:$16 sps:$4 sm:$0xff]   ;;  %v12003_v15 = vld [vmem:[%s14249_s29 + $0x60] ss:$16 sps:$4 sm:$0xff]  }
  0x41   : > { %v12004_v16 = vld [vmem:[%s14249_s29 + $0x68] ss:$16 sps:$4 sm:$0xff]   ;;  %v12005_v17 = vld [vmem:[%s14249_s29 + $0x84] ss:$16 sps:$4 sm:$0xff]   ;;  %v12007_v18 = vld [vmem:[%s14249_s29 + $0x8c] ss:$16 sps:$4 sm:$0xff]  }
  0x42   : > { %8500 = vmatpush1.bf16.msra.mxu0 %v11991_v7  ;;  %9361 = vmatpush1.bf16.msra.mxu1 %v11992_v8  ;;  %v12009_v19 = vld [vmem:[%s14249_s29 + $0x80] ss:$16 sps:$4 sm:$0xff]   ;;  %v12010_v20 = vld [vmem:[%s14249_s29 + $0x88] ss:$16 sps:$4 sm:$0xff]   ;;  %v12011_v21 = vld [vmem:[%s14249_s29 + $0xa4] ss:$16 sps:$4 sm:$0xff]  }
  0x43   : > { %8501 = vmatprep.subr.bf16.mxu0 %v11993_v9  ;;  %9362 = vmatprep.subr.bf16.mxu1 %v11995_v10  ;;  %v12013_v22 = vld [vmem:[%s14249_s29 + $0xac] ss:$16 sps:$4 sm:$0xff]   ;;  %v12015_v23 = vld [vmem:[%s14249_s29 + $0xa0] ss:$16 sps:$4 sm:$0xff]   ;;  %v12016_v24 = vld [vmem:[%s14249_s29 + $0xa8] ss:$16 sps:$4 sm:$0xff]  }
  0x44   : > { %v12017_v25 = vld [vmem:[%s14249_s29 + $0xc4] ss:$16 sps:$4 sm:$0xff]   ;;  %v12019_v26 = vld [vmem:[%s14249_s29 + $0xcc] ss:$16 sps:$4 sm:$0xff]   ;;  %v12021_v27 = vld [vmem:[%s14249_s29 + $0xc0] ss:$16 sps:$4 sm:$0xff]  }
  0x45   : > { %v12022_v28 = vld [vmem:[%s14249_s29 + $0xc8] ss:$16 sps:$4 sm:$0xff]   ;;  %v12023_v29 = vld [vmem:[%s14249_s29 + $0xe4] ss:$16 sps:$4 sm:$0xff]   ;;  %v12025_v30 = vld [vmem:[%s14249_s29 + $0xec] ss:$16 sps:$4 sm:$0xff]  }
  0x46   : > { %8502 = vmatpush1.bf16.msra.mxu0 %v11997_v11  ;;  %9363 = vmatpush1.bf16.msra.mxu1 %v11998_v12  ;;  %v12027_v31 = vld [vmem:[%s14249_s29 + $0xe0] ss:$16 sps:$4 sm:$0xff]   ;;  %v12028_v32 = vld [vmem:[%s14249_s29 + $0xe8] ss:$16 sps:$4 sm:$0xff]   ;;  %v12029_v33 = vld [vmem:[%s14249_s29 + $0x104] ss:$16 sps:$4 sm:$0xff]  }
  0x47   : > { %8503 = vmatprep.subr.bf16.mxu0 %v11999_v13  ;;  %9364 = vmatprep.subr.bf16.mxu1 %v12001_v14  ;;  %v12031_v34 = vld [vmem:[%s14249_s29 + $0x10c] ss:$16 sps:$4 sm:$0xff]   ;;  %s184_s15 = smul.u32 5376, %s14182_s16  ;;  %v12033_v35 = vld [vmem:[%s14249_s29 + $0x100] ss:$16 sps:$4 sm:$0xff]   ;;  %v14296_v44 = vshrl.u32 %v1561_v39, 7 }
  0x48   : > { %v12034_v36 = vld [vmem:[%s14249_s29 + $0x108] ss:$16 sps:$4 sm:$0xff]   ;;  %v14139_v37 = vmov 1983009808   ;;  %v12035_v40 = vld [vmem:[%s14249_s29 + $0x124] ss:$16 sps:$4 sm:$0xff]  }
  0x49   : > { %v1559_v38 = vunpack.c.l.s4 %v14139_v37  ;;  %v12037_v41 = vld [vmem:[%s14249_s29 + $0x12c] ss:$16 sps:$4 sm:$0xff]   ;;  %s185_s21 = sshra.s32 %s184_s15, 7  ;;  %v12039_v42 = vld [vmem:[%s14249_s29 + $0x120] ss:$16 sps:$4 sm:$0xff]   ;;  %p11749_p7 = scmp.ne.s32.totalorder %s14182_s16, 6 }
  0x4a   : > { %8504 = vmatpush1.bf16.msra.mxu0 %v12003_v15  ;;  %9365 = vmatpush1.bf16.msra.mxu1 %v12004_v16  ;;  %v12040_v45 = vld [vmem:[%s14249_s29 + $0x128] ss:$16 sps:$4 sm:$0xff]   ;;  %v12041_v46 = vld [vmem:[%s14249_s29 + $0x144] ss:$16 sps:$4 sm:$0xff]   ;;  %s10403_s25 = sshll.u32 %s185_s21, 1  ;;  %vm10245_vm0 = vcmask (!%p11749_p7), 1043456  }
  0x4b   : > { %8505 = vmatprep.subr.bf16.mxu0 %v12005_v17  ;;  %9366 = vmatprep.subr.bf16.mxu1 %v12007_v18  ;;  %v1560_v43 = vunpack.c.0.s8 %v1559_v38  ;;  %v12043_v47 = vld [vmem:[%s14249_s29 + $0x14c] ss:$16 sps:$4 sm:$0xff]   ;;  %v12045_v48 = vld [vmem:[%s14249_s29 + $0x140] ss:$16 sps:$4 sm:$0xff]   ;;  %v12046_v49 = vld [vmem:[%s14249_s29 + $0x148] ss:$16 sps:$4 sm:$0xff]   ;;  %s14306_s4 = scalar_lea.vmem %s15873_s0, %s10403_s25 }
  0x4c   : > { %v12047_v51 = vld [vmem:[%s14249_s29 + $0x164] ss:$16 sps:$4 sm:$0xff]   ;;  %v12049_v52 = vld [vmem:[%s14249_s29 + $0x16c] ss:$16 sps:$4 sm:$0xff]   ;;  %v12051_v54 = vld [vmem:[%s14249_s29 + $0x160] ss:$16 sps:$4 sm:$0xff]  }
  0x4d   : > { %v14309_v50 = vsub.s32 %v1560_v43, %v14296_v44  ;;  %v189_v53 = vld [vmem:[%s14306_s4] sm:$0xff]  ;;  %v12052_v56 = vld [vmem:[%s14249_s29 + $0x168] ss:$16 sps:$4 sm:$0xff]   ;;  %v12055_v58 = vld [vmem:[%s14249_s29 + $0x18c] ss:$16 sps:$4 sm:$0xff]   ;;  %vm10284_vm1 = vcmask (!%p11749_p7), 1041408  }
  0x4e   : > { %8506 = vmatpush1.bf16.msra.mxu0 %v12009_v19  ;;  %9367 = vmatpush1.bf16.msra.mxu1 %v12010_v20  ;;  %v12053_v57 = vld [vmem:[%s14249_s29 + $0x184] ss:$16 sps:$4 sm:$0xff]   ;;  %v12057_v60 = vld [vmem:[%s14249_s29 + $0x180] ss:$16 sps:$4 sm:$0xff]   ;;  %v12058_v61 = vld [vmem:[%s14249_s29 + $0x188] ss:$16 sps:$4 sm:$0xff]   ;;  %v1557_v8 = vcombine.high %v189_v53, %v189_v53 }
  0x4f   : > { %8507 = vmatprep.subr.bf16.mxu0 %v12011_v21  ;;  %9368 = vmatprep.subr.bf16.mxu1 %v12013_v22  ;;  %v1564_v55 = vrot.slane %v189_v53, %v14309_v50  ;;  %v12059_v62 = vld [vmem:[%s14249_s29 + $0x1a4] ss:$16 sps:$4 sm:$0xff]   ;;  %v12061_v63 = vld [vmem:[%s14249_s29 + $0x1ac] ss:$16 sps:$4 sm:$0xff]   ;;  %v12063_v0 = vld [vmem:[%s14249_s29 + $0x1a0] ss:$16 sps:$4 sm:$0xff]  }
  0x50   : > { %v12064_v1 = vld [vmem:[%s14249_s29 + $0x1a8] ss:$16 sps:$4 sm:$0xff]   ;;  %v12065_v2 = vld [vmem:[%s14249_s29 + $0x1c4] ss:$16 sps:$4 sm:$0xff]   ;;  %v12067_v3 = vld [vmem:[%s14249_s29 + $0x1cc] ss:$16 sps:$4 sm:$0xff]   ;;  %v14336_v13 = vrot.slane %v1557_v8, %v14309_v50 }
  0x51   : > { %v1572_v59 = vcombine.high %v1564_v55, %v1564_v55  ;;  %v12069_v4 = vld [vmem:[%s14249_s29 + $0x1c0] ss:$16 sps:$4 sm:$0xff]   ;;  %v12070_v5 = vld [vmem:[%s14249_s29 + $0x1c8] ss:$16 sps:$4 sm:$0xff]   ;;  %v12071_v6 = vld [vmem:[%s14249_s29 + $0x1e4] ss:$16 sps:$4 sm:$0xff]  }
  0x52   : > { %8508 = vmatpush1.bf16.msra.mxu0 %v12015_v23  ;;  %9369 = vmatpush1.bf16.msra.mxu1 %v12016_v24  ;;  %v12073_v7 = vld [vmem:[%s14249_s29 + $0x1ec] ss:$16 sps:$4 sm:$0xff]   ;;  %v12075_v9 = vld [vmem:[%s14249_s29 + $0x1e0] ss:$16 sps:$4 sm:$0xff]   ;;  %v12076_v10 = vld [vmem:[%s14249_s29 + $0x1e8] ss:$16 sps:$4 sm:$0xff]   ;;  %v1573_v18 = vcombine.high %v14336_v13, %v14336_v13 }
  0x53   : > { %8509 = vmatprep.subr.bf16.mxu0 %v12017_v25  ;;  %9370 = vmatprep.subr.bf16.mxu1 %v12019_v26  ;;  %v12080_v11 = vld [vmem:[%s14249_s29 + $0x204] ss:$16 sps:$4 sm:$0xff]   ;;  %v12083_v12 = vld [vmem:[%s14249_s29 + $0x20c] ss:$16 sps:$4 sm:$0xff]   ;;  %v12078_v14 = vld [vmem:[%s14249_s29 + $0x200] ss:$16 sps:$4 sm:$0xff]  }
  0x54   : > { %8529 = vmatprep.mubr.bf16.mxu0 %v1572_v59  ;;  %9390 = vmatprep.mubr.bf16.mxu1 %v1572_v59  ;;  %v12081_v15 = vld [vmem:[%s14249_s29 + $0x208] ss:$16 sps:$4 sm:$0xff]   ;;  %v12086_v16 = vld [vmem:[%s14249_s29 + $0x224] ss:$16 sps:$4 sm:$0xff]   ;;  %v12089_v17 = vld [vmem:[%s14249_s29 + $0x22c] ss:$16 sps:$4 sm:$0xff]  }
  0x55   : > { %v12084_v19 = vld [vmem:[%s14249_s29 + $0x220] ss:$16 sps:$4 sm:$0xff]   ;;  %v12087_v20 = vld [vmem:[%s14249_s29 + $0x228] ss:$16 sps:$4 sm:$0xff]   ;;  %v12092_v21 = vld [vmem:[%s14249_s29 + $0x244] ss:$16 sps:$4 sm:$0xff]  }
  0x56   : > { %8510 = vmatpush1.bf16.msra.mxu0 %v12021_v27  ;;  %9371 = vmatpush1.bf16.msra.mxu1 %v12022_v28  ;;  %v12095_v22 = vld [vmem:[%s14249_s29 + $0x24c] ss:$16 sps:$4 sm:$0xff]   ;;  %v12090_v23 = vld [vmem:[%s14249_s29 + $0x240] ss:$16 sps:$4 sm:$0xff]   ;;  %v12093_v24 = vld [vmem:[%s14249_s29 + $0x248] ss:$16 sps:$4 sm:$0xff]  }
  0x57   : > { %8511 = vmatprep.subr.bf16.mxu0 %v12023_v29  ;;  %9372 = vmatprep.subr.bf16.mxu1 %v12025_v30  ;;  %v12098_v25 = vld [vmem:[%s14249_s29 + $0x264] ss:$16 sps:$4 sm:$0xff]   ;;  %v12101_v26 = vld [vmem:[%s14249_s29 + $0x26c] ss:$16 sps:$4 sm:$0xff]   ;;  %v12096_v27 = vld [vmem:[%s14249_s29 + $0x260] ss:$16 sps:$4 sm:$0xff]  }
  0x58   : > { %v12099_v28 = vld [vmem:[%s14249_s29 + $0x268] ss:$16 sps:$4 sm:$0xff]   ;;  %v12104_v29 = vld [vmem:[%s14249_s29 + $0x284] ss:$16 sps:$4 sm:$0xff]   ;;  %v12107_v30 = vld [vmem:[%s14249_s29 + $0x28c] ss:$16 sps:$4 sm:$0xff]  }
  0x59   : > { %v12116_v37 = vld [vmem:[%s14249_s29 + $0x2c4] ss:$16 sps:$4 sm:$0xff]   ;;  %v12119_v38 = vld [vmem:[%s14249_s29 + $0x2cc] ss:$16 sps:$4 sm:$0xff]   ;;  %v12114_v39 = vld [vmem:[%s14249_s29 + $0x2c0] ss:$16 sps:$4 sm:$0xff]  }
  0x5a   : > { %8512 = vmatpush1.bf16.msra.mxu0 %v12027_v31  ;;  %9373 = vmatpush1.bf16.msra.mxu1 %v12028_v32  ;;  %v12102_v31 = vld [vmem:[%s14249_s29 + $0x280] ss:$16 sps:$4 sm:$0xff]   ;;  %v12105_v32 = vld [vmem:[%s14249_s29 + $0x288] ss:$16 sps:$4 sm:$0xff]   ;;  %v12146_v59 = vld [vmem:[%s14249_s29 + $0x364] ss:$16 sps:$4 sm:$0xff]  }
  0x5b   : > { %8513 = vmatprep.subr.bf16.mxu0 %v12029_v33  ;;  %9374 = vmatprep.subr.bf16.mxu1 %v12031_v34  ;;  %v12110_v33 = vld [vmem:[%s14249_s29 + $0x2a4] ss:$16 sps:$4 sm:$0xff]   ;;  %v12113_v34 = vld [vmem:[%s14249_s29 + $0x2ac] ss:$16 sps:$4 sm:$0xff]   ;;  %v12120_v43 = vld [vmem:[%s14249_s29 + $0x2e0] ss:$16 sps:$4 sm:$0xff]  }
  0x5c   : > { %v12132_v53 = vld [vmem:[%s14249_s29 + $0x320] ss:$16 sps:$4 sm:$0xff]   ;;  %v12167_v8 = vld [vmem:[%s14249_s29 + $0x3cc] ss:$16 sps:$4 sm:$0xff]   ;;  %vm10303_vm2 = vcmask (!%p11749_p7), 0  }
  0x5e   : > { %8514 = vmatpush1.bf16.msra.mxu0 %v12033_v35  ;;  %9375 = vmatpush1.bf16.msra.mxu1 %v12034_v36  ;;  %v12108_v35 = vld [vmem:[%s14249_s29 + $0x2a0] ss:$16 sps:$4 sm:$0xff]   ;;  %v12111_v36 = vld [vmem:[%s14249_s29 + $0x2a8] ss:$16 sps:$4 sm:$0xff]  }
  0x5f   : > { %8515 = vmatprep.subr.bf16.mxu0 %v12035_v40  ;;  %9376 = vmatprep.subr.bf16.mxu1 %v12037_v41  ;;  %v12117_v40 = vld [vmem:[%s14249_s29 + $0x2c8] ss:$16 sps:$4 sm:$0xff]   ;;  %v12122_v41 = vld [vmem:[%s14249_s29 + $0x2e4] ss:$16 sps:$4 sm:$0xff]  }
  0x62   : > { %8516 = vmatpush1.bf16.msra.mxu0 %v12039_v42  ;;  %9377 = vmatpush1.bf16.msra.mxu1 %v12040_v45  ;;  %v12125_v42 = vld [vmem:[%s14249_s29 + $0x2ec] ss:$16 sps:$4 sm:$0xff]   ;;  %v12123_v45 = vld [vmem:[%s14249_s29 + $0x2e8] ss:$16 sps:$4 sm:$0xff]  }
  0x63   : > { %8517 = vmatprep.subr.bf16.mxu0 %v12041_v46  ;;  %9378 = vmatprep.subr.bf16.mxu1 %v12043_v47  ;;  %v12128_v46 = vld [vmem:[%s14249_s29 + $0x304] ss:$16 sps:$4 sm:$0xff]   ;;  %v12131_v47 = vld [vmem:[%s14249_s29 + $0x30c] ss:$16 sps:$4 sm:$0xff]  }
  0x66   : > { %8518 = vmatpush1.bf16.msra.mxu0 %v12045_v48  ;;  %9379 = vmatpush1.bf16.msra.mxu1 %v12046_v49  ;;  %v12126_v48 = vld [vmem:[%s14249_s29 + $0x300] ss:$16 sps:$4 sm:$0xff]   ;;  %v12129_v49 = vld [vmem:[%s14249_s29 + $0x308] ss:$16 sps:$4 sm:$0xff]  }
  0x67   : > { %8519 = vmatprep.subr.bf16.mxu0 %v12047_v51  ;;  %9380 = vmatprep.subr.bf16.mxu1 %v12049_v52  ;;  %v12134_v51 = vld [vmem:[%s14249_s29 + $0x324] ss:$16 sps:$4 sm:$0xff]   ;;  %v12137_v52 = vld [vmem:[%s14249_s29 + $0x32c] ss:$16 sps:$4 sm:$0xff]  }
  0x6a   : > { %8520 = vmatpush1.bf16.msra.mxu0 %v12051_v54  ;;  %9381 = vmatpush1.bf16.msra.mxu1 %v12052_v56  ;;  %v12135_v54 = vld [vmem:[%s14249_s29 + $0x328] ss:$16 sps:$4 sm:$0xff]   ;;  %v12143_v56 = vld [vmem:[%s14249_s29 + $0x34c] ss:$16 sps:$4 sm:$0xff]  }
  0x6b   : > { %8521 = vmatprep.subr.bf16.mxu0 %v12053_v57  ;;  %9382 = vmatprep.subr.bf16.mxu1 %v12055_v58  ;;  %v12138_v57 = vld [vmem:[%s14249_s29 + $0x340] ss:$16 sps:$4 sm:$0xff]   ;;  %v12141_v58 = vld [vmem:[%s14249_s29 + $0x348] ss:$16 sps:$4 sm:$0xff]  }
  0x6e   : > { %8522 = vmatpush1.bf16.msra.mxu0 %v12057_v60  ;;  %9383 = vmatpush1.bf16.msra.mxu1 %v12058_v61  ;;  %v12149_v60 = vld [vmem:[%s14249_s29 + $0x36c] ss:$16 sps:$4 sm:$0xff]   ;;  %v12144_v61 = vld [vmem:[%s14249_s29 + $0x360] ss:$16 sps:$4 sm:$0xff]  }
  0x6f   : > { %8523 = vmatprep.subr.bf16.mxu0 %v12059_v62  ;;  %9384 = vmatprep.subr.bf16.mxu1 %v12061_v63  ;;  %v12147_v62 = vld [vmem:[%s14249_s29 + $0x368] ss:$16 sps:$4 sm:$0xff]   ;;  %v12152_v63 = vld [vmem:[%s14249_s29 + $0x384] ss:$16 sps:$4 sm:$0xff]  }
  0x72   : > { %8524 = vmatpush1.bf16.msra.mxu0 %v12063_v0  ;;  %9385 = vmatpush1.bf16.msra.mxu1 %v12064_v1  ;;  %v12155_v0 = vld [vmem:[%s14249_s29 + $0x38c] ss:$16 sps:$4 sm:$0xff]   ;;  %v12150_v1 = vld [vmem:[%s14249_s29 + $0x380] ss:$16 sps:$4 sm:$0xff]  }
  0x73   : > { %8525 = vmatprep.subr.bf16.mxu0 %v12065_v2  ;;  %9386 = vmatprep.subr.bf16.mxu1 %v12067_v3  ;;  %v12153_v2 = vld [vmem:[%s14249_s29 + $0x388] ss:$16 sps:$4 sm:$0xff]   ;;  %v12158_v3 = vld [vmem:[%s14249_s29 + $0x3a4] ss:$16 sps:$4 sm:$0xff]  }
  0x76   : > { %8526 = vmatpush1.bf16.msra.mxu0 %v12069_v4  ;;  %9387 = vmatpush1.bf16.msra.mxu1 %v12070_v5  ;;  %v12161_v4 = vld [vmem:[%s14249_s29 + $0x3ac] ss:$16 sps:$4 sm:$0xff]   ;;  %v12156_v5 = vld [vmem:[%s14249_s29 + $0x3a0] ss:$16 sps:$4 sm:$0xff]  }
  0x77   : > { %8527 = vmatprep.subr.bf16.mxu0 %v12071_v6  ;;  %9388 = vmatprep.subr.bf16.mxu1 %v12073_v7  ;;  %v12159_v6 = vld [vmem:[%s14249_s29 + $0x3a8] ss:$16 sps:$4 sm:$0xff]   ;;  %v12164_v7 = vld [vmem:[%s14249_s29 + $0x3c4] ss:$16 sps:$4 sm:$0xff]  }
  0x7a   : > { %8528 = vmatpush1.bf16.msra.mxu0 %v12075_v9  ;;  %9389 = vmatpush1.bf16.msra.mxu1 %v12076_v10  ;;  %v12162_v9 = vld [vmem:[%s14249_s29 + $0x3c0] ss:$16 sps:$4 sm:$0xff]   ;;  %v12165_v10 = vld [vmem:[%s14249_s29 + $0x3c8] ss:$16 sps:$4 sm:$0xff]  }
  0x7b   : > { %8538 = vmatprep.subr.bf16.mxu0 %v12080_v11  ;;  %9399 = vmatprep.subr.bf16.mxu1 %v12083_v12  ;;  %v12170_v11 = vld [vmem:[%s14249_s29 + $0x3e4] ss:$16 sps:$4 sm:$0xff]   ;;  %v12173_v12 = vld [vmem:[%s14249_s29 + $0x3ec] ss:$16 sps:$4 sm:$0xff]  }
  0x7d   : > { %8530 = vmatmul.mubr.bf16.vlgmr.msra.gmra.mrb[0].mxu0 %v1564_v55  ;;  %9391 = vmatmul.mubr.bf16.vlgmr.msra.gmra.mrb[0].mxu1 %v1564_v55  ;;  %v12140_v55 = vld [vmem:[%s14249_s29 + $0x344] ss:$16 sps:$4 sm:$0xff]  }
  0x7e   : > { %8539 = vmatpush1.bf16.msra.mxu0 %v12078_v14  ;;  %9400 = vmatpush1.bf16.msra.mxu1 %v12081_v15  ;;  %v12168_v14 = vld [vmem:[%s14249_s29 + $0x3e0] ss:$16 sps:$4 sm:$0xff]   ;;  %v12171_v15 = vld [vmem:[%s14249_s29 + $0x3e8] ss:$16 sps:$4 sm:$0xff]  }
  0x7f   : > { %8540 = vmatprep.subr.bf16.mxu0 %v12086_v16  ;;  %9401 = vmatprep.subr.bf16.mxu1 %v12089_v17  ;;  %v12176_v16 = vld [vmem:[%s14249_s29 + $0x404] ss:$16 sps:$4 sm:$0xff]   ;;  %v12179_v17 = vld [vmem:[%s14249_s29 + $0x40c] ss:$16 sps:$4 sm:$0xff]  }
  0x80   : > { %8570 = vmatprep.mubr.bf16.mxu0 %v1573_v18  ;;  %9431 = vmatprep.mubr.bf16.mxu1 %v1573_v18  ;;  %v12174_v18 = vld [vmem:[%s14249_s29 + $0x400] ss:$16 sps:$4 sm:$0xff]  }
  0x82   : > { %8541 = vmatpush1.bf16.msra.mxu0 %v12084_v19  ;;  %9402 = vmatpush1.bf16.msra.mxu1 %v12087_v20  ;;  %v12177_v19 = vld [vmem:[%s14249_s29 + $0x408] ss:$16 sps:$4 sm:$0xff]  }
  0x83   : > { %8542 = vmatprep.subr.bf16.mxu0 %v12092_v21  ;;  %9403 = vmatprep.subr.bf16.mxu1 %v12095_v22  ;;  %v14407_v20 = vld [vmem:[%s14306_s4 + $0x8] sm:$0xff]  ;;  %v12182_v21 = vld [vmem:[%s14249_s29 + $0x424] ss:$16 sps:$4 sm:$0xff]  }
  0x84   : > { %v12185_v22 = vld [vmem:[%s14249_s29 + $0x42c] ss:$16 sps:$4 sm:$0xff]  }
  0x86   : > { %8543 = vmatpush1.bf16.msra.mxu0 %v12090_v23  ;;  %9404 = vmatpush1.bf16.msra.mxu1 %v12093_v24  ;;  %v14413_v23 = vrot.slane %v14407_v20, %v14309_v50 }
  0x87   : > { %8544 = vmatprep.subr.bf16.mxu0 %v12098_v25  ;;  %9405 = vmatprep.subr.bf16.mxu1 %v12101_v26  ;;  %v12180_v25 = vld [vmem:[%s14249_s29 + $0x420] ss:$16 sps:$4 sm:$0xff]   ;;  %v12183_v26 = vld [vmem:[%s14249_s29 + $0x428] ss:$16 sps:$4 sm:$0xff]  }
  0x88   : > { %v1589_v24 = vcombine.high %v14413_v23, %v14413_v23 }
  0x8a   : > { %8545 = vmatpush1.bf16.msra.mxu0 %v12096_v27  ;;  %9406 = vmatpush1.bf16.msra.mxu1 %v12099_v28  ;;  %v12188_v27 = vld [vmem:[%s14249_s29 + $0x444] ss:$16 sps:$4 sm:$0xff]   ;;  %v12191_v28 = vld [vmem:[%s14249_s29 + $0x44c] ss:$16 sps:$4 sm:$0xff]  }
  0x8b   : > { %8546 = vmatprep.subr.bf16.mxu0 %v12104_v29  ;;  %9407 = vmatprep.subr.bf16.mxu1 %v12107_v30  ;;  %v12189_v29 = vld [vmem:[%s14249_s29 + $0x448] ss:$16 sps:$4 sm:$0xff]   ;;  %v12194_v30 = vld [vmem:[%s14249_s29 + $0x464] ss:$16 sps:$4 sm:$0xff]  }
  0x8e   : > { %8547 = vmatpush1.bf16.msra.mxu0 %v12102_v31  ;;  %9408 = vmatpush1.bf16.msra.mxu1 %v12105_v32  ;;  %v12197_v31 = vld [vmem:[%s14249_s29 + $0x46c] ss:$16 sps:$4 sm:$0xff]   ;;  %v12192_v32 = vld [vmem:[%s14249_s29 + $0x460] ss:$16 sps:$4 sm:$0xff]  }
  0x8f   : > { %8548 = vmatprep.subr.bf16.mxu0 %v12110_v33  ;;  %9409 = vmatprep.subr.bf16.mxu1 %v12113_v34  ;;  %v12195_v33 = vld [vmem:[%s14249_s29 + $0x468] ss:$16 sps:$4 sm:$0xff]   ;;  %v12200_v34 = vld [vmem:[%s14249_s29 + $0x484] ss:$16 sps:$4 sm:$0xff]  }
  0x92   : > { %8549 = vmatpush1.bf16.msra.mxu0 %v12108_v35  ;;  %9410 = vmatpush1.bf16.msra.mxu1 %v12111_v36  ;;  %v12203_v35 = vld [vmem:[%s14249_s29 + $0x48c] ss:$16 sps:$4 sm:$0xff]   ;;  %v12198_v36 = vld [vmem:[%s14249_s29 + $0x480] ss:$16 sps:$4 sm:$0xff]  }
  0x93   : > { %8550 = vmatprep.subr.bf16.mxu0 %v12116_v37  ;;  %9411 = vmatprep.subr.bf16.mxu1 %v12119_v38  ;;  %v12201_v37 = vld [vmem:[%s14249_s29 + $0x488] ss:$16 sps:$4 sm:$0xff]   ;;  %v12206_v38 = vld [vmem:[%s14249_s29 + $0x4a4] ss:$16 sps:$4 sm:$0xff]  }
  0x96   : > { %8551 = vmatpush1.bf16.msra.mxu0 %v12114_v39  ;;  %9412 = vmatpush1.bf16.msra.mxu1 %v12117_v40  ;;  %v12209_v39 = vld [vmem:[%s14249_s29 + $0x4ac] ss:$16 sps:$4 sm:$0xff]   ;;  %v12204_v40 = vld [vmem:[%s14249_s29 + $0x4a0] ss:$16 sps:$4 sm:$0xff]  }
  0x97   : > { %8552 = vmatprep.subr.bf16.mxu0 %v12122_v41  ;;  %9413 = vmatprep.subr.bf16.mxu1 %v12125_v42  ;;  %v12207_v41 = vld [vmem:[%s14249_s29 + $0x4a8] ss:$16 sps:$4 sm:$0xff]   ;;  %v12212_v42 = vld [vmem:[%s14249_s29 + $0x4c4] ss:$16 sps:$4 sm:$0xff]  }
  0x9a   : > { %8553 = vmatpush1.bf16.msra.mxu0 %v12120_v43  ;;  %9414 = vmatpush1.bf16.msra.mxu1 %v12123_v45  ;;  %v12215_v43 = vld [vmem:[%s14249_s29 + $0x4cc] ss:$16 sps:$4 sm:$0xff]   ;;  %v12210_v45 = vld [vmem:[%s14249_s29 + $0x4c0] ss:$16 sps:$4 sm:$0xff]  }
  0x9b   : > { %8554 = vmatprep.subr.bf16.mxu0 %v12128_v46  ;;  %9415 = vmatprep.subr.bf16.mxu1 %v12131_v47  ;;  %v12213_v46 = vld [vmem:[%s14249_s29 + $0x4c8] ss:$16 sps:$4 sm:$0xff]   ;;  %v12218_v47 = vld [vmem:[%s14249_s29 + $0x4e4] ss:$16 sps:$4 sm:$0xff]  }
  0x9e   : > { %8555 = vmatpush1.bf16.msra.mxu0 %v12126_v48  ;;  %9416 = vmatpush1.bf16.msra.mxu1 %v12129_v49  ;;  %v12221_v48 = vld [vmem:[%s14249_s29 + $0x4ec] ss:$16 sps:$4 sm:$0xff]   ;;  %v12216_v49 = vld [vmem:[%s14249_s29 + $0x4e0] ss:$16 sps:$4 sm:$0xff]  }
  0x9f   : > { %8556 = vmatprep.subr.bf16.mxu0 %v12134_v51  ;;  %9417 = vmatprep.subr.bf16.mxu1 %v12137_v52  ;;  %v12219_v51 = vld [vmem:[%s14249_s29 + $0x4e8] ss:$16 sps:$4 sm:$0xff]   ;;  %v12224_v52 = vld [vmem:[%s14249_s29 + $0x504] ss:$16 sps:$4 sm:$0xff]  }
  0xa2   : > { %8557 = vmatpush1.bf16.msra.mxu0 %v12132_v53  ;;  %9418 = vmatpush1.bf16.msra.mxu1 %v12135_v54  ;;  %v12227_v53 = vld [vmem:[%s14249_s29 + $0x50c] ss:$16 sps:$4 sm:$0xff]   ;;  %v12222_v54 = vld [vmem:[%s14249_s29 + $0x500] ss:$16 sps:$4 sm:$0xff]  }
  0xa3   : > { %8558 = vmatprep.subr.bf16.mxu0 %v12140_v55  ;;  %9419 = vmatprep.subr.bf16.mxu1 %v12143_v56  ;;  %v12225_v55 = vld [vmem:[%s14249_s29 + $0x508] ss:$16 sps:$4 sm:$0xff]   ;;  %v12230_v56 = vld [vmem:[%s14249_s29 + $0x524] ss:$16 sps:$4 sm:$0xff]  }
  0xa6   : > { %8559 = vmatpush1.bf16.msra.mxu0 %v12138_v57  ;;  %9420 = vmatpush1.bf16.msra.mxu1 %v12141_v58  ;;  %v12233_v57 = vld [vmem:[%s14249_s29 + $0x52c] ss:$16 sps:$4 sm:$0xff]   ;;  %v12228_v58 = vld [vmem:[%s14249_s29 + $0x520] ss:$16 sps:$4 sm:$0xff]  }
  0xa7   : > { %8560 = vmatprep.subr.bf16.mxu0 %v12146_v59  ;;  %9421 = vmatprep.subr.bf16.mxu1 %v12149_v60  ;;  %v12231_v59 = vld [vmem:[%s14249_s29 + $0x528] ss:$16 sps:$4 sm:$0xff]   ;;  %v12236_v60 = vld [vmem:[%s14249_s29 + $0x544] ss:$16 sps:$4 sm:$0xff]  }
  0xaa   : > { %8561 = vmatpush1.bf16.msra.mxu0 %v12144_v61  ;;  %9422 = vmatpush1.bf16.msra.mxu1 %v12147_v62  ;;  %v12239_v61 = vld [vmem:[%s14249_s29 + $0x54c] ss:$16 sps:$4 sm:$0xff]   ;;  %v12234_v62 = vld [vmem:[%s14249_s29 + $0x540] ss:$16 sps:$4 sm:$0xff]  }
  0xab   : > { %8562 = vmatprep.subr.bf16.mxu0 %v12152_v63  ;;  %9423 = vmatprep.subr.bf16.mxu1 %v12155_v0  ;;  %v12237_v63 = vld [vmem:[%s14249_s29 + $0x548] ss:$16 sps:$4 sm:$0xff]   ;;  %v12242_v0 = vld [vmem:[%s14249_s29 + $0x564] ss:$16 sps:$4 sm:$0xff]  }
  0xae   : > { %8563 = vmatpush1.bf16.msra.mxu0 %v12150_v1  ;;  %9424 = vmatpush1.bf16.msra.mxu1 %v12153_v2  ;;  %v12245_v1 = vld [vmem:[%s14249_s29 + $0x56c] ss:$16 sps:$4 sm:$0xff]   ;;  %v12240_v2 = vld [vmem:[%s14249_s29 + $0x560] ss:$16 sps:$4 sm:$0xff]  }
  0xaf   : > { %8564 = vmatprep.subr.bf16.mxu0 %v12158_v3  ;;  %9425 = vmatprep.subr.bf16.mxu1 %v12161_v4  ;;  %v12243_v3 = vld [vmem:[%s14249_s29 + $0x568] ss:$16 sps:$4 sm:$0xff]   ;;  %v12248_v4 = vld [vmem:[%s14249_s29 + $0x584] ss:$16 sps:$4 sm:$0xff]  }
  0xb2   : > { %8565 = vmatpush1.bf16.msra.mxu0 %v12156_v5  ;;  %9426 = vmatpush1.bf16.msra.mxu1 %v12159_v6  ;;  %v12251_v5 = vld [vmem:[%s14249_s29 + $0x58c] ss:$16 sps:$4 sm:$0xff]   ;;  %v12246_v6 = vld [vmem:[%s14249_s29 + $0x580] ss:$16 sps:$4 sm:$0xff]  }
  0xb3   : > { %8566 = vmatprep.subr.bf16.mxu0 %v12164_v7  ;;  %9427 = vmatprep.subr.bf16.mxu1 %v12167_v8  ;;  %v12249_v7 = vld [vmem:[%s14249_s29 + $0x588] ss:$16 sps:$4 sm:$0xff]   ;;  %v12254_v8 = vld [vmem:[%s14249_s29 + $0x5a4] ss:$16 sps:$4 sm:$0xff]  }
  0xb6   : > { %8567 = vmatpush1.bf16.msra.mxu0 %v12162_v9  ;;  %9428 = vmatpush1.bf16.msra.mxu1 %v12165_v10  ;;  %v12257_v9 = vld [vmem:[%s14249_s29 + $0x5ac] ss:$16 sps:$4 sm:$0xff]   ;;  %v12252_v10 = vld [vmem:[%s14249_s29 + $0x5a0] ss:$16 sps:$4 sm:$0xff]  }
  0xb7   : > { %8568 = vmatprep.subr.bf16.mxu0 %v12170_v11  ;;  %9429 = vmatprep.subr.bf16.mxu1 %v12173_v12  ;;  %v12255_v11 = vld [vmem:[%s14249_s29 + $0x5a8] ss:$16 sps:$4 sm:$0xff]   ;;  %v12260_v12 = vld [vmem:[%s14249_s29 + $0x5c4] ss:$16 sps:$4 sm:$0xff]  }
  0xba   : > { %8569 = vmatpush1.bf16.msra.mxu0 %v12168_v14  ;;  %9430 = vmatpush1.bf16.msra.mxu1 %v12171_v15  ;;  %v12263_v14 = vld [vmem:[%s14249_s29 + $0x5cc] ss:$16 sps:$4 sm:$0xff]   ;;  %v12258_v15 = vld [vmem:[%s14249_s29 + $0x5c0] ss:$16 sps:$4 sm:$0xff]  }
  0xbb   : > { %8579 = vmatprep.subr.bf16.mxu0 %v12176_v16  ;;  %9440 = vmatprep.subr.bf16.mxu1 %v12179_v17  ;;  %v12261_v16 = vld [vmem:[%s14249_s29 + $0x5c8] ss:$16 sps:$4 sm:$0xff]   ;;  %v12266_v17 = vld [vmem:[%s14249_s29 + $0x5e4] ss:$16 sps:$4 sm:$0xff]  }
  0xbd   : > { %8571 = vmatmul.mubr.bf16.vlgmr.msra.gmra.mrb[0].mxu0 %v14336_v13  ;;  %9432 = vmatmul.mubr.bf16.vlgmr.msra.gmra.mrb[0].mxu1 %v14336_v13  ;;  %v12186_v13 = vld [vmem:[%s14249_s29 + $0x440] ss:$16 sps:$4 sm:$0xff]  }
  0xbe   : > { %8580 = vmatpush1.bf16.msra.mxu0 %v12174_v18  ;;  %9441 = vmatpush1.bf16.msra.mxu1 %v12177_v19  ;;  %v12269_v18 = vld [vmem:[%s14249_s29 + $0x5ec] ss:$16 sps:$4 sm:$0xff]   ;;  %v1574_v19 = vcombine.high %v14407_v20, %v14407_v20  ;;  %v12273_v20 = vld [vmem:[%s14249_s29 + $0x608] ss:$16 sps:$4 sm:$0xff]  }
  0xbf   : > { %8581 = vmatprep.subr.bf16.mxu0 %v12182_v21  ;;  %9442 = vmatprep.subr.bf16.mxu1 %v12185_v22  ;;  %v12264_v21 = vld [vmem:[%s14249_s29 + $0x5e0] ss:$16 sps:$4 sm:$0xff]   ;;  %v12267_v22 = vld [vmem:[%s14249_s29 + $0x5e8] ss:$16 sps:$4 sm:$0xff]  }
  0xc0   : > { %8611 = vmatprep.mubr.bf16.mxu0 %v1589_v24  ;;  %9472 = vmatprep.mubr.bf16.mxu1 %v1589_v24  ;;  %v12272_v24 = vld [vmem:[%s14249_s29 + $0x604] ss:$16 sps:$4 sm:$0xff]  }
  0xc2   : > { %8582 = vmatpush1.bf16.msra.mxu0 %v12180_v25  ;;  %9443 = vmatpush1.bf16.msra.mxu1 %v12183_v26  ;;  %v12275_v25 = vld [vmem:[%s14249_s29 + $0x60c] ss:$16 sps:$4 sm:$0xff]   ;;  %v14482_v26 = vrot.slane %v1574_v19, %v14309_v50 }
  0xc3   : > { %8583 = vmatprep.subr.bf16.mxu0 %v12188_v27  ;;  %9444 = vmatprep.subr.bf16.mxu1 %v12191_v28  ;;  %v12270_v27 = vld [vmem:[%s14249_s29 + $0x600] ss:$16 sps:$4 sm:$0xff]   ;;  %v12278_v28 = vld [vmem:[%s14249_s29 + $0x624] ss:$16 sps:$4 sm:$0xff]   ;;  %v12359_v19 = vld [vmem:[%s14249_s29 + $0x7cc] ss:$16 sps:$4 sm:$0xff]  }
  0xc6   : > { %8584 = vmatpush1.bf16.msra.mxu0 %v12186_v13  ;;  %9445 = vmatpush1.bf16.msra.mxu1 %v12189_v29  ;;  %v12281_v13 = vld [vmem:[%s14249_s29 + $0x62c] ss:$16 sps:$4 sm:$0xff]   ;;  %v1590_v29 = vcombine.high %v14482_v26, %v14482_v26 }
  0xc7   : > { %8585 = vmatprep.subr.bf16.mxu0 %v12194_v30  ;;  %9446 = vmatprep.subr.bf16.mxu1 %v12197_v31  ;;  %v12276_v30 = vld [vmem:[%s14249_s29 + $0x620] ss:$16 sps:$4 sm:$0xff]   ;;  %v12279_v31 = vld [vmem:[%s14249_s29 + $0x628] ss:$16 sps:$4 sm:$0xff]  }
  0xca   : > { %8586 = vmatpush1.bf16.msra.mxu0 %v12192_v32  ;;  %9447 = vmatpush1.bf16.msra.mxu1 %v12195_v33  ;;  %v12284_v32 = vld [vmem:[%s14249_s29 + $0x644] ss:$16 sps:$4 sm:$0xff]   ;;  %v12287_v33 = vld [vmem:[%s14249_s29 + $0x64c] ss:$16 sps:$4 sm:$0xff]  }
  0xcb   : > { %8587 = vmatprep.subr.bf16.mxu0 %v12200_v34  ;;  %9448 = vmatprep.subr.bf16.mxu1 %v12203_v35  ;;  %v12282_v34 = vld [vmem:[%s14249_s29 + $0x640] ss:$16 sps:$4 sm:$0xff]   ;;  %v12290_v35 = vld [vmem:[%s14249_s29 + $0x664] ss:$16 sps:$4 sm:$0xff]  }
  0xce   : > { %8588 = vmatpush1.bf16.msra.mxu0 %v12198_v36  ;;  %9449 = vmatpush1.bf16.msra.mxu1 %v12201_v37  ;;  %v12293_v36 = vld [vmem:[%s14249_s29 + $0x66c] ss:$16 sps:$4 sm:$0xff]   ;;  %v12288_v37 = vld [vmem:[%s14249_s29 + $0x660] ss:$16 sps:$4 sm:$0xff]  }
  0xcf   : > { %8589 = vmatprep.subr.bf16.mxu0 %v12206_v38  ;;  %9450 = vmatprep.subr.bf16.mxu1 %v12209_v39  ;;  %v12291_v38 = vld [vmem:[%s14249_s29 + $0x668] ss:$16 sps:$4 sm:$0xff]   ;;  %v12296_v39 = vld [vmem:[%s14249_s29 + $0x684] ss:$16 sps:$4 sm:$0xff]  }
  0xd2   : > { %8590 = vmatpush1.bf16.msra.mxu0 %v12204_v40  ;;  %9451 = vmatpush1.bf16.msra.mxu1 %v12207_v41  ;;  %v12299_v40 = vld [vmem:[%s14249_s29 + $0x68c] ss:$16 sps:$4 sm:$0xff]   ;;  %v12294_v41 = vld [vmem:[%s14249_s29 + $0x680] ss:$16 sps:$4 sm:$0xff]  }
  0xd3   : > { %8591 = vmatprep.subr.bf16.mxu0 %v12212_v42  ;;  %9452 = vmatprep.subr.bf16.mxu1 %v12215_v43  ;;  %v12297_v42 = vld [vmem:[%s14249_s29 + $0x688] ss:$16 sps:$4 sm:$0xff]   ;;  %v12302_v43 = vld [vmem:[%s14249_s29 + $0x6a4] ss:$16 sps:$4 sm:$0xff]  }
  0xd6   : > { %8592 = vmatpush1.bf16.msra.mxu0 %v12210_v45  ;;  %9453 = vmatpush1.bf16.msra.mxu1 %v12213_v46  ;;  %v12305_v45 = vld [vmem:[%s14249_s29 + $0x6ac] ss:$16 sps:$4 sm:$0xff]   ;;  %v12300_v46 = vld [vmem:[%s14249_s29 + $0x6a0] ss:$16 sps:$4 sm:$0xff]  }
  0xd7   : > { %8593 = vmatprep.subr.bf16.mxu0 %v12218_v47  ;;  %9454 = vmatprep.subr.bf16.mxu1 %v12221_v48  ;;  %v12303_v47 = vld [vmem:[%s14249_s29 + $0x6a8] ss:$16 sps:$4 sm:$0xff]   ;;  %v12308_v48 = vld [vmem:[%s14249_s29 + $0x6c4] ss:$16 sps:$4 sm:$0xff]  }
  0xda   : > { %8594 = vmatpush1.bf16.msra.mxu0 %v12216_v49  ;;  %9455 = vmatpush1.bf16.msra.mxu1 %v12219_v51  ;;  %v12311_v49 = vld [vmem:[%s14249_s29 + $0x6cc] ss:$16 sps:$4 sm:$0xff]   ;;  %v12306_v51 = vld [vmem:[%s14249_s29 + $0x6c0] ss:$16 sps:$4 sm:$0xff]  }
  0xdb   : > { %8595 = vmatprep.subr.bf16.mxu0 %v12224_v52  ;;  %9456 = vmatprep.subr.bf16.mxu1 %v12227_v53  ;;  %v12309_v52 = vld [vmem:[%s14249_s29 + $0x6c8] ss:$16 sps:$4 sm:$0xff]   ;;  %v12314_v53 = vld [vmem:[%s14249_s29 + $0x6e4] ss:$16 sps:$4 sm:$0xff]  }
  0xde   : > { %8596 = vmatpush1.bf16.msra.mxu0 %v12222_v54  ;;  %9457 = vmatpush1.bf16.msra.mxu1 %v12225_v55  ;;  %v12317_v54 = vld [vmem:[%s14249_s29 + $0x6ec] ss:$16 sps:$4 sm:$0xff]   ;;  %v12312_v55 = vld [vmem:[%s14249_s29 + $0x6e0] ss:$16 sps:$4 sm:$0xff]  }
  0xdf   : > { %8597 = vmatprep.subr.bf16.mxu0 %v12230_v56  ;;  %9458 = vmatprep.subr.bf16.mxu1 %v12233_v57  ;;  %v12315_v56 = vld [vmem:[%s14249_s29 + $0x6e8] ss:$16 sps:$4 sm:$0xff]   ;;  %v12320_v57 = vld [vmem:[%s14249_s29 + $0x704] ss:$16 sps:$4 sm:$0xff]  }
  0xe2   : > { %8598 = vmatpush1.bf16.msra.mxu0 %v12228_v58  ;;  %9459 = vmatpush1.bf16.msra.mxu1 %v12231_v59  ;;  %v12323_v58 = vld [vmem:[%s14249_s29 + $0x70c] ss:$16 sps:$4 sm:$0xff]   ;;  %v12318_v59 = vld [vmem:[%s14249_s29 + $0x700] ss:$16 sps:$4 sm:$0xff]  }
  0xe3   : > { %8599 = vmatprep.subr.bf16.mxu0 %v12236_v60  ;;  %9460 = vmatprep.subr.bf16.mxu1 %v12239_v61  ;;  %v12321_v60 = vld [vmem:[%s14249_s29 + $0x708] ss:$16 sps:$4 sm:$0xff]   ;;  %v12326_v61 = vld [vmem:[%s14249_s29 + $0x724] ss:$16 sps:$4 sm:$0xff]  }
  0xe6   : > { %8600 = vmatpush1.bf16.msra.mxu0 %v12234_v62  ;;  %9461 = vmatpush1.bf16.msra.mxu1 %v12237_v63  ;;  %v12329_v62 = vld [vmem:[%s14249_s29 + $0x72c] ss:$16 sps:$4 sm:$0xff]   ;;  %v12324_v63 = vld [vmem:[%s14249_s29 + $0x720] ss:$16 sps:$4 sm:$0xff]  }
  0xe7   : > { %8601 = vmatprep.subr.bf16.mxu0 %v12242_v0  ;;  %9462 = vmatprep.subr.bf16.mxu1 %v12245_v1  ;;  %v12327_v0 = vld [vmem:[%s14249_s29 + $0x728] ss:$16 sps:$4 sm:$0xff]   ;;  %v12332_v1 = vld [vmem:[%s14249_s29 + $0x744] ss:$16 sps:$4 sm:$0xff]  }
  0xea   : > { %8602 = vmatpush1.bf16.msra.mxu0 %v12240_v2  ;;  %9463 = vmatpush1.bf16.msra.mxu1 %v12243_v3  ;;  %v12335_v2 = vld [vmem:[%s14249_s29 + $0x74c] ss:$16 sps:$4 sm:$0xff]   ;;  %v12330_v3 = vld [vmem:[%s14249_s29 + $0x740] ss:$16 sps:$4 sm:$0xff]  }
  0xeb   : > { %8603 = vmatprep.subr.bf16.mxu0 %v12248_v4  ;;  %9464 = vmatprep.subr.bf16.mxu1 %v12251_v5  ;;  %v12333_v4 = vld [vmem:[%s14249_s29 + $0x748] ss:$16 sps:$4 sm:$0xff]   ;;  %v12338_v5 = vld [vmem:[%s14249_s29 + $0x764] ss:$16 sps:$4 sm:$0xff]  }
  0xee   : > { %8604 = vmatpush1.bf16.msra.mxu0 %v12246_v6  ;;  %9465 = vmatpush1.bf16.msra.mxu1 %v12249_v7  ;;  %v12341_v6 = vld [vmem:[%s14249_s29 + $0x76c] ss:$16 sps:$4 sm:$0xff]   ;;  %v12336_v7 = vld [vmem:[%s14249_s29 + $0x760] ss:$16 sps:$4 sm:$0xff]  }
  0xef   : > { %8605 = vmatprep.subr.bf16.mxu0 %v12254_v8  ;;  %9466 = vmatprep.subr.bf16.mxu1 %v12257_v9  ;;  %v12339_v8 = vld [vmem:[%s14249_s29 + $0x768] ss:$16 sps:$4 sm:$0xff]   ;;  %v12344_v9 = vld [vmem:[%s14249_s29 + $0x784] ss:$16 sps:$4 sm:$0xff]  }
  0xf2   : > { %8606 = vmatpush1.bf16.msra.mxu0 %v12252_v10  ;;  %9467 = vmatpush1.bf16.msra.mxu1 %v12255_v11  ;;  %v12347_v10 = vld [vmem:[%s14249_s29 + $0x78c] ss:$16 sps:$4 sm:$0xff]   ;;  %v12342_v11 = vld [vmem:[%s14249_s29 + $0x780] ss:$16 sps:$4 sm:$0xff]  }
  0xf3   : > { %8607 = vmatprep.subr.bf16.mxu0 %v12260_v12  ;;  %9468 = vmatprep.subr.bf16.mxu1 %v12263_v14  ;;  %v12345_v12 = vld [vmem:[%s14249_s29 + $0x788] ss:$16 sps:$4 sm:$0xff]   ;;  %v12350_v14 = vld [vmem:[%s14249_s29 + $0x7a4] ss:$16 sps:$4 sm:$0xff]  }
  0xf6   : > { %8608 = vmatpush1.bf16.msra.mxu0 %v12258_v15  ;;  %9469 = vmatpush1.bf16.msra.mxu1 %v12261_v16  ;;  %v12353_v15 = vld [vmem:[%s14249_s29 + $0x7ac] ss:$16 sps:$4 sm:$0xff]   ;;  %v12348_v16 = vld [vmem:[%s14249_s29 + $0x7a0] ss:$16 sps:$4 sm:$0xff]  }
  0xf7   : > { %8609 = vmatprep.subr.bf16.mxu0 %v12266_v17  ;;  %9470 = vmatprep.subr.bf16.mxu1 %v12269_v18  ;;  %v12351_v17 = vld [vmem:[%s14249_s29 + $0x7a8] ss:$16 sps:$4 sm:$0xff]   ;;  %v12356_v18 = vld [vmem:[%s14249_s29 + $0x7c4] ss:$16 sps:$4 sm:$0xff]  }
  0xfa   : > { %8610 = vmatpush1.bf16.msra.mxu0 %v12264_v21  ;;  %9471 = vmatpush1.bf16.msra.mxu1 %v12267_v22  ;;  %v12354_v21 = vld [vmem:[%s14249_s29 + $0x7c0] ss:$16 sps:$4 sm:$0xff]   ;;  %v12357_v22 = vld [vmem:[%s14249_s29 + $0x7c8] ss:$16 sps:$4 sm:$0xff]  }
  0xfb   : > { %8620 = vmatprep.subr.bf16.mxu0 %v12272_v24  ;;  %9481 = vmatprep.subr.bf16.mxu1 %v12275_v25  ;;  %v12362_v24 = vld [vmem:[%s14249_s29 + $0x7e4] ss:$16 sps:$4 sm:$0xff]   ;;  %v12365_v25 = vld [vmem:[%s14249_s29 + $0x7ec] ss:$16 sps:$4 sm:$0xff]  }
  0xfd   : > { %8612 = vmatmul.mubr.bf16.vlgmr.msra.gmra.mrb[0].mxu0 %v14413_v23  ;;  %9473 = vmatmul.mubr.bf16.vlgmr.msra.gmra.mrb[0].mxu1 %v14413_v23  ;;  %v12285_v23 = vld [vmem:[%s14249_s29 + $0x648] ss:$16 sps:$4 sm:$0xff]  }
  0xfe   : > { %8621 = vmatpush1.bf16.msra.mxu0 %v12270_v27  ;;  %9482 = vmatpush1.bf16.msra.mxu1 %v12273_v20  ;;  %v12360_v27 = vld [vmem:[%s14249_s29 + $0x7e0] ss:$16 sps:$4 sm:$0xff]  }
  0xff   : > { %8622 = vmatprep.subr.bf16.mxu0 %v12278_v28  ;;  %9483 = vmatprep.subr.bf16.mxu1 %v12281_v13  ;;  %v14550_v20 = vld [vmem:[%s14306_s4 + $0x10] sm:$0xff]  ;;  %v12363_v28 = vld [vmem:[%s14249_s29 + $0x7e8] ss:$16 sps:$4 sm:$0xff]  }
 0x100   : > { %8652 = vmatprep.mubr.bf16.mxu0 %v1590_v29  ;;  %9513 = vmatprep.mubr.bf16.mxu1 %v1590_v29  ;;  %v12369_v13 = vld [vmem:[%s14249_s29 + $0x804] ss:$16 sps:$4 sm:$0xff]   ;;  %v12372_v29 = vld [vmem:[%s14249_s29 + $0x80c] ss:$16 sps:$4 sm:$0xff]  }
 0x102   : > { %8623 = vmatpush1.bf16.msra.mxu0 %v12276_v30  ;;  %9484 = vmatpush1.bf16.msra.mxu1 %v12279_v31  ;;  %v14557_v30 = vrot.slane %v14550_v20, %v14309_v50  ;;  %v12367_v31 = vld [vmem:[%s14249_s29 + $0x800] ss:$16 sps:$4 sm:$0xff]  }
 0x103   : > { %8624 = vmatprep.subr.bf16.mxu0 %v12284_v32  ;;  %9485 = vmatprep.subr.bf16.mxu1 %v12287_v33  ;;  %v12370_v32 = vld [vmem:[%s14249_s29 + $0x808] ss:$16 sps:$4 sm:$0xff]   ;;  %v12375_v33 = vld [vmem:[%s14249_s29 + $0x824] ss:$16 sps:$4 sm:$0xff]  }
 0x106   : > { %8625 = vmatpush1.bf16.msra.mxu0 %v12282_v34  ;;  %9486 = vmatpush1.bf16.msra.mxu1 %v12285_v23  ;;  %v12378_v34 = vld [vmem:[%s14249_s29 + $0x82c] ss:$16 sps:$4 sm:$0xff]   ;;  %v1606_v23 = vcombine.high %v14557_v30, %v14557_v30 }
 0x107   : > { %8626 = vmatprep.subr.bf16.mxu0 %v12290_v35  ;;  %9487 = vmatprep.subr.bf16.mxu1 %v12293_v36  ;;  %v12373_v35 = vld [vmem:[%s14249_s29 + $0x820] ss:$16 sps:$4 sm:$0xff]   ;;  %v12376_v36 = vld [vmem:[%s14249_s29 + $0x828] ss:$16 sps:$4 sm:$0xff]  }
 0x10a   : > { %8627 = vmatpush1.bf16.msra.mxu0 %v12288_v37  ;;  %9488 = vmatpush1.bf16.msra.mxu1 %v12291_v38  ;;  %v12381_v37 = vld [vmem:[%s14249_s29 + $0x844] ss:$16 sps:$4 sm:$0xff]   ;;  %v12384_v38 = vld [vmem:[%s14249_s29 + $0x84c] ss:$16 sps:$4 sm:$0xff]  }
 0x10b   : > { %8628 = vmatprep.subr.bf16.mxu0 %v12296_v39  ;;  %9489 = vmatprep.subr.bf16.mxu1 %v12299_v40  ;;  %v12379_v39 = vld [vmem:[%s14249_s29 + $0x840] ss:$16 sps:$4 sm:$0xff]   ;;  %v12387_v40 = vld [vmem:[%s14249_s29 + $0x864] ss:$16 sps:$4 sm:$0xff]  }
 0x10e   : > { %8629 = vmatpush1.bf16.msra.mxu0 %v12294_v41  ;;  %9490 = vmatpush1.bf16.msra.mxu1 %v12297_v42  ;;  %v12390_v41 = vld [vmem:[%s14249_s29 + $0x86c] ss:$16 sps:$4 sm:$0xff]   ;;  %v12385_v42 = vld [vmem:[%s14249_s29 + $0x860] ss:$16 sps:$4 sm:$0xff]  }
 0x10f   : > { %8630 = vmatprep.subr.bf16.mxu0 %v12302_v43  ;;  %9491 = vmatprep.subr.bf16.mxu1 %v12305_v45  ;;  %v12388_v43 = vld [vmem:[%s14249_s29 + $0x868] ss:$16 sps:$4 sm:$0xff]   ;;  %v12393_v45 = vld [vmem:[%s14249_s29 + $0x884] ss:$16 sps:$4 sm:$0xff]  }
 0x112   : > { %8631 = vmatpush1.bf16.msra.mxu0 %v12300_v46  ;;  %9492 = vmatpush1.bf16.msra.mxu1 %v12303_v47  ;;  %v12396_v46 = vld [vmem:[%s14249_s29 + $0x88c] ss:$16 sps:$4 sm:$0xff]   ;;  %v12391_v47 = vld [vmem:[%s14249_s29 + $0x880] ss:$16 sps:$4 sm:$0xff]  }
 0x113   : > { %8632 = vmatprep.subr.bf16.mxu0 %v12308_v48  ;;  %9493 = vmatprep.subr.bf16.mxu1 %v12311_v49  ;;  %v12394_v48 = vld [vmem:[%s14249_s29 + $0x888] ss:$16 sps:$4 sm:$0xff]   ;;  %v12399_v49 = vld [vmem:[%s14249_s29 + $0x8a4] ss:$16 sps:$4 sm:$0xff]  }
 0x116   : > { %8633 = vmatpush1.bf16.msra.mxu0 %v12306_v51  ;;  %9494 = vmatpush1.bf16.msra.mxu1 %v12309_v52  ;;  %v12402_v51 = vld [vmem:[%s14249_s29 + $0x8ac] ss:$16 sps:$4 sm:$0xff]   ;;  %v12397_v52 = vld [vmem:[%s14249_s29 + $0x8a0] ss:$16 sps:$4 sm:$0xff]  }
 0x117   : > { %8634 = vmatprep.subr.bf16.mxu0 %v12314_v53  ;;  %9495 = vmatprep.subr.bf16.mxu1 %v12317_v54  ;;  %v12400_v53 = vld [vmem:[%s14249_s29 + $0x8a8] ss:$16 sps:$4 sm:$0xff]   ;;  %v12405_v54 = vld [vmem:[%s14249_s29 + $0x8c4] ss:$16 sps:$4 sm:$0xff]  }
 0x11a   : > { %8635 = vmatpush1.bf16.msra.mxu0 %v12312_v55  ;;  %9496 = vmatpush1.bf16.msra.mxu1 %v12315_v56  ;;  %v12408_v55 = vld [vmem:[%s14249_s29 + $0x8cc] ss:$16 sps:$4 sm:$0xff]   ;;  %v12403_v56 = vld [vmem:[%s14249_s29 + $0x8c0] ss:$16 sps:$4 sm:$0xff]  }
 0x11b   : > { %8636 = vmatprep.subr.bf16.mxu0 %v12320_v57  ;;  %9497 = vmatprep.subr.bf16.mxu1 %v12323_v58  ;;  %v12406_v57 = vld [vmem:[%s14249_s29 + $0x8c8] ss:$16 sps:$4 sm:$0xff]   ;;  %v12411_v58 = vld [vmem:[%s14249_s29 + $0x8e4] ss:$16 sps:$4 sm:$0xff]  }
 0x11e   : > { %8637 = vmatpush1.bf16.msra.mxu0 %v12318_v59  ;;  %9498 = vmatpush1.bf16.msra.mxu1 %v12321_v60  ;;  %v12414_v59 = vld [vmem:[%s14249_s29 + $0x8ec] ss:$16 sps:$4 sm:$0xff]   ;;  %v12409_v60 = vld [vmem:[%s14249_s29 + $0x8e0] ss:$16 sps:$4 sm:$0xff]  }
 0x11f   : > { %8638 = vmatprep.subr.bf16.mxu0 %v12326_v61  ;;  %9499 = vmatprep.subr.bf16.mxu1 %v12329_v62  ;;  %v12412_v61 = vld [vmem:[%s14249_s29 + $0x8e8] ss:$16 sps:$4 sm:$0xff]   ;;  %v12417_v62 = vld [vmem:[%s14249_s29 + $0x904] ss:$16 sps:$4 sm:$0xff]  }
 0x122   : > { %8639 = vmatpush1.bf16.msra.mxu0 %v12324_v63  ;;  %9500 = vmatpush1.bf16.msra.mxu1 %v12327_v0  ;;  %v12420_v63 = vld [vmem:[%s14249_s29 + $0x90c] ss:$16 sps:$4 sm:$0xff]   ;;  %v12415_v0 = vld [vmem:[%s14249_s29 + $0x900] ss:$16 sps:$4 sm:$0xff]  }
 0x123   : > { %8640 = vmatprep.subr.bf16.mxu0 %v12332_v1  ;;  %9501 = vmatprep.subr.bf16.mxu1 %v12335_v2  ;;  %v12418_v1 = vld [vmem:[%s14249_s29 + $0x908] ss:$16 sps:$4 sm:$0xff]   ;;  %v12423_v2 = vld [vmem:[%s14249_s29 + $0x924] ss:$16 sps:$4 sm:$0xff]  }
 0x126   : > { %8641 = vmatpush1.bf16.msra.mxu0 %v12330_v3  ;;  %9502 = vmatpush1.bf16.msra.mxu1 %v12333_v4  ;;  %v12426_v3 = vld [vmem:[%s14249_s29 + $0x92c] ss:$16 sps:$4 sm:$0xff]   ;;  %v12421_v4 = vld [vmem:[%s14249_s29 + $0x920] ss:$16 sps:$4 sm:$0xff]  }
 0x127   : > { %8642 = vmatprep.subr.bf16.mxu0 %v12338_v5  ;;  %9503 = vmatprep.subr.bf16.mxu1 %v12341_v6  ;;  %v12424_v5 = vld [vmem:[%s14249_s29 + $0x928] ss:$16 sps:$4 sm:$0xff]   ;;  %v12429_v6 = vld [vmem:[%s14249_s29 + $0x944] ss:$16 sps:$4 sm:$0xff]  }
 0x12a   : > { %8643 = vmatpush1.bf16.msra.mxu0 %v12336_v7  ;;  %9504 = vmatpush1.bf16.msra.mxu1 %v12339_v8  ;;  %v12432_v7 = vld [vmem:[%s14249_s29 + $0x94c] ss:$16 sps:$4 sm:$0xff]   ;;  %v12427_v8 = vld [vmem:[%s14249_s29 + $0x940] ss:$16 sps:$4 sm:$0xff]  }
 0x12b   : > { %8644 = vmatprep.subr.bf16.mxu0 %v12344_v9  ;;  %9505 = vmatprep.subr.bf16.mxu1 %v12347_v10  ;;  %v12430_v9 = vld [vmem:[%s14249_s29 + $0x948] ss:$16 sps:$4 sm:$0xff]   ;;  %v12435_v10 = vld [vmem:[%s14249_s29 + $0x964] ss:$16 sps:$4 sm:$0xff]  }
 0x12e   : > { %8645 = vmatpush1.bf16.msra.mxu0 %v12342_v11  ;;  %9506 = vmatpush1.bf16.msra.mxu1 %v12345_v12  ;;  %v12438_v11 = vld [vmem:[%s14249_s29 + $0x96c] ss:$16 sps:$4 sm:$0xff]   ;;  %v12433_v12 = vld [vmem:[%s14249_s29 + $0x960] ss:$16 sps:$4 sm:$0xff]  }
 0x12f   : > { %8646 = vmatprep.subr.bf16.mxu0 %v12350_v14  ;;  %9507 = vmatprep.subr.bf16.mxu1 %v12353_v15  ;;  %v12436_v14 = vld [vmem:[%s14249_s29 + $0x968] ss:$16 sps:$4 sm:$0xff]   ;;  %v12441_v15 = vld [vmem:[%s14249_s29 + $0x984] ss:$16 sps:$4 sm:$0xff]  }
 0x132   : > { %8647 = vmatpush1.bf16.msra.mxu0 %v12348_v16  ;;  %9508 = vmatpush1.bf16.msra.mxu1 %v12351_v17  ;;  %v12444_v16 = vld [vmem:[%s14249_s29 + $0x98c] ss:$16 sps:$4 sm:$0xff]   ;;  %v12439_v17 = vld [vmem:[%s14249_s29 + $0x980] ss:$16 sps:$4 sm:$0xff]  }
 0x133   : > { %8648 = vmatprep.subr.bf16.mxu0 %v12356_v18  ;;  %9509 = vmatprep.subr.bf16.mxu1 %v12359_v19  ;;  %v12442_v18 = vld [vmem:[%s14249_s29 + $0x988] ss:$16 sps:$4 sm:$0xff]   ;;  %v12447_v19 = vld [vmem:[%s14249_s29 + $0x9a4] ss:$16 sps:$4 sm:$0xff]  }
 0x136   : > { %8649 = vmatpush1.bf16.msra.mxu0 %v12354_v21  ;;  %9510 = vmatpush1.bf16.msra.mxu1 %v12357_v22  ;;  %v12450_v21 = vld [vmem:[%s14249_s29 + $0x9ac] ss:$16 sps:$4 sm:$0xff]   ;;  %v12445_v22 = vld [vmem:[%s14249_s29 + $0x9a0] ss:$16 sps:$4 sm:$0xff]  }
 0x137   : > { %8650 = vmatprep.subr.bf16.mxu0 %v12362_v24  ;;  %9511 = vmatprep.subr.bf16.mxu1 %v12365_v25  ;;  %v12448_v24 = vld [vmem:[%s14249_s29 + $0x9a8] ss:$16 sps:$4 sm:$0xff]   ;;  %v12453_v25 = vld [vmem:[%s14249_s29 + $0x9c4] ss:$16 sps:$4 sm:$0xff]  }
 0x13a   : > { %8651 = vmatpush1.bf16.msra.mxu0 %v12360_v27  ;;  %9512 = vmatpush1.bf16.msra.mxu1 %v12363_v28  ;;  %v12456_v27 = vld [vmem:[%s14249_s29 + $0x9cc] ss:$16 sps:$4 sm:$0xff]   ;;  %v12451_v28 = vld [vmem:[%s14249_s29 + $0x9c0] ss:$16 sps:$4 sm:$0xff]  }
 0x13b   : > { %8661 = vmatprep.subr.bf16.mxu0 %v12369_v13  ;;  %9522 = vmatprep.subr.bf16.mxu1 %v12372_v29  ;;  %v12454_v13 = vld [vmem:[%s14249_s29 + $0x9c8] ss:$16 sps:$4 sm:$0xff]   ;;  %v12459_v29 = vld [vmem:[%s14249_s29 + $0x9e4] ss:$16 sps:$4 sm:$0xff]  }
 0x13d   : > { %8653 = vmatmul.mubr.bf16.vlgmr.msra.gmra.mrb[0].mxu0 %v14482_v26  ;;  %9514 = vmatmul.mubr.bf16.vlgmr.msra.gmra.mrb[0].mxu1 %v14482_v26  ;;  %v12382_v26 = vld [vmem:[%s14249_s29 + $0x848] ss:$16 sps:$4 sm:$0xff]  }
 0x13e   : > { %8662 = vmatpush1.bf16.msra.mxu0 %v12367_v31  ;;  %9523 = vmatpush1.bf16.msra.mxu1 %v12370_v32  ;;  %v12462_v31 = vld [vmem:[%s14249_s29 + $0x9ec] ss:$16 sps:$4 sm:$0xff]   ;;  %v1591_v32 = vcombine.high %v14550_v20, %v14550_v20  ;;  %v12466_v20 = vld [vmem:[%s14249_s29 + $0xa08] ss:$16 sps:$4 sm:$0xff]  }
 0x13f   : > { %8663 = vmatprep.subr.bf16.mxu0 %v12375_v33  ;;  %9524 = vmatprep.subr.bf16.mxu1 %v12378_v34  ;;  %v12457_v33 = vld [vmem:[%s14249_s29 + $0x9e0] ss:$16 sps:$4 sm:$0xff]   ;;  %v12460_v34 = vld [vmem:[%s14249_s29 + $0x9e8] ss:$16 sps:$4 sm:$0xff]  }
 0x140   : > { %8693 = vmatprep.mubr.bf16.mxu0 %v1606_v23  ;;  %9554 = vmatprep.mubr.bf16.mxu1 %v1606_v23  ;;  %v12465_v23 = vld [vmem:[%s14249_s29 + $0xa04] ss:$16 sps:$4 sm:$0xff]  }
 0x142   : > { %8664 = vmatpush1.bf16.msra.mxu0 %v12373_v35  ;;  %9525 = vmatpush1.bf16.msra.mxu1 %v12376_v36  ;;  %v12468_v35 = vld [vmem:[%s14249_s29 + $0xa0c] ss:$16 sps:$4 sm:$0xff]   ;;  %v14630_v36 = vrot.slane %v1591_v32, %v14309_v50 }
 0x143   : > { %8665 = vmatprep.subr.bf16.mxu0 %v12381_v37  ;;  %9526 = vmatprep.subr.bf16.mxu1 %v12384_v38  ;;  %v12463_v37 = vld [vmem:[%s14249_s29 + $0xa00] ss:$16 sps:$4 sm:$0xff]   ;;  %v12471_v38 = vld [vmem:[%s14249_s29 + $0xa24] ss:$16 sps:$4 sm:$0xff]   ;;  %v12552_v32 = vld [vmem:[%s14249_s29 + $0xbcc] ss:$16 sps:$4 sm:$0xff]  }
 0x146   : > { %8666 = vmatpush1.bf16.msra.mxu0 %v12379_v39  ;;  %9527 = vmatpush1.bf16.msra.mxu1 %v12382_v26  ;;  %v12474_v39 = vld [vmem:[%s14249_s29 + $0xa2c] ss:$16 sps:$4 sm:$0xff]   ;;  %v1607_v26 = vcombine.high %v14630_v36, %v14630_v36 }
 0x147   : > { %8667 = vmatprep.subr.bf16.mxu0 %v12387_v40  ;;  %9528 = vmatprep.subr.bf16.mxu1 %v12390_v41  ;;  %v12469_v40 = vld [vmem:[%s14249_s29 + $0xa20] ss:$16 sps:$4 sm:$0xff]   ;;  %v12472_v41 = vld [vmem:[%s14249_s29 + $0xa28] ss:$16 sps:$4 sm:$0xff]  }
 0x14a   : > { %8668 = vmatpush1.bf16.msra.mxu0 %v12385_v42  ;;  %9529 = vmatpush1.bf16.msra.mxu1 %v12388_v43  ;;  %v12477_v42 = vld [vmem:[%s14249_s29 + $0xa44] ss:$16 sps:$4 sm:$0xff]   ;;  %v12480_v43 = vld [vmem:[%s14249_s29 + $0xa4c] ss:$16 sps:$4 sm:$0xff]  }
 0x14b   : > { %8669 = vmatprep.subr.bf16.mxu0 %v12393_v45  ;;  %9530 = vmatprep.subr.bf16.mxu1 %v12396_v46  ;;  %v12475_v45 = vld [vmem:[%s14249_s29 + $0xa40] ss:$16 sps:$4 sm:$0xff]   ;;  %v12483_v46 = vld [vmem:[%s14249_s29 + $0xa64] ss:$16 sps:$4 sm:$0xff]  }
 0x14e   : > { %8670 = vmatpush1.bf16.msra.mxu0 %v12391_v47  ;;  %9531 = vmatpush1.bf16.msra.mxu1 %v12394_v48  ;;  %v12486_v47 = vld [vmem:[%s14249_s29 + $0xa6c] ss:$16 sps:$4 sm:$0xff]   ;;  %v12481_v48 = vld [vmem:[%s14249_s29 + $0xa60] ss:$16 sps:$4 sm:$0xff]  }
 0x14f   : > { %8671 = vmatprep.subr.bf16.mxu0 %v12399_v49  ;;  %9532 = vmatprep.subr.bf16.mxu1 %v12402_v51  ;;  %v12484_v49 = vld [vmem:[%s14249_s29 + $0xa68] ss:$16 sps:$4 sm:$0xff]   ;;  %v12489_v51 = vld [vmem:[%s14249_s29 + $0xa84] ss:$16 sps:$4 sm:$0xff]  }
 0x152   : > { %8672 = vmatpush1.bf16.msra.mxu0 %v12397_v52  ;;  %9533 = vmatpush1.bf16.msra.mxu1 %v12400_v53  ;;  %v12492_v52 = vld [vmem:[%s14249_s29 + $0xa8c] ss:$16 sps:$4 sm:$0xff]   ;;  %v12487_v53 = vld [vmem:[%s14249_s29 + $0xa80] ss:$16 sps:$4 sm:$0xff]  }
 0x153   : > { %8673 = vmatprep.subr.bf16.mxu0 %v12405_v54  ;;  %9534 = vmatprep.subr.bf16.mxu1 %v12408_v55  ;;  %v12490_v54 = vld [vmem:[%s14249_s29 + $0xa88] ss:$16 sps:$4 sm:$0xff]   ;;  %v12495_v55 = vld [vmem:[%s14249_s29 + $0xaa4] ss:$16 sps:$4 sm:$0xff]  }
 0x156   : > { %8674 = vmatpush1.bf16.msra.mxu0 %v12403_v56  ;;  %9535 = vmatpush1.bf16.msra.mxu1 %v12406_v57  ;;  %v12498_v56 = vld [vmem:[%s14249_s29 + $0xaac] ss:$16 sps:$4 sm:$0xff]   ;;  %v12493_v57 = vld [vmem:[%s14249_s29 + $0xaa0] ss:$16 sps:$4 sm:$0xff]  }
 0x157   : > { %8675 = vmatprep.subr.bf16.mxu0 %v12411_v58  ;;  %9536 = vmatprep.subr.bf16.mxu1 %v12414_v59  ;;  %v12496_v58 = vld [vmem:[%s14249_s29 + $0xaa8] ss:$16 sps:$4 sm:$0xff]   ;;  %v12501_v59 = vld [vmem:[%s14249_s29 + $0xac4] ss:$16 sps:$4 sm:$0xff]  }
 0x15a   : > { %8676 = vmatpush1.bf16.msra.mxu0 %v12409_v60  ;;  %9537 = vmatpush1.bf16.msra.mxu1 %v12412_v61  ;;  %v12504_v60 = vld [vmem:[%s14249_s29 + $0xacc] ss:$16 sps:$4 sm:$0xff]   ;;  %v12499_v61 = vld [vmem:[%s14249_s29 + $0xac0] ss:$16 sps:$4 sm:$0xff]  }
 0x15b   : > { %8677 = vmatprep.subr.bf16.mxu0 %v12417_v62  ;;  %9538 = vmatprep.subr.bf16.mxu1 %v12420_v63  ;;  %v12502_v62 = vld [vmem:[%s14249_s29 + $0xac8] ss:$16 sps:$4 sm:$0xff]   ;;  %v12507_v63 = vld [vmem:[%s14249_s29 + $0xae4] ss:$16 sps:$4 sm:$0xff]  }
 0x15e   : > { %8678 = vmatpush1.bf16.msra.mxu0 %v12415_v0  ;;  %9539 = vmatpush1.bf16.msra.mxu1 %v12418_v1  ;;  %v12510_v0 = vld [vmem:[%s14249_s29 + $0xaec] ss:$16 sps:$4 sm:$0xff]   ;;  %v12505_v1 = vld [vmem:[%s14249_s29 + $0xae0] ss:$16 sps:$4 sm:$0xff]  }
 0x15f   : > { %8679 = vmatprep.subr.bf16.mxu0 %v12423_v2  ;;  %9540 = vmatprep.subr.bf16.mxu1 %v12426_v3  ;;  %v12508_v2 = vld [vmem:[%s14249_s29 + $0xae8] ss:$16 sps:$4 sm:$0xff]   ;;  %v12513_v3 = vld [vmem:[%s14249_s29 + $0xb04] ss:$16 sps:$4 sm:$0xff]  }
 0x162   : > { %8680 = vmatpush1.bf16.msra.mxu0 %v12421_v4  ;;  %9541 = vmatpush1.bf16.msra.mxu1 %v12424_v5  ;;  %v12516_v4 = vld [vmem:[%s14249_s29 + $0xb0c] ss:$16 sps:$4 sm:$0xff]   ;;  %v12511_v5 = vld [vmem:[%s14249_s29 + $0xb00] ss:$16 sps:$4 sm:$0xff]  }
 0x163   : > { %8681 = vmatprep.subr.bf16.mxu0 %v12429_v6  ;;  %9542 = vmatprep.subr.bf16.mxu1 %v12432_v7  ;;  %v12514_v6 = vld [vmem:[%s14249_s29 + $0xb08] ss:$16 sps:$4 sm:$0xff]   ;;  %v12519_v7 = vld [vmem:[%s14249_s29 + $0xb24] ss:$16 sps:$4 sm:$0xff]  }
 0x166   : > { %8682 = vmatpush1.bf16.msra.mxu0 %v12427_v8  ;;  %9543 = vmatpush1.bf16.msra.mxu1 %v12430_v9  ;;  %v12522_v8 = vld [vmem:[%s14249_s29 + $0xb2c] ss:$16 sps:$4 sm:$0xff]   ;;  %v12517_v9 = vld [vmem:[%s14249_s29 + $0xb20] ss:$16 sps:$4 sm:$0xff]  }
 0x167   : > { %8683 = vmatprep.subr.bf16.mxu0 %v12435_v10  ;;  %9544 = vmatprep.subr.bf16.mxu1 %v12438_v11  ;;  %v12520_v10 = vld [vmem:[%s14249_s29 + $0xb28] ss:$16 sps:$4 sm:$0xff]   ;;  %v12525_v11 = vld [vmem:[%s14249_s29 + $0xb44] ss:$16 sps:$4 sm:$0xff]  }
 0x16a   : > { %8684 = vmatpush1.bf16.msra.mxu0 %v12433_v12  ;;  %9545 = vmatpush1.bf16.msra.mxu1 %v12436_v14  ;;  %v12528_v12 = vld [vmem:[%s14249_s29 + $0xb4c] ss:$16 sps:$4 sm:$0xff]   ;;  %v12523_v14 = vld [vmem:[%s14249_s29 + $0xb40] ss:$16 sps:$4 sm:$0xff]  }
 0x16b   : > { %8685 = vmatprep.subr.bf16.mxu0 %v12441_v15  ;;  %9546 = vmatprep.subr.bf16.mxu1 %v12444_v16  ;;  %v12526_v15 = vld [vmem:[%s14249_s29 + $0xb48] ss:$16 sps:$4 sm:$0xff]   ;;  %v12531_v16 = vld [vmem:[%s14249_s29 + $0xb64] ss:$16 sps:$4 sm:$0xff]  }
 0x16e   : > { %8686 = vmatpush1.bf16.msra.mxu0 %v12439_v17  ;;  %9547 = vmatpush1.bf16.msra.mxu1 %v12442_v18  ;;  %v12534_v17 = vld [vmem:[%s14249_s29 + $0xb6c] ss:$16 sps:$4 sm:$0xff]   ;;  %v12529_v18 = vld [vmem:[%s14249_s29 + $0xb60] ss:$16 sps:$4 sm:$0xff]  }
 0x16f   : > { %8687 = vmatprep.subr.bf16.mxu0 %v12447_v19  ;;  %9548 = vmatprep.subr.bf16.mxu1 %v12450_v21  ;;  %v12532_v19 = vld [vmem:[%s14249_s29 + $0xb68] ss:$16 sps:$4 sm:$0xff]   ;;  %v12537_v21 = vld [vmem:[%s14249_s29 + $0xb84] ss:$16 sps:$4 sm:$0xff]  }
 0x172   : > { %8688 = vmatpush1.bf16.msra.mxu0 %v12445_v22  ;;  %9549 = vmatpush1.bf16.msra.mxu1 %v12448_v24  ;;  %v12540_v22 = vld [vmem:[%s14249_s29 + $0xb8c] ss:$16 sps:$4 sm:$0xff]   ;;  %v12535_v24 = vld [vmem:[%s14249_s29 + $0xb80] ss:$16 sps:$4 sm:$0xff]  }
 0x173   : > { %8689 = vmatprep.subr.bf16.mxu0 %v12453_v25  ;;  %9550 = vmatprep.subr.bf16.mxu1 %v12456_v27  ;;  %v12538_v25 = vld [vmem:[%s14249_s29 + $0xb88] ss:$16 sps:$4 sm:$0xff]   ;;  %v12543_v27 = vld [vmem:[%s14249_s29 + $0xba4] ss:$16 sps:$4 sm:$0xff]  }
 0x176   : > { %8690 = vmatpush1.bf16.msra.mxu0 %v12451_v28  ;;  %9551 = vmatpush1.bf16.msra.mxu1 %v12454_v13  ;;  %v12546_v28 = vld [vmem:[%s14249_s29 + $0xbac] ss:$16 sps:$4 sm:$0xff]   ;;  %v12541_v13 = vld [vmem:[%s14249_s29 + $0xba0] ss:$16 sps:$4 sm:$0xff]  }
 0x177   : > { %8691 = vmatprep.subr.bf16.mxu0 %v12459_v29  ;;  %9552 = vmatprep.subr.bf16.mxu1 %v12462_v31  ;;  %v12544_v29 = vld [vmem:[%s14249_s29 + $0xba8] ss:$16 sps:$4 sm:$0xff]   ;;  %v12549_v31 = vld [vmem:[%s14249_s29 + $0xbc4] ss:$16 sps:$4 sm:$0xff]  }
 0x17a   : > { %8692 = vmatpush1.bf16.msra.mxu0 %v12457_v33  ;;  %9553 = vmatpush1.bf16.msra.mxu1 %v12460_v34  ;;  %v12547_v33 = vld [vmem:[%s14249_s29 + $0xbc0] ss:$16 sps:$4 sm:$0xff]   ;;  %v12550_v34 = vld [vmem:[%s14249_s29 + $0xbc8] ss:$16 sps:$4 sm:$0xff]  }
 0x17b   : > { %8702 = vmatprep.subr.bf16.mxu0 %v12465_v23  ;;  %9563 = vmatprep.subr.bf16.mxu1 %v12468_v35  ;;  %v12555_v23 = vld [vmem:[%s14249_s29 + $0xbe4] ss:$16 sps:$4 sm:$0xff]   ;;  %v12558_v35 = vld [vmem:[%s14249_s29 + $0xbec] ss:$16 sps:$4 sm:$0xff]  }
 0x17d   : > { %8694 = vmatmul.mubr.bf16.vlgmr.msra.gmra.mrb[0].mxu0 %v14557_v30  ;;  %9555 = vmatmul.mubr.bf16.vlgmr.msra.gmra.mrb[0].mxu1 %v14557_v30  ;;  %v12478_v30 = vld [vmem:[%s14249_s29 + $0xa48] ss:$16 sps:$4 sm:$0xff]  }
 0x17e   : > { %8703 = vmatpush1.bf16.msra.mxu0 %v12463_v37  ;;  %9564 = vmatpush1.bf16.msra.mxu1 %v12466_v20  ;;  %v14697_v37 = vld [vmem:[%s14306_s4 + $0x18] sm:$0xff]  ;;  %v12553_v20 = vld [vmem:[%s14249_s29 + $0xbe0] ss:$16 sps:$4 sm:$0xff]  }
 0x17f   : > { %8704 = vmatprep.subr.bf16.mxu0 %v12471_v38  ;;  %9565 = vmatprep.subr.bf16.mxu1 %v12474_v39  ;;  %v12556_v38 = vld [vmem:[%s14249_s29 + $0xbe8] ss:$16 sps:$4 sm:$0xff]   ;;  %v12562_v39 = vld [vmem:[%s14249_s29 + $0xc04] ss:$16 sps:$4 sm:$0xff]  }
 0x180   : > { %8734 = vmatprep.mubr.bf16.mxu0 %v1607_v26  ;;  %9595 = vmatprep.mubr.bf16.mxu1 %v1607_v26  ;;  %v12565_v26 = vld [vmem:[%s14249_s29 + $0xc0c] ss:$16 sps:$4 sm:$0xff]  }
 0x182   : > { %8705 = vmatpush1.bf16.msra.mxu0 %v12469_v40  ;;  %9566 = vmatpush1.bf16.msra.mxu1 %v12472_v41  ;;  %v14705_v40 = vrot.slane %v14697_v37, %v14309_v50  ;;  %v12560_v41 = vld [vmem:[%s14249_s29 + $0xc00] ss:$16 sps:$4 sm:$0xff]  }
 0x183   : > { %8706 = vmatprep.subr.bf16.mxu0 %v12477_v42  ;;  %9567 = vmatprep.subr.bf16.mxu1 %v12480_v43  ;;  %v12563_v42 = vld [vmem:[%s14249_s29 + $0xc08] ss:$16 sps:$4 sm:$0xff]   ;;  %v12568_v43 = vld [vmem:[%s14249_s29 + $0xc24] ss:$16 sps:$4 sm:$0xff]  }
 0x186   : > { %8707 = vmatpush1.bf16.msra.mxu0 %v12475_v45  ;;  %9568 = vmatpush1.bf16.msra.mxu1 %v12478_v30  ;;  %v12571_v45 = vld [vmem:[%s14249_s29 + $0xc2c] ss:$16 sps:$4 sm:$0xff]   ;;  %v1623_v30 = vcombine.high %v14705_v40, %v14705_v40 }
 0x187   : > { %8708 = vmatprep.subr.bf16.mxu0 %v12483_v46  ;;  %9569 = vmatprep.subr.bf16.mxu1 %v12486_v47  ;;  %v12566_v46 = vld [vmem:[%s14249_s29 + $0xc20] ss:$16 sps:$4 sm:$0xff]   ;;  %v12569_v47 = vld [vmem:[%s14249_s29 + $0xc28] ss:$16 sps:$4 sm:$0xff]  }
 0x18a   : > { %8709 = vmatpush1.bf16.msra.mxu0 %v12481_v48  ;;  %9570 = vmatpush1.bf16.msra.mxu1 %v12484_v49  ;;  %v12574_v48 = vld [vmem:[%s14249_s29 + $0xc44] ss:$16 sps:$4 sm:$0xff]   ;;  %v12577_v49 = vld [vmem:[%s14249_s29 + $0xc4c] ss:$16 sps:$4 sm:$0xff]  }
 0x18b   : > { %8710 = vmatprep.subr.bf16.mxu0 %v12489_v51  ;;  %9571 = vmatprep.subr.bf16.mxu1 %v12492_v52  ;;  %v12572_v51 = vld [vmem:[%s14249_s29 + $0xc40] ss:$16 sps:$4 sm:$0xff]   ;;  %v12580_v52 = vld [vmem:[%s14249_s29 + $0xc64] ss:$16 sps:$4 sm:$0xff]  }
 0x18e   : > { %8711 = vmatpush1.bf16.msra.mxu0 %v12487_v53  ;;  %9572 = vmatpush1.bf16.msra.mxu1 %v12490_v54  ;;  %v12583_v53 = vld [vmem:[%s14249_s29 + $0xc6c] ss:$16 sps:$4 sm:$0xff]   ;;  %v12578_v54 = vld [vmem:[%s14249_s29 + $0xc60] ss:$16 sps:$4 sm:$0xff]  }
 0x18f   : > { %8712 = vmatprep.subr.bf16.mxu0 %v12495_v55  ;;  %9573 = vmatprep.subr.bf16.mxu1 %v12498_v56  ;;  %v12581_v55 = vld [vmem:[%s14249_s29 + $0xc68] ss:$16 sps:$4 sm:$0xff]   ;;  %v12586_v56 = vld [vmem:[%s14249_s29 + $0xc84] ss:$16 sps:$4 sm:$0xff]  }
 0x192   : > { %8713 = vmatpush1.bf16.msra.mxu0 %v12493_v57  ;;  %9574 = vmatpush1.bf16.msra.mxu1 %v12496_v58  ;;  %v12589_v57 = vld [vmem:[%s14249_s29 + $0xc8c] ss:$16 sps:$4 sm:$0xff]   ;;  %v12584_v58 = vld [vmem:[%s14249_s29 + $0xc80] ss:$16 sps:$4 sm:$0xff]  }
 0x193   : > { %8714 = vmatprep.subr.bf16.mxu0 %v12501_v59  ;;  %9575 = vmatprep.subr.bf16.mxu1 %v12504_v60  ;;  %v12587_v59 = vld [vmem:[%s14249_s29 + $0xc88] ss:$16 sps:$4 sm:$0xff]   ;;  %v12592_v60 = vld [vmem:[%s14249_s29 + $0xca4] ss:$16 sps:$4 sm:$0xff]  }
 0x196   : > { %8715 = vmatpush1.bf16.msra.mxu0 %v12499_v61  ;;  %9576 = vmatpush1.bf16.msra.mxu1 %v12502_v62  ;;  %v12595_v61 = vld [vmem:[%s14249_s29 + $0xcac] ss:$16 sps:$4 sm:$0xff]   ;;  %v12590_v62 = vld [vmem:[%s14249_s29 + $0xca0] ss:$16 sps:$4 sm:$0xff]  }
 0x197   : > { %8716 = vmatprep.subr.bf16.mxu0 %v12507_v63  ;;  %9577 = vmatprep.subr.bf16.mxu1 %v12510_v0  ;;  %v12593_v63 = vld [vmem:[%s14249_s29 + $0xca8] ss:$16 sps:$4 sm:$0xff]   ;;  %v12598_v0 = vld [vmem:[%s14249_s29 + $0xcc4] ss:$16 sps:$4 sm:$0xff]  }
 0x19a   : > { %8717 = vmatpush1.bf16.msra.mxu0 %v12505_v1  ;;  %9578 = vmatpush1.bf16.msra.mxu1 %v12508_v2  ;;  %v12601_v1 = vld [vmem:[%s14249_s29 + $0xccc] ss:$16 sps:$4 sm:$0xff]   ;;  %v12596_v2 = vld [vmem:[%s14249_s29 + $0xcc0] ss:$16 sps:$4 sm:$0xff]  }
 0x19b   : > { %8718 = vmatprep.subr.bf16.mxu0 %v12513_v3  ;;  %9579 = vmatprep.subr.bf16.mxu1 %v12516_v4  ;;  %v12599_v3 = vld [vmem:[%s14249_s29 + $0xcc8] ss:$16 sps:$4 sm:$0xff]   ;;  %v12604_v4 = vld [vmem:[%s14249_s29 + $0xce4] ss:$16 sps:$4 sm:$0xff]  }
 0x19e   : > { %8719 = vmatpush1.bf16.msra.mxu0 %v12511_v5  ;;  %9580 = vmatpush1.bf16.msra.mxu1 %v12514_v6  ;;  %v12607_v5 = vld [vmem:[%s14249_s29 + $0xcec] ss:$16 sps:$4 sm:$0xff]   ;;  %v12602_v6 = vld [vmem:[%s14249_s29 + $0xce0] ss:$16 sps:$4 sm:$0xff]  }
 0x19f   : > { %8720 = vmatprep.subr.bf16.mxu0 %v12519_v7  ;;  %9581 = vmatprep.subr.bf16.mxu1 %v12522_v8  ;;  %v12605_v7 = vld [vmem:[%s14249_s29 + $0xce8] ss:$16 sps:$4 sm:$0xff]   ;;  %v12610_v8 = vld [vmem:[%s14249_s29 + $0xd04] ss:$16 sps:$4 sm:$0xff]  }
 0x1a2   : > { %8721 = vmatpush1.bf16.msra.mxu0 %v12517_v9  ;;  %9582 = vmatpush1.bf16.msra.mxu1 %v12520_v10  ;;  %v12613_v9 = vld [vmem:[%s14249_s29 + $0xd0c] ss:$16 sps:$4 sm:$0xff]   ;;  %v12608_v10 = vld [vmem:[%s14249_s29 + $0xd00] ss:$16 sps:$4 sm:$0xff]  }
 0x1a3   : > { %8722 = vmatprep.subr.bf16.mxu0 %v12525_v11  ;;  %9583 = vmatprep.subr.bf16.mxu1 %v12528_v12  ;;  %v12611_v11 = vld [vmem:[%s14249_s29 + $0xd08] ss:$16 sps:$4 sm:$0xff]   ;;  %v12616_v12 = vld [vmem:[%s14249_s29 + $0xd24] ss:$16 sps:$4 sm:$0xff]  }
 0x1a6   : > { %8723 = vmatpush1.bf16.msra.mxu0 %v12523_v14  ;;  %9584 = vmatpush1.bf16.msra.mxu1 %v12526_v15  ;;  %v12619_v14 = vld [vmem:[%s14249_s29 + $0xd2c] ss:$16 sps:$4 sm:$0xff]   ;;  %v12614_v15 = vld [vmem:[%s14249_s29 + $0xd20] ss:$16 sps:$4 sm:$0xff]  }
 0x1a7   : > { %8724 = vmatprep.subr.bf16.mxu0 %v12531_v16  ;;  %9585 = vmatprep.subr.bf16.mxu1 %v12534_v17  ;;  %v12617_v16 = vld [vmem:[%s14249_s29 + $0xd28] ss:$16 sps:$4 sm:$0xff]   ;;  %v12622_v17 = vld [vmem:[%s14249_s29 + $0xd44] ss:$16 sps:$4 sm:$0xff]  }
 0x1aa   : > { %8725 = vmatpush1.bf16.msra.mxu0 %v12529_v18  ;;  %9586 = vmatpush1.bf16.msra.mxu1 %v12532_v19  ;;  %v12625_v18 = vld [vmem:[%s14249_s29 + $0xd4c] ss:$16 sps:$4 sm:$0xff]   ;;  %v12620_v19 = vld [vmem:[%s14249_s29 + $0xd40] ss:$16 sps:$4 sm:$0xff]  }
 0x1ab   : > { %8726 = vmatprep.subr.bf16.mxu0 %v12537_v21  ;;  %9587 = vmatprep.subr.bf16.mxu1 %v12540_v22  ;;  %v12623_v21 = vld [vmem:[%s14249_s29 + $0xd48] ss:$16 sps:$4 sm:$0xff]   ;;  %v12628_v22 = vld [vmem:[%s14249_s29 + $0xd64] ss:$16 sps:$4 sm:$0xff]  }
 0x1ae   : > { %8727 = vmatpush1.bf16.msra.mxu0 %v12535_v24  ;;  %9588 = vmatpush1.bf16.msra.mxu1 %v12538_v25  ;;  %v12631_v24 = vld [vmem:[%s14249_s29 + $0xd6c] ss:$16 sps:$4 sm:$0xff]   ;;  %v12626_v25 = vld [vmem:[%s14249_s29 + $0xd60] ss:$16 sps:$4 sm:$0xff]  }
 0x1af   : > { %8728 = vmatprep.subr.bf16.mxu0 %v12543_v27  ;;  %9589 = vmatprep.subr.bf16.mxu1 %v12546_v28  ;;  %v12629_v27 = vld [vmem:[%s14249_s29 + $0xd68] ss:$16 sps:$4 sm:$0xff]   ;;  %v12634_v28 = vld [vmem:[%s14249_s29 + $0xd84] ss:$16 sps:$4 sm:$0xff]  }
 0x1b2   : > { %8729 = vmatpush1.bf16.msra.mxu0 %v12541_v13  ;;  %9590 = vmatpush1.bf16.msra.mxu1 %v12544_v29  ;;  %v12637_v13 = vld [vmem:[%s14249_s29 + $0xd8c] ss:$16 sps:$4 sm:$0xff]   ;;  %v12632_v29 = vld [vmem:[%s14249_s29 + $0xd80] ss:$16 sps:$4 sm:$0xff]  }
 0x1b3   : > { %8730 = vmatprep.subr.bf16.mxu0 %v12549_v31  ;;  %9591 = vmatprep.subr.bf16.mxu1 %v12552_v32  ;;  %v12635_v31 = vld [vmem:[%s14249_s29 + $0xd88] ss:$16 sps:$4 sm:$0xff]   ;;  %v12640_v32 = vld [vmem:[%s14249_s29 + $0xda4] ss:$16 sps:$4 sm:$0xff]  }
 0x1b6   : > { %8731 = vmatpush1.bf16.msra.mxu0 %v12547_v33  ;;  %9592 = vmatpush1.bf16.msra.mxu1 %v12550_v34  ;;  %v12643_v33 = vld [vmem:[%s14249_s29 + $0xdac] ss:$16 sps:$4 sm:$0xff]   ;;  %v12638_v34 = vld [vmem:[%s14249_s29 + $0xda0] ss:$16 sps:$4 sm:$0xff]  }
 0x1b7   : > { %8732 = vmatprep.subr.bf16.mxu0 %v12555_v23  ;;  %9593 = vmatprep.subr.bf16.mxu1 %v12558_v35  ;;  %v12641_v23 = vld [vmem:[%s14249_s29 + $0xda8] ss:$16 sps:$4 sm:$0xff]   ;;  %v12646_v35 = vld [vmem:[%s14249_s29 + $0xdc4] ss:$16 sps:$4 sm:$0xff]  }
 0x1ba   : > { %8733 = vmatpush1.bf16.msra.mxu0 %v12553_v20  ;;  %9594 = vmatpush1.bf16.msra.mxu1 %v12556_v38  ;;  %v12649_v20 = vld [vmem:[%s14249_s29 + $0xdcc] ss:$16 sps:$4 sm:$0xff]   ;;  %v12644_v38 = vld [vmem:[%s14249_s29 + $0xdc0] ss:$16 sps:$4 sm:$0xff]  }
 0x1bb   : > { %8743 = vmatprep.subr.bf16.mxu0 %v12562_v39  ;;  %9604 = vmatprep.subr.bf16.mxu1 %v12565_v26  ;;  %v12647_v39 = vld [vmem:[%s14249_s29 + $0xdc8] ss:$16 sps:$4 sm:$0xff]   ;;  %v12652_v26 = vld [vmem:[%s14249_s29 + $0xde4] ss:$16 sps:$4 sm:$0xff]  }
 0x1bd   : > { %8735 = vmatmul.mubr.bf16.vlgmr.msra.gmra.mrb[0].mxu0 %v14630_v36  ;;  %9596 = vmatmul.mubr.bf16.vlgmr.msra.gmra.mrb[0].mxu1 %v14630_v36  ;;  %v12575_v36 = vld [vmem:[%s14249_s29 + $0xc48] ss:$16 sps:$4 sm:$0xff]  }
 0x1be   : > { %8744 = vmatpush1.bf16.msra.mxu0 %v12560_v41  ;;  %9605 = vmatpush1.bf16.msra.mxu1 %v12563_v42  ;;  %v12655_v41 = vld [vmem:[%s14249_s29 + $0xdec] ss:$16 sps:$4 sm:$0xff]   ;;  %v1608_v42 = vcombine.high %v14697_v37, %v14697_v37  ;;  %v12659_v37 = vld [vmem:[%s14249_s29 + $0xe08] ss:$16 sps:$4 sm:$0xff]  }
 0x1bf   : > { %8745 = vmatprep.subr.bf16.mxu0 %v12568_v43  ;;  %9606 = vmatprep.subr.bf16.mxu1 %v12571_v45  ;;  %v12650_v43 = vld [vmem:[%s14249_s29 + $0xde0] ss:$16 sps:$4 sm:$0xff]   ;;  %v12653_v45 = vld [vmem:[%s14249_s29 + $0xde8] ss:$16 sps:$4 sm:$0xff]  }
 0x1c0   : > { %8775 = vmatprep.mubr.bf16.mxu0 %v1623_v30  ;;  %9636 = vmatprep.mubr.bf16.mxu1 %v1623_v30  ;;  %v12658_v30 = vld [vmem:[%s14249_s29 + $0xe04] ss:$16 sps:$4 sm:$0xff]  }
 0x1c2   : > { %8746 = vmatpush1.bf16.msra.mxu0 %v12566_v46  ;;  %9607 = vmatpush1.bf16.msra.mxu1 %v12569_v47  ;;  %v12661_v46 = vld [vmem:[%s14249_s29 + $0xe0c] ss:$16 sps:$4 sm:$0xff]   ;;  %v14778_v47 = vrot.slane %v1608_v42, %v14309_v50 }
 0x1c3   : > { %8747 = vmatprep.subr.bf16.mxu0 %v12574_v48  ;;  %9608 = vmatprep.subr.bf16.mxu1 %v12577_v49  ;;  %v12656_v48 = vld [vmem:[%s14249_s29 + $0xe00] ss:$16 sps:$4 sm:$0xff]   ;;  %v12664_v49 = vld [vmem:[%s14249_s29 + $0xe24] ss:$16 sps:$4 sm:$0xff]   ;;  %v12745_v42 = vld [vmem:[%s14249_s29 + $0xfcc] ss:$16 sps:$4 sm:$0xff]  }
 0x1c6   : > { %8748 = vmatpush1.bf16.msra.mxu0 %v12572_v51  ;;  %9609 = vmatpush1.bf16.msra.mxu1 %v12575_v36  ;;  %v12667_v51 = vld [vmem:[%s14249_s29 + $0xe2c] ss:$16 sps:$4 sm:$0xff]   ;;  %v1624_v36 = vcombine.high %v14778_v47, %v14778_v47 }
 0x1c7   : > { %8749 = vmatprep.subr.bf16.mxu0 %v12580_v52  ;;  %9610 = vmatprep.subr.bf16.mxu1 %v12583_v53  ;;  %v12662_v52 = vld [vmem:[%s14249_s29 + $0xe20] ss:$16 sps:$4 sm:$0xff]   ;;  %v12665_v53 = vld [vmem:[%s14249_s29 + $0xe28] ss:$16 sps:$4 sm:$0xff]  }
 0x1ca   : > { %8750 = vmatpush1.bf16.msra.mxu0 %v12578_v54  ;;  %9611 = vmatpush1.bf16.msra.mxu1 %v12581_v55  ;;  %v12670_v54 = vld [vmem:[%s14249_s29 + $0xe44] ss:$16 sps:$4 sm:$0xff]   ;;  %v12673_v55 = vld [vmem:[%s14249_s29 + $0xe4c] ss:$16 sps:$4 sm:$0xff]  }
 0x1cb   : > { %8751 = vmatprep.subr.bf16.mxu0 %v12586_v56  ;;  %9612 = vmatprep.subr.bf16.mxu1 %v12589_v57  ;;  %v12668_v56 = vld [vmem:[%s14249_s29 + $0xe40] ss:$16 sps:$4 sm:$0xff]   ;;  %v12676_v57 = vld [vmem:[%s14249_s29 + $0xe64] ss:$16 sps:$4 sm:$0xff]  }
 0x1ce   : > { %8752 = vmatpush1.bf16.msra.mxu0 %v12584_v58  ;;  %9613 = vmatpush1.bf16.msra.mxu1 %v12587_v59  ;;  %v12679_v58 = vld [vmem:[%s14249_s29 + $0xe6c] ss:$16 sps:$4 sm:$0xff]   ;;  %v12674_v59 = vld [vmem:[%s14249_s29 + $0xe60] ss:$16 sps:$4 sm:$0xff]  }
 0x1cf   : > { %8753 = vmatprep.subr.bf16.mxu0 %v12592_v60  ;;  %9614 = vmatprep.subr.bf16.mxu1 %v12595_v61  ;;  %v12677_v60 = vld [vmem:[%s14249_s29 + $0xe68] ss:$16 sps:$4 sm:$0xff]   ;;  %v12682_v61 = vld [vmem:[%s14249_s29 + $0xe84] ss:$16 sps:$4 sm:$0xff]  }
 0x1d2   : > { %8754 = vmatpush1.bf16.msra.mxu0 %v12590_v62  ;;  %9615 = vmatpush1.bf16.msra.mxu1 %v12593_v63  ;;  %v12685_v62 = vld [vmem:[%s14249_s29 + $0xe8c] ss:$16 sps:$4 sm:$0xff]   ;;  %v12680_v63 = vld [vmem:[%s14249_s29 + $0xe80] ss:$16 sps:$4 sm:$0xff]  }
 0x1d3   : > { %8755 = vmatprep.subr.bf16.mxu0 %v12598_v0  ;;  %9616 = vmatprep.subr.bf16.mxu1 %v12601_v1  ;;  %v12683_v0 = vld [vmem:[%s14249_s29 + $0xe88] ss:$16 sps:$4 sm:$0xff]   ;;  %v12688_v1 = vld [vmem:[%s14249_s29 + $0xea4] ss:$16 sps:$4 sm:$0xff]  }
 0x1d6   : > { %8756 = vmatpush1.bf16.msra.mxu0 %v12596_v2  ;;  %9617 = vmatpush1.bf16.msra.mxu1 %v12599_v3  ;;  %v12691_v2 = vld [vmem:[%s14249_s29 + $0xeac] ss:$16 sps:$4 sm:$0xff]   ;;  %v12686_v3 = vld [vmem:[%s14249_s29 + $0xea0] ss:$16 sps:$4 sm:$0xff]  }
 0x1d7   : > { %8757 = vmatprep.subr.bf16.mxu0 %v12604_v4  ;;  %9618 = vmatprep.subr.bf16.mxu1 %v12607_v5  ;;  %v12689_v4 = vld [vmem:[%s14249_s29 + $0xea8] ss:$16 sps:$4 sm:$0xff]   ;;  %v12694_v5 = vld [vmem:[%s14249_s29 + $0xec4] ss:$16 sps:$4 sm:$0xff]  }
 0x1da   : > { %8758 = vmatpush1.bf16.msra.mxu0 %v12602_v6  ;;  %9619 = vmatpush1.bf16.msra.mxu1 %v12605_v7  ;;  %v12697_v6 = vld [vmem:[%s14249_s29 + $0xecc] ss:$16 sps:$4 sm:$0xff]   ;;  %v12692_v7 = vld [vmem:[%s14249_s29 + $0xec0] ss:$16 sps:$4 sm:$0xff]  }
 0x1db   : > { %8759 = vmatprep.subr.bf16.mxu0 %v12610_v8  ;;  %9620 = vmatprep.subr.bf16.mxu1 %v12613_v9  ;;  %v12695_v8 = vld [vmem:[%s14249_s29 + $0xec8] ss:$16 sps:$4 sm:$0xff]   ;;  %v12700_v9 = vld [vmem:[%s14249_s29 + $0xee4] ss:$16 sps:$4 sm:$0xff]  }
 0x1de   : > { %8760 = vmatpush1.bf16.msra.mxu0 %v12608_v10  ;;  %9621 = vmatpush1.bf16.msra.mxu1 %v12611_v11  ;;  %v12703_v10 = vld [vmem:[%s14249_s29 + $0xeec] ss:$16 sps:$4 sm:$0xff]   ;;  %v12698_v11 = vld [vmem:[%s14249_s29 + $0xee0] ss:$16 sps:$4 sm:$0xff]  }
 0x1df   : > { %8761 = vmatprep.subr.bf16.mxu0 %v12616_v12  ;;  %9622 = vmatprep.subr.bf16.mxu1 %v12619_v14  ;;  %v12701_v12 = vld [vmem:[%s14249_s29 + $0xee8] ss:$16 sps:$4 sm:$0xff]   ;;  %v12706_v14 = vld [vmem:[%s14249_s29 + $0xf04] ss:$16 sps:$4 sm:$0xff]  }
 0x1e2   : > { %8762 = vmatpush1.bf16.msra.mxu0 %v12614_v15  ;;  %9623 = vmatpush1.bf16.msra.mxu1 %v12617_v16  ;;  %v12709_v15 = vld [vmem:[%s14249_s29 + $0xf0c] ss:$16 sps:$4 sm:$0xff]   ;;  %v12704_v16 = vld [vmem:[%s14249_s29 + $0xf00] ss:$16 sps:$4 sm:$0xff]  }
 0x1e3   : > { %8763 = vmatprep.subr.bf16.mxu0 %v12622_v17  ;;  %9624 = vmatprep.subr.bf16.mxu1 %v12625_v18  ;;  %v12707_v17 = vld [vmem:[%s14249_s29 + $0xf08] ss:$16 sps:$4 sm:$0xff]   ;;  %v12712_v18 = vld [vmem:[%s14249_s29 + $0xf24] ss:$16 sps:$4 sm:$0xff]  }
 0x1e6   : > { %8764 = vmatpush1.bf16.msra.mxu0 %v12620_v19  ;;  %9625 = vmatpush1.bf16.msra.mxu1 %v12623_v21  ;;  %v12715_v19 = vld [vmem:[%s14249_s29 + $0xf2c] ss:$16 sps:$4 sm:$0xff]   ;;  %v12710_v21 = vld [vmem:[%s14249_s29 + $0xf20] ss:$16 sps:$4 sm:$0xff]  }
 0x1e7   : > { %8765 = vmatprep.subr.bf16.mxu0 %v12628_v22  ;;  %9626 = vmatprep.subr.bf16.mxu1 %v12631_v24  ;;  %v12713_v22 = vld [vmem:[%s14249_s29 + $0xf28] ss:$16 sps:$4 sm:$0xff]   ;;  %v12718_v24 = vld [vmem:[%s14249_s29 + $0xf44] ss:$16 sps:$4 sm:$0xff]  }
 0x1ea   : > { %8766 = vmatpush1.bf16.msra.mxu0 %v12626_v25  ;;  %9627 = vmatpush1.bf16.msra.mxu1 %v12629_v27  ;;  %v12721_v25 = vld [vmem:[%s14249_s29 + $0xf4c] ss:$16 sps:$4 sm:$0xff]   ;;  %v12716_v27 = vld [vmem:[%s14249_s29 + $0xf40] ss:$16 sps:$4 sm:$0xff]  }
 0x1eb   : > { %8767 = vmatprep.subr.bf16.mxu0 %v12634_v28  ;;  %9628 = vmatprep.subr.bf16.mxu1 %v12637_v13  ;;  %v12719_v28 = vld [vmem:[%s14249_s29 + $0xf48] ss:$16 sps:$4 sm:$0xff]   ;;  %v12724_v13 = vld [vmem:[%s14249_s29 + $0xf64] ss:$16 sps:$4 sm:$0xff]  }
 0x1ee   : > { %8768 = vmatpush1.bf16.msra.mxu0 %v12632_v29  ;;  %9629 = vmatpush1.bf16.msra.mxu1 %v12635_v31  ;;  %v12727_v29 = vld [vmem:[%s14249_s29 + $0xf6c] ss:$16 sps:$4 sm:$0xff]   ;;  %v12722_v31 = vld [vmem:[%s14249_s29 + $0xf60] ss:$16 sps:$4 sm:$0xff]  }
 0x1ef   : > { %8769 = vmatprep.subr.bf16.mxu0 %v12640_v32  ;;  %9630 = vmatprep.subr.bf16.mxu1 %v12643_v33  ;;  %v12725_v32 = vld [vmem:[%s14249_s29 + $0xf68] ss:$16 sps:$4 sm:$0xff]   ;;  %v12730_v33 = vld [vmem:[%s14249_s29 + $0xf84] ss:$16 sps:$4 sm:$0xff]  }
 0x1f2   : > { %8770 = vmatpush1.bf16.msra.mxu0 %v12638_v34  ;;  %9631 = vmatpush1.bf16.msra.mxu1 %v12641_v23  ;;  %v12733_v34 = vld [vmem:[%s14249_s29 + $0xf8c] ss:$16 sps:$4 sm:$0xff]   ;;  %v12728_v23 = vld [vmem:[%s14249_s29 + $0xf80] ss:$16 sps:$4 sm:$0xff]  }
 0x1f3   : > { %8771 = vmatprep.subr.bf16.mxu0 %v12646_v35  ;;  %9632 = vmatprep.subr.bf16.mxu1 %v12649_v20  ;;  %v12731_v35 = vld [vmem:[%s14249_s29 + $0xf88] ss:$16 sps:$4 sm:$0xff]   ;;  %v12736_v20 = vld [vmem:[%s14249_s29 + $0xfa4] ss:$16 sps:$4 sm:$0xff]  }
 0x1f6   : > { %8772 = vmatpush1.bf16.msra.mxu0 %v12644_v38  ;;  %9633 = vmatpush1.bf16.msra.mxu1 %v12647_v39  ;;  %v12739_v38 = vld [vmem:[%s14249_s29 + $0xfac] ss:$16 sps:$4 sm:$0xff]   ;;  %v12734_v39 = vld [vmem:[%s14249_s29 + $0xfa0] ss:$16 sps:$4 sm:$0xff]  }
 0x1f7   : > { %8773 = vmatprep.subr.bf16.mxu0 %v12652_v26  ;;  %9634 = vmatprep.subr.bf16.mxu1 %v12655_v41  ;;  %v12737_v26 = vld [vmem:[%s14249_s29 + $0xfa8] ss:$16 sps:$4 sm:$0xff]   ;;  %v12742_v41 = vld [vmem:[%s14249_s29 + $0xfc4] ss:$16 sps:$4 sm:$0xff]  }
 0x1fa   : > { %8774 = vmatpush1.bf16.msra.mxu0 %v12650_v43  ;;  %9635 = vmatpush1.bf16.msra.mxu1 %v12653_v45  ;;  %v12740_v43 = vld [vmem:[%s14249_s29 + $0xfc0] ss:$16 sps:$4 sm:$0xff]   ;;  %v12743_v45 = vld [vmem:[%s14249_s29 + $0xfc8] ss:$16 sps:$4 sm:$0xff]  }
 0x1fb   : > { %8784 = vmatprep.subr.bf16.mxu0 %v12658_v30  ;;  %9645 = vmatprep.subr.bf16.mxu1 %v12661_v46  ;;  %v12748_v30 = vld [vmem:[%s14249_s29 + $0xfe4] ss:$16 sps:$4 sm:$0xff]   ;;  %v12751_v46 = vld [vmem:[%s14249_s29 + $0xfec] ss:$16 sps:$4 sm:$0xff]  }
 0x1fd   : > { %8776 = vmatmul.mubr.bf16.vlgmr.msra.gmra.mrb[0].mxu0 %v14705_v40  ;;  %9637 = vmatmul.mubr.bf16.vlgmr.msra.gmra.mrb[0].mxu1 %v14705_v40  ;;  %v12671_v40 = vld [vmem:[%s14249_s29 + $0xe48] ss:$16 sps:$4 sm:$0xff]  }
 0x1fe   : > { %8785 = vmatpush1.bf16.msra.mxu0 %v12656_v48  ;;  %9646 = vmatpush1.bf16.msra.mxu1 %v12659_v37  ;;  %v14845_v48 = vld [vmem:[%s14306_s4 + $0x20] sm:$0xff] }
 0x1ff   : > { %8786 = vmatprep.subr.bf16.mxu0 %v12664_v49  ;;  %9647 = vmatprep.subr.bf16.mxu1 %v12667_v51  ;;  %v12746_v37 = vld [vmem:[%s14249_s29 + $0xfe0] ss:$16 sps:$4 sm:$0xff]   ;;  %v12749_v49 = vld [vmem:[%s14249_s29 + $0xfe8] ss:$16 sps:$4 sm:$0xff]   ;;  %v12755_v51 = vld [vmem:[%s14249_s29 + $0x1004] ss:$16 sps:$4 sm:$0xff]  }
 0x200   : > { %8816 = vmatprep.mubr.bf16.mxu0 %v1624_v36  ;;  %9677 = vmatprep.mubr.bf16.mxu1 %v1624_v36  ;;  %v12758_v36 = vld [vmem:[%s14249_s29 + $0x100c] ss:$16 sps:$4 sm:$0xff]  }
 0x202   : > { %8787 = vmatpush1.bf16.msra.mxu0 %v12662_v52  ;;  %9648 = vmatpush1.bf16.msra.mxu1 %v12665_v53  ;;  %v14853_v52 = vrot.slane %v14845_v48, %v14309_v50  ;;  %v12753_v53 = vld [vmem:[%s14249_s29 + $0x1000] ss:$16 sps:$4 sm:$0xff]  }
 0x203   : > { %8788 = vmatprep.subr.bf16.mxu0 %v12670_v54  ;;  %9649 = vmatprep.subr.bf16.mxu1 %v12673_v55  ;;  %v12756_v54 = vld [vmem:[%s14249_s29 + $0x1008] ss:$16 sps:$4 sm:$0xff]   ;;  %v12761_v55 = vld [vmem:[%s14249_s29 + $0x1024] ss:$16 sps:$4 sm:$0xff]  }
 0x206   : > { %8789 = vmatpush1.bf16.msra.mxu0 %v12668_v56  ;;  %9650 = vmatpush1.bf16.msra.mxu1 %v12671_v40  ;;  %v12764_v56 = vld [vmem:[%s14249_s29 + $0x102c] ss:$16 sps:$4 sm:$0xff]   ;;  %v1640_v40 = vcombine.high %v14853_v52, %v14853_v52 }
 0x207   : > { %8790 = vmatprep.subr.bf16.mxu0 %v12676_v57  ;;  %9651 = vmatprep.subr.bf16.mxu1 %v12679_v58  ;;  %v12759_v57 = vld [vmem:[%s14249_s29 + $0x1020] ss:$16 sps:$4 sm:$0xff]   ;;  %v12762_v58 = vld [vmem:[%s14249_s29 + $0x1028] ss:$16 sps:$4 sm:$0xff]  }
 0x20a   : > { %8791 = vmatpush1.bf16.msra.mxu0 %v12674_v59  ;;  %9652 = vmatpush1.bf16.msra.mxu1 %v12677_v60  ;;  %v12767_v59 = vld [vmem:[%s14249_s29 + $0x1044] ss:$16 sps:$4 sm:$0xff]   ;;  %v12770_v60 = vld [vmem:[%s14249_s29 + $0x104c] ss:$16 sps:$4 sm:$0xff]  }
 0x20b   : > { %8792 = vmatprep.subr.bf16.mxu0 %v12682_v61  ;;  %9653 = vmatprep.subr.bf16.mxu1 %v12685_v62  ;;  %v12765_v61 = vld [vmem:[%s14249_s29 + $0x1040] ss:$16 sps:$4 sm:$0xff]   ;;  %v12773_v62 = vld [vmem:[%s14249_s29 + $0x1064] ss:$16 sps:$4 sm:$0xff]  }
 0x20e   : > { %8793 = vmatpush1.bf16.msra.mxu0 %v12680_v63  ;;  %9654 = vmatpush1.bf16.msra.mxu1 %v12683_v0  ;;  %v12776_v63 = vld [vmem:[%s14249_s29 + $0x106c] ss:$16 sps:$4 sm:$0xff]   ;;  %v12771_v0 = vld [vmem:[%s14249_s29 + $0x1060] ss:$16 sps:$4 sm:$0xff]  }
 0x20f   : > { %8794 = vmatprep.subr.bf16.mxu0 %v12688_v1  ;;  %9655 = vmatprep.subr.bf16.mxu1 %v12691_v2  ;;  %v12774_v1 = vld [vmem:[%s14249_s29 + $0x1068] ss:$16 sps:$4 sm:$0xff]   ;;  %v12779_v2 = vld [vmem:[%s14249_s29 + $0x1084] ss:$16 sps:$4 sm:$0xff]  }
 0x212   : > { %8795 = vmatpush1.bf16.msra.mxu0 %v12686_v3  ;;  %9656 = vmatpush1.bf16.msra.mxu1 %v12689_v4  ;;  %v12782_v3 = vld [vmem:[%s14249_s29 + $0x108c] ss:$16 sps:$4 sm:$0xff]   ;;  %v12777_v4 = vld [vmem:[%s14249_s29 + $0x1080] ss:$16 sps:$4 sm:$0xff]  }
 0x213   : > { %8796 = vmatprep.subr.bf16.mxu0 %v12694_v5  ;;  %9657 = vmatprep.subr.bf16.mxu1 %v12697_v6  ;;  %v12780_v5 = vld [vmem:[%s14249_s29 + $0x1088] ss:$16 sps:$4 sm:$0xff]   ;;  %v12785_v6 = vld [vmem:[%s14249_s29 + $0x10a4] ss:$16 sps:$4 sm:$0xff]  }
 0x216   : > { %8797 = vmatpush1.bf16.msra.mxu0 %v12692_v7  ;;  %9658 = vmatpush1.bf16.msra.mxu1 %v12695_v8  ;;  %v12788_v7 = vld [vmem:[%s14249_s29 + $0x10ac] ss:$16 sps:$4 sm:$0xff]   ;;  %v12783_v8 = vld [vmem:[%s14249_s29 + $0x10a0] ss:$16 sps:$4 sm:$0xff]  }
 0x217   : > { %8798 = vmatprep.subr.bf16.mxu0 %v12700_v9  ;;  %9659 = vmatprep.subr.bf16.mxu1 %v12703_v10  ;;  %v12786_v9 = vld [vmem:[%s14249_s29 + $0x10a8] ss:$16 sps:$4 sm:$0xff]   ;;  %v12791_v10 = vld [vmem:[%s14249_s29 + $0x10c4] ss:$16 sps:$4 sm:$0xff]  }
 0x21a   : > { %8799 = vmatpush1.bf16.msra.mxu0 %v12698_v11  ;;  %9660 = vmatpush1.bf16.msra.mxu1 %v12701_v12  ;;  %v12794_v11 = vld [vmem:[%s14249_s29 + $0x10cc] ss:$16 sps:$4 sm:$0xff]   ;;  %v12789_v12 = vld [vmem:[%s14249_s29 + $0x10c0] ss:$16 sps:$4 sm:$0xff]  }
 0x21b   : > { %8800 = vmatprep.subr.bf16.mxu0 %v12706_v14  ;;  %9661 = vmatprep.subr.bf16.mxu1 %v12709_v15  ;;  %v12792_v14 = vld [vmem:[%s14249_s29 + $0x10c8] ss:$16 sps:$4 sm:$0xff]   ;;  %v12797_v15 = vld [vmem:[%s14249_s29 + $0x10e4] ss:$16 sps:$4 sm:$0xff]  }
 0x21e   : > { %8801 = vmatpush1.bf16.msra.mxu0 %v12704_v16  ;;  %9662 = vmatpush1.bf16.msra.mxu1 %v12707_v17  ;;  %v12800_v16 = vld [vmem:[%s14249_s29 + $0x10ec] ss:$16 sps:$4 sm:$0xff]   ;;  %v12795_v17 = vld [vmem:[%s14249_s29 + $0x10e0] ss:$16 sps:$4 sm:$0xff]  }
 0x21f   : > { %8802 = vmatprep.subr.bf16.mxu0 %v12712_v18  ;;  %9663 = vmatprep.subr.bf16.mxu1 %v12715_v19  ;;  %v12798_v18 = vld [vmem:[%s14249_s29 + $0x10e8] ss:$16 sps:$4 sm:$0xff]   ;;  %v12803_v19 = vld [vmem:[%s14249_s29 + $0x1104] ss:$16 sps:$4 sm:$0xff]  }
 0x222   : > { %8803 = vmatpush1.bf16.msra.mxu0 %v12710_v21  ;;  %9664 = vmatpush1.bf16.msra.mxu1 %v12713_v22  ;;  %v12806_v21 = vld [vmem:[%s14249_s29 + $0x110c] ss:$16 sps:$4 sm:$0xff]   ;;  %v12801_v22 = vld [vmem:[%s14249_s29 + $0x1100] ss:$16 sps:$4 sm:$0xff]  }
 0x223   : > { %8804 = vmatprep.subr.bf16.mxu0 %v12718_v24  ;;  %9665 = vmatprep.subr.bf16.mxu1 %v12721_v25  ;;  %v12804_v24 = vld [vmem:[%s14249_s29 + $0x1108] ss:$16 sps:$4 sm:$0xff]   ;;  %v12809_v25 = vld [vmem:[%s14249_s29 + $0x1124] ss:$16 sps:$4 sm:$0xff]  }
 0x226   : > { %8805 = vmatpush1.bf16.msra.mxu0 %v12716_v27  ;;  %9666 = vmatpush1.bf16.msra.mxu1 %v12719_v28  ;;  %v12812_v27 = vld [vmem:[%s14249_s29 + $0x112c] ss:$16 sps:$4 sm:$0xff]   ;;  %v12807_v28 = vld [vmem:[%s14249_s29 + $0x1120] ss:$16 sps:$4 sm:$0xff]  }
 0x227   : > { %8806 = vmatprep.subr.bf16.mxu0 %v12724_v13  ;;  %9667 = vmatprep.subr.bf16.mxu1 %v12727_v29  ;;  %v12810_v13 = vld [vmem:[%s14249_s29 + $0x1128] ss:$16 sps:$4 sm:$0xff]   ;;  %v12815_v29 = vld [vmem:[%s14249_s29 + $0x1144] ss:$16 sps:$4 sm:$0xff]  }
 0x22a   : > { %8807 = vmatpush1.bf16.msra.mxu0 %v12722_v31  ;;  %9668 = vmatpush1.bf16.msra.mxu1 %v12725_v32  ;;  %v12818_v31 = vld [vmem:[%s14249_s29 + $0x114c] ss:$16 sps:$4 sm:$0xff]   ;;  %v12813_v32 = vld [vmem:[%s14249_s29 + $0x1140] ss:$16 sps:$4 sm:$0xff]  }
 0x22b   : > { %8808 = vmatprep.subr.bf16.mxu0 %v12730_v33  ;;  %9669 = vmatprep.subr.bf16.mxu1 %v12733_v34  ;;  %v12816_v33 = vld [vmem:[%s14249_s29 + $0x1148] ss:$16 sps:$4 sm:$0xff]   ;;  %v12821_v34 = vld [vmem:[%s14249_s29 + $0x1164] ss:$16 sps:$4 sm:$0xff]  }
 0x22e   : > { %8809 = vmatpush1.bf16.msra.mxu0 %v12728_v23  ;;  %9670 = vmatpush1.bf16.msra.mxu1 %v12731_v35  ;;  %v12824_v23 = vld [vmem:[%s14249_s29 + $0x116c] ss:$16 sps:$4 sm:$0xff]   ;;  %v12819_v35 = vld [vmem:[%s14249_s29 + $0x1160] ss:$16 sps:$4 sm:$0xff]  }
 0x22f   : > { %8810 = vmatprep.subr.bf16.mxu0 %v12736_v20  ;;  %9671 = vmatprep.subr.bf16.mxu1 %v12739_v38  ;;  %v12822_v20 = vld [vmem:[%s14249_s29 + $0x1168] ss:$16 sps:$4 sm:$0xff]   ;;  %v12827_v38 = vld [vmem:[%s14249_s29 + $0x1184] ss:$16 sps:$4 sm:$0xff]  }
 0x232   : > { %8811 = vmatpush1.bf16.msra.mxu0 %v12734_v39  ;;  %9672 = vmatpush1.bf16.msra.mxu1 %v12737_v26  ;;  %v12830_v39 = vld [vmem:[%s14249_s29 + $0x118c] ss:$16 sps:$4 sm:$0xff]   ;;  %v12825_v26 = vld [vmem:[%s14249_s29 + $0x1180] ss:$16 sps:$4 sm:$0xff]  }
 0x233   : > { %8812 = vmatprep.subr.bf16.mxu0 %v12742_v41  ;;  %9673 = vmatprep.subr.bf16.mxu1 %v12745_v42  ;;  %v12828_v41 = vld [vmem:[%s14249_s29 + $0x1188] ss:$16 sps:$4 sm:$0xff]   ;;  %v12833_v42 = vld [vmem:[%s14249_s29 + $0x11a4] ss:$16 sps:$4 sm:$0xff]  }
 0x236   : > { %8813 = vmatpush1.bf16.msra.mxu0 %v12740_v43  ;;  %9674 = vmatpush1.bf16.msra.mxu1 %v12743_v45  ;;  %v12836_v43 = vld [vmem:[%s14249_s29 + $0x11ac] ss:$16 sps:$4 sm:$0xff]   ;;  %v12831_v45 = vld [vmem:[%s14249_s29 + $0x11a0] ss:$16 sps:$4 sm:$0xff]  }
 0x237   : > { %8814 = vmatprep.subr.bf16.mxu0 %v12748_v30  ;;  %9675 = vmatprep.subr.bf16.mxu1 %v12751_v46  ;;  %v12834_v30 = vld [vmem:[%s14249_s29 + $0x11a8] ss:$16 sps:$4 sm:$0xff]   ;;  %v12839_v46 = vld [vmem:[%s14249_s29 + $0x11c4] ss:$16 sps:$4 sm:$0xff]  }
 0x23a   : > { %8815 = vmatpush1.bf16.msra.mxu0 %v12746_v37  ;;  %9676 = vmatpush1.bf16.msra.mxu1 %v12749_v49  ;;  %v12842_v37 = vld [vmem:[%s14249_s29 + $0x11cc] ss:$16 sps:$4 sm:$0xff]   ;;  %v12837_v49 = vld [vmem:[%s14249_s29 + $0x11c0] ss:$16 sps:$4 sm:$0xff]  }
 0x23b   : > { %8825 = vmatprep.subr.bf16.mxu0 %v12755_v51  ;;  %9686 = vmatprep.subr.bf16.mxu1 %v12758_v36  ;;  %v12840_v51 = vld [vmem:[%s14249_s29 + $0x11c8] ss:$16 sps:$4 sm:$0xff]   ;;  %v12845_v36 = vld [vmem:[%s14249_s29 + $0x11e4] ss:$16 sps:$4 sm:$0xff]  }
 0x23d   : > { %8817 = vmatmul.mubr.bf16.vlgmr.msra.gmra.mrb[0].mxu0 %v14778_v47  ;;  %9678 = vmatmul.mubr.bf16.vlgmr.msra.gmra.mrb[0].mxu1 %v14778_v47  ;;  %v12768_v47 = vld [vmem:[%s14249_s29 + $0x1048] ss:$16 sps:$4 sm:$0xff]  }
 0x23e   : > { %8826 = vmatpush1.bf16.msra.mxu0 %v12753_v53  ;;  %9687 = vmatpush1.bf16.msra.mxu1 %v12756_v54  ;;  %v12848_v53 = vld [vmem:[%s14249_s29 + $0x11ec] ss:$16 sps:$4 sm:$0xff]   ;;  %v1625_v54 = vcombine.high %v14845_v48, %v14845_v48  ;;  %v12852_v48 = vld [vmem:[%s14249_s29 + $0x1208] ss:$16 sps:$4 sm:$0xff]  }
 0x23f   : > { %8827 = vmatprep.subr.bf16.mxu0 %v12761_v55  ;;  %9688 = vmatprep.subr.bf16.mxu1 %v12764_v56  ;;  %v12843_v55 = vld [vmem:[%s14249_s29 + $0x11e0] ss:$16 sps:$4 sm:$0xff]   ;;  %v12846_v56 = vld [vmem:[%s14249_s29 + $0x11e8] ss:$16 sps:$4 sm:$0xff]  }
 0x240   : > { %8857 = vmatprep.mubr.bf16.mxu0 %v1640_v40  ;;  %9718 = vmatprep.mubr.bf16.mxu1 %v1640_v40  ;;  %v12851_v40 = vld [vmem:[%s14249_s29 + $0x1204] ss:$16 sps:$4 sm:$0xff]  }
 0x242   : > { %8828 = vmatpush1.bf16.msra.mxu0 %v12759_v57  ;;  %9689 = vmatpush1.bf16.msra.mxu1 %v12762_v58  ;;  %v12854_v57 = vld [vmem:[%s14249_s29 + $0x120c] ss:$16 sps:$4 sm:$0xff]   ;;  %v14926_v58 = vrot.slane %v1625_v54, %v14309_v50 }
 0x243   : > { %8829 = vmatprep.subr.bf16.mxu0 %v12767_v59  ;;  %9690 = vmatprep.subr.bf16.mxu1 %v12770_v60  ;;  %v12849_v59 = vld [vmem:[%s14249_s29 + $0x1200] ss:$16 sps:$4 sm:$0xff]   ;;  %v12857_v60 = vld [vmem:[%s14249_s29 + $0x1224] ss:$16 sps:$4 sm:$0xff]   ;;  %v12938_v54 = vld [vmem:[%s14249_s29 + $0x13cc] ss:$16 sps:$4 sm:$0xff]  }
 0x246   : > { %8830 = vmatpush1.bf16.msra.mxu0 %v12765_v61  ;;  %9691 = vmatpush1.bf16.msra.mxu1 %v12768_v47  ;;  %v12860_v61 = vld [vmem:[%s14249_s29 + $0x122c] ss:$16 sps:$4 sm:$0xff]   ;;  %v1641_v47 = vcombine.high %v14926_v58, %v14926_v58 }
 0x247   : > { %8831 = vmatprep.subr.bf16.mxu0 %v12773_v62  ;;  %9692 = vmatprep.subr.bf16.mxu1 %v12776_v63  ;;  %v12855_v62 = vld [vmem:[%s14249_s29 + $0x1220] ss:$16 sps:$4 sm:$0xff]   ;;  %v12858_v63 = vld [vmem:[%s14249_s29 + $0x1228] ss:$16 sps:$4 sm:$0xff]  }
 0x24a   : > { %8832 = vmatpush1.bf16.msra.mxu0 %v12771_v0  ;;  %9693 = vmatpush1.bf16.msra.mxu1 %v12774_v1  ;;  %v12863_v0 = vld [vmem:[%s14249_s29 + $0x1244] ss:$16 sps:$4 sm:$0xff]   ;;  %v12866_v1 = vld [vmem:[%s14249_s29 + $0x124c] ss:$16 sps:$4 sm:$0xff]  }
 0x24b   : > { %8833 = vmatprep.subr.bf16.mxu0 %v12779_v2  ;;  %9694 = vmatprep.subr.bf16.mxu1 %v12782_v3  ;;  %v12861_v2 = vld [vmem:[%s14249_s29 + $0x1240] ss:$16 sps:$4 sm:$0xff]   ;;  %v12869_v3 = vld [vmem:[%s14249_s29 + $0x1264] ss:$16 sps:$4 sm:$0xff]  }
 0x24e   : > { %8834 = vmatpush1.bf16.msra.mxu0 %v12777_v4  ;;  %9695 = vmatpush1.bf16.msra.mxu1 %v12780_v5  ;;  %v12872_v4 = vld [vmem:[%s14249_s29 + $0x126c] ss:$16 sps:$4 sm:$0xff]   ;;  %v12867_v5 = vld [vmem:[%s14249_s29 + $0x1260] ss:$16 sps:$4 sm:$0xff]  }
 0x24f   : > { %8835 = vmatprep.subr.bf16.mxu0 %v12785_v6  ;;  %9696 = vmatprep.subr.bf16.mxu1 %v12788_v7  ;;  %v12870_v6 = vld [vmem:[%s14249_s29 + $0x1268] ss:$16 sps:$4 sm:$0xff]   ;;  %v12875_v7 = vld [vmem:[%s14249_s29 + $0x1284] ss:$16 sps:$4 sm:$0xff]  }
 0x252   : > { %8836 = vmatpush1.bf16.msra.mxu0 %v12783_v8  ;;  %9697 = vmatpush1.bf16.msra.mxu1 %v12786_v9  ;;  %v12878_v8 = vld [vmem:[%s14249_s29 + $0x128c] ss:$16 sps:$4 sm:$0xff]   ;;  %v12873_v9 = vld [vmem:[%s14249_s29 + $0x1280] ss:$16 sps:$4 sm:$0xff]  }
 0x253   : > { %8837 = vmatprep.subr.bf16.mxu0 %v12791_v10  ;;  %9698 = vmatprep.subr.bf16.mxu1 %v12794_v11  ;;  %v12876_v10 = vld [vmem:[%s14249_s29 + $0x1288] ss:$16 sps:$4 sm:$0xff]   ;;  %v12881_v11 = vld [vmem:[%s14249_s29 + $0x12a4] ss:$16 sps:$4 sm:$0xff]  }
 0x256   : > { %8838 = vmatpush1.bf16.msra.mxu0 %v12789_v12  ;;  %9699 = vmatpush1.bf16.msra.mxu1 %v12792_v14  ;;  %v12884_v12 = vld [vmem:[%s14249_s29 + $0x12ac] ss:$16 sps:$4 sm:$0xff]   ;;  %v12879_v14 = vld [vmem:[%s14249_s29 + $0x12a0] ss:$16 sps:$4 sm:$0xff]  }
 0x257   : > { %8839 = vmatprep.subr.bf16.mxu0 %v12797_v15  ;;  %9700 = vmatprep.subr.bf16.mxu1 %v12800_v16  ;;  %v12882_v15 = vld [vmem:[%s14249_s29 + $0x12a8] ss:$16 sps:$4 sm:$0xff]   ;;  %v12887_v16 = vld [vmem:[%s14249_s29 + $0x12c4] ss:$16 sps:$4 sm:$0xff]  }
 0x25a   : > { %8840 = vmatpush1.bf16.msra.mxu0 %v12795_v17  ;;  %9701 = vmatpush1.bf16.msra.mxu1 %v12798_v18  ;;  %v12890_v17 = vld [vmem:[%s14249_s29 + $0x12cc] ss:$16 sps:$4 sm:$0xff]   ;;  %v12885_v18 = vld [vmem:[%s14249_s29 + $0x12c0] ss:$16 sps:$4 sm:$0xff]  }
 0x25b   : > { %8841 = vmatprep.subr.bf16.mxu0 %v12803_v19  ;;  %9702 = vmatprep.subr.bf16.mxu1 %v12806_v21  ;;  %v12888_v19 = vld [vmem:[%s14249_s29 + $0x12c8] ss:$16 sps:$4 sm:$0xff]   ;;  %v12893_v21 = vld [vmem:[%s14249_s29 + $0x12e4] ss:$16 sps:$4 sm:$0xff]  }
 0x25e   : > { %8842 = vmatpush1.bf16.msra.mxu0 %v12801_v22  ;;  %9703 = vmatpush1.bf16.msra.mxu1 %v12804_v24  ;;  %v12896_v22 = vld [vmem:[%s14249_s29 + $0x12ec] ss:$16 sps:$4 sm:$0xff]   ;;  %v12891_v24 = vld [vmem:[%s14249_s29 + $0x12e0] ss:$16 sps:$4 sm:$0xff]  }
 0x25f   : > { %8843 = vmatprep.subr.bf16.mxu0 %v12809_v25  ;;  %9704 = vmatprep.subr.bf16.mxu1 %v12812_v27  ;;  %v12894_v25 = vld [vmem:[%s14249_s29 + $0x12e8] ss:$16 sps:$4 sm:$0xff]   ;;  %v12899_v27 = vld [vmem:[%s14249_s29 + $0x1304] ss:$16 sps:$4 sm:$0xff]  }
 0x262   : > { %8844 = vmatpush1.bf16.msra.mxu0 %v12807_v28  ;;  %9705 = vmatpush1.bf16.msra.mxu1 %v12810_v13  ;;  %v12902_v28 = vld [vmem:[%s14249_s29 + $0x130c] ss:$16 sps:$4 sm:$0xff]   ;;  %v12897_v13 = vld [vmem:[%s14249_s29 + $0x1300] ss:$16 sps:$4 sm:$0xff]  }
 0x263   : > { %8845 = vmatprep.subr.bf16.mxu0 %v12815_v29  ;;  %9706 = vmatprep.subr.bf16.mxu1 %v12818_v31  ;;  %v12900_v29 = vld [vmem:[%s14249_s29 + $0x1308] ss:$16 sps:$4 sm:$0xff]   ;;  %v12905_v31 = vld [vmem:[%s14249_s29 + $0x1324] ss:$16 sps:$4 sm:$0xff]  }
 0x266   : > { %8846 = vmatpush1.bf16.msra.mxu0 %v12813_v32  ;;  %9707 = vmatpush1.bf16.msra.mxu1 %v12816_v33  ;;  %v12908_v32 = vld [vmem:[%s14249_s29 + $0x132c] ss:$16 sps:$4 sm:$0xff]   ;;  %v12903_v33 = vld [vmem:[%s14249_s29 + $0x1320] ss:$16 sps:$4 sm:$0xff]  }
 0x267   : > { %8847 = vmatprep.subr.bf16.mxu0 %v12821_v34  ;;  %9708 = vmatprep.subr.bf16.mxu1 %v12824_v23  ;;  %v12906_v34 = vld [vmem:[%s14249_s29 + $0x1328] ss:$16 sps:$4 sm:$0xff]   ;;  %v12911_v23 = vld [vmem:[%s14249_s29 + $0x1344] ss:$16 sps:$4 sm:$0xff]  }
 0x26a   : > { %8848 = vmatpush1.bf16.msra.mxu0 %v12819_v35  ;;  %9709 = vmatpush1.bf16.msra.mxu1 %v12822_v20  ;;  %v12914_v35 = vld [vmem:[%s14249_s29 + $0x134c] ss:$16 sps:$4 sm:$0xff]   ;;  %v12909_v20 = vld [vmem:[%s14249_s29 + $0x1340] ss:$16 sps:$4 sm:$0xff]  }
 0x26b   : > { %8849 = vmatprep.subr.bf16.mxu0 %v12827_v38  ;;  %9710 = vmatprep.subr.bf16.mxu1 %v12830_v39  ;;  %v12912_v38 = vld [vmem:[%s14249_s29 + $0x1348] ss:$16 sps:$4 sm:$0xff]   ;;  %v12917_v39 = vld [vmem:[%s14249_s29 + $0x1364] ss:$16 sps:$4 sm:$0xff]  }
 0x26e   : > { %8850 = vmatpush1.bf16.msra.mxu0 %v12825_v26  ;;  %9711 = vmatpush1.bf16.msra.mxu1 %v12828_v41  ;;  %v12920_v26 = vld [vmem:[%s14249_s29 + $0x136c] ss:$16 sps:$4 sm:$0xff]   ;;  %v12915_v41 = vld [vmem:[%s14249_s29 + $0x1360] ss:$16 sps:$4 sm:$0xff]  }
 0x26f   : > { %8851 = vmatprep.subr.bf16.mxu0 %v12833_v42  ;;  %9712 = vmatprep.subr.bf16.mxu1 %v12836_v43  ;;  %v12918_v42 = vld [vmem:[%s14249_s29 + $0x1368] ss:$16 sps:$4 sm:$0xff]   ;;  %v12923_v43 = vld [vmem:[%s14249_s29 + $0x1384] ss:$16 sps:$4 sm:$0xff]  }
 0x272   : > { %8852 = vmatpush1.bf16.msra.mxu0 %v12831_v45  ;;  %9713 = vmatpush1.bf16.msra.mxu1 %v12834_v30  ;;  %v12926_v45 = vld [vmem:[%s14249_s29 + $0x138c] ss:$16 sps:$4 sm:$0xff]   ;;  %v12921_v30 = vld [vmem:[%s14249_s29 + $0x1380] ss:$16 sps:$4 sm:$0xff]  }
 0x273   : > { %8853 = vmatprep.subr.bf16.mxu0 %v12839_v46  ;;  %9714 = vmatprep.subr.bf16.mxu1 %v12842_v37  ;;  %v12924_v46 = vld [vmem:[%s14249_s29 + $0x1388] ss:$16 sps:$4 sm:$0xff]   ;;  %v12929_v37 = vld [vmem:[%s14249_s29 + $0x13a4] ss:$16 sps:$4 sm:$0xff]  }
 0x276   : > { %8854 = vmatpush1.bf16.msra.mxu0 %v12837_v49  ;;  %9715 = vmatpush1.bf16.msra.mxu1 %v12840_v51  ;;  %v12932_v49 = vld [vmem:[%s14249_s29 + $0x13ac] ss:$16 sps:$4 sm:$0xff]   ;;  %v12927_v51 = vld [vmem:[%s14249_s29 + $0x13a0] ss:$16 sps:$4 sm:$0xff]  }
 0x277   : > { %8855 = vmatprep.subr.bf16.mxu0 %v12845_v36  ;;  %9716 = vmatprep.subr.bf16.mxu1 %v12848_v53  ;;  %v12930_v36 = vld [vmem:[%s14249_s29 + $0x13a8] ss:$16 sps:$4 sm:$0xff]   ;;  %v12935_v53 = vld [vmem:[%s14249_s29 + $0x13c4] ss:$16 sps:$4 sm:$0xff]  }
 0x27a   : > { %8856 = vmatpush1.bf16.msra.mxu0 %v12843_v55  ;;  %9717 = vmatpush1.bf16.msra.mxu1 %v12846_v56  ;;  %v12933_v55 = vld [vmem:[%s14249_s29 + $0x13c0] ss:$16 sps:$4 sm:$0xff]   ;;  %v12936_v56 = vld [vmem:[%s14249_s29 + $0x13c8] ss:$16 sps:$4 sm:$0xff]  }
 0x27b   : > { %8866 = vmatprep.subr.bf16.mxu0 %v12851_v40  ;;  %9727 = vmatprep.subr.bf16.mxu1 %v12854_v57  ;;  %v12941_v40 = vld [vmem:[%s14249_s29 + $0x13e4] ss:$16 sps:$4 sm:$0xff]   ;;  %v12944_v57 = vld [vmem:[%s14249_s29 + $0x13ec] ss:$16 sps:$4 sm:$0xff]  }
 0x27d   : > { %8858 = vmatmul.mubr.bf16.vlgmr.msra.gmra.mrb[0].mxu0 %v14853_v52  ;;  %9719 = vmatmul.mubr.bf16.vlgmr.msra.gmra.mrb[0].mxu1 %v14853_v52  ;;  %v12864_v52 = vld [vmem:[%s14249_s29 + $0x1248] ss:$16 sps:$4 sm:$0xff]  }
 0x27e   : > { %8867 = vmatpush1.bf16.msra.mxu0 %v12849_v59  ;;  %9728 = vmatpush1.bf16.msra.mxu1 %v12852_v48  ;;  %v14993_v59 = vld [vmem:[%s14306_s4 + $0x28] sm:$0xff]  ;;  %v12939_v48 = vld [vmem:[%s14249_s29 + $0x13e0] ss:$16 sps:$4 sm:$0xff]  }
 0x27f   : > { %8868 = vmatprep.subr.bf16.mxu0 %v12857_v60  ;;  %9729 = vmatprep.subr.bf16.mxu1 %v12860_v61  ;;  %v12942_v60 = vld [vmem:[%s14249_s29 + $0x13e8] ss:$16 sps:$4 sm:$0xff]   ;;  %v12948_v61 = vld [vmem:[%s14249_s29 + $0x1404] ss:$16 sps:$4 sm:$0xff]  }
 0x280   : > { %8898 = vmatprep.mubr.bf16.mxu0 %v1641_v47  ;;  %9759 = vmatprep.mubr.bf16.mxu1 %v1641_v47  ;;  %v12951_v47 = vld [vmem:[%s14249_s29 + $0x140c] ss:$16 sps:$4 sm:$0xff]  }
 0x282   : > { %8869 = vmatpush1.bf16.msra.mxu0 %v12855_v62  ;;  %9730 = vmatpush1.bf16.msra.mxu1 %v12858_v63  ;;  %v15001_v62 = vrot.slane %v14993_v59, %v14309_v50  ;;  %v12946_v63 = vld [vmem:[%s14249_s29 + $0x1400] ss:$16 sps:$4 sm:$0xff]  }
 0x283   : > { %8870 = vmatprep.subr.bf16.mxu0 %v12863_v0  ;;  %9731 = vmatprep.subr.bf16.mxu1 %v12866_v1  ;;  %v12949_v0 = vld [vmem:[%s14249_s29 + $0x1408] ss:$16 sps:$4 sm:$0xff]   ;;  %v12954_v1 = vld [vmem:[%s14249_s29 + $0x1424] ss:$16 sps:$4 sm:$0xff]  }
 0x286   : > { %8871 = vmatpush1.bf16.msra.mxu0 %v12861_v2  ;;  %9732 = vmatpush1.bf16.msra.mxu1 %v12864_v52  ;;  %v12957_v2 = vld [vmem:[%s14249_s29 + $0x142c] ss:$16 sps:$4 sm:$0xff]   ;;  %v1657_v52 = vcombine.high %v15001_v62, %v15001_v62 }
 0x287   : > { %8872 = vmatprep.subr.bf16.mxu0 %v12869_v3  ;;  %9733 = vmatprep.subr.bf16.mxu1 %v12872_v4  ;;  %v12952_v3 = vld [vmem:[%s14249_s29 + $0x1420] ss:$16 sps:$4 sm:$0xff]   ;;  %v12955_v4 = vld [vmem:[%s14249_s29 + $0x1428] ss:$16 sps:$4 sm:$0xff]  }
 0x28a   : > { %8873 = vmatpush1.bf16.msra.mxu0 %v12867_v5  ;;  %9734 = vmatpush1.bf16.msra.mxu1 %v12870_v6  ;;  %v12960_v5 = vld [vmem:[%s14249_s29 + $0x1444] ss:$16 sps:$4 sm:$0xff]   ;;  %v12963_v6 = vld [vmem:[%s14249_s29 + $0x144c] ss:$16 sps:$4 sm:$0xff]  }
 0x28b   : > { %8874 = vmatprep.subr.bf16.mxu0 %v12875_v7  ;;  %9735 = vmatprep.subr.bf16.mxu1 %v12878_v8  ;;  %v12958_v7 = vld [vmem:[%s14249_s29 + $0x1440] ss:$16 sps:$4 sm:$0xff]   ;;  %v12966_v8 = vld [vmem:[%s14249_s29 + $0x1464] ss:$16 sps:$4 sm:$0xff]  }
 0x28e   : > { %8875 = vmatpush1.bf16.msra.mxu0 %v12873_v9  ;;  %9736 = vmatpush1.bf16.msra.mxu1 %v12876_v10  ;;  %v12969_v9 = vld [vmem:[%s14249_s29 + $0x146c] ss:$16 sps:$4 sm:$0xff]   ;;  %v12964_v10 = vld [vmem:[%s14249_s29 + $0x1460] ss:$16 sps:$4 sm:$0xff]  }
 0x28f   : > { %8876 = vmatprep.subr.bf16.mxu0 %v12881_v11  ;;  %9737 = vmatprep.subr.bf16.mxu1 %v12884_v12  ;;  %v12967_v11 = vld [vmem:[%s14249_s29 + $0x1468] ss:$16 sps:$4 sm:$0xff]   ;;  %v12972_v12 = vld [vmem:[%s14249_s29 + $0x1484] ss:$16 sps:$4 sm:$0xff]  }
 0x292   : > { %8877 = vmatpush1.bf16.msra.mxu0 %v12879_v14  ;;  %9738 = vmatpush1.bf16.msra.mxu1 %v12882_v15  ;;  %v12975_v14 = vld [vmem:[%s14249_s29 + $0x148c] ss:$16 sps:$4 sm:$0xff]   ;;  %v12970_v15 = vld [vmem:[%s14249_s29 + $0x1480] ss:$16 sps:$4 sm:$0xff]  }
 0x293   : > { %8878 = vmatprep.subr.bf16.mxu0 %v12887_v16  ;;  %9739 = vmatprep.subr.bf16.mxu1 %v12890_v17  ;;  %v12973_v16 = vld [vmem:[%s14249_s29 + $0x1488] ss:$16 sps:$4 sm:$0xff]   ;;  %v12978_v17 = vld [vmem:[%s14249_s29 + $0x14a4] ss:$16 sps:$4 sm:$0xff]  }
 0x296   : > { %8879 = vmatpush1.bf16.msra.mxu0 %v12885_v18  ;;  %9740 = vmatpush1.bf16.msra.mxu1 %v12888_v19  ;;  %v12981_v18 = vld [vmem:[%s14249_s29 + $0x14ac] ss:$16 sps:$4 sm:$0xff]   ;;  %v12976_v19 = vld [vmem:[%s14249_s29 + $0x14a0] ss:$16 sps:$4 sm:$0xff]  }
 0x297   : > { %8880 = vmatprep.subr.bf16.mxu0 %v12893_v21  ;;  %9741 = vmatprep.subr.bf16.mxu1 %v12896_v22  ;;  %v12979_v21 = vld [vmem:[%s14249_s29 + $0x14a8] ss:$16 sps:$4 sm:$0xff]   ;;  %v12984_v22 = vld [vmem:[%s14249_s29 + $0x14c4] ss:$16 sps:$4 sm:$0xff]  }
 0x29a   : > { %8881 = vmatpush1.bf16.msra.mxu0 %v12891_v24  ;;  %9742 = vmatpush1.bf16.msra.mxu1 %v12894_v25  ;;  %v12987_v24 = vld [vmem:[%s14249_s29 + $0x14cc] ss:$16 sps:$4 sm:$0xff]   ;;  %v12982_v25 = vld [vmem:[%s14249_s29 + $0x14c0] ss:$16 sps:$4 sm:$0xff]  }
 0x29b   : > { %8882 = vmatprep.subr.bf16.mxu0 %v12899_v27  ;;  %9743 = vmatprep.subr.bf16.mxu1 %v12902_v28  ;;  %v12985_v27 = vld [vmem:[%s14249_s29 + $0x14c8] ss:$16 sps:$4 sm:$0xff]   ;;  %v12990_v28 = vld [vmem:[%s14249_s29 + $0x14e4] ss:$16 sps:$4 sm:$0xff]  }
 0x29e   : > { %8883 = vmatpush1.bf16.msra.mxu0 %v12897_v13  ;;  %9744 = vmatpush1.bf16.msra.mxu1 %v12900_v29  ;;  %v12993_v13 = vld [vmem:[%s14249_s29 + $0x14ec] ss:$16 sps:$4 sm:$0xff]   ;;  %v12988_v29 = vld [vmem:[%s14249_s29 + $0x14e0] ss:$16 sps:$4 sm:$0xff]  }
 0x29f   : > { %8884 = vmatprep.subr.bf16.mxu0 %v12905_v31  ;;  %9745 = vmatprep.subr.bf16.mxu1 %v12908_v32  ;;  %v12991_v31 = vld [vmem:[%s14249_s29 + $0x14e8] ss:$16 sps:$4 sm:$0xff]   ;;  %v12996_v32 = vld [vmem:[%s14249_s29 + $0x1504] ss:$16 sps:$4 sm:$0xff]  }
 0x2a2   : > { %8885 = vmatpush1.bf16.msra.mxu0 %v12903_v33  ;;  %9746 = vmatpush1.bf16.msra.mxu1 %v12906_v34  ;;  %v12999_v33 = vld [vmem:[%s14249_s29 + $0x150c] ss:$16 sps:$4 sm:$0xff]   ;;  %v12994_v34 = vld [vmem:[%s14249_s29 + $0x1500] ss:$16 sps:$4 sm:$0xff]  }
 0x2a3   : > { %8886 = vmatprep.subr.bf16.mxu0 %v12911_v23  ;;  %9747 = vmatprep.subr.bf16.mxu1 %v12914_v35  ;;  %v12997_v23 = vld [vmem:[%s14249_s29 + $0x1508] ss:$16 sps:$4 sm:$0xff]   ;;  %v13002_v35 = vld [vmem:[%s14249_s29 + $0x1524] ss:$16 sps:$4 sm:$0xff]  }
 0x2a6   : > { %8887 = vmatpush1.bf16.msra.mxu0 %v12909_v20  ;;  %9748 = vmatpush1.bf16.msra.mxu1 %v12912_v38  ;;  %v13005_v20 = vld [vmem:[%s14249_s29 + $0x152c] ss:$16 sps:$4 sm:$0xff]   ;;  %v13000_v38 = vld [vmem:[%s14249_s29 + $0x1520] ss:$16 sps:$4 sm:$0xff]  }
 0x2a7   : > { %8888 = vmatprep.subr.bf16.mxu0 %v12917_v39  ;;  %9749 = vmatprep.subr.bf16.mxu1 %v12920_v26  ;;  %v13003_v39 = vld [vmem:[%s14249_s29 + $0x1528] ss:$16 sps:$4 sm:$0xff]   ;;  %v13008_v26 = vld [vmem:[%s14249_s29 + $0x1544] ss:$16 sps:$4 sm:$0xff]  }
 0x2aa   : > { %8889 = vmatpush1.bf16.msra.mxu0 %v12915_v41  ;;  %9750 = vmatpush1.bf16.msra.mxu1 %v12918_v42  ;;  %v13011_v41 = vld [vmem:[%s14249_s29 + $0x154c] ss:$16 sps:$4 sm:$0xff]   ;;  %v13006_v42 = vld [vmem:[%s14249_s29 + $0x1540] ss:$16 sps:$4 sm:$0xff]  }
 0x2ab   : > { %8890 = vmatprep.subr.bf16.mxu0 %v12923_v43  ;;  %9751 = vmatprep.subr.bf16.mxu1 %v12926_v45  ;;  %v13009_v43 = vld [vmem:[%s14249_s29 + $0x1548] ss:$16 sps:$4 sm:$0xff]   ;;  %v13014_v45 = vld [vmem:[%s14249_s29 + $0x1564] ss:$16 sps:$4 sm:$0xff]  }
 0x2ae   : > { %8891 = vmatpush1.bf16.msra.mxu0 %v12921_v30  ;;  %9752 = vmatpush1.bf16.msra.mxu1 %v12924_v46  ;;  %v13017_v30 = vld [vmem:[%s14249_s29 + $0x156c] ss:$16 sps:$4 sm:$0xff]   ;;  %v13012_v46 = vld [vmem:[%s14249_s29 + $0x1560] ss:$16 sps:$4 sm:$0xff]  }
 0x2af   : > { %8892 = vmatprep.subr.bf16.mxu0 %v12929_v37  ;;  %9753 = vmatprep.subr.bf16.mxu1 %v12932_v49  ;;  %v13015_v37 = vld [vmem:[%s14249_s29 + $0x1568] ss:$16 sps:$4 sm:$0xff]   ;;  %v13020_v49 = vld [vmem:[%s14249_s29 + $0x1584] ss:$16 sps:$4 sm:$0xff]  }
 0x2b2   : > { %8893 = vmatpush1.bf16.msra.mxu0 %v12927_v51  ;;  %9754 = vmatpush1.bf16.msra.mxu1 %v12930_v36  ;;  %v13023_v51 = vld [vmem:[%s14249_s29 + $0x158c] ss:$16 sps:$4 sm:$0xff]   ;;  %v13018_v36 = vld [vmem:[%s14249_s29 + $0x1580] ss:$16 sps:$4 sm:$0xff]  }
 0x2b3   : > { %8894 = vmatprep.subr.bf16.mxu0 %v12935_v53  ;;  %9755 = vmatprep.subr.bf16.mxu1 %v12938_v54  ;;  %v13021_v53 = vld [vmem:[%s14249_s29 + $0x1588] ss:$16 sps:$4 sm:$0xff]   ;;  %v13026_v54 = vld [vmem:[%s14249_s29 + $0x15a4] ss:$16 sps:$4 sm:$0xff]  }
 0x2b6   : > { %8895 = vmatpush1.bf16.msra.mxu0 %v12933_v55  ;;  %9756 = vmatpush1.bf16.msra.mxu1 %v12936_v56  ;;  %v13029_v55 = vld [vmem:[%s14249_s29 + $0x15ac] ss:$16 sps:$4 sm:$0xff]   ;;  %v13024_v56 = vld [vmem:[%s14249_s29 + $0x15a0] ss:$16 sps:$4 sm:$0xff]  }
 0x2b7   : > { %8896 = vmatprep.subr.bf16.mxu0 %v12941_v40  ;;  %9757 = vmatprep.subr.bf16.mxu1 %v12944_v57  ;;  %v13027_v40 = vld [vmem:[%s14249_s29 + $0x15a8] ss:$16 sps:$4 sm:$0xff]   ;;  %v13032_v57 = vld [vmem:[%s14249_s29 + $0x15c4] ss:$16 sps:$4 sm:$0xff]  }
 0x2ba   : > { %8897 = vmatpush1.bf16.msra.mxu0 %v12939_v48  ;;  %9758 = vmatpush1.bf16.msra.mxu1 %v12942_v60  ;;  %v13035_v48 = vld [vmem:[%s14249_s29 + $0x15cc] ss:$16 sps:$4 sm:$0xff]   ;;  %v13030_v60 = vld [vmem:[%s14249_s29 + $0x15c0] ss:$16 sps:$4 sm:$0xff]  }
 0x2bb   : > { %8907 = vmatprep.subr.bf16.mxu0 %v12948_v61  ;;  %9768 = vmatprep.subr.bf16.mxu1 %v12951_v47  ;;  %v13033_v61 = vld [vmem:[%s14249_s29 + $0x15c8] ss:$16 sps:$4 sm:$0xff]   ;;  %v13038_v47 = vld [vmem:[%s14249_s29 + $0x15e4] ss:$16 sps:$4 sm:$0xff]  }
 0x2bd   : > { %8899 = vmatmul.mubr.bf16.vlgmr.msra.gmra.mrb[0].mxu0 %v14926_v58  ;;  %9760 = vmatmul.mubr.bf16.vlgmr.msra.gmra.mrb[0].mxu1 %v14926_v58  ;;  %v12961_v58 = vld [vmem:[%s14249_s29 + $0x1448] ss:$16 sps:$4 sm:$0xff]  }
 0x2be   : > { %8908 = vmatpush1.bf16.msra.mxu0 %v12946_v63  ;;  %9769 = vmatpush1.bf16.msra.mxu1 %v12949_v0  ;;  %v13041_v63 = vld [vmem:[%s14249_s29 + $0x15ec] ss:$16 sps:$4 sm:$0xff]   ;;  %v1642_v0 = vcombine.high %v14993_v59, %v14993_v59  ;;  %v13045_v59 = vld [vmem:[%s14249_s29 + $0x1608] ss:$16 sps:$4 sm:$0xff]  }
 0x2bf   : > { %8909 = vmatprep.subr.bf16.mxu0 %v12954_v1  ;;  %9770 = vmatprep.subr.bf16.mxu1 %v12957_v2  ;;  %v13036_v1 = vld [vmem:[%s14249_s29 + $0x15e0] ss:$16 sps:$4 sm:$0xff]   ;;  %v13039_v2 = vld [vmem:[%s14249_s29 + $0x15e8] ss:$16 sps:$4 sm:$0xff]  }
 0x2c0   : > { %8939 = vmatprep.mubr.bf16.mxu0 %v1657_v52  ;;  %9800 = vmatprep.mubr.bf16.mxu1 %v1657_v52  ;;  %v13044_v52 = vld [vmem:[%s14249_s29 + $0x1604] ss:$16 sps:$4 sm:$0xff]  }
 0x2c2   : > { %8910 = vmatpush1.bf16.msra.mxu0 %v12952_v3  ;;  %9771 = vmatpush1.bf16.msra.mxu1 %v12955_v4  ;;  %v13047_v3 = vld [vmem:[%s14249_s29 + $0x160c] ss:$16 sps:$4 sm:$0xff]   ;;  %v15074_v4 = vrot.slane %v1642_v0, %v14309_v50 }
 0x2c3   : > { %8911 = vmatprep.subr.bf16.mxu0 %v12960_v5  ;;  %9772 = vmatprep.subr.bf16.mxu1 %v12963_v6  ;;  %v13042_v5 = vld [vmem:[%s14249_s29 + $0x1600] ss:$16 sps:$4 sm:$0xff]   ;;  %v13050_v6 = vld [vmem:[%s14249_s29 + $0x1624] ss:$16 sps:$4 sm:$0xff]   ;;  %v13131_v0 = vld [vmem:[%s14249_s29 + $0x17cc] ss:$16 sps:$4 sm:$0xff]  }
 0x2c6   : > { %8912 = vmatpush1.bf16.msra.mxu0 %v12958_v7  ;;  %9773 = vmatpush1.bf16.msra.mxu1 %v12961_v58  ;;  %v13053_v7 = vld [vmem:[%s14249_s29 + $0x162c] ss:$16 sps:$4 sm:$0xff]   ;;  %v1658_v58 = vcombine.high %v15074_v4, %v15074_v4 }
 0x2c7   : > { %8913 = vmatprep.subr.bf16.mxu0 %v12966_v8  ;;  %9774 = vmatprep.subr.bf16.mxu1 %v12969_v9  ;;  %v13048_v8 = vld [vmem:[%s14249_s29 + $0x1620] ss:$16 sps:$4 sm:$0xff]   ;;  %v13051_v9 = vld [vmem:[%s14249_s29 + $0x1628] ss:$16 sps:$4 sm:$0xff]  }
 0x2ca   : > { %8914 = vmatpush1.bf16.msra.mxu0 %v12964_v10  ;;  %9775 = vmatpush1.bf16.msra.mxu1 %v12967_v11  ;;  %v13056_v10 = vld [vmem:[%s14249_s29 + $0x1644] ss:$16 sps:$4 sm:$0xff]   ;;  %v13059_v11 = vld [vmem:[%s14249_s29 + $0x164c] ss:$16 sps:$4 sm:$0xff]  }
 0x2cb   : > { %8915 = vmatprep.subr.bf16.mxu0 %v12972_v12  ;;  %9776 = vmatprep.subr.bf16.mxu1 %v12975_v14  ;;  %v13054_v12 = vld [vmem:[%s14249_s29 + $0x1640] ss:$16 sps:$4 sm:$0xff]   ;;  %v13062_v14 = vld [vmem:[%s14249_s29 + $0x1664] ss:$16 sps:$4 sm:$0xff]  }
 0x2ce   : > { %8916 = vmatpush1.bf16.msra.mxu0 %v12970_v15  ;;  %9777 = vmatpush1.bf16.msra.mxu1 %v12973_v16  ;;  %v13065_v15 = vld [vmem:[%s14249_s29 + $0x166c] ss:$16 sps:$4 sm:$0xff]   ;;  %v13060_v16 = vld [vmem:[%s14249_s29 + $0x1660] ss:$16 sps:$4 sm:$0xff]  }
 0x2cf   : > { %8917 = vmatprep.subr.bf16.mxu0 %v12978_v17  ;;  %9778 = vmatprep.subr.bf16.mxu1 %v12981_v18  ;;  %v13063_v17 = vld [vmem:[%s14249_s29 + $0x1668] ss:$16 sps:$4 sm:$0xff]   ;;  %v13068_v18 = vld [vmem:[%s14249_s29 + $0x1684] ss:$16 sps:$4 sm:$0xff]  }
 0x2d2   : > { %8918 = vmatpush1.bf16.msra.mxu0 %v12976_v19  ;;  %9779 = vmatpush1.bf16.msra.mxu1 %v12979_v21  ;;  %v13071_v19 = vld [vmem:[%s14249_s29 + $0x168c] ss:$16 sps:$4 sm:$0xff]   ;;  %v13066_v21 = vld [vmem:[%s14249_s29 + $0x1680] ss:$16 sps:$4 sm:$0xff]  }
 0x2d3   : > { %8919 = vmatprep.subr.bf16.mxu0 %v12984_v22  ;;  %9780 = vmatprep.subr.bf16.mxu1 %v12987_v24  ;;  %v13069_v22 = vld [vmem:[%s14249_s29 + $0x1688] ss:$16 sps:$4 sm:$0xff]   ;;  %v13074_v24 = vld [vmem:[%s14249_s29 + $0x16a4] ss:$16 sps:$4 sm:$0xff]  }
 0x2d6   : > { %8920 = vmatpush1.bf16.msra.mxu0 %v12982_v25  ;;  %9781 = vmatpush1.bf16.msra.mxu1 %v12985_v27  ;;  %v13077_v25 = vld [vmem:[%s14249_s29 + $0x16ac] ss:$16 sps:$4 sm:$0xff]   ;;  %v13072_v27 = vld [vmem:[%s14249_s29 + $0x16a0] ss:$16 sps:$4 sm:$0xff]  }
 0x2d7   : > { %8921 = vmatprep.subr.bf16.mxu0 %v12990_v28  ;;  %9782 = vmatprep.subr.bf16.mxu1 %v12993_v13  ;;  %v13075_v28 = vld [vmem:[%s14249_s29 + $0x16a8] ss:$16 sps:$4 sm:$0xff]   ;;  %v13080_v13 = vld [vmem:[%s14249_s29 + $0x16c4] ss:$16 sps:$4 sm:$0xff]  }
 0x2da   : > { %8922 = vmatpush1.bf16.msra.mxu0 %v12988_v29  ;;  %9783 = vmatpush1.bf16.msra.mxu1 %v12991_v31  ;;  %v13083_v29 = vld [vmem:[%s14249_s29 + $0x16cc] ss:$16 sps:$4 sm:$0xff]   ;;  %v13078_v31 = vld [vmem:[%s14249_s29 + $0x16c0] ss:$16 sps:$4 sm:$0xff]  }
 0x2db   : > { %8923 = vmatprep.subr.bf16.mxu0 %v12996_v32  ;;  %9784 = vmatprep.subr.bf16.mxu1 %v12999_v33  ;;  %v13081_v32 = vld [vmem:[%s14249_s29 + $0x16c8] ss:$16 sps:$4 sm:$0xff]   ;;  %v13086_v33 = vld [vmem:[%s14249_s29 + $0x16e4] ss:$16 sps:$4 sm:$0xff]  }
 0x2de   : > { %8924 = vmatpush1.bf16.msra.mxu0 %v12994_v34  ;;  %9785 = vmatpush1.bf16.msra.mxu1 %v12997_v23  ;;  %v13089_v34 = vld [vmem:[%s14249_s29 + $0x16ec] ss:$16 sps:$4 sm:$0xff]   ;;  %v13084_v23 = vld [vmem:[%s14249_s29 + $0x16e0] ss:$16 sps:$4 sm:$0xff]  }
 0x2df   : > { %8925 = vmatprep.subr.bf16.mxu0 %v13002_v35  ;;  %9786 = vmatprep.subr.bf16.mxu1 %v13005_v20  ;;  %v13087_v35 = vld [vmem:[%s14249_s29 + $0x16e8] ss:$16 sps:$4 sm:$0xff]   ;;  %v13092_v20 = vld [vmem:[%s14249_s29 + $0x1704] ss:$16 sps:$4 sm:$0xff]  }
 0x2e2   : > { %8926 = vmatpush1.bf16.msra.mxu0 %v13000_v38  ;;  %9787 = vmatpush1.bf16.msra.mxu1 %v13003_v39  ;;  %v13095_v38 = vld [vmem:[%s14249_s29 + $0x170c] ss:$16 sps:$4 sm:$0xff]   ;;  %v13090_v39 = vld [vmem:[%s14249_s29 + $0x1700] ss:$16 sps:$4 sm:$0xff]  }
 0x2e3   : > { %8927 = vmatprep.subr.bf16.mxu0 %v13008_v26  ;;  %9788 = vmatprep.subr.bf16.mxu1 %v13011_v41  ;;  %v13093_v26 = vld [vmem:[%s14249_s29 + $0x1708] ss:$16 sps:$4 sm:$0xff]   ;;  %v13098_v41 = vld [vmem:[%s14249_s29 + $0x1724] ss:$16 sps:$4 sm:$0xff]  }
 0x2e6   : > { %8928 = vmatpush1.bf16.msra.mxu0 %v13006_v42  ;;  %9789 = vmatpush1.bf16.msra.mxu1 %v13009_v43  ;;  %v13101_v42 = vld [vmem:[%s14249_s29 + $0x172c] ss:$16 sps:$4 sm:$0xff]   ;;  %v13096_v43 = vld [vmem:[%s14249_s29 + $0x1720] ss:$16 sps:$4 sm:$0xff]  }
 0x2e7   : > { %8929 = vmatprep.subr.bf16.mxu0 %v13014_v45  ;;  %9790 = vmatprep.subr.bf16.mxu1 %v13017_v30  ;;  %v13099_v45 = vld [vmem:[%s14249_s29 + $0x1728] ss:$16 sps:$4 sm:$0xff]   ;;  %v13104_v30 = vld [vmem:[%s14249_s29 + $0x1744] ss:$16 sps:$4 sm:$0xff]  }
 0x2ea   : > { %8930 = vmatpush1.bf16.msra.mxu0 %v13012_v46  ;;  %9791 = vmatpush1.bf16.msra.mxu1 %v13015_v37  ;;  %v13107_v46 = vld [vmem:[%s14249_s29 + $0x174c] ss:$16 sps:$4 sm:$0xff]   ;;  %v13102_v37 = vld [vmem:[%s14249_s29 + $0x1740] ss:$16 sps:$4 sm:$0xff]  }
 0x2eb   : > { %8931 = vmatprep.subr.bf16.mxu0 %v13020_v49  ;;  %9792 = vmatprep.subr.bf16.mxu1 %v13023_v51  ;;  %v13105_v49 = vld [vmem:[%s14249_s29 + $0x1748] ss:$16 sps:$4 sm:$0xff]   ;;  %v13110_v51 = vld [vmem:[%s14249_s29 + $0x1764] ss:$16 sps:$4 sm:$0xff]  }
 0x2ee   : > { %8932 = vmatpush1.bf16.msra.mxu0 %v13018_v36  ;;  %9793 = vmatpush1.bf16.msra.mxu1 %v13021_v53  ;;  %v13113_v36 = vld [vmem:[%s14249_s29 + $0x176c] ss:$16 sps:$4 sm:$0xff]   ;;  %v13108_v53 = vld [vmem:[%s14249_s29 + $0x1760] ss:$16 sps:$4 sm:$0xff]  }
 0x2ef   : > { %8933 = vmatprep.subr.bf16.mxu0 %v13026_v54  ;;  %9794 = vmatprep.subr.bf16.mxu1 %v13029_v55  ;;  %v13111_v54 = vld [vmem:[%s14249_s29 + $0x1768] ss:$16 sps:$4 sm:$0xff]   ;;  %v13116_v55 = vld [vmem:[%s14249_s29 + $0x1784] ss:$16 sps:$4 sm:$0xff]  }
 0x2f2   : > { %8934 = vmatpush1.bf16.msra.mxu0 %v13024_v56  ;;  %9795 = vmatpush1.bf16.msra.mxu1 %v13027_v40  ;;  %v13119_v56 = vld [vmem:[%s14249_s29 + $0x178c] ss:$16 sps:$4 sm:$0xff]   ;;  %v13114_v40 = vld [vmem:[%s14249_s29 + $0x1780] ss:$16 sps:$4 sm:$0xff]  }
 0x2f3   : > { %8935 = vmatprep.subr.bf16.mxu0 %v13032_v57  ;;  %9796 = vmatprep.subr.bf16.mxu1 %v13035_v48  ;;  %v13117_v57 = vld [vmem:[%s14249_s29 + $0x1788] ss:$16 sps:$4 sm:$0xff]   ;;  %v13122_v48 = vld [vmem:[%s14249_s29 + $0x17a4] ss:$16 sps:$4 sm:$0xff]  }
 0x2f6   : > { %8936 = vmatpush1.bf16.msra.mxu0 %v13030_v60  ;;  %9797 = vmatpush1.bf16.msra.mxu1 %v13033_v61  ;;  %v13125_v60 = vld [vmem:[%s14249_s29 + $0x17ac] ss:$16 sps:$4 sm:$0xff]   ;;  %v13120_v61 = vld [vmem:[%s14249_s29 + $0x17a0] ss:$16 sps:$4 sm:$0xff]  }
 0x2f7   : > { %8937 = vmatprep.subr.bf16.mxu0 %v13038_v47  ;;  %9798 = vmatprep.subr.bf16.mxu1 %v13041_v63  ;;  %v13123_v47 = vld [vmem:[%s14249_s29 + $0x17a8] ss:$16 sps:$4 sm:$0xff]   ;;  %v13128_v63 = vld [vmem:[%s14249_s29 + $0x17c4] ss:$16 sps:$4 sm:$0xff]  }
 0x2fa   : > { %8938 = vmatpush1.bf16.msra.mxu0 %v13036_v1  ;;  %9799 = vmatpush1.bf16.msra.mxu1 %v13039_v2  ;;  %v13126_v1 = vld [vmem:[%s14249_s29 + $0x17c0] ss:$16 sps:$4 sm:$0xff]   ;;  %v13129_v2 = vld [vmem:[%s14249_s29 + $0x17c8] ss:$16 sps:$4 sm:$0xff]  }
 0x2fb   : > { %8948 = vmatprep.subr.bf16.mxu0 %v13044_v52  ;;  %9809 = vmatprep.subr.bf16.mxu1 %v13047_v3  ;;  %v13134_v52 = vld [vmem:[%s14249_s29 + $0x17e4] ss:$16 sps:$4 sm:$0xff]   ;;  %v13137_v3 = vld [vmem:[%s14249_s29 + $0x17ec] ss:$16 sps:$4 sm:$0xff]  }
 0x2fd   : > { %8940 = vmatmul.mubr.bf16.vlgmr.msra.gmra.mrb[0].mxu0 %v15001_v62  ;;  %9801 = vmatmul.mubr.bf16.vlgmr.msra.gmra.mrb[0].mxu1 %v15001_v62  ;;  %v13057_v62 = vld [vmem:[%s14249_s29 + $0x1648] ss:$16 sps:$4 sm:$0xff]  }
 0x2fe   : > { %8949 = vmatpush1.bf16.msra.mxu0 %v13042_v5  ;;  %9810 = vmatpush1.bf16.msra.mxu1 %v13045_v59  ;;  %v15141_v5 = vld [vmem:[%s14306_s4 + $0x30] sm:$0xff] }
 0x2ff   : > { %8950 = vmatprep.subr.bf16.mxu0 %v13050_v6  ;;  %9811 = vmatprep.subr.bf16.mxu1 %v13053_v7  ;;  %v13132_v59 = vld [vmem:[%s14249_s29 + $0x17e0] ss:$16 sps:$4 sm:$0xff]   ;;  %v13135_v6 = vld [vmem:[%s14249_s29 + $0x17e8] ss:$16 sps:$4 sm:$0xff]   ;;  %v13141_v7 = vld [vmem:[%s14249_s29 + $0x1804] ss:$16 sps:$4 sm:$0xff]  }
 0x300   : > { %8980 = vmatprep.mubr.bf16.mxu0 %v1658_v58  ;;  %9841 = vmatprep.mubr.bf16.mxu1 %v1658_v58  ;;  %v13144_v58 = vld [vmem:[%s14249_s29 + $0x180c] ss:$16 sps:$4 sm:$0xff]  }
 0x302   : > { %8951 = vmatpush1.bf16.msra.mxu0 %v13048_v8  ;;  %9812 = vmatpush1.bf16.msra.mxu1 %v13051_v9  ;;  %v15149_v8 = vrot.slane %v15141_v5, %v14309_v50  ;;  %v13139_v9 = vld [vmem:[%s14249_s29 + $0x1800] ss:$16 sps:$4 sm:$0xff]  }
 0x303   : > { %8952 = vmatprep.subr.bf16.mxu0 %v13056_v10  ;;  %9813 = vmatprep.subr.bf16.mxu1 %v13059_v11  ;;  %v13142_v10 = vld [vmem:[%s14249_s29 + $0x1808] ss:$16 sps:$4 sm:$0xff]   ;;  %v13147_v11 = vld [vmem:[%s14249_s29 + $0x1824] ss:$16 sps:$4 sm:$0xff]  }
 0x306   : > { %8953 = vmatpush1.bf16.msra.mxu0 %v13054_v12  ;;  %9814 = vmatpush1.bf16.msra.mxu1 %v13057_v62  ;;  %v13150_v12 = vld [vmem:[%s14249_s29 + $0x182c] ss:$16 sps:$4 sm:$0xff]   ;;  %v1674_v62 = vcombine.high %v15149_v8, %v15149_v8 }
 0x307   : > { %8954 = vmatprep.subr.bf16.mxu0 %v13062_v14  ;;  %9815 = vmatprep.subr.bf16.mxu1 %v13065_v15  ;;  %v13145_v14 = vld [vmem:[%s14249_s29 + $0x1820] ss:$16 sps:$4 sm:$0xff]   ;;  %v13148_v15 = vld [vmem:[%s14249_s29 + $0x1828] ss:$16 sps:$4 sm:$0xff]  }
 0x30a   : > { %8955 = vmatpush1.bf16.msra.mxu0 %v13060_v16  ;;  %9816 = vmatpush1.bf16.msra.mxu1 %v13063_v17  ;;  %v13153_v16 = vld [vmem:[%s14249_s29 + $0x1844] ss:$16 sps:$4 sm:$0xff]   ;;  %v13156_v17 = vld [vmem:[%s14249_s29 + $0x184c] ss:$16 sps:$4 sm:$0xff]  }
 0x30b   : > { %8956 = vmatprep.subr.bf16.mxu0 %v13068_v18  ;;  %9817 = vmatprep.subr.bf16.mxu1 %v13071_v19  ;;  %v13151_v18 = vld [vmem:[%s14249_s29 + $0x1840] ss:$16 sps:$4 sm:$0xff]   ;;  %v13159_v19 = vld [vmem:[%s14249_s29 + $0x1864] ss:$16 sps:$4 sm:$0xff]  }
 0x30e   : > { %8957 = vmatpush1.bf16.msra.mxu0 %v13066_v21  ;;  %9818 = vmatpush1.bf16.msra.mxu1 %v13069_v22  ;;  %v13162_v21 = vld [vmem:[%s14249_s29 + $0x186c] ss:$16 sps:$4 sm:$0xff]   ;;  %v13157_v22 = vld [vmem:[%s14249_s29 + $0x1860] ss:$16 sps:$4 sm:$0xff]  }
 0x30f   : > { %8958 = vmatprep.subr.bf16.mxu0 %v13074_v24  ;;  %9819 = vmatprep.subr.bf16.mxu1 %v13077_v25  ;;  %v13160_v24 = vld [vmem:[%s14249_s29 + $0x1868] ss:$16 sps:$4 sm:$0xff]   ;;  %v13165_v25 = vld [vmem:[%s14249_s29 + $0x1884] ss:$16 sps:$4 sm:$0xff]  }
 0x312   : > { %8959 = vmatpush1.bf16.msra.mxu0 %v13072_v27  ;;  %9820 = vmatpush1.bf16.msra.mxu1 %v13075_v28  ;;  %v13168_v27 = vld [vmem:[%s14249_s29 + $0x188c] ss:$16 sps:$4 sm:$0xff]   ;;  %v13163_v28 = vld [vmem:[%s14249_s29 + $0x1880] ss:$16 sps:$4 sm:$0xff]  }
 0x313   : > { %8960 = vmatprep.subr.bf16.mxu0 %v13080_v13  ;;  %9821 = vmatprep.subr.bf16.mxu1 %v13083_v29  ;;  %v13166_v13 = vld [vmem:[%s14249_s29 + $0x1888] ss:$16 sps:$4 sm:$0xff]   ;;  %v13171_v29 = vld [vmem:[%s14249_s29 + $0x18a4] ss:$16 sps:$4 sm:$0xff]  }
 0x316   : > { %8961 = vmatpush1.bf16.msra.mxu0 %v13078_v31  ;;  %9822 = vmatpush1.bf16.msra.mxu1 %v13081_v32  ;;  %v13174_v31 = vld [vmem:[%s14249_s29 + $0x18ac] ss:$16 sps:$4 sm:$0xff]   ;;  %v13169_v32 = vld [vmem:[%s14249_s29 + $0x18a0] ss:$16 sps:$4 sm:$0xff]  }
 0x317   : > { %8962 = vmatprep.subr.bf16.mxu0 %v13086_v33  ;;  %9823 = vmatprep.subr.bf16.mxu1 %v13089_v34  ;;  %v13172_v33 = vld [vmem:[%s14249_s29 + $0x18a8] ss:$16 sps:$4 sm:$0xff]   ;;  %v13177_v34 = vld [vmem:[%s14249_s29 + $0x18c4] ss:$16 sps:$4 sm:$0xff]  }
 0x31a   : > { %8963 = vmatpush1.bf16.msra.mxu0 %v13084_v23  ;;  %9824 = vmatpush1.bf16.msra.mxu1 %v13087_v35  ;;  %v13180_v23 = vld [vmem:[%s14249_s29 + $0x18cc] ss:$16 sps:$4 sm:$0xff]   ;;  %v13175_v35 = vld [vmem:[%s14249_s29 + $0x18c0] ss:$16 sps:$4 sm:$0xff]  }
 0x31b   : > { %8964 = vmatprep.subr.bf16.mxu0 %v13092_v20  ;;  %9825 = vmatprep.subr.bf16.mxu1 %v13095_v38  ;;  %v13178_v20 = vld [vmem:[%s14249_s29 + $0x18c8] ss:$16 sps:$4 sm:$0xff]   ;;  %v13183_v38 = vld [vmem:[%s14249_s29 + $0x18e4] ss:$16 sps:$4 sm:$0xff]  }
 0x31e   : > { %8965 = vmatpush1.bf16.msra.mxu0 %v13090_v39  ;;  %9826 = vmatpush1.bf16.msra.mxu1 %v13093_v26  ;;  %v13186_v39 = vld [vmem:[%s14249_s29 + $0x18ec] ss:$16 sps:$4 sm:$0xff]   ;;  %v13181_v26 = vld [vmem:[%s14249_s29 + $0x18e0] ss:$16 sps:$4 sm:$0xff]  }
 0x31f   : > { %8966 = vmatprep.subr.bf16.mxu0 %v13098_v41  ;;  %9827 = vmatprep.subr.bf16.mxu1 %v13101_v42  ;;  %v13184_v41 = vld [vmem:[%s14249_s29 + $0x18e8] ss:$16 sps:$4 sm:$0xff]   ;;  %v13189_v42 = vld [vmem:[%s14249_s29 + $0x1904] ss:$16 sps:$4 sm:$0xff]  }
 0x322   : > { %8967 = vmatpush1.bf16.msra.mxu0 %v13096_v43  ;;  %9828 = vmatpush1.bf16.msra.mxu1 %v13099_v45  ;;  %v13192_v43 = vld [vmem:[%s14249_s29 + $0x190c] ss:$16 sps:$4 sm:$0xff]   ;;  %v13187_v45 = vld [vmem:[%s14249_s29 + $0x1900] ss:$16 sps:$4 sm:$0xff]  }
 0x323   : > { %8968 = vmatprep.subr.bf16.mxu0 %v13104_v30  ;;  %9829 = vmatprep.subr.bf16.mxu1 %v13107_v46  ;;  %v13190_v30 = vld [vmem:[%s14249_s29 + $0x1908] ss:$16 sps:$4 sm:$0xff]   ;;  %v13195_v46 = vld [vmem:[%s14249_s29 + $0x1924] ss:$16 sps:$4 sm:$0xff]  }
 0x326   : > { %8969 = vmatpush1.bf16.msra.mxu0 %v13102_v37  ;;  %9830 = vmatpush1.bf16.msra.mxu1 %v13105_v49  ;;  %v13198_v37 = vld [vmem:[%s14249_s29 + $0x192c] ss:$16 sps:$4 sm:$0xff]   ;;  %v13193_v49 = vld [vmem:[%s14249_s29 + $0x1920] ss:$16 sps:$4 sm:$0xff]  }
 0x327   : > { %8970 = vmatprep.subr.bf16.mxu0 %v13110_v51  ;;  %9831 = vmatprep.subr.bf16.mxu1 %v13113_v36  ;;  %v13196_v51 = vld [vmem:[%s14249_s29 + $0x1928] ss:$16 sps:$4 sm:$0xff]   ;;  %v13201_v36 = vld [vmem:[%s14249_s29 + $0x1944] ss:$16 sps:$4 sm:$0xff]  }
 0x32a   : > { %8971 = vmatpush1.bf16.msra.mxu0 %v13108_v53  ;;  %9832 = vmatpush1.bf16.msra.mxu1 %v13111_v54  ;;  %v13204_v53 = vld [vmem:[%s14249_s29 + $0x194c] ss:$16 sps:$4 sm:$0xff]   ;;  %v13199_v54 = vld [vmem:[%s14249_s29 + $0x1940] ss:$16 sps:$4 sm:$0xff]  }
 0x32b   : > { %8972 = vmatprep.subr.bf16.mxu0 %v13116_v55  ;;  %9833 = vmatprep.subr.bf16.mxu1 %v13119_v56  ;;  %v13202_v55 = vld [vmem:[%s14249_s29 + $0x1948] ss:$16 sps:$4 sm:$0xff]   ;;  %v13207_v56 = vld [vmem:[%s14249_s29 + $0x1964] ss:$16 sps:$4 sm:$0xff]  }
 0x32e   : > { %8973 = vmatpush1.bf16.msra.mxu0 %v13114_v40  ;;  %9834 = vmatpush1.bf16.msra.mxu1 %v13117_v57  ;;  %v13210_v40 = vld [vmem:[%s14249_s29 + $0x196c] ss:$16 sps:$4 sm:$0xff]   ;;  %v13205_v57 = vld [vmem:[%s14249_s29 + $0x1960] ss:$16 sps:$4 sm:$0xff]  }
 0x32f   : > { %8974 = vmatprep.subr.bf16.mxu0 %v13122_v48  ;;  %9835 = vmatprep.subr.bf16.mxu1 %v13125_v60  ;;  %v13208_v48 = vld [vmem:[%s14249_s29 + $0x1968] ss:$16 sps:$4 sm:$0xff]   ;;  %v13213_v60 = vld [vmem:[%s14249_s29 + $0x1984] ss:$16 sps:$4 sm:$0xff]  }
 0x332   : > { %8975 = vmatpush1.bf16.msra.mxu0 %v13120_v61  ;;  %9836 = vmatpush1.bf16.msra.mxu1 %v13123_v47  ;;  %v13216_v61 = vld [vmem:[%s14249_s29 + $0x198c] ss:$16 sps:$4 sm:$0xff]   ;;  %v13211_v47 = vld [vmem:[%s14249_s29 + $0x1980] ss:$16 sps:$4 sm:$0xff]  }
 0x333   : > { %8976 = vmatprep.subr.bf16.mxu0 %v13128_v63  ;;  %9837 = vmatprep.subr.bf16.mxu1 %v13131_v0  ;;  %v13214_v63 = vld [vmem:[%s14249_s29 + $0x1988] ss:$16 sps:$4 sm:$0xff]   ;;  %v13219_v0 = vld [vmem:[%s14249_s29 + $0x19a4] ss:$16 sps:$4 sm:$0xff]  }
 0x336   : > { %8977 = vmatpush1.bf16.msra.mxu0 %v13126_v1  ;;  %9838 = vmatpush1.bf16.msra.mxu1 %v13129_v2  ;;  %v13222_v1 = vld [vmem:[%s14249_s29 + $0x19ac] ss:$16 sps:$4 sm:$0xff]   ;;  %v13217_v2 = vld [vmem:[%s14249_s29 + $0x19a0] ss:$16 sps:$4 sm:$0xff]  }
 0x337   : > { %8978 = vmatprep.subr.bf16.mxu0 %v13134_v52  ;;  %9839 = vmatprep.subr.bf16.mxu1 %v13137_v3  ;;  %v13220_v52 = vld [vmem:[%s14249_s29 + $0x19a8] ss:$16 sps:$4 sm:$0xff]   ;;  %v13225_v3 = vld [vmem:[%s14249_s29 + $0x19c4] ss:$16 sps:$4 sm:$0xff]  }
 0x33a   : > { %8979 = vmatpush1.bf16.msra.mxu0 %v13132_v59  ;;  %9840 = vmatpush1.bf16.msra.mxu1 %v13135_v6  ;;  %v13228_v59 = vld [vmem:[%s14249_s29 + $0x19cc] ss:$16 sps:$4 sm:$0xff]   ;;  %v13223_v6 = vld [vmem:[%s14249_s29 + $0x19c0] ss:$16 sps:$4 sm:$0xff]  }
 0x33b   : > { %8989 = vmatprep.subr.bf16.mxu0 %v13141_v7  ;;  %9850 = vmatprep.subr.bf16.mxu1 %v13144_v58  ;;  %v13226_v7 = vld [vmem:[%s14249_s29 + $0x19c8] ss:$16 sps:$4 sm:$0xff]   ;;  %v13231_v58 = vld [vmem:[%s14249_s29 + $0x19e4] ss:$16 sps:$4 sm:$0xff]  }
 0x33d   : > { %8981 = vmatmul.mubr.bf16.vlgmr.msra.gmra.mrb[0].mxu0 %v15074_v4  ;;  %9842 = vmatmul.mubr.bf16.vlgmr.msra.gmra.mrb[0].mxu1 %v15074_v4  ;;  %v13154_v4 = vld [vmem:[%s14249_s29 + $0x1848] ss:$16 sps:$4 sm:$0xff]  }
 0x33e   : > { %8990 = vmatpush1.bf16.msra.mxu0 %v13139_v9  ;;  %9851 = vmatpush1.bf16.msra.mxu1 %v13142_v10  ;;  %v13234_v9 = vld [vmem:[%s14249_s29 + $0x19ec] ss:$16 sps:$4 sm:$0xff]   ;;  %v1659_v10 = vcombine.high %v15141_v5, %v15141_v5  ;;  %v13238_v5 = vld [vmem:[%s14249_s29 + $0x1a08] ss:$16 sps:$4 sm:$0xff]  }
 0x33f   : > { %8991 = vmatprep.subr.bf16.mxu0 %v13147_v11  ;;  %9852 = vmatprep.subr.bf16.mxu1 %v13150_v12  ;;  %v13229_v11 = vld [vmem:[%s14249_s29 + $0x19e0] ss:$16 sps:$4 sm:$0xff]   ;;  %v13232_v12 = vld [vmem:[%s14249_s29 + $0x19e8] ss:$16 sps:$4 sm:$0xff]  }
 0x340   : > { %9021 = vmatprep.mubr.bf16.mxu0 %v1674_v62  ;;  %9882 = vmatprep.mubr.bf16.mxu1 %v1674_v62  ;;  %v13237_v62 = vld [vmem:[%s14249_s29 + $0x1a04] ss:$16 sps:$4 sm:$0xff]  }
 0x342   : > { %8992 = vmatpush1.bf16.msra.mxu0 %v13145_v14  ;;  %9853 = vmatpush1.bf16.msra.mxu1 %v13148_v15  ;;  %v13240_v14 = vld [vmem:[%s14249_s29 + $0x1a0c] ss:$16 sps:$4 sm:$0xff]   ;;  %v15222_v15 = vrot.slane %v1659_v10, %v14309_v50 }
 0x343   : > { %8993 = vmatprep.subr.bf16.mxu0 %v13153_v16  ;;  %9854 = vmatprep.subr.bf16.mxu1 %v13156_v17  ;;  %v13235_v16 = vld [vmem:[%s14249_s29 + $0x1a00] ss:$16 sps:$4 sm:$0xff]   ;;  %v13243_v17 = vld [vmem:[%s14249_s29 + $0x1a24] ss:$16 sps:$4 sm:$0xff]   ;;  %v13324_v10 = vld [vmem:[%s14249_s29 + $0x1bcc] ss:$16 sps:$4 sm:$0xff]  }
 0x346   : > { %8994 = vmatpush1.bf16.msra.mxu0 %v13151_v18  ;;  %9855 = vmatpush1.bf16.msra.mxu1 %v13154_v4  ;;  %v13246_v18 = vld [vmem:[%s14249_s29 + $0x1a2c] ss:$16 sps:$4 sm:$0xff]   ;;  %v1675_v4 = vcombine.high %v15222_v15, %v15222_v15 }
 0x347   : > { %8995 = vmatprep.subr.bf16.mxu0 %v13159_v19  ;;  %9856 = vmatprep.subr.bf16.mxu1 %v13162_v21  ;;  %v13241_v19 = vld [vmem:[%s14249_s29 + $0x1a20] ss:$16 sps:$4 sm:$0xff]   ;;  %v13244_v21 = vld [vmem:[%s14249_s29 + $0x1a28] ss:$16 sps:$4 sm:$0xff]  }
 0x34a   : > { %8996 = vmatpush1.bf16.msra.mxu0 %v13157_v22  ;;  %9857 = vmatpush1.bf16.msra.mxu1 %v13160_v24  ;;  %v13249_v22 = vld [vmem:[%s14249_s29 + $0x1a44] ss:$16 sps:$4 sm:$0xff]   ;;  %v13252_v24 = vld [vmem:[%s14249_s29 + $0x1a4c] ss:$16 sps:$4 sm:$0xff]  }
 0x34b   : > { %8997 = vmatprep.subr.bf16.mxu0 %v13165_v25  ;;  %9858 = vmatprep.subr.bf16.mxu1 %v13168_v27  ;;  %v13247_v25 = vld [vmem:[%s14249_s29 + $0x1a40] ss:$16 sps:$4 sm:$0xff]   ;;  %v13255_v27 = vld [vmem:[%s14249_s29 + $0x1a64] ss:$16 sps:$4 sm:$0xff]  }
 0x34e   : > { %8998 = vmatpush1.bf16.msra.mxu0 %v13163_v28  ;;  %9859 = vmatpush1.bf16.msra.mxu1 %v13166_v13  ;;  %v13258_v28 = vld [vmem:[%s14249_s29 + $0x1a6c] ss:$16 sps:$4 sm:$0xff]   ;;  %v13253_v13 = vld [vmem:[%s14249_s29 + $0x1a60] ss:$16 sps:$4 sm:$0xff]  }
 0x34f   : > { %8999 = vmatprep.subr.bf16.mxu0 %v13171_v29  ;;  %9860 = vmatprep.subr.bf16.mxu1 %v13174_v31  ;;  %v13256_v29 = vld [vmem:[%s14249_s29 + $0x1a68] ss:$16 sps:$4 sm:$0xff]   ;;  %v13261_v31 = vld [vmem:[%s14249_s29 + $0x1a84] ss:$16 sps:$4 sm:$0xff]  }
 0x352   : > { %9000 = vmatpush1.bf16.msra.mxu0 %v13169_v32  ;;  %9861 = vmatpush1.bf16.msra.mxu1 %v13172_v33  ;;  %v13264_v32 = vld [vmem:[%s14249_s29 + $0x1a8c] ss:$16 sps:$4 sm:$0xff]   ;;  %v13259_v33 = vld [vmem:[%s14249_s29 + $0x1a80] ss:$16 sps:$4 sm:$0xff]  }
 0x353   : > { %9001 = vmatprep.subr.bf16.mxu0 %v13177_v34  ;;  %9862 = vmatprep.subr.bf16.mxu1 %v13180_v23  ;;  %v13262_v34 = vld [vmem:[%s14249_s29 + $0x1a88] ss:$16 sps:$4 sm:$0xff]   ;;  %v13267_v23 = vld [vmem:[%s14249_s29 + $0x1aa4] ss:$16 sps:$4 sm:$0xff]  }
 0x356   : > { %9002 = vmatpush1.bf16.msra.mxu0 %v13175_v35  ;;  %9863 = vmatpush1.bf16.msra.mxu1 %v13178_v20  ;;  %v13270_v35 = vld [vmem:[%s14249_s29 + $0x1aac] ss:$16 sps:$4 sm:$0xff]   ;;  %v13265_v20 = vld [vmem:[%s14249_s29 + $0x1aa0] ss:$16 sps:$4 sm:$0xff]  }
 0x357   : > { %9003 = vmatprep.subr.bf16.mxu0 %v13183_v38  ;;  %9864 = vmatprep.subr.bf16.mxu1 %v13186_v39  ;;  %v13268_v38 = vld [vmem:[%s14249_s29 + $0x1aa8] ss:$16 sps:$4 sm:$0xff]   ;;  %v13273_v39 = vld [vmem:[%s14249_s29 + $0x1ac4] ss:$16 sps:$4 sm:$0xff]  }
 0x35a   : > { %9004 = vmatpush1.bf16.msra.mxu0 %v13181_v26  ;;  %9865 = vmatpush1.bf16.msra.mxu1 %v13184_v41  ;;  %v13276_v26 = vld [vmem:[%s14249_s29 + $0x1acc] ss:$16 sps:$4 sm:$0xff]   ;;  %v13271_v41 = vld [vmem:[%s14249_s29 + $0x1ac0] ss:$16 sps:$4 sm:$0xff]  }
 0x35b   : > { %9005 = vmatprep.subr.bf16.mxu0 %v13189_v42  ;;  %9866 = vmatprep.subr.bf16.mxu1 %v13192_v43  ;;  %v13274_v42 = vld [vmem:[%s14249_s29 + $0x1ac8] ss:$16 sps:$4 sm:$0xff]   ;;  %v13279_v43 = vld [vmem:[%s14249_s29 + $0x1ae4] ss:$16 sps:$4 sm:$0xff]  }
 0x35e   : > { %9006 = vmatpush1.bf16.msra.mxu0 %v13187_v45  ;;  %9867 = vmatpush1.bf16.msra.mxu1 %v13190_v30  ;;  %v13282_v45 = vld [vmem:[%s14249_s29 + $0x1aec] ss:$16 sps:$4 sm:$0xff]   ;;  %v13277_v30 = vld [vmem:[%s14249_s29 + $0x1ae0] ss:$16 sps:$4 sm:$0xff]  }
 0x35f   : > { %9007 = vmatprep.subr.bf16.mxu0 %v13195_v46  ;;  %9868 = vmatprep.subr.bf16.mxu1 %v13198_v37  ;;  %v13280_v46 = vld [vmem:[%s14249_s29 + $0x1ae8] ss:$16 sps:$4 sm:$0xff]   ;;  %v13285_v37 = vld [vmem:[%s14249_s29 + $0x1b04] ss:$16 sps:$4 sm:$0xff]  }
 0x362   : > { %9008 = vmatpush1.bf16.msra.mxu0 %v13193_v49  ;;  %9869 = vmatpush1.bf16.msra.mxu1 %v13196_v51  ;;  %v13288_v49 = vld [vmem:[%s14249_s29 + $0x1b0c] ss:$16 sps:$4 sm:$0xff]   ;;  %v13283_v51 = vld [vmem:[%s14249_s29 + $0x1b00] ss:$16 sps:$4 sm:$0xff]  }
 0x363   : > { %9009 = vmatprep.subr.bf16.mxu0 %v13201_v36  ;;  %9870 = vmatprep.subr.bf16.mxu1 %v13204_v53  ;;  %v13286_v36 = vld [vmem:[%s14249_s29 + $0x1b08] ss:$16 sps:$4 sm:$0xff]   ;;  %v13291_v53 = vld [vmem:[%s14249_s29 + $0x1b24] ss:$16 sps:$4 sm:$0xff]  }
 0x366   : > { %9010 = vmatpush1.bf16.msra.mxu0 %v13199_v54  ;;  %9871 = vmatpush1.bf16.msra.mxu1 %v13202_v55  ;;  %v13294_v54 = vld [vmem:[%s14249_s29 + $0x1b2c] ss:$16 sps:$4 sm:$0xff]   ;;  %v13289_v55 = vld [vmem:[%s14249_s29 + $0x1b20] ss:$16 sps:$4 sm:$0xff]  }
 0x367   : > { %9011 = vmatprep.subr.bf16.mxu0 %v13207_v56  ;;  %9872 = vmatprep.subr.bf16.mxu1 %v13210_v40  ;;  %v13292_v56 = vld [vmem:[%s14249_s29 + $0x1b28] ss:$16 sps:$4 sm:$0xff]   ;;  %v13297_v40 = vld [vmem:[%s14249_s29 + $0x1b44] ss:$16 sps:$4 sm:$0xff]  }
 0x36a   : > { %9012 = vmatpush1.bf16.msra.mxu0 %v13205_v57  ;;  %9873 = vmatpush1.bf16.msra.mxu1 %v13208_v48  ;;  %v13300_v57 = vld [vmem:[%s14249_s29 + $0x1b4c] ss:$16 sps:$4 sm:$0xff]   ;;  %v13295_v48 = vld [vmem:[%s14249_s29 + $0x1b40] ss:$16 sps:$4 sm:$0xff]  }
 0x36b   : > { %9013 = vmatprep.subr.bf16.mxu0 %v13213_v60  ;;  %9874 = vmatprep.subr.bf16.mxu1 %v13216_v61  ;;  %v13298_v60 = vld [vmem:[%s14249_s29 + $0x1b48] ss:$16 sps:$4 sm:$0xff]   ;;  %v13303_v61 = vld [vmem:[%s14249_s29 + $0x1b64] ss:$16 sps:$4 sm:$0xff]  }
 0x36e   : > { %9014 = vmatpush1.bf16.msra.mxu0 %v13211_v47  ;;  %9875 = vmatpush1.bf16.msra.mxu1 %v13214_v63  ;;  %v13306_v47 = vld [vmem:[%s14249_s29 + $0x1b6c] ss:$16 sps:$4 sm:$0xff]   ;;  %v13301_v63 = vld [vmem:[%s14249_s29 + $0x1b60] ss:$16 sps:$4 sm:$0xff]  }
 0x36f   : > { %9015 = vmatprep.subr.bf16.mxu0 %v13219_v0  ;;  %9876 = vmatprep.subr.bf16.mxu1 %v13222_v1  ;;  %v13304_v0 = vld [vmem:[%s14249_s29 + $0x1b68] ss:$16 sps:$4 sm:$0xff]   ;;  %v13309_v1 = vld [vmem:[%s14249_s29 + $0x1b84] ss:$16 sps:$4 sm:$0xff]  }
 0x372   : > { %9016 = vmatpush1.bf16.msra.mxu0 %v13217_v2  ;;  %9877 = vmatpush1.bf16.msra.mxu1 %v13220_v52  ;;  %v13312_v2 = vld [vmem:[%s14249_s29 + $0x1b8c] ss:$16 sps:$4 sm:$0xff]   ;;  %v13307_v52 = vld [vmem:[%s14249_s29 + $0x1b80] ss:$16 sps:$4 sm:$0xff]  }
 0x373   : > { %9017 = vmatprep.subr.bf16.mxu0 %v13225_v3  ;;  %9878 = vmatprep.subr.bf16.mxu1 %v13228_v59  ;;  %v13310_v3 = vld [vmem:[%s14249_s29 + $0x1b88] ss:$16 sps:$4 sm:$0xff]   ;;  %v13315_v59 = vld [vmem:[%s14249_s29 + $0x1ba4] ss:$16 sps:$4 sm:$0xff]  }
 0x376   : > { %9018 = vmatpush1.bf16.msra.mxu0 %v13223_v6  ;;  %9879 = vmatpush1.bf16.msra.mxu1 %v13226_v7  ;;  %v13318_v6 = vld [vmem:[%s14249_s29 + $0x1bac] ss:$16 sps:$4 sm:$0xff]   ;;  %v13313_v7 = vld [vmem:[%s14249_s29 + $0x1ba0] ss:$16 sps:$4 sm:$0xff]  }
 0x377   : > { %9019 = vmatprep.subr.bf16.mxu0 %v13231_v58  ;;  %9880 = vmatprep.subr.bf16.mxu1 %v13234_v9  ;;  %v13316_v58 = vld [vmem:[%s14249_s29 + $0x1ba8] ss:$16 sps:$4 sm:$0xff]   ;;  %v13321_v9 = vld [vmem:[%s14249_s29 + $0x1bc4] ss:$16 sps:$4 sm:$0xff]  }
 0x37a   : > { %9020 = vmatpush1.bf16.msra.mxu0 %v13229_v11  ;;  %9881 = vmatpush1.bf16.msra.mxu1 %v13232_v12  ;;  %v13319_v11 = vld [vmem:[%s14249_s29 + $0x1bc0] ss:$16 sps:$4 sm:$0xff]   ;;  %v13322_v12 = vld [vmem:[%s14249_s29 + $0x1bc8] ss:$16 sps:$4 sm:$0xff]  }
 0x37b   : > { %9030 = vmatprep.subr.bf16.mxu0 %v13237_v62  ;;  %9891 = vmatprep.subr.bf16.mxu1 %v13240_v14  ;;  %v13327_v62 = vld [vmem:[%s14249_s29 + $0x1be4] ss:$16 sps:$4 sm:$0xff]   ;;  %v13330_v14 = vld [vmem:[%s14249_s29 + $0x1bec] ss:$16 sps:$4 sm:$0xff]  }
 0x37d   : > { %9022 = vmatmul.mubr.bf16.vlgmr.msra.gmra.mrb[0].mxu0 %v15149_v8  ;;  %9883 = vmatmul.mubr.bf16.vlgmr.msra.gmra.mrb[0].mxu1 %v15149_v8  ;;  %v13250_v8 = vld [vmem:[%s14249_s29 + $0x1a48] ss:$16 sps:$4 sm:$0xff]  }
 0x37e   : > { %9031 = vmatpush1.bf16.msra.mxu0 %v13235_v16  ;;  %9892 = vmatpush1.bf16.msra.mxu1 %v13238_v5  ;;  %v15289_v16 = vld [vmem:[%s14306_s4 + $0x38] sm:$0xff]  ;;  %v13325_v5 = vld [vmem:[%s14249_s29 + $0x1be0] ss:$16 sps:$4 sm:$0xff]  }
 0x37f   : > { %9032 = vmatprep.subr.bf16.mxu0 %v13243_v17  ;;  %9893 = vmatprep.subr.bf16.mxu1 %v13246_v18  ;;  %v13328_v17 = vld [vmem:[%s14249_s29 + $0x1be8] ss:$16 sps:$4 sm:$0xff]   ;;  %v13334_v18 = vld [vmem:[%s14249_s29 + $0x1c04] ss:$16 sps:$4 sm:$0xff]  }
 0x380   : > { %9062 = vmatprep.mubr.bf16.mxu0 %v1675_v4  ;;  %9923 = vmatprep.mubr.bf16.mxu1 %v1675_v4  ;;  %v13337_v4 = vld [vmem:[%s14249_s29 + $0x1c0c] ss:$16 sps:$4 sm:$0xff]  }
 0x382   : > { %9033 = vmatpush1.bf16.msra.mxu0 %v13241_v19  ;;  %9894 = vmatpush1.bf16.msra.mxu1 %v13244_v21  ;;  %v15297_v19 = vrot.slane %v15289_v16, %v14309_v50  ;;  %v13332_v21 = vld [vmem:[%s14249_s29 + $0x1c00] ss:$16 sps:$4 sm:$0xff]  }
 0x383   : > { %9034 = vmatprep.subr.bf16.mxu0 %v13249_v22  ;;  %9895 = vmatprep.subr.bf16.mxu1 %v13252_v24  ;;  %v13335_v22 = vld [vmem:[%s14249_s29 + $0x1c08] ss:$16 sps:$4 sm:$0xff]   ;;  %v13340_v24 = vld [vmem:[%s14249_s29 + $0x1c24] ss:$16 sps:$4 sm:$0xff]  }
 0x386   : > { %9035 = vmatpush1.bf16.msra.mxu0 %v13247_v25  ;;  %9896 = vmatpush1.bf16.msra.mxu1 %v13250_v8  ;;  %v13343_v25 = vld [vmem:[%s14249_s29 + $0x1c2c] ss:$16 sps:$4 sm:$0xff]   ;;  %v1691_v8 = vcombine.high %v15297_v19, %v15297_v19 }
 0x387   : > { %9036 = vmatprep.subr.bf16.mxu0 %v13255_v27  ;;  %9897 = vmatprep.subr.bf16.mxu1 %v13258_v28  ;;  %v13338_v27 = vld [vmem:[%s14249_s29 + $0x1c20] ss:$16 sps:$4 sm:$0xff]   ;;  %v13341_v28 = vld [vmem:[%s14249_s29 + $0x1c28] ss:$16 sps:$4 sm:$0xff]  }
 0x38a   : > { %9037 = vmatpush1.bf16.msra.mxu0 %v13253_v13  ;;  %9898 = vmatpush1.bf16.msra.mxu1 %v13256_v29  ;;  %v13346_v13 = vld [vmem:[%s14249_s29 + $0x1c44] ss:$16 sps:$4 sm:$0xff]   ;;  %v13349_v29 = vld [vmem:[%s14249_s29 + $0x1c4c] ss:$16 sps:$4 sm:$0xff]  }
 0x38b   : > { %9038 = vmatprep.subr.bf16.mxu0 %v13261_v31  ;;  %9899 = vmatprep.subr.bf16.mxu1 %v13264_v32  ;;  %v13344_v31 = vld [vmem:[%s14249_s29 + $0x1c40] ss:$16 sps:$4 sm:$0xff]   ;;  %v13352_v32 = vld [vmem:[%s14249_s29 + $0x1c64] ss:$16 sps:$4 sm:$0xff]  }
 0x38e   : > { %9039 = vmatpush1.bf16.msra.mxu0 %v13259_v33  ;;  %9900 = vmatpush1.bf16.msra.mxu1 %v13262_v34  ;;  %v13355_v33 = vld [vmem:[%s14249_s29 + $0x1c6c] ss:$16 sps:$4 sm:$0xff]   ;;  %v13350_v34 = vld [vmem:[%s14249_s29 + $0x1c60] ss:$16 sps:$4 sm:$0xff]  }
 0x38f   : > { %9040 = vmatprep.subr.bf16.mxu0 %v13267_v23  ;;  %9901 = vmatprep.subr.bf16.mxu1 %v13270_v35  ;;  %v13353_v23 = vld [vmem:[%s14249_s29 + $0x1c68] ss:$16 sps:$4 sm:$0xff]   ;;  %v13358_v35 = vld [vmem:[%s14249_s29 + $0x1c84] ss:$16 sps:$4 sm:$0xff]  }
 0x392   : > { %9041 = vmatpush1.bf16.msra.mxu0 %v13265_v20  ;;  %9902 = vmatpush1.bf16.msra.mxu1 %v13268_v38  ;;  %v13361_v20 = vld [vmem:[%s14249_s29 + $0x1c8c] ss:$16 sps:$4 sm:$0xff]   ;;  %v13356_v38 = vld [vmem:[%s14249_s29 + $0x1c80] ss:$16 sps:$4 sm:$0xff]  }
 0x393   : > { %9042 = vmatprep.subr.bf16.mxu0 %v13273_v39  ;;  %9903 = vmatprep.subr.bf16.mxu1 %v13276_v26  ;;  %v13359_v39 = vld [vmem:[%s14249_s29 + $0x1c88] ss:$16 sps:$4 sm:$0xff]   ;;  %v13364_v26 = vld [vmem:[%s14249_s29 + $0x1ca4] ss:$16 sps:$4 sm:$0xff]  }
 0x396   : > { %9043 = vmatpush1.bf16.msra.mxu0 %v13271_v41  ;;  %9904 = vmatpush1.bf16.msra.mxu1 %v13274_v42  ;;  %v13367_v41 = vld [vmem:[%s14249_s29 + $0x1cac] ss:$16 sps:$4 sm:$0xff]   ;;  %v13362_v42 = vld [vmem:[%s14249_s29 + $0x1ca0] ss:$16 sps:$4 sm:$0xff]  }
 0x397   : > { %9044 = vmatprep.subr.bf16.mxu0 %v13279_v43  ;;  %9905 = vmatprep.subr.bf16.mxu1 %v13282_v45  ;;  %v13365_v43 = vld [vmem:[%s14249_s29 + $0x1ca8] ss:$16 sps:$4 sm:$0xff]   ;;  %v13370_v45 = vld [vmem:[%s14249_s29 + $0x1cc4] ss:$16 sps:$4 sm:$0xff]  }
 0x39a   : > { %9045 = vmatpush1.bf16.msra.mxu0 %v13277_v30  ;;  %9906 = vmatpush1.bf16.msra.mxu1 %v13280_v46  ;;  %v13373_v30 = vld [vmem:[%s14249_s29 + $0x1ccc] ss:$16 sps:$4 sm:$0xff]   ;;  %v13368_v46 = vld [vmem:[%s14249_s29 + $0x1cc0] ss:$16 sps:$4 sm:$0xff]  }
 0x39b   : > { %9046 = vmatprep.subr.bf16.mxu0 %v13285_v37  ;;  %9907 = vmatprep.subr.bf16.mxu1 %v13288_v49  ;;  %v13371_v37 = vld [vmem:[%s14249_s29 + $0x1cc8] ss:$16 sps:$4 sm:$0xff]   ;;  %v13376_v49 = vld [vmem:[%s14249_s29 + $0x1ce4] ss:$16 sps:$4 sm:$0xff]  }
 0x39e   : > { %9047 = vmatpush1.bf16.msra.mxu0 %v13283_v51  ;;  %9908 = vmatpush1.bf16.msra.mxu1 %v13286_v36  ;;  %v13379_v51 = vld [vmem:[%s14249_s29 + $0x1cec] ss:$16 sps:$4 sm:$0xff]   ;;  %v13374_v36 = vld [vmem:[%s14249_s29 + $0x1ce0] ss:$16 sps:$4 sm:$0xff]  }
 0x39f   : > { %9048 = vmatprep.subr.bf16.mxu0 %v13291_v53  ;;  %9909 = vmatprep.subr.bf16.mxu1 %v13294_v54  ;;  %v13377_v53 = vld [vmem:[%s14249_s29 + $0x1ce8] ss:$16 sps:$4 sm:$0xff]   ;;  %v13382_v54 = vld [vmem:[%s14249_s29 + $0x1d04] ss:$16 sps:$4 sm:$0xff]  }
 0x3a2   : > { %9049 = vmatpush1.bf16.msra.mxu0 %v13289_v55  ;;  %9910 = vmatpush1.bf16.msra.mxu1 %v13292_v56  ;;  %v13385_v55 = vld [vmem:[%s14249_s29 + $0x1d0c] ss:$16 sps:$4 sm:$0xff]   ;;  %v13380_v56 = vld [vmem:[%s14249_s29 + $0x1d00] ss:$16 sps:$4 sm:$0xff]  }
 0x3a3   : > { %9050 = vmatprep.subr.bf16.mxu0 %v13297_v40  ;;  %9911 = vmatprep.subr.bf16.mxu1 %v13300_v57  ;;  %v13383_v40 = vld [vmem:[%s14249_s29 + $0x1d08] ss:$16 sps:$4 sm:$0xff]   ;;  %v13388_v57 = vld [vmem:[%s14249_s29 + $0x1d24] ss:$16 sps:$4 sm:$0xff]  }
 0x3a6   : > { %9051 = vmatpush1.bf16.msra.mxu0 %v13295_v48  ;;  %9912 = vmatpush1.bf16.msra.mxu1 %v13298_v60  ;;  %v13391_v48 = vld [vmem:[%s14249_s29 + $0x1d2c] ss:$16 sps:$4 sm:$0xff]   ;;  %v13386_v60 = vld [vmem:[%s14249_s29 + $0x1d20] ss:$16 sps:$4 sm:$0xff]  }
 0x3a7   : > { %9052 = vmatprep.subr.bf16.mxu0 %v13303_v61  ;;  %9913 = vmatprep.subr.bf16.mxu1 %v13306_v47  ;;  %v13389_v61 = vld [vmem:[%s14249_s29 + $0x1d28] ss:$16 sps:$4 sm:$0xff]   ;;  %v13394_v47 = vld [vmem:[%s14249_s29 + $0x1d44] ss:$16 sps:$4 sm:$0xff]  }
 0x3aa   : > { %9053 = vmatpush1.bf16.msra.mxu0 %v13301_v63  ;;  %9914 = vmatpush1.bf16.msra.mxu1 %v13304_v0  ;;  %v13397_v63 = vld [vmem:[%s14249_s29 + $0x1d4c] ss:$16 sps:$4 sm:$0xff]   ;;  %v13392_v0 = vld [vmem:[%s14249_s29 + $0x1d40] ss:$16 sps:$4 sm:$0xff]  }
 0x3ab   : > { %9054 = vmatprep.subr.bf16.mxu0 %v13309_v1  ;;  %9915 = vmatprep.subr.bf16.mxu1 %v13312_v2  ;;  %v13395_v1 = vld [vmem:[%s14249_s29 + $0x1d48] ss:$16 sps:$4 sm:$0xff]   ;;  %v13400_v2 = vld [vmem:[%s14249_s29 + $0x1d64] ss:$16 sps:$4 sm:$0xff]  }
 0x3ae   : > { %9055 = vmatpush1.bf16.msra.mxu0 %v13307_v52  ;;  %9916 = vmatpush1.bf16.msra.mxu1 %v13310_v3  ;;  %v13403_v52 = vld [vmem:[%s14249_s29 + $0x1d6c] ss:$16 sps:$4 sm:$0xff]   ;;  %v13398_v3 = vld [vmem:[%s14249_s29 + $0x1d60] ss:$16 sps:$4 sm:$0xff]  }
 0x3af   : > { %9056 = vmatprep.subr.bf16.mxu0 %v13315_v59  ;;  %9917 = vmatprep.subr.bf16.mxu1 %v13318_v6  ;;  %v13401_v59 = vld [vmem:[%s14249_s29 + $0x1d68] ss:$16 sps:$4 sm:$0xff]   ;;  %v13406_v6 = vld [vmem:[%s14249_s29 + $0x1d84] ss:$16 sps:$4 sm:$0xff]  }
 0x3b2   : > { %9057 = vmatpush1.bf16.msra.mxu0 %v13313_v7  ;;  %9918 = vmatpush1.bf16.msra.mxu1 %v13316_v58  ;;  %v13409_v7 = vld [vmem:[%s14249_s29 + $0x1d8c] ss:$16 sps:$4 sm:$0xff]   ;;  %v13404_v58 = vld [vmem:[%s14249_s29 + $0x1d80] ss:$16 sps:$4 sm:$0xff]  }
 0x3b3   : > { %9058 = vmatprep.subr.bf16.mxu0 %v13321_v9  ;;  %9919 = vmatprep.subr.bf16.mxu1 %v13324_v10  ;;  %v13407_v9 = vld [vmem:[%s14249_s29 + $0x1d88] ss:$16 sps:$4 sm:$0xff]   ;;  %v13412_v10 = vld [vmem:[%s14249_s29 + $0x1da4] ss:$16 sps:$4 sm:$0xff]  }
 0x3b6   : > { %9059 = vmatpush1.bf16.msra.mxu0 %v13319_v11  ;;  %9920 = vmatpush1.bf16.msra.mxu1 %v13322_v12  ;;  %v13415_v11 = vld [vmem:[%s14249_s29 + $0x1dac] ss:$16 sps:$4 sm:$0xff]   ;;  %v13410_v12 = vld [vmem:[%s14249_s29 + $0x1da0] ss:$16 sps:$4 sm:$0xff]  }
 0x3b7   : > { %9060 = vmatprep.subr.bf16.mxu0 %v13327_v62  ;;  %9921 = vmatprep.subr.bf16.mxu1 %v13330_v14  ;;  %v13413_v62 = vld [vmem:[%s14249_s29 + $0x1da8] ss:$16 sps:$4 sm:$0xff]   ;;  %v13418_v14 = vld [vmem:[%s14249_s29 + $0x1dc4] ss:$16 sps:$4 sm:$0xff]  }
 0x3ba   : > { %9061 = vmatpush1.bf16.msra.mxu0 %v13325_v5  ;;  %9922 = vmatpush1.bf16.msra.mxu1 %v13328_v17  ;;  %v13421_v5 = vld [vmem:[%s14249_s29 + $0x1dcc] ss:$16 sps:$4 sm:$0xff]   ;;  %v13416_v17 = vld [vmem:[%s14249_s29 + $0x1dc0] ss:$16 sps:$4 sm:$0xff]  }
 0x3bb   : > { %9071 = vmatprep.subr.bf16.mxu0 %v13334_v18  ;;  %9932 = vmatprep.subr.bf16.mxu1 %v13337_v4  ;;  %v13419_v18 = vld [vmem:[%s14249_s29 + $0x1dc8] ss:$16 sps:$4 sm:$0xff]   ;;  %v13424_v4 = vld [vmem:[%s14249_s29 + $0x1de4] ss:$16 sps:$4 sm:$0xff]  }
 0x3bd   : > { %9063 = vmatmul.mubr.bf16.vlgmr.msra.gmra.mrb[0].mxu0 %v15222_v15  ;;  %9924 = vmatmul.mubr.bf16.vlgmr.msra.gmra.mrb[0].mxu1 %v15222_v15  ;;  %v13347_v15 = vld [vmem:[%s14249_s29 + $0x1c48] ss:$16 sps:$4 sm:$0xff]  }
 0x3be   : > { %9072 = vmatpush1.bf16.msra.mxu0 %v13332_v21  ;;  %9933 = vmatpush1.bf16.msra.mxu1 %v13335_v22  ;;  %v13427_v21 = vld [vmem:[%s14249_s29 + $0x1dec] ss:$16 sps:$4 sm:$0xff]   ;;  %v1676_v22 = vcombine.high %v15289_v16, %v15289_v16  ;;  %v13431_v16 = vld [vmem:[%s14249_s29 + $0x1e08] ss:$16 sps:$4 sm:$0xff]  }
 0x3bf   : > { %9073 = vmatprep.subr.bf16.mxu0 %v13340_v24  ;;  %9934 = vmatprep.subr.bf16.mxu1 %v13343_v25  ;;  %v13422_v24 = vld [vmem:[%s14249_s29 + $0x1de0] ss:$16 sps:$4 sm:$0xff]   ;;  %v13425_v25 = vld [vmem:[%s14249_s29 + $0x1de8] ss:$16 sps:$4 sm:$0xff]  }
 0x3c0   : > { %9103 = vmatprep.mubr.bf16.mxu0 %v1691_v8  ;;  %9964 = vmatprep.mubr.bf16.mxu1 %v1691_v8  ;;  %v13430_v8 = vld [vmem:[%s14249_s29 + $0x1e04] ss:$16 sps:$4 sm:$0xff]  }
 0x3c2   : > { %9074 = vmatpush1.bf16.msra.mxu0 %v13338_v27  ;;  %9935 = vmatpush1.bf16.msra.mxu1 %v13341_v28  ;;  %v13433_v27 = vld [vmem:[%s14249_s29 + $0x1e0c] ss:$16 sps:$4 sm:$0xff]   ;;  %v15370_v28 = vrot.slane %v1676_v22, %v14309_v50 }
 0x3c3   : > { %9075 = vmatprep.subr.bf16.mxu0 %v13346_v13  ;;  %9936 = vmatprep.subr.bf16.mxu1 %v13349_v29  ;;  %v13428_v13 = vld [vmem:[%s14249_s29 + $0x1e00] ss:$16 sps:$4 sm:$0xff]   ;;  %v13436_v29 = vld [vmem:[%s14249_s29 + $0x1e24] ss:$16 sps:$4 sm:$0xff]   ;;  %v13517_v22 = vld [vmem:[%s14249_s29 + $0x1fcc] ss:$16 sps:$4 sm:$0xff]  }
 0x3c6   : > { %9076 = vmatpush1.bf16.msra.mxu0 %v13344_v31  ;;  %9937 = vmatpush1.bf16.msra.mxu1 %v13347_v15  ;;  %v13439_v31 = vld [vmem:[%s14249_s29 + $0x1e2c] ss:$16 sps:$4 sm:$0xff]   ;;  %v1692_v15 = vcombine.high %v15370_v28, %v15370_v28 }
 0x3c7   : > { %9077 = vmatprep.subr.bf16.mxu0 %v13352_v32  ;;  %9938 = vmatprep.subr.bf16.mxu1 %v13355_v33  ;;  %v13434_v32 = vld [vmem:[%s14249_s29 + $0x1e20] ss:$16 sps:$4 sm:$0xff]   ;;  %v13437_v33 = vld [vmem:[%s14249_s29 + $0x1e28] ss:$16 sps:$4 sm:$0xff]  }
 0x3ca   : > { %9078 = vmatpush1.bf16.msra.mxu0 %v13350_v34  ;;  %9939 = vmatpush1.bf16.msra.mxu1 %v13353_v23  ;;  %v13442_v34 = vld [vmem:[%s14249_s29 + $0x1e44] ss:$16 sps:$4 sm:$0xff]   ;;  %v13445_v23 = vld [vmem:[%s14249_s29 + $0x1e4c] ss:$16 sps:$4 sm:$0xff]  }
 0x3cb   : > { %9079 = vmatprep.subr.bf16.mxu0 %v13358_v35  ;;  %9940 = vmatprep.subr.bf16.mxu1 %v13361_v20  ;;  %v13440_v35 = vld [vmem:[%s14249_s29 + $0x1e40] ss:$16 sps:$4 sm:$0xff]   ;;  %v13448_v20 = vld [vmem:[%s14249_s29 + $0x1e64] ss:$16 sps:$4 sm:$0xff]  }
 0x3ce   : > { %9080 = vmatpush1.bf16.msra.mxu0 %v13356_v38  ;;  %9941 = vmatpush1.bf16.msra.mxu1 %v13359_v39  ;;  %v13451_v38 = vld [vmem:[%s14249_s29 + $0x1e6c] ss:$16 sps:$4 sm:$0xff]   ;;  %v13446_v39 = vld [vmem:[%s14249_s29 + $0x1e60] ss:$16 sps:$4 sm:$0xff]  }
 0x3cf   : > { %9081 = vmatprep.subr.bf16.mxu0 %v13364_v26  ;;  %9942 = vmatprep.subr.bf16.mxu1 %v13367_v41  ;;  %v13449_v26 = vld [vmem:[%s14249_s29 + $0x1e68] ss:$16 sps:$4 sm:$0xff]   ;;  %v13454_v41 = vld [vmem:[%s14249_s29 + $0x1e84] ss:$16 sps:$4 sm:$0xff]  }
 0x3d2   : > { %9082 = vmatpush1.bf16.msra.mxu0 %v13362_v42  ;;  %9943 = vmatpush1.bf16.msra.mxu1 %v13365_v43  ;;  %v13457_v42 = vld [vmem:[%s14249_s29 + $0x1e8c] ss:$16 sps:$4 sm:$0xff]   ;;  %v13452_v43 = vld [vmem:[%s14249_s29 + $0x1e80] ss:$16 sps:$4 sm:$0xff]  }
 0x3d3   : > { %9083 = vmatprep.subr.bf16.mxu0 %v13370_v45  ;;  %9944 = vmatprep.subr.bf16.mxu1 %v13373_v30  ;;  %v13455_v45 = vld [vmem:[%s14249_s29 + $0x1e88] ss:$16 sps:$4 sm:$0xff]   ;;  %v13460_v30 = vld [vmem:[%s14249_s29 + $0x1ea4] ss:$16 sps:$4 sm:$0xff]  }
 0x3d6   : > { %9084 = vmatpush1.bf16.msra.mxu0 %v13368_v46  ;;  %9945 = vmatpush1.bf16.msra.mxu1 %v13371_v37  ;;  %v13463_v46 = vld [vmem:[%s14249_s29 + $0x1eac] ss:$16 sps:$4 sm:$0xff]   ;;  %v13458_v37 = vld [vmem:[%s14249_s29 + $0x1ea0] ss:$16 sps:$4 sm:$0xff]  }
 0x3d7   : > { %9085 = vmatprep.subr.bf16.mxu0 %v13376_v49  ;;  %9946 = vmatprep.subr.bf16.mxu1 %v13379_v51  ;;  %v13461_v49 = vld [vmem:[%s14249_s29 + $0x1ea8] ss:$16 sps:$4 sm:$0xff]   ;;  %v13466_v51 = vld [vmem:[%s14249_s29 + $0x1ec4] ss:$16 sps:$4 sm:$0xff]  }
 0x3da   : > { %9086 = vmatpush1.bf16.msra.mxu0 %v13374_v36  ;;  %9947 = vmatpush1.bf16.msra.mxu1 %v13377_v53  ;;  %v13469_v36 = vld [vmem:[%s14249_s29 + $0x1ecc] ss:$16 sps:$4 sm:$0xff]   ;;  %v13464_v53 = vld [vmem:[%s14249_s29 + $0x1ec0] ss:$16 sps:$4 sm:$0xff]  }
 0x3db   : > { %9087 = vmatprep.subr.bf16.mxu0 %v13382_v54  ;;  %9948 = vmatprep.subr.bf16.mxu1 %v13385_v55  ;;  %v13467_v54 = vld [vmem:[%s14249_s29 + $0x1ec8] ss:$16 sps:$4 sm:$0xff]   ;;  %v13472_v55 = vld [vmem:[%s14249_s29 + $0x1ee4] ss:$16 sps:$4 sm:$0xff]  }
 0x3de   : > { %9088 = vmatpush1.bf16.msra.mxu0 %v13380_v56  ;;  %9949 = vmatpush1.bf16.msra.mxu1 %v13383_v40  ;;  %v13475_v56 = vld [vmem:[%s14249_s29 + $0x1eec] ss:$16 sps:$4 sm:$0xff]   ;;  %v13470_v40 = vld [vmem:[%s14249_s29 + $0x1ee0] ss:$16 sps:$4 sm:$0xff]  }
 0x3df   : > { %9089 = vmatprep.subr.bf16.mxu0 %v13388_v57  ;;  %9950 = vmatprep.subr.bf16.mxu1 %v13391_v48  ;;  %v13473_v57 = vld [vmem:[%s14249_s29 + $0x1ee8] ss:$16 sps:$4 sm:$0xff]   ;;  %v13478_v48 = vld [vmem:[%s14249_s29 + $0x1f04] ss:$16 sps:$4 sm:$0xff]  }
 0x3e2   : > { %9090 = vmatpush1.bf16.msra.mxu0 %v13386_v60  ;;  %9951 = vmatpush1.bf16.msra.mxu1 %v13389_v61  ;;  %v13481_v60 = vld [vmem:[%s14249_s29 + $0x1f0c] ss:$16 sps:$4 sm:$0xff]   ;;  %v13476_v61 = vld [vmem:[%s14249_s29 + $0x1f00] ss:$16 sps:$4 sm:$0xff]  }
 0x3e3   : > { %9091 = vmatprep.subr.bf16.mxu0 %v13394_v47  ;;  %9952 = vmatprep.subr.bf16.mxu1 %v13397_v63  ;;  %v13479_v47 = vld [vmem:[%s14249_s29 + $0x1f08] ss:$16 sps:$4 sm:$0xff]   ;;  %v13484_v63 = vld [vmem:[%s14249_s29 + $0x1f24] ss:$16 sps:$4 sm:$0xff]  }
 0x3e6   : > { %9092 = vmatpush1.bf16.msra.mxu0 %v13392_v0  ;;  %9953 = vmatpush1.bf16.msra.mxu1 %v13395_v1  ;;  %v13487_v0 = vld [vmem:[%s14249_s29 + $0x1f2c] ss:$16 sps:$4 sm:$0xff]   ;;  %v13482_v1 = vld [vmem:[%s14249_s29 + $0x1f20] ss:$16 sps:$4 sm:$0xff]  }
 0x3e7   : > { %9093 = vmatprep.subr.bf16.mxu0 %v13400_v2  ;;  %9954 = vmatprep.subr.bf16.mxu1 %v13403_v52  ;;  %v13485_v2 = vld [vmem:[%s14249_s29 + $0x1f28] ss:$16 sps:$4 sm:$0xff]   ;;  %v13490_v52 = vld [vmem:[%s14249_s29 + $0x1f44] ss:$16 sps:$4 sm:$0xff]  }
 0x3ea   : > { %9094 = vmatpush1.bf16.msra.mxu0 %v13398_v3  ;;  %9955 = vmatpush1.bf16.msra.mxu1 %v13401_v59  ;;  %v13493_v3 = vld [vmem:[%s14249_s29 + $0x1f4c] ss:$16 sps:$4 sm:$0xff]   ;;  %v13488_v59 = vld [vmem:[%s14249_s29 + $0x1f40] ss:$16 sps:$4 sm:$0xff]  }
 0x3eb   : > { %9095 = vmatprep.subr.bf16.mxu0 %v13406_v6  ;;  %9956 = vmatprep.subr.bf16.mxu1 %v13409_v7  ;;  %v13491_v6 = vld [vmem:[%s14249_s29 + $0x1f48] ss:$16 sps:$4 sm:$0xff]   ;;  %v13496_v7 = vld [vmem:[%s14249_s29 + $0x1f64] ss:$16 sps:$4 sm:$0xff]  }
 0x3ee   : > { %9096 = vmatpush1.bf16.msra.mxu0 %v13404_v58  ;;  %9957 = vmatpush1.bf16.msra.mxu1 %v13407_v9  ;;  %v13499_v58 = vld [vmem:[%s14249_s29 + $0x1f6c] ss:$16 sps:$4 sm:$0xff]   ;;  %v13494_v9 = vld [vmem:[%s14249_s29 + $0x1f60] ss:$16 sps:$4 sm:$0xff]  }
 0x3ef   : > { %9097 = vmatprep.subr.bf16.mxu0 %v13412_v10  ;;  %9958 = vmatprep.subr.bf16.mxu1 %v13415_v11  ;;  %v13497_v10 = vld [vmem:[%s14249_s29 + $0x1f68] ss:$16 sps:$4 sm:$0xff]   ;;  %v13502_v11 = vld [vmem:[%s14249_s29 + $0x1f84] ss:$16 sps:$4 sm:$0xff]  }
 0x3f2   : > { %9098 = vmatpush1.bf16.msra.mxu0 %v13410_v12  ;;  %9959 = vmatpush1.bf16.msra.mxu1 %v13413_v62  ;;  %v13505_v12 = vld [vmem:[%s14249_s29 + $0x1f8c] ss:$16 sps:$4 sm:$0xff]   ;;  %v13500_v62 = vld [vmem:[%s14249_s29 + $0x1f80] ss:$16 sps:$4 sm:$0xff]  }
 0x3f3   : > { %9099 = vmatprep.subr.bf16.mxu0 %v13418_v14  ;;  %9960 = vmatprep.subr.bf16.mxu1 %v13421_v5  ;;  %v13503_v14 = vld [vmem:[%s14249_s29 + $0x1f88] ss:$16 sps:$4 sm:$0xff]   ;;  %v13508_v5 = vld [vmem:[%s14249_s29 + $0x1fa4] ss:$16 sps:$4 sm:$0xff]  }
 0x3f6   : > { %9100 = vmatpush1.bf16.msra.mxu0 %v13416_v17  ;;  %9961 = vmatpush1.bf16.msra.mxu1 %v13419_v18  ;;  %v13511_v17 = vld [vmem:[%s14249_s29 + $0x1fac] ss:$16 sps:$4 sm:$0xff]   ;;  %v13506_v18 = vld [vmem:[%s14249_s29 + $0x1fa0] ss:$16 sps:$4 sm:$0xff]  }
 0x3f7   : > { %9101 = vmatprep.subr.bf16.mxu0 %v13424_v4  ;;  %9962 = vmatprep.subr.bf16.mxu1 %v13427_v21  ;;  %v13509_v4 = vld [vmem:[%s14249_s29 + $0x1fa8] ss:$16 sps:$4 sm:$0xff]   ;;  %v13514_v21 = vld [vmem:[%s14249_s29 + $0x1fc4] ss:$16 sps:$4 sm:$0xff]  }
 0x3fa   : > { %9102 = vmatpush1.bf16.msra.mxu0 %v13422_v24  ;;  %9963 = vmatpush1.bf16.msra.mxu1 %v13425_v25  ;;  %v13512_v24 = vld [vmem:[%s14249_s29 + $0x1fc0] ss:$16 sps:$4 sm:$0xff]   ;;  %v13515_v25 = vld [vmem:[%s14249_s29 + $0x1fc8] ss:$16 sps:$4 sm:$0xff]  }
 0x3fb   : > { %9112 = vmatprep.subr.bf16.mxu0 %v13430_v8  ;;  %9973 = vmatprep.subr.bf16.mxu1 %v13433_v27  ;;  %v13520_v8 = vld [vmem:[%s14249_s29 + $0x1fe4] ss:$16 sps:$4 sm:$0xff]   ;;  %v13523_v27 = vld [vmem:[%s14249_s29 + $0x1fec] ss:$16 sps:$4 sm:$0xff]  }
 0x3fd   : > { %9104 = vmatmul.mubr.bf16.vlgmr.msra.gmra.mrb[0].mxu0 %v15297_v19  ;;  %9965 = vmatmul.mubr.bf16.vlgmr.msra.gmra.mrb[0].mxu1 %v15297_v19  ;;  %v13443_v19 = vld [vmem:[%s14249_s29 + $0x1e48] ss:$16 sps:$4 sm:$0xff]  }
 0x3fe   : > { %9113 = vmatpush1.bf16.msra.mxu0 %v13428_v13  ;;  %9974 = vmatpush1.bf16.msra.mxu1 %v13431_v16  ;;  %v15437_v13 = vld [vmem:[%s14306_s4 + $0x40] sm:$0xff] }
 0x3ff   : > { %9114 = vmatprep.subr.bf16.mxu0 %v13436_v29  ;;  %9975 = vmatprep.subr.bf16.mxu1 %v13439_v31  ;;  %v13518_v16 = vld [vmem:[%s14249_s29 + $0x1fe0] ss:$16 sps:$4 sm:$0xff]   ;;  %v13521_v29 = vld [vmem:[%s14249_s29 + $0x1fe8] ss:$16 sps:$4 sm:$0xff]   ;;  %v13527_v31 = vld [vmem:[%s14249_s29 + $0x2004] ss:$16 sps:$4 sm:$0xff]  }
 0x400   : > { %9144 = vmatprep.mubr.bf16.mxu0 %v1692_v15  ;;  %10005 = vmatprep.mubr.bf16.mxu1 %v1692_v15  ;;  %v13530_v15 = vld [vmem:[%s14249_s29 + $0x200c] ss:$16 sps:$4 sm:$0xff]  }
 0x402   : > { %9115 = vmatpush1.bf16.msra.mxu0 %v13434_v32  ;;  %9976 = vmatpush1.bf16.msra.mxu1 %v13437_v33  ;;  %v15445_v32 = vrot.slane %v15437_v13, %v14309_v50  ;;  %v13525_v33 = vld [vmem:[%s14249_s29 + $0x2000] ss:$16 sps:$4 sm:$0xff]  }
 0x403   : > { %9116 = vmatprep.subr.bf16.mxu0 %v13442_v34  ;;  %9977 = vmatprep.subr.bf16.mxu1 %v13445_v23  ;;  %v13528_v34 = vld [vmem:[%s14249_s29 + $0x2008] ss:$16 sps:$4 sm:$0xff]   ;;  %v13533_v23 = vld [vmem:[%s14249_s29 + $0x2024] ss:$16 sps:$4 sm:$0xff]  }
 0x406   : > { %9117 = vmatpush1.bf16.msra.mxu0 %v13440_v35  ;;  %9978 = vmatpush1.bf16.msra.mxu1 %v13443_v19  ;;  %v13536_v35 = vld [vmem:[%s14249_s29 + $0x202c] ss:$16 sps:$4 sm:$0xff]   ;;  %v1708_v19 = vcombine.high %v15445_v32, %v15445_v32 }
 0x407   : > { %9118 = vmatprep.subr.bf16.mxu0 %v13448_v20  ;;  %9979 = vmatprep.subr.bf16.mxu1 %v13451_v38  ;;  %v13531_v20 = vld [vmem:[%s14249_s29 + $0x2020] ss:$16 sps:$4 sm:$0xff]   ;;  %v13534_v38 = vld [vmem:[%s14249_s29 + $0x2028] ss:$16 sps:$4 sm:$0xff]  }
 0x40a   : > { %9119 = vmatpush1.bf16.msra.mxu0 %v13446_v39  ;;  %9980 = vmatpush1.bf16.msra.mxu1 %v13449_v26  ;;  %v13539_v39 = vld [vmem:[%s14249_s29 + $0x2044] ss:$16 sps:$4 sm:$0xff]   ;;  %v13542_v26 = vld [vmem:[%s14249_s29 + $0x204c] ss:$16 sps:$4 sm:$0xff]  }
 0x40b   : > { %9120 = vmatprep.subr.bf16.mxu0 %v13454_v41  ;;  %9981 = vmatprep.subr.bf16.mxu1 %v13457_v42  ;;  %v13537_v41 = vld [vmem:[%s14249_s29 + $0x2040] ss:$16 sps:$4 sm:$0xff]   ;;  %v13545_v42 = vld [vmem:[%s14249_s29 + $0x2064] ss:$16 sps:$4 sm:$0xff]  }
 0x40e   : > { %9121 = vmatpush1.bf16.msra.mxu0 %v13452_v43  ;;  %9982 = vmatpush1.bf16.msra.mxu1 %v13455_v45  ;;  %v13548_v43 = vld [vmem:[%s14249_s29 + $0x206c] ss:$16 sps:$4 sm:$0xff]   ;;  %v13543_v45 = vld [vmem:[%s14249_s29 + $0x2060] ss:$16 sps:$4 sm:$0xff]  }
 0x40f   : > { %9122 = vmatprep.subr.bf16.mxu0 %v13460_v30  ;;  %9983 = vmatprep.subr.bf16.mxu1 %v13463_v46  ;;  %v13546_v30 = vld [vmem:[%s14249_s29 + $0x2068] ss:$16 sps:$4 sm:$0xff]   ;;  %v13551_v46 = vld [vmem:[%s14249_s29 + $0x2084] ss:$16 sps:$4 sm:$0xff]  }
 0x412   : > { %9123 = vmatpush1.bf16.msra.mxu0 %v13458_v37  ;;  %9984 = vmatpush1.bf16.msra.mxu1 %v13461_v49  ;;  %v13554_v37 = vld [vmem:[%s14249_s29 + $0x208c] ss:$16 sps:$4 sm:$0xff]   ;;  %v13549_v49 = vld [vmem:[%s14249_s29 + $0x2080] ss:$16 sps:$4 sm:$0xff]  }
 0x413   : > { %9124 = vmatprep.subr.bf16.mxu0 %v13466_v51  ;;  %9985 = vmatprep.subr.bf16.mxu1 %v13469_v36  ;;  %v13552_v51 = vld [vmem:[%s14249_s29 + $0x2088] ss:$16 sps:$4 sm:$0xff]   ;;  %v13557_v36 = vld [vmem:[%s14249_s29 + $0x20a4] ss:$16 sps:$4 sm:$0xff]  }
 0x416   : > { %9125 = vmatpush1.bf16.msra.mxu0 %v13464_v53  ;;  %9986 = vmatpush1.bf16.msra.mxu1 %v13467_v54  ;;  %v13560_v53 = vld [vmem:[%s14249_s29 + $0x20ac] ss:$16 sps:$4 sm:$0xff]   ;;  %v13555_v54 = vld [vmem:[%s14249_s29 + $0x20a0] ss:$16 sps:$4 sm:$0xff]  }
 0x417   : > { %9126 = vmatprep.subr.bf16.mxu0 %v13472_v55  ;;  %9987 = vmatprep.subr.bf16.mxu1 %v13475_v56  ;;  %v13558_v55 = vld [vmem:[%s14249_s29 + $0x20a8] ss:$16 sps:$4 sm:$0xff]   ;;  %v13563_v56 = vld [vmem:[%s14249_s29 + $0x20c4] ss:$16 sps:$4 sm:$0xff]  }
 0x41a   : > { %9127 = vmatpush1.bf16.msra.mxu0 %v13470_v40  ;;  %9988 = vmatpush1.bf16.msra.mxu1 %v13473_v57  ;;  %v13566_v40 = vld [vmem:[%s14249_s29 + $0x20cc] ss:$16 sps:$4 sm:$0xff]   ;;  %v13561_v57 = vld [vmem:[%s14249_s29 + $0x20c0] ss:$16 sps:$4 sm:$0xff]  }
 0x41b   : > { %9128 = vmatprep.subr.bf16.mxu0 %v13478_v48  ;;  %9989 = vmatprep.subr.bf16.mxu1 %v13481_v60  ;;  %v13564_v48 = vld [vmem:[%s14249_s29 + $0x20c8] ss:$16 sps:$4 sm:$0xff]   ;;  %v13569_v60 = vld [vmem:[%s14249_s29 + $0x20e4] ss:$16 sps:$4 sm:$0xff]  }
 0x41e   : > { %9129 = vmatpush1.bf16.msra.mxu0 %v13476_v61  ;;  %9990 = vmatpush1.bf16.msra.mxu1 %v13479_v47  ;;  %v13572_v61 = vld [vmem:[%s14249_s29 + $0x20ec] ss:$16 sps:$4 sm:$0xff]   ;;  %v13567_v47 = vld [vmem:[%s14249_s29 + $0x20e0] ss:$16 sps:$4 sm:$0xff]  }
 0x41f   : > { %9130 = vmatprep.subr.bf16.mxu0 %v13484_v63  ;;  %9991 = vmatprep.subr.bf16.mxu1 %v13487_v0  ;;  %v13570_v63 = vld [vmem:[%s14249_s29 + $0x20e8] ss:$16 sps:$4 sm:$0xff]   ;;  %v13575_v0 = vld [vmem:[%s14249_s29 + $0x2104] ss:$16 sps:$4 sm:$0xff]  }
 0x422   : > { %9131 = vmatpush1.bf16.msra.mxu0 %v13482_v1  ;;  %9992 = vmatpush1.bf16.msra.mxu1 %v13485_v2  ;;  %v13578_v1 = vld [vmem:[%s14249_s29 + $0x210c] ss:$16 sps:$4 sm:$0xff]   ;;  %v13573_v2 = vld [vmem:[%s14249_s29 + $0x2100] ss:$16 sps:$4 sm:$0xff]  }
 0x423   : > { %9132 = vmatprep.subr.bf16.mxu0 %v13490_v52  ;;  %9993 = vmatprep.subr.bf16.mxu1 %v13493_v3  ;;  %v13576_v52 = vld [vmem:[%s14249_s29 + $0x2108] ss:$16 sps:$4 sm:$0xff]   ;;  %v13581_v3 = vld [vmem:[%s14249_s29 + $0x2124] ss:$16 sps:$4 sm:$0xff]  }
 0x426   : > { %9133 = vmatpush1.bf16.msra.mxu0 %v13488_v59  ;;  %9994 = vmatpush1.bf16.msra.mxu1 %v13491_v6  ;;  %v13584_v59 = vld [vmem:[%s14249_s29 + $0x212c] ss:$16 sps:$4 sm:$0xff]   ;;  %v13579_v6 = vld [vmem:[%s14249_s29 + $0x2120] ss:$16 sps:$4 sm:$0xff]  }
 0x427   : > { %9134 = vmatprep.subr.bf16.mxu0 %v13496_v7  ;;  %9995 = vmatprep.subr.bf16.mxu1 %v13499_v58  ;;  %v13582_v7 = vld [vmem:[%s14249_s29 + $0x2128] ss:$16 sps:$4 sm:$0xff]   ;;  %v13587_v58 = vld [vmem:[%s14249_s29 + $0x2144] ss:$16 sps:$4 sm:$0xff]  }
 0x42a   : > { %9135 = vmatpush1.bf16.msra.mxu0 %v13494_v9  ;;  %9996 = vmatpush1.bf16.msra.mxu1 %v13497_v10  ;;  %v13590_v9 = vld [vmem:[%s14249_s29 + $0x214c] ss:$16 sps:$4 sm:$0xff]   ;;  %v13585_v10 = vld [vmem:[%s14249_s29 + $0x2140] ss:$16 sps:$4 sm:$0xff]  }
 0x42b   : > { %9136 = vmatprep.subr.bf16.mxu0 %v13502_v11  ;;  %9997 = vmatprep.subr.bf16.mxu1 %v13505_v12  ;;  %v13588_v11 = vld [vmem:[%s14249_s29 + $0x2148] ss:$16 sps:$4 sm:$0xff]   ;;  %v13593_v12 = vld [vmem:[%s14249_s29 + $0x2164] ss:$16 sps:$4 sm:$0xff]  }
 0x42e   : > { %9137 = vmatpush1.bf16.msra.mxu0 %v13500_v62  ;;  %9998 = vmatpush1.bf16.msra.mxu1 %v13503_v14  ;;  %v13596_v62 = vld [vmem:[%s14249_s29 + $0x216c] ss:$16 sps:$4 sm:$0xff]   ;;  %v13591_v14 = vld [vmem:[%s14249_s29 + $0x2160] ss:$16 sps:$4 sm:$0xff]  }
 0x42f   : > { %9138 = vmatprep.subr.bf16.mxu0 %v13508_v5  ;;  %9999 = vmatprep.subr.bf16.mxu1 %v13511_v17  ;;  %v13594_v5 = vld [vmem:[%s14249_s29 + $0x2168] ss:$16 sps:$4 sm:$0xff]   ;;  %v13599_v17 = vld [vmem:[%s14249_s29 + $0x2184] ss:$16 sps:$4 sm:$0xff]  }
 0x432   : > { %9139 = vmatpush1.bf16.msra.mxu0 %v13506_v18  ;;  %10000 = vmatpush1.bf16.msra.mxu1 %v13509_v4  ;;  %v13602_v18 = vld [vmem:[%s14249_s29 + $0x218c] ss:$16 sps:$4 sm:$0xff]   ;;  %v13597_v4 = vld [vmem:[%s14249_s29 + $0x2180] ss:$16 sps:$4 sm:$0xff]  }
 0x433   : > { %9140 = vmatprep.subr.bf16.mxu0 %v13514_v21  ;;  %10001 = vmatprep.subr.bf16.mxu1 %v13517_v22  ;;  %v13600_v21 = vld [vmem:[%s14249_s29 + $0x2188] ss:$16 sps:$4 sm:$0xff]   ;;  %v13605_v22 = vld [vmem:[%s14249_s29 + $0x21a4] ss:$16 sps:$4 sm:$0xff]  }
 0x436   : > { %9141 = vmatpush1.bf16.msra.mxu0 %v13512_v24  ;;  %10002 = vmatpush1.bf16.msra.mxu1 %v13515_v25  ;;  %v13608_v24 = vld [vmem:[%s14249_s29 + $0x21ac] ss:$16 sps:$4 sm:$0xff]   ;;  %v13603_v25 = vld [vmem:[%s14249_s29 + $0x21a0] ss:$16 sps:$4 sm:$0xff]  }
 0x437   : > { %9142 = vmatprep.subr.bf16.mxu0 %v13520_v8  ;;  %10003 = vmatprep.subr.bf16.mxu1 %v13523_v27  ;;  %v13606_v8 = vld [vmem:[%s14249_s29 + $0x21a8] ss:$16 sps:$4 sm:$0xff]   ;;  %v13611_v27 = vld [vmem:[%s14249_s29 + $0x21c4] ss:$16 sps:$4 sm:$0xff]  }
 0x43a   : > { %9143 = vmatpush1.bf16.msra.mxu0 %v13518_v16  ;;  %10004 = vmatpush1.bf16.msra.mxu1 %v13521_v29  ;;  %v13614_v16 = vld [vmem:[%s14249_s29 + $0x21cc] ss:$16 sps:$4 sm:$0xff]   ;;  %v13609_v29 = vld [vmem:[%s14249_s29 + $0x21c0] ss:$16 sps:$4 sm:$0xff]  }
 0x43b   : > { %9153 = vmatprep.subr.bf16.mxu0 %v13527_v31  ;;  %10014 = vmatprep.subr.bf16.mxu1 %v13530_v15  ;;  %v13612_v31 = vld [vmem:[%s14249_s29 + $0x21c8] ss:$16 sps:$4 sm:$0xff]   ;;  %v13617_v15 = vld [vmem:[%s14249_s29 + $0x21e4] ss:$16 sps:$4 sm:$0xff]  }
 0x43d   : > { %9145 = vmatmul.mubr.bf16.vlgmr.msra.gmra.mrb[0].mxu0 %v15370_v28  ;;  %10006 = vmatmul.mubr.bf16.vlgmr.msra.gmra.mrb[0].mxu1 %v15370_v28  ;;  %v13540_v28 = vld [vmem:[%s14249_s29 + $0x2048] ss:$16 sps:$4 sm:$0xff]  }
 0x43e   : > { %9154 = vmatpush1.bf16.msra.mxu0 %v13525_v33  ;;  %10015 = vmatpush1.bf16.msra.mxu1 %v13528_v34  ;;  %v13620_v33 = vld [vmem:[%s14249_s29 + $0x21ec] ss:$16 sps:$4 sm:$0xff]   ;;  %v1693_v34 = vcombine.high %v15437_v13, %v15437_v13  ;;  %v13624_v13 = vld [vmem:[%s14249_s29 + $0x2208] ss:$16 sps:$4 sm:$0xff]  }
 0x43f   : > { %9155 = vmatprep.subr.bf16.mxu0 %v13533_v23  ;;  %10016 = vmatprep.subr.bf16.mxu1 %v13536_v35  ;;  %v13615_v23 = vld [vmem:[%s14249_s29 + $0x21e0] ss:$16 sps:$4 sm:$0xff]   ;;  %v13618_v35 = vld [vmem:[%s14249_s29 + $0x21e8] ss:$16 sps:$4 sm:$0xff]  }
 0x440   : > { %9185 = vmatprep.mubr.bf16.mxu0 %v1708_v19  ;;  %10046 = vmatprep.mubr.bf16.mxu1 %v1708_v19  ;;  %v13623_v19 = vld [vmem:[%s14249_s29 + $0x2204] ss:$16 sps:$4 sm:$0xff]  }
 0x442   : > { %9156 = vmatpush1.bf16.msra.mxu0 %v13531_v20  ;;  %10017 = vmatpush1.bf16.msra.mxu1 %v13534_v38  ;;  %v13626_v20 = vld [vmem:[%s14249_s29 + $0x220c] ss:$16 sps:$4 sm:$0xff]   ;;  %v15518_v38 = vrot.slane %v1693_v34, %v14309_v50 }
 0x443   : > { %9157 = vmatprep.subr.bf16.mxu0 %v13539_v39  ;;  %10018 = vmatprep.subr.bf16.mxu1 %v13542_v26  ;;  %v13621_v39 = vld [vmem:[%s14249_s29 + $0x2200] ss:$16 sps:$4 sm:$0xff]   ;;  %v13629_v26 = vld [vmem:[%s14249_s29 + $0x2224] ss:$16 sps:$4 sm:$0xff]   ;;  %v13710_v34 = vld [vmem:[%s14249_s29 + $0x23cc] ss:$16 sps:$4 sm:$0xff]  }
 0x446   : > { %9158 = vmatpush1.bf16.msra.mxu0 %v13537_v41  ;;  %10019 = vmatpush1.bf16.msra.mxu1 %v13540_v28  ;;  %v13632_v41 = vld [vmem:[%s14249_s29 + $0x222c] ss:$16 sps:$4 sm:$0xff]   ;;  %v1709_v28 = vcombine.high %v15518_v38, %v15518_v38 }
 0x447   : > { %9159 = vmatprep.subr.bf16.mxu0 %v13545_v42  ;;  %10020 = vmatprep.subr.bf16.mxu1 %v13548_v43  ;;  %v13627_v42 = vld [vmem:[%s14249_s29 + $0x2220] ss:$16 sps:$4 sm:$0xff]   ;;  %v13630_v43 = vld [vmem:[%s14249_s29 + $0x2228] ss:$16 sps:$4 sm:$0xff]  }
 0x44a   : > { %9160 = vmatpush1.bf16.msra.mxu0 %v13543_v45  ;;  %10021 = vmatpush1.bf16.msra.mxu1 %v13546_v30  ;;  %v13635_v45 = vld [vmem:[%s14249_s29 + $0x2244] ss:$16 sps:$4 sm:$0xff]   ;;  %v13638_v30 = vld [vmem:[%s14249_s29 + $0x224c] ss:$16 sps:$4 sm:$0xff]  }
 0x44b   : > { %9161 = vmatprep.subr.bf16.mxu0 %v13551_v46  ;;  %10022 = vmatprep.subr.bf16.mxu1 %v13554_v37  ;;  %v13633_v46 = vld [vmem:[%s14249_s29 + $0x2240] ss:$16 sps:$4 sm:$0xff]   ;;  %v13641_v37 = vld [vmem:[%s14249_s29 + $0x2264] ss:$16 sps:$4 sm:$0xff]  }
 0x44e   : > { %9162 = vmatpush1.bf16.msra.mxu0 %v13549_v49  ;;  %10023 = vmatpush1.bf16.msra.mxu1 %v13552_v51  ;;  %v13644_v49 = vld [vmem:[%s14249_s29 + $0x226c] ss:$16 sps:$4 sm:$0xff]   ;;  %v13639_v51 = vld [vmem:[%s14249_s29 + $0x2260] ss:$16 sps:$4 sm:$0xff]  }
 0x44f   : > { %9163 = vmatprep.subr.bf16.mxu0 %v13557_v36  ;;  %10024 = vmatprep.subr.bf16.mxu1 %v13560_v53  ;;  %v13642_v36 = vld [vmem:[%s14249_s29 + $0x2268] ss:$16 sps:$4 sm:$0xff]   ;;  %v13647_v53 = vld [vmem:[%s14249_s29 + $0x2284] ss:$16 sps:$4 sm:$0xff]  }
 0x452   : > { %9164 = vmatpush1.bf16.msra.mxu0 %v13555_v54  ;;  %10025 = vmatpush1.bf16.msra.mxu1 %v13558_v55  ;;  %v13650_v54 = vld [vmem:[%s14249_s29 + $0x228c] ss:$16 sps:$4 sm:$0xff]   ;;  %v13645_v55 = vld [vmem:[%s14249_s29 + $0x2280] ss:$16 sps:$4 sm:$0xff]  }
 0x453   : > { %9165 = vmatprep.subr.bf16.mxu0 %v13563_v56  ;;  %10026 = vmatprep.subr.bf16.mxu1 %v13566_v40  ;;  %v13648_v56 = vld [vmem:[%s14249_s29 + $0x2288] ss:$16 sps:$4 sm:$0xff]   ;;  %v13653_v40 = vld [vmem:[%s14249_s29 + $0x22a4] ss:$16 sps:$4 sm:$0xff]  }
 0x456   : > { %9166 = vmatpush1.bf16.msra.mxu0 %v13561_v57  ;;  %10027 = vmatpush1.bf16.msra.mxu1 %v13564_v48  ;;  %v13656_v57 = vld [vmem:[%s14249_s29 + $0x22ac] ss:$16 sps:$4 sm:$0xff]   ;;  %v13651_v48 = vld [vmem:[%s14249_s29 + $0x22a0] ss:$16 sps:$4 sm:$0xff]  }
 0x457   : > { %9167 = vmatprep.subr.bf16.mxu0 %v13569_v60  ;;  %10028 = vmatprep.subr.bf16.mxu1 %v13572_v61  ;;  %v13654_v60 = vld [vmem:[%s14249_s29 + $0x22a8] ss:$16 sps:$4 sm:$0xff]   ;;  %v13659_v61 = vld [vmem:[%s14249_s29 + $0x22c4] ss:$16 sps:$4 sm:$0xff]  }
 0x45a   : > { %9168 = vmatpush1.bf16.msra.mxu0 %v13567_v47  ;;  %10029 = vmatpush1.bf16.msra.mxu1 %v13570_v63  ;;  %v13662_v47 = vld [vmem:[%s14249_s29 + $0x22cc] ss:$16 sps:$4 sm:$0xff]   ;;  %v13657_v63 = vld [vmem:[%s14249_s29 + $0x22c0] ss:$16 sps:$4 sm:$0xff]  }
 0x45b   : > { %9169 = vmatprep.subr.bf16.mxu0 %v13575_v0  ;;  %10030 = vmatprep.subr.bf16.mxu1 %v13578_v1  ;;  %v13660_v0 = vld [vmem:[%s14249_s29 + $0x22c8] ss:$16 sps:$4 sm:$0xff]   ;;  %v13665_v1 = vld [vmem:[%s14249_s29 + $0x22e4] ss:$16 sps:$4 sm:$0xff]  }
 0x45e   : > { %9170 = vmatpush1.bf16.msra.mxu0 %v13573_v2  ;;  %10031 = vmatpush1.bf16.msra.mxu1 %v13576_v52  ;;  %v13668_v2 = vld [vmem:[%s14249_s29 + $0x22ec] ss:$16 sps:$4 sm:$0xff]   ;;  %v13663_v52 = vld [vmem:[%s14249_s29 + $0x22e0] ss:$16 sps:$4 sm:$0xff]  }
 0x45f   : > { %9171 = vmatprep.subr.bf16.mxu0 %v13581_v3  ;;  %10032 = vmatprep.subr.bf16.mxu1 %v13584_v59  ;;  %v13666_v3 = vld [vmem:[%s14249_s29 + $0x22e8] ss:$16 sps:$4 sm:$0xff]   ;;  %v13671_v59 = vld [vmem:[%s14249_s29 + $0x2304] ss:$16 sps:$4 sm:$0xff]  }
 0x462   : > { %9172 = vmatpush1.bf16.msra.mxu0 %v13579_v6  ;;  %10033 = vmatpush1.bf16.msra.mxu1 %v13582_v7  ;;  %v13674_v6 = vld [vmem:[%s14249_s29 + $0x230c] ss:$16 sps:$4 sm:$0xff]   ;;  %v13669_v7 = vld [vmem:[%s14249_s29 + $0x2300] ss:$16 sps:$4 sm:$0xff]  }
 0x463   : > { %9173 = vmatprep.subr.bf16.mxu0 %v13587_v58  ;;  %10034 = vmatprep.subr.bf16.mxu1 %v13590_v9  ;;  %v13672_v58 = vld [vmem:[%s14249_s29 + $0x2308] ss:$16 sps:$4 sm:$0xff]   ;;  %v13677_v9 = vld [vmem:[%s14249_s29 + $0x2324] ss:$16 sps:$4 sm:$0xff]  }
 0x466   : > { %9174 = vmatpush1.bf16.msra.mxu0 %v13585_v10  ;;  %10035 = vmatpush1.bf16.msra.mxu1 %v13588_v11  ;;  %v13680_v10 = vld [vmem:[%s14249_s29 + $0x232c] ss:$16 sps:$4 sm:$0xff]   ;;  %v13675_v11 = vld [vmem:[%s14249_s29 + $0x2320] ss:$16 sps:$4 sm:$0xff]  }
 0x467   : > { %9175 = vmatprep.subr.bf16.mxu0 %v13593_v12  ;;  %10036 = vmatprep.subr.bf16.mxu1 %v13596_v62  ;;  %v13678_v12 = vld [vmem:[%s14249_s29 + $0x2328] ss:$16 sps:$4 sm:$0xff]   ;;  %v13683_v62 = vld [vmem:[%s14249_s29 + $0x2344] ss:$16 sps:$4 sm:$0xff]  }
 0x46a   : > { %9176 = vmatpush1.bf16.msra.mxu0 %v13591_v14  ;;  %10037 = vmatpush1.bf16.msra.mxu1 %v13594_v5  ;;  %v13686_v14 = vld [vmem:[%s14249_s29 + $0x234c] ss:$16 sps:$4 sm:$0xff]   ;;  %v13681_v5 = vld [vmem:[%s14249_s29 + $0x2340] ss:$16 sps:$4 sm:$0xff]  }
 0x46b   : > { %9177 = vmatprep.subr.bf16.mxu0 %v13599_v17  ;;  %10038 = vmatprep.subr.bf16.mxu1 %v13602_v18  ;;  %v13684_v17 = vld [vmem:[%s14249_s29 + $0x2348] ss:$16 sps:$4 sm:$0xff]   ;;  %v13689_v18 = vld [vmem:[%s14249_s29 + $0x2364] ss:$16 sps:$4 sm:$0xff]  }
 0x46e   : > { %9178 = vmatpush1.bf16.msra.mxu0 %v13597_v4  ;;  %10039 = vmatpush1.bf16.msra.mxu1 %v13600_v21  ;;  %v13692_v4 = vld [vmem:[%s14249_s29 + $0x236c] ss:$16 sps:$4 sm:$0xff]   ;;  %v13687_v21 = vld [vmem:[%s14249_s29 + $0x2360] ss:$16 sps:$4 sm:$0xff]  }
 0x46f   : > { %9179 = vmatprep.subr.bf16.mxu0 %v13605_v22  ;;  %10040 = vmatprep.subr.bf16.mxu1 %v13608_v24  ;;  %v13690_v22 = vld [vmem:[%s14249_s29 + $0x2368] ss:$16 sps:$4 sm:$0xff]   ;;  %v13695_v24 = vld [vmem:[%s14249_s29 + $0x2384] ss:$16 sps:$4 sm:$0xff]  }
 0x472   : > { %9180 = vmatpush1.bf16.msra.mxu0 %v13603_v25  ;;  %10041 = vmatpush1.bf16.msra.mxu1 %v13606_v8  ;;  %v13698_v25 = vld [vmem:[%s14249_s29 + $0x238c] ss:$16 sps:$4 sm:$0xff]   ;;  %v13693_v8 = vld [vmem:[%s14249_s29 + $0x2380] ss:$16 sps:$4 sm:$0xff]  }
 0x473   : > { %9181 = vmatprep.subr.bf16.mxu0 %v13611_v27  ;;  %10042 = vmatprep.subr.bf16.mxu1 %v13614_v16  ;;  %v13696_v27 = vld [vmem:[%s14249_s29 + $0x2388] ss:$16 sps:$4 sm:$0xff]   ;;  %v13701_v16 = vld [vmem:[%s14249_s29 + $0x23a4] ss:$16 sps:$4 sm:$0xff]  }
 0x476   : > { %9182 = vmatpush1.bf16.msra.mxu0 %v13609_v29  ;;  %10043 = vmatpush1.bf16.msra.mxu1 %v13612_v31  ;;  %v13704_v29 = vld [vmem:[%s14249_s29 + $0x23ac] ss:$16 sps:$4 sm:$0xff]   ;;  %v13699_v31 = vld [vmem:[%s14249_s29 + $0x23a0] ss:$16 sps:$4 sm:$0xff]  }
 0x477   : > { %9183 = vmatprep.subr.bf16.mxu0 %v13617_v15  ;;  %10044 = vmatprep.subr.bf16.mxu1 %v13620_v33  ;;  %v13702_v15 = vld [vmem:[%s14249_s29 + $0x23a8] ss:$16 sps:$4 sm:$0xff]   ;;  %v13707_v33 = vld [vmem:[%s14249_s29 + $0x23c4] ss:$16 sps:$4 sm:$0xff]  }
 0x47a   : > { %9184 = vmatpush1.bf16.msra.mxu0 %v13615_v23  ;;  %10045 = vmatpush1.bf16.msra.mxu1 %v13618_v35  ;;  %v13705_v23 = vld [vmem:[%s14249_s29 + $0x23c0] ss:$16 sps:$4 sm:$0xff]   ;;  %v13708_v35 = vld [vmem:[%s14249_s29 + $0x23c8] ss:$16 sps:$4 sm:$0xff]  }
 0x47b   : > { %9194 = vmatprep.subr.bf16.mxu0 %v13623_v19  ;;  %10055 = vmatprep.subr.bf16.mxu1 %v13626_v20  ;;  %v13713_v19 = vld [vmem:[%s14249_s29 + $0x23e4] ss:$16 sps:$4 sm:$0xff]   ;;  %v13716_v20 = vld [vmem:[%s14249_s29 + $0x23ec] ss:$16 sps:$4 sm:$0xff]  }
 0x47d   : > { %9186 = vmatmul.mubr.bf16.vlgmr.msra.gmra.mrb[0].mxu0 %v15445_v32  ;;  %10047 = vmatmul.mubr.bf16.vlgmr.msra.gmra.mrb[0].mxu1 %v15445_v32  ;;  %v13636_v32 = vld [vmem:[%s14249_s29 + $0x2248] ss:$16 sps:$4 sm:$0xff]  }
 0x47e   : > { %9195 = vmatpush1.bf16.msra.mxu0 %v13621_v39  ;;  %10056 = vmatpush1.bf16.msra.mxu1 %v13624_v13  ;;  %v15585_v39 = vld [vmem:[%s14306_s4 + $0x48] sm:$0xff]  ;;  %v13711_v13 = vld [vmem:[%s14249_s29 + $0x23e0] ss:$16 sps:$4 sm:$0xff]  }
 0x47f   : > { %9196 = vmatprep.subr.bf16.mxu0 %v13629_v26  ;;  %10057 = vmatprep.subr.bf16.mxu1 %v13632_v41  ;;  %v13714_v26 = vld [vmem:[%s14249_s29 + $0x23e8] ss:$16 sps:$4 sm:$0xff]   ;;  %v13720_v41 = vld [vmem:[%s14249_s29 + $0x2404] ss:$16 sps:$4 sm:$0xff]  }
 0x480   : > { %9226 = vmatprep.mubr.bf16.mxu0 %v1709_v28  ;;  %10087 = vmatprep.mubr.bf16.mxu1 %v1709_v28  ;;  %v13723_v28 = vld [vmem:[%s14249_s29 + $0x240c] ss:$16 sps:$4 sm:$0xff]  }
 0x482   : > { %9197 = vmatpush1.bf16.msra.mxu0 %v13627_v42  ;;  %10058 = vmatpush1.bf16.msra.mxu1 %v13630_v43  ;;  %v15593_v42 = vrot.slane %v15585_v39, %v14309_v50  ;;  %v13718_v43 = vld [vmem:[%s14249_s29 + $0x2400] ss:$16 sps:$4 sm:$0xff]  }
 0x483   : > { %9198 = vmatprep.subr.bf16.mxu0 %v13635_v45  ;;  %10059 = vmatprep.subr.bf16.mxu1 %v13638_v30  ;;  %v13721_v45 = vld [vmem:[%s14249_s29 + $0x2408] ss:$16 sps:$4 sm:$0xff]   ;;  %v13726_v30 = vld [vmem:[%s14249_s29 + $0x2424] ss:$16 sps:$4 sm:$0xff]  }
 0x486   : > { %9199 = vmatpush1.bf16.msra.mxu0 %v13633_v46  ;;  %10060 = vmatpush1.bf16.msra.mxu1 %v13636_v32  ;;  %v13729_v46 = vld [vmem:[%s14249_s29 + $0x242c] ss:$16 sps:$4 sm:$0xff]   ;;  %v1725_v32 = vcombine.high %v15593_v42, %v15593_v42 }
 0x487   : > { %9200 = vmatprep.subr.bf16.mxu0 %v13641_v37  ;;  %10061 = vmatprep.subr.bf16.mxu1 %v13644_v49  ;;  %v13724_v37 = vld [vmem:[%s14249_s29 + $0x2420] ss:$16 sps:$4 sm:$0xff]   ;;  %v13727_v49 = vld [vmem:[%s14249_s29 + $0x2428] ss:$16 sps:$4 sm:$0xff]  }
 0x48a   : > { %9201 = vmatpush1.bf16.msra.mxu0 %v13639_v51  ;;  %10062 = vmatpush1.bf16.msra.mxu1 %v13642_v36  ;;  %v13732_v51 = vld [vmem:[%s14249_s29 + $0x2444] ss:$16 sps:$4 sm:$0xff]   ;;  %v13735_v36 = vld [vmem:[%s14249_s29 + $0x244c] ss:$16 sps:$4 sm:$0xff]  }
 0x48b   : > { %9202 = vmatprep.subr.bf16.mxu0 %v13647_v53  ;;  %10063 = vmatprep.subr.bf16.mxu1 %v13650_v54  ;;  %v13730_v53 = vld [vmem:[%s14249_s29 + $0x2440] ss:$16 sps:$4 sm:$0xff]   ;;  %v13738_v54 = vld [vmem:[%s14249_s29 + $0x2464] ss:$16 sps:$4 sm:$0xff]  }
 0x48e   : > { %9203 = vmatpush1.bf16.msra.mxu0 %v13645_v55  ;;  %10064 = vmatpush1.bf16.msra.mxu1 %v13648_v56  ;;  %v13741_v55 = vld [vmem:[%s14249_s29 + $0x246c] ss:$16 sps:$4 sm:$0xff]   ;;  %v13736_v56 = vld [vmem:[%s14249_s29 + $0x2460] ss:$16 sps:$4 sm:$0xff]  }
 0x48f   : > { %9204 = vmatprep.subr.bf16.mxu0 %v13653_v40  ;;  %10065 = vmatprep.subr.bf16.mxu1 %v13656_v57  ;;  %v13739_v40 = vld [vmem:[%s14249_s29 + $0x2468] ss:$16 sps:$4 sm:$0xff]   ;;  %v13744_v57 = vld [vmem:[%s14249_s29 + $0x2484] ss:$16 sps:$4 sm:$0xff]  }
 0x492   : > { %9205 = vmatpush1.bf16.msra.mxu0 %v13651_v48  ;;  %10066 = vmatpush1.bf16.msra.mxu1 %v13654_v60  ;;  %v13747_v48 = vld [vmem:[%s14249_s29 + $0x248c] ss:$16 sps:$4 sm:$0xff]   ;;  %v13742_v60 = vld [vmem:[%s14249_s29 + $0x2480] ss:$16 sps:$4 sm:$0xff]  }
 0x493   : > { %9206 = vmatprep.subr.bf16.mxu0 %v13659_v61  ;;  %10067 = vmatprep.subr.bf16.mxu1 %v13662_v47  ;;  %v13745_v61 = vld [vmem:[%s14249_s29 + $0x2488] ss:$16 sps:$4 sm:$0xff]   ;;  %v13750_v47 = vld [vmem:[%s14249_s29 + $0x24a4] ss:$16 sps:$4 sm:$0xff]  }
 0x496   : > { %9207 = vmatpush1.bf16.msra.mxu0 %v13657_v63  ;;  %10068 = vmatpush1.bf16.msra.mxu1 %v13660_v0  ;;  %v13753_v63 = vld [vmem:[%s14249_s29 + $0x24ac] ss:$16 sps:$4 sm:$0xff]   ;;  %v13748_v0 = vld [vmem:[%s14249_s29 + $0x24a0] ss:$16 sps:$4 sm:$0xff]  }
 0x497   : > { %9208 = vmatprep.subr.bf16.mxu0 %v13665_v1  ;;  %10069 = vmatprep.subr.bf16.mxu1 %v13668_v2  ;;  %v13751_v1 = vld [vmem:[%s14249_s29 + $0x24a8] ss:$16 sps:$4 sm:$0xff]   ;;  %v13756_v2 = vld [vmem:[%s14249_s29 + $0x24c4] ss:$16 sps:$4 sm:$0xff]  }
 0x49a   : > { %9209 = vmatpush1.bf16.msra.mxu0 %v13663_v52  ;;  %10070 = vmatpush1.bf16.msra.mxu1 %v13666_v3  ;;  %v13759_v52 = vld [vmem:[%s14249_s29 + $0x24cc] ss:$16 sps:$4 sm:$0xff]   ;;  %v13754_v3 = vld [vmem:[%s14249_s29 + $0x24c0] ss:$16 sps:$4 sm:$0xff]  }
 0x49b   : > { %9210 = vmatprep.subr.bf16.mxu0 %v13671_v59  ;;  %10071 = vmatprep.subr.bf16.mxu1 %v13674_v6  ;;  %v13757_v59 = vld [vmem:[%s14249_s29 + $0x24c8] ss:$16 sps:$4 sm:$0xff]   ;;  %v13762_v6 = vld [vmem:[%s14249_s29 + $0x24e4] ss:$16 sps:$4 sm:$0xff]  }
 0x49e   : > { %9211 = vmatpush1.bf16.msra.mxu0 %v13669_v7  ;;  %10072 = vmatpush1.bf16.msra.mxu1 %v13672_v58  ;;  %v13765_v7 = vld [vmem:[%s14249_s29 + $0x24ec] ss:$16 sps:$4 sm:$0xff]   ;;  %v13760_v58 = vld [vmem:[%s14249_s29 + $0x24e0] ss:$16 sps:$4 sm:$0xff]  }
 0x49f   : > { %9212 = vmatprep.subr.bf16.mxu0 %v13677_v9  ;;  %10073 = vmatprep.subr.bf16.mxu1 %v13680_v10  ;;  %v13763_v9 = vld [vmem:[%s14249_s29 + $0x24e8] ss:$16 sps:$4 sm:$0xff]   ;;  %v13768_v10 = vld [vmem:[%s14249_s29 + $0x2504] ss:$16 sps:$4 sm:$0xff]  }
 0x4a2   : > { %9213 = vmatpush1.bf16.msra.mxu0 %v13675_v11  ;;  %10074 = vmatpush1.bf16.msra.mxu1 %v13678_v12  ;;  %v13771_v11 = vld [vmem:[%s14249_s29 + $0x250c] ss:$16 sps:$4 sm:$0xff]   ;;  %v13766_v12 = vld [vmem:[%s14249_s29 + $0x2500] ss:$16 sps:$4 sm:$0xff]  }
 0x4a3   : > { %9214 = vmatprep.subr.bf16.mxu0 %v13683_v62  ;;  %10075 = vmatprep.subr.bf16.mxu1 %v13686_v14  ;;  %v13769_v62 = vld [vmem:[%s14249_s29 + $0x2508] ss:$16 sps:$4 sm:$0xff]   ;;  %v13774_v14 = vld [vmem:[%s14249_s29 + $0x2524] ss:$16 sps:$4 sm:$0xff]  }
 0x4a6   : > { %9215 = vmatpush1.bf16.msra.mxu0 %v13681_v5  ;;  %10076 = vmatpush1.bf16.msra.mxu1 %v13684_v17  ;;  %v13777_v5 = vld [vmem:[%s14249_s29 + $0x252c] ss:$16 sps:$4 sm:$0xff]   ;;  %v13772_v17 = vld [vmem:[%s14249_s29 + $0x2520] ss:$16 sps:$4 sm:$0xff]  }
 0x4a7   : > { %9216 = vmatprep.subr.bf16.mxu0 %v13689_v18  ;;  %10077 = vmatprep.subr.bf16.mxu1 %v13692_v4  ;;  %v13775_v18 = vld [vmem:[%s14249_s29 + $0x2528] ss:$16 sps:$4 sm:$0xff]   ;;  %v13780_v4 = vld [vmem:[%s14249_s29 + $0x2544] ss:$16 sps:$4 sm:$0xff]  }
 0x4aa   : > { %9217 = vmatpush1.bf16.msra.mxu0 %v13687_v21  ;;  %10078 = vmatpush1.bf16.msra.mxu1 %v13690_v22  ;;  %v13783_v21 = vld [vmem:[%s14249_s29 + $0x254c] ss:$16 sps:$4 sm:$0xff]   ;;  %v13778_v22 = vld [vmem:[%s14249_s29 + $0x2540] ss:$16 sps:$4 sm:$0xff]  }
 0x4ab   : > { %9218 = vmatprep.subr.bf16.mxu0 %v13695_v24  ;;  %10079 = vmatprep.subr.bf16.mxu1 %v13698_v25  ;;  %v13781_v24 = vld [vmem:[%s14249_s29 + $0x2548] ss:$16 sps:$4 sm:$0xff]   ;;  %v13786_v25 = vld [vmem:[%s14249_s29 + $0x2564] ss:$16 sps:$4 sm:$0xff]  }
 0x4ae   : > { %9219 = vmatpush1.bf16.msra.mxu0 %v13693_v8  ;;  %10080 = vmatpush1.bf16.msra.mxu1 %v13696_v27  ;;  %v13789_v8 = vld [vmem:[%s14249_s29 + $0x256c] ss:$16 sps:$4 sm:$0xff]   ;;  %v13784_v27 = vld [vmem:[%s14249_s29 + $0x2560] ss:$16 sps:$4 sm:$0xff]  }
 0x4af   : > { %9220 = vmatprep.subr.bf16.mxu0 %v13701_v16  ;;  %10081 = vmatprep.subr.bf16.mxu1 %v13704_v29  ;;  %v13787_v16 = vld [vmem:[%s14249_s29 + $0x2568] ss:$16 sps:$4 sm:$0xff]   ;;  %v13792_v29 = vld [vmem:[%s14249_s29 + $0x2584] ss:$16 sps:$4 sm:$0xff]  }
 0x4b2   : > { %9221 = vmatpush1.bf16.msra.mxu0 %v13699_v31  ;;  %10082 = vmatpush1.bf16.msra.mxu1 %v13702_v15  ;;  %v13795_v31 = vld [vmem:[%s14249_s29 + $0x258c] ss:$16 sps:$4 sm:$0xff]   ;;  %v13790_v15 = vld [vmem:[%s14249_s29 + $0x2580] ss:$16 sps:$4 sm:$0xff]  }
 0x4b3   : > { %9222 = vmatprep.subr.bf16.mxu0 %v13707_v33  ;;  %10083 = vmatprep.subr.bf16.mxu1 %v13710_v34  ;;  %v13793_v33 = vld [vmem:[%s14249_s29 + $0x2588] ss:$16 sps:$4 sm:$0xff]   ;;  %v13798_v34 = vld [vmem:[%s14249_s29 + $0x25a4] ss:$16 sps:$4 sm:$0xff]  }
 0x4b6   : > { %9223 = vmatpush1.bf16.msra.mxu0 %v13705_v23  ;;  %10084 = vmatpush1.bf16.msra.mxu1 %v13708_v35  ;;  %v13801_v23 = vld [vmem:[%s14249_s29 + $0x25ac] ss:$16 sps:$4 sm:$0xff]   ;;  %v13796_v35 = vld [vmem:[%s14249_s29 + $0x25a0] ss:$16 sps:$4 sm:$0xff]  }
 0x4b7   : > { %9224 = vmatprep.subr.bf16.mxu0 %v13713_v19  ;;  %10085 = vmatprep.subr.bf16.mxu1 %v13716_v20  ;;  %v13799_v19 = vld [vmem:[%s14249_s29 + $0x25a8] ss:$16 sps:$4 sm:$0xff]   ;;  %v13804_v20 = vld [vmem:[%s14249_s29 + $0x25c4] ss:$16 sps:$4 sm:$0xff]  }
 0x4ba   : > { %9225 = vmatpush1.bf16.msra.mxu0 %v13711_v13  ;;  %10086 = vmatpush1.bf16.msra.mxu1 %v13714_v26  ;;  %v13807_v13 = vld [vmem:[%s14249_s29 + $0x25cc] ss:$16 sps:$4 sm:$0xff]   ;;  %v13802_v26 = vld [vmem:[%s14249_s29 + $0x25c0] ss:$16 sps:$4 sm:$0xff]  }
 0x4bb   : > { %9235 = vmatprep.subr.bf16.mxu0 %v13720_v41  ;;  %10096 = vmatprep.subr.bf16.mxu1 %v13723_v28  ;;  %v13805_v41 = vld [vmem:[%s14249_s29 + $0x25c8] ss:$16 sps:$4 sm:$0xff]   ;;  %v13810_v28 = vld [vmem:[%s14249_s29 + $0x25e4] ss:$16 sps:$4 sm:$0xff]  }
 0x4bd   : > { %9227 = vmatmul.mubr.bf16.vlgmr.msra.gmra.mrb[0].mxu0 %v15518_v38  ;;  %10088 = vmatmul.mubr.bf16.vlgmr.msra.gmra.mrb[0].mxu1 %v15518_v38  ;;  %v13733_v38 = vld [vmem:[%s14249_s29 + $0x2448] ss:$16 sps:$4 sm:$0xff]  }
 0x4be   : > { %9236 = vmatpush1.bf16.msra.mxu0 %v13718_v43  ;;  %10097 = vmatpush1.bf16.msra.mxu1 %v13721_v45  ;;  %v13813_v43 = vld [vmem:[%s14249_s29 + $0x25ec] ss:$16 sps:$4 sm:$0xff]   ;;  %v1710_v45 = vcombine.high %v15585_v39, %v15585_v39  ;;  %v13817_v39 = vld [vmem:[%s14249_s29 + $0x2608] ss:$16 sps:$4 sm:$0xff]  }
 0x4bf   : > { %9237 = vmatprep.subr.bf16.mxu0 %v13726_v30  ;;  %10098 = vmatprep.subr.bf16.mxu1 %v13729_v46  ;;  %v13808_v30 = vld [vmem:[%s14249_s29 + $0x25e0] ss:$16 sps:$4 sm:$0xff]   ;;  %v13811_v46 = vld [vmem:[%s14249_s29 + $0x25e8] ss:$16 sps:$4 sm:$0xff]  }
 0x4c0   : > { %9267 = vmatprep.mubr.bf16.mxu0 %v1725_v32  ;;  %10128 = vmatprep.mubr.bf16.mxu1 %v1725_v32  ;;  %v13816_v32 = vld [vmem:[%s14249_s29 + $0x2604] ss:$16 sps:$4 sm:$0xff]  }
 0x4c2   : > { %9238 = vmatpush1.bf16.msra.mxu0 %v13724_v37  ;;  %10099 = vmatpush1.bf16.msra.mxu1 %v13727_v49  ;;  %v13819_v37 = vld [vmem:[%s14249_s29 + $0x260c] ss:$16 sps:$4 sm:$0xff]   ;;  %v15666_v49 = vrot.slane %v1710_v45, %v14309_v50  ;;  %v13820_v50 = vld [vmem:[%s14249_s29 + $0x2620] ss:$16 sps:$4 sm:$0xff]  }
 0x4c3   : > { %9239 = vmatprep.subr.bf16.mxu0 %v13732_v51  ;;  %10100 = vmatprep.subr.bf16.mxu1 %v13735_v36  ;;  %v13814_v51 = vld [vmem:[%s14249_s29 + $0x2600] ss:$16 sps:$4 sm:$0xff]   ;;  %v13822_v36 = vld [vmem:[%s14249_s29 + $0x2624] ss:$16 sps:$4 sm:$0xff]  }
 0x4c4   : > { %v13898_v45 = vld [vmem:[%s14249_s29 + $0x27c0] ss:$16 sps:$4 sm:$0xff]  }
 0x4c6   : > { %9240 = vmatpush1.bf16.msra.mxu0 %v13730_v53  ;;  %10101 = vmatpush1.bf16.msra.mxu1 %v13733_v38  ;;  %v13825_v53 = vld [vmem:[%s14249_s29 + $0x262c] ss:$16 sps:$4 sm:$0xff]   ;;  %v1726_v38 = vcombine.high %v15666_v49, %v15666_v49 }
 0x4c7   : > { %9241 = vmatprep.subr.bf16.mxu0 %v13738_v54  ;;  %10102 = vmatprep.subr.bf16.mxu1 %v13741_v55  ;;  %v13823_v54 = vld [vmem:[%s14249_s29 + $0x2628] ss:$16 sps:$4 sm:$0xff]   ;;  %v13828_v55 = vld [vmem:[%s14249_s29 + $0x2644] ss:$16 sps:$4 sm:$0xff]  }
 0x4ca   : > { %9242 = vmatpush1.bf16.msra.mxu0 %v13736_v56  ;;  %10103 = vmatpush1.bf16.msra.mxu1 %v13739_v40  ;;  %v13831_v56 = vld [vmem:[%s14249_s29 + $0x264c] ss:$16 sps:$4 sm:$0xff]   ;;  %v13826_v40 = vld [vmem:[%s14249_s29 + $0x2640] ss:$16 sps:$4 sm:$0xff]  }
 0x4cb   : > { %9243 = vmatprep.subr.bf16.mxu0 %v13744_v57  ;;  %10104 = vmatprep.subr.bf16.mxu1 %v13747_v48  ;;  %v13834_v57 = vld [vmem:[%s14249_s29 + $0x2664] ss:$16 sps:$4 sm:$0xff]   ;;  %v13837_v48 = vld [vmem:[%s14249_s29 + $0x266c] ss:$16 sps:$4 sm:$0xff]  }
 0x4ce   : > { %9244 = vmatpush1.bf16.msra.mxu0 %v13742_v60  ;;  %10105 = vmatpush1.bf16.msra.mxu1 %v13745_v61  ;;  %v13832_v60 = vld [vmem:[%s14249_s29 + $0x2660] ss:$16 sps:$4 sm:$0xff]   ;;  %v13835_v61 = vld [vmem:[%s14249_s29 + $0x2668] ss:$16 sps:$4 sm:$0xff]  }
 0x4cf   : > { %9245 = vmatprep.subr.bf16.mxu0 %v13750_v47  ;;  %10106 = vmatprep.subr.bf16.mxu1 %v13753_v63  ;;  %v13840_v47 = vld [vmem:[%s14249_s29 + $0x2684] ss:$16 sps:$4 sm:$0xff]   ;;  %v13843_v63 = vld [vmem:[%s14249_s29 + $0x268c] ss:$16 sps:$4 sm:$0xff]  }
 0x4d2   : > { %9246 = vmatpush1.bf16.msra.mxu0 %v13748_v0  ;;  %10107 = vmatpush1.bf16.msra.mxu1 %v13751_v1  ;;  %v13838_v0 = vld [vmem:[%s14249_s29 + $0x2680] ss:$16 sps:$4 sm:$0xff]   ;;  %v13841_v1 = vld [vmem:[%s14249_s29 + $0x2688] ss:$16 sps:$4 sm:$0xff]  }
 0x4d3   : > { %9247 = vmatprep.subr.bf16.mxu0 %v13756_v2  ;;  %10108 = vmatprep.subr.bf16.mxu1 %v13759_v52  ;;  %v13846_v2 = vld [vmem:[%s14249_s29 + $0x26a4] ss:$16 sps:$4 sm:$0xff]   ;;  %v13849_v52 = vld [vmem:[%s14249_s29 + $0x26ac] ss:$16 sps:$4 sm:$0xff]  }
 0x4d6   : > { %9248 = vmatpush1.bf16.msra.mxu0 %v13754_v3  ;;  %10109 = vmatpush1.bf16.msra.mxu1 %v13757_v59  ;;  %v13844_v3 = vld [vmem:[%s14249_s29 + $0x26a0] ss:$16 sps:$4 sm:$0xff]   ;;  %v13847_v59 = vld [vmem:[%s14249_s29 + $0x26a8] ss:$16 sps:$4 sm:$0xff]  }
 0x4d7   : > { %9249 = vmatprep.subr.bf16.mxu0 %v13762_v6  ;;  %10110 = vmatprep.subr.bf16.mxu1 %v13765_v7  ;;  %v13852_v6 = vld [vmem:[%s14249_s29 + $0x26c4] ss:$16 sps:$4 sm:$0xff]   ;;  %v13855_v7 = vld [vmem:[%s14249_s29 + $0x26cc] ss:$16 sps:$4 sm:$0xff]  }
 0x4da   : > { %9250 = vmatpush1.bf16.msra.mxu0 %v13760_v58  ;;  %10111 = vmatpush1.bf16.msra.mxu1 %v13763_v9  ;;  %v13850_v58 = vld [vmem:[%s14249_s29 + $0x26c0] ss:$16 sps:$4 sm:$0xff]   ;;  %v13853_v9 = vld [vmem:[%s14249_s29 + $0x26c8] ss:$16 sps:$4 sm:$0xff]  }
 0x4db   : > { %9251 = vmatprep.subr.bf16.mxu0 %v13768_v10  ;;  %10112 = vmatprep.subr.bf16.mxu1 %v13771_v11  ;;  %v13858_v10 = vld [vmem:[%s14249_s29 + $0x26e4] ss:$16 sps:$4 sm:$0xff]   ;;  %v13861_v11 = vld [vmem:[%s14249_s29 + $0x26ec] ss:$16 sps:$4 sm:$0xff]  }
 0x4de   : > { %9252 = vmatpush1.bf16.msra.mxu0 %v13766_v12  ;;  %10113 = vmatpush1.bf16.msra.mxu1 %v13769_v62  ;;  %v13856_v12 = vld [vmem:[%s14249_s29 + $0x26e0] ss:$16 sps:$4 sm:$0xff]   ;;  %v13859_v62 = vld [vmem:[%s14249_s29 + $0x26e8] ss:$16 sps:$4 sm:$0xff]  }
 0x4df   : > { %9253 = vmatprep.subr.bf16.mxu0 %v13774_v14  ;;  %10114 = vmatprep.subr.bf16.mxu1 %v13777_v5  ;;  %v13864_v14 = vld [vmem:[%s14249_s29 + $0x2704] ss:$16 sps:$4 sm:$0xff]   ;;  %v13867_v5 = vld [vmem:[%s14249_s29 + $0x270c] ss:$16 sps:$4 sm:$0xff]  }
 0x4e2   : > { %9254 = vmatpush1.bf16.msra.mxu0 %v13772_v17  ;;  %10115 = vmatpush1.bf16.msra.mxu1 %v13775_v18  ;;  %v13862_v17 = vld [vmem:[%s14249_s29 + $0x2700] ss:$16 sps:$4 sm:$0xff]   ;;  %v13865_v18 = vld [vmem:[%s14249_s29 + $0x2708] ss:$16 sps:$4 sm:$0xff]  }
 0x4e3   : > { %9255 = vmatprep.subr.bf16.mxu0 %v13780_v4  ;;  %10116 = vmatprep.subr.bf16.mxu1 %v13783_v21  ;;  %v13870_v4 = vld [vmem:[%s14249_s29 + $0x2724] ss:$16 sps:$4 sm:$0xff]   ;;  %v13873_v21 = vld [vmem:[%s14249_s29 + $0x272c] ss:$16 sps:$4 sm:$0xff]  }
 0x4e6   : > { %9256 = vmatpush1.bf16.msra.mxu0 %v13778_v22  ;;  %10117 = vmatpush1.bf16.msra.mxu1 %v13781_v24  ;;  %v13868_v22 = vld [vmem:[%s14249_s29 + $0x2720] ss:$16 sps:$4 sm:$0xff]   ;;  %v13871_v24 = vld [vmem:[%s14249_s29 + $0x2728] ss:$16 sps:$4 sm:$0xff]  }
 0x4e7   : > { %9257 = vmatprep.subr.bf16.mxu0 %v13786_v25  ;;  %10118 = vmatprep.subr.bf16.mxu1 %v13789_v8  ;;  %v13876_v25 = vld [vmem:[%s14249_s29 + $0x2744] ss:$16 sps:$4 sm:$0xff]   ;;  %v13879_v8 = vld [vmem:[%s14249_s29 + $0x274c] ss:$16 sps:$4 sm:$0xff]  }
 0x4ea   : > { %9258 = vmatpush1.bf16.msra.mxu0 %v13784_v27  ;;  %10119 = vmatpush1.bf16.msra.mxu1 %v13787_v16  ;;  %v13874_v27 = vld [vmem:[%s14249_s29 + $0x2740] ss:$16 sps:$4 sm:$0xff]   ;;  %v13877_v16 = vld [vmem:[%s14249_s29 + $0x2748] ss:$16 sps:$4 sm:$0xff]  }
 0x4eb   : > { %9259 = vmatprep.subr.bf16.mxu0 %v13792_v29  ;;  %10120 = vmatprep.subr.bf16.mxu1 %v13795_v31  ;;  %v13882_v29 = vld [vmem:[%s14249_s29 + $0x2764] ss:$16 sps:$4 sm:$0xff]   ;;  %v13885_v31 = vld [vmem:[%s14249_s29 + $0x276c] ss:$16 sps:$4 sm:$0xff]  }
 0x4ee   : > { %9260 = vmatpush1.bf16.msra.mxu0 %v13790_v15  ;;  %10121 = vmatpush1.bf16.msra.mxu1 %v13793_v33  ;;  %v13880_v15 = vld [vmem:[%s14249_s29 + $0x2760] ss:$16 sps:$4 sm:$0xff]   ;;  %v13883_v33 = vld [vmem:[%s14249_s29 + $0x2768] ss:$16 sps:$4 sm:$0xff]  }
 0x4ef   : > { %9261 = vmatprep.subr.bf16.mxu0 %v13798_v34  ;;  %10122 = vmatprep.subr.bf16.mxu1 %v13801_v23  ;;  %v13888_v34 = vld [vmem:[%s14249_s29 + $0x2784] ss:$16 sps:$4 sm:$0xff]   ;;  %v13891_v23 = vld [vmem:[%s14249_s29 + $0x278c] ss:$16 sps:$4 sm:$0xff]  }
 0x4f2   : > { %9262 = vmatpush1.bf16.msra.mxu0 %v13796_v35  ;;  %10123 = vmatpush1.bf16.msra.mxu1 %v13799_v19  ;;  %v13886_v35 = vld [vmem:[%s14249_s29 + $0x2780] ss:$16 sps:$4 sm:$0xff]   ;;  %v13889_v19 = vld [vmem:[%s14249_s29 + $0x2788] ss:$16 sps:$4 sm:$0xff]  }
 0x4f3   : > { %9263 = vmatprep.subr.bf16.mxu0 %v13804_v20  ;;  %10124 = vmatprep.subr.bf16.mxu1 %v13807_v13  ;;  %v13894_v20 = vld [vmem:[%s14249_s29 + $0x27a4] ss:$16 sps:$4 sm:$0xff]   ;;  %v13897_v13 = vld [vmem:[%s14249_s29 + $0x27ac] ss:$16 sps:$4 sm:$0xff]  }
 0x4f6   : > { %9264 = vmatpush1.bf16.msra.mxu0 %v13802_v26  ;;  %10125 = vmatpush1.bf16.msra.mxu1 %v13805_v41  ;;  %v13892_v26 = vld [vmem:[%s14249_s29 + $0x27a0] ss:$16 sps:$4 sm:$0xff]   ;;  %v13895_v41 = vld [vmem:[%s14249_s29 + $0x27a8] ss:$16 sps:$4 sm:$0xff]  }
 0x4f7   : > { %9265 = vmatprep.subr.bf16.mxu0 %v13810_v28  ;;  %10126 = vmatprep.subr.bf16.mxu1 %v13813_v43  ;;  %v13900_v28 = vld [vmem:[%s14249_s29 + $0x27c4] ss:$16 sps:$4 sm:$0xff]   ;;  %v13903_v43 = vld [vmem:[%s14249_s29 + $0x27cc] ss:$16 sps:$4 sm:$0xff]  }
 0x4fa   : > { %9266 = vmatpush1.bf16.msra.mxu0 %v13808_v30  ;;  %10127 = vmatpush1.bf16.msra.mxu1 %v13811_v46  ;;  %v13901_v30 = vld [vmem:[%s14249_s29 + $0x27c8] ss:$16 sps:$4 sm:$0xff]   ;;  %v13906_v46 = vld [vmem:[%s14249_s29 + $0x27e4] ss:$16 sps:$4 sm:$0xff]  }
 0x4fb   : > { %9276 = vmatprep.subr.bf16.mxu0 %v13816_v32  ;;  %10137 = vmatprep.subr.bf16.mxu1 %v13819_v37  ;;  %v13909_v32 = vld [vmem:[%s14249_s29 + $0x27ec] ss:$16 sps:$4 sm:$0xff]   ;;  %v13904_v37 = vld [vmem:[%s14249_s29 + $0x27e0] ss:$16 sps:$4 sm:$0xff]  }
 0x4fd   : > { %9268 = vmatmul.mubr.bf16.vlgmr.msra.gmra.mrb[0].mxu0 %v15593_v42  ;;  %10129 = vmatmul.mubr.bf16.vlgmr.msra.gmra.mrb[0].mxu1 %v15593_v42  ;;  %v13829_v42 = vld [vmem:[%s14249_s29 + $0x2648] ss:$16 sps:$4 sm:$0xff]  }
 0x4fe   : > { %9277 = vmatpush1.bf16.msra.mxu0 %v13814_v51  ;;  %10138 = vmatpush1.bf16.msra.mxu1 %v13817_v39  ;;  %v13907_v51 = vld [vmem:[%s14249_s29 + $0x27e8] ss:$16 sps:$4 sm:$0xff]   ;;  %v13913_v39 = vld [vmem:[%s14249_s29 + $0x2804] ss:$16 sps:$4 sm:$0xff]  }
 0x4ff   : > { %9278 = vmatprep.subr.bf16.mxu0 %v13822_v36  ;;  %10139 = vmatprep.subr.bf16.mxu1 %v13825_v53  ;;  %v13916_v36 = vld [vmem:[%s14249_s29 + $0x280c] ss:$16 sps:$4 sm:$0xff]   ;;  %v15737_v53 = vld.sshfl [vmem:[%s14306_s4 + $0x50] sm:$0x33 pattern:$0x76325410] }
 0x500   : > { %9308 = vmatprep.mubr.bf16.mxu0 %v1726_v38  ;;  %10169 = vmatprep.mubr.bf16.mxu1 %v1726_v38  ;;  %v13911_v38 = vld [vmem:[%s14249_s29 + $0x2800] ss:$16 sps:$4 sm:$0xff]  }
 0x502   : > { %9279 = vmatpush1.bf16.msra.mxu0 %v13820_v50  ;;  %10140 = vmatpush1.bf16.msra.mxu1 %v13823_v54  ;;  %v13914_v50 = vld [vmem:[%s14249_s29 + $0x2808] ss:$16 sps:$4 sm:$0xff]   ;;  %v13919_v54 = vld [vmem:[%s14249_s29 + $0x2824] ss:$16 sps:$4 sm:$0xff]  }
 0x503   : > { %9280 = vmatprep.subr.bf16.mxu0 %v13828_v55  ;;  %10141 = vmatprep.subr.bf16.mxu1 %v13831_v56  ;;  %v13922_v55 = vld [vmem:[%s14249_s29 + $0x282c] ss:$16 sps:$4 sm:$0xff]   ;;  %v1734_v56 = vcombine.high %v15737_v53, %v15737_v53 }
 0x506   : > { %9281 = vmatpush1.bf16.msra.mxu0 %v13826_v40  ;;  %10142 = vmatpush1.bf16.msra.mxu1 %v13829_v42  ;;  %v13917_v40 = vld [vmem:[%s14249_s29 + $0x2820] ss:$16 sps:$4 sm:$0xff]   ;;  %v13920_v42 = vld [vmem:[%s14249_s29 + $0x2828] ss:$16 sps:$4 sm:$0xff]  }
 0x507   : > { %9282 = vmatprep.subr.bf16.mxu0 %v13834_v57  ;;  %10143 = vmatprep.subr.bf16.mxu1 %v13837_v48  ;;  %v13925_v57 = vld [vmem:[%s14249_s29 + $0x2844] ss:$16 sps:$4 sm:$0xff]   ;;  %v13928_v48 = vld [vmem:[%s14249_s29 + $0x284c] ss:$16 sps:$4 sm:$0xff]  }
 0x50a   : > { %9283 = vmatpush1.bf16.msra.mxu0 %v13832_v60  ;;  %10144 = vmatpush1.bf16.msra.mxu1 %v13835_v61  ;;  %v13923_v60 = vld [vmem:[%s14249_s29 + $0x2840] ss:$16 sps:$4 sm:$0xff]   ;;  %v13931_v61 = vld [vmem:[%s14249_s29 + $0x2864] ss:$16 sps:$4 sm:$0xff]  }
 0x50b   : > { %9284 = vmatprep.subr.bf16.mxu0 %v13840_v47  ;;  %10145 = vmatprep.subr.bf16.mxu1 %v13843_v63  ;;  %v13934_v47 = vld [vmem:[%s14249_s29 + $0x286c] ss:$16 sps:$4 sm:$0xff]   ;;  %v13929_v63 = vld [vmem:[%s14249_s29 + $0x2860] ss:$16 sps:$4 sm:$0xff]  }
 0x50e   : > { %9285 = vmatpush1.bf16.msra.mxu0 %v13838_v0  ;;  %10146 = vmatpush1.bf16.msra.mxu1 %v13841_v1  ;;  %v13932_v0 = vld [vmem:[%s14249_s29 + $0x2868] ss:$16 sps:$4 sm:$0xff]   ;;  %v13937_v1 = vld [vmem:[%s14249_s29 + $0x2884] ss:$16 sps:$4 sm:$0xff]  }
 0x50f   : > { %9286 = vmatprep.subr.bf16.mxu0 %v13846_v2  ;;  %10147 = vmatprep.subr.bf16.mxu1 %v13849_v52  ;;  %v13940_v2 = vld [vmem:[%s14249_s29 + $0x288c] ss:$16 sps:$4 sm:$0xff]   ;;  %v13935_v52 = vld [vmem:[%s14249_s29 + $0x2880] ss:$16 sps:$4 sm:$0xff]  }
 0x512   : > { %9287 = vmatpush1.bf16.msra.mxu0 %v13844_v3  ;;  %10148 = vmatpush1.bf16.msra.mxu1 %v13847_v59  ;;  %v13938_v3 = vld [vmem:[%s14249_s29 + $0x2888] ss:$16 sps:$4 sm:$0xff]   ;;  %v13943_v59 = vld [vmem:[%s14249_s29 + $0x28a4] ss:$16 sps:$4 sm:$0xff]  }
 0x513   : > { %9288 = vmatprep.subr.bf16.mxu0 %v13852_v6  ;;  %10149 = vmatprep.subr.bf16.mxu1 %v13855_v7  ;;  %v13946_v6 = vld [vmem:[%s14249_s29 + $0x28ac] ss:$16 sps:$4 sm:$0xff]   ;;  %v13941_v7 = vld [vmem:[%s14249_s29 + $0x28a0] ss:$16 sps:$4 sm:$0xff]  }
 0x516   : > { %9289 = vmatpush1.bf16.msra.mxu0 %v13850_v58  ;;  %10150 = vmatpush1.bf16.msra.mxu1 %v13853_v9  ;;  %v13944_v58 = vld [vmem:[%s14249_s29 + $0x28a8] ss:$16 sps:$4 sm:$0xff]   ;;  %v13949_v9 = vld [vmem:[%s14249_s29 + $0x28c4] ss:$16 sps:$4 sm:$0xff]  }
 0x517   : > { %9290 = vmatprep.subr.bf16.mxu0 %v13858_v10  ;;  %10151 = vmatprep.subr.bf16.mxu1 %v13861_v11  ;;  %v13952_v10 = vld [vmem:[%s14249_s29 + $0x28cc] ss:$16 sps:$4 sm:$0xff]   ;;  %v13947_v11 = vld [vmem:[%s14249_s29 + $0x28c0] ss:$16 sps:$4 sm:$0xff]  }
 0x51a   : > { %9291 = vmatpush1.bf16.msra.mxu0 %v13856_v12  ;;  %10152 = vmatpush1.bf16.msra.mxu1 %v13859_v62  ;;  %v13950_v12 = vld [vmem:[%s14249_s29 + $0x28c8] ss:$16 sps:$4 sm:$0xff]   ;;  %v13955_v62 = vld [vmem:[%s14249_s29 + $0x28e4] ss:$16 sps:$4 sm:$0xff]  }
 0x51b   : > { %9292 = vmatprep.subr.bf16.mxu0 %v13864_v14  ;;  %10153 = vmatprep.subr.bf16.mxu1 %v13867_v5  ;;  %v13958_v14 = vld [vmem:[%s14249_s29 + $0x28ec] ss:$16 sps:$4 sm:$0xff]   ;;  %v13953_v5 = vld [vmem:[%s14249_s29 + $0x28e0] ss:$16 sps:$4 sm:$0xff]  }
 0x51e   : > { %9293 = vmatpush1.bf16.msra.mxu0 %v13862_v17  ;;  %10154 = vmatpush1.bf16.msra.mxu1 %v13865_v18  ;;  %v13956_v17 = vld [vmem:[%s14249_s29 + $0x28e8] ss:$16 sps:$4 sm:$0xff]   ;;  %v13961_v18 = vld [vmem:[%s14249_s29 + $0x2904] ss:$16 sps:$4 sm:$0xff]  }
 0x51f   : > { %9294 = vmatprep.subr.bf16.mxu0 %v13870_v4  ;;  %10155 = vmatprep.subr.bf16.mxu1 %v13873_v21  ;;  %v13964_v4 = vld [vmem:[%s14249_s29 + $0x290c] ss:$16 sps:$4 sm:$0xff]   ;;  %v13959_v21 = vld [vmem:[%s14249_s29 + $0x2900] ss:$16 sps:$4 sm:$0xff]  }
 0x522   : > { %9295 = vmatpush1.bf16.msra.mxu0 %v13868_v22  ;;  %10156 = vmatpush1.bf16.msra.mxu1 %v13871_v24  ;;  %v13962_v22 = vld [vmem:[%s14249_s29 + $0x2908] ss:$16 sps:$4 sm:$0xff]   ;;  %v13967_v24 = vld [vmem:[%s14249_s29 + $0x2924] ss:$16 sps:$4 sm:$0xff]  }
 0x523   : > { %9296 = vmatprep.subr.bf16.mxu0 %v13876_v25  ;;  %10157 = vmatprep.subr.bf16.mxu1 %v13879_v8  ;;  %v13970_v25 = vld [vmem:[%s14249_s29 + $0x292c] ss:$16 sps:$4 sm:$0xff]   ;;  %v13965_v8 = vld [vmem:[%s14249_s29 + $0x2920] ss:$16 sps:$4 sm:$0xff]  }
 0x526   : > { %9297 = vmatpush1.bf16.msra.mxu0 %v13874_v27  ;;  %10158 = vmatpush1.bf16.msra.mxu1 %v13877_v16  ;;  %v13968_v27 = vld [vmem:[%s14249_s29 + $0x2928] ss:$16 sps:$4 sm:$0xff]   ;;  %v13973_v16 = vld [vmem:[%s14249_s29 + $0x2944] ss:$16 sps:$4 sm:$0xff]  }
 0x527   : > { %9298 = vmatprep.subr.bf16.mxu0 %v13882_v29  ;;  %10159 = vmatprep.subr.bf16.mxu1 %v13885_v31  ;;  %v13976_v29 = vld [vmem:[%s14249_s29 + $0x294c] ss:$16 sps:$4 sm:$0xff]   ;;  %v13971_v31 = vld [vmem:[%s14249_s29 + $0x2940] ss:$16 sps:$4 sm:$0xff]  }
 0x52a   : > { %9299 = vmatpush1.bf16.msra.mxu0 %v13880_v15  ;;  %10160 = vmatpush1.bf16.msra.mxu1 %v13883_v33  ;;  %v13974_v15 = vld [vmem:[%s14249_s29 + $0x2948] ss:$16 sps:$4 sm:$0xff]   ;;  %v13979_v33 = vld [vmem:[%s14249_s29 + $0x2964] ss:$16 sps:$4 sm:$0xff]  }
 0x52b   : > { %9300 = vmatprep.subr.bf16.mxu0 %v13888_v34  ;;  %10161 = vmatprep.subr.bf16.mxu1 %v13891_v23  ;;  %v13982_v34 = vld [vmem:[%s14249_s29 + $0x296c] ss:$16 sps:$4 sm:$0xff]   ;;  %v13977_v23 = vld [vmem:[%s14249_s29 + $0x2960] ss:$16 sps:$4 sm:$0xff]  }
 0x52e   : > { %9301 = vmatpush1.bf16.msra.mxu0 %v13886_v35  ;;  %10162 = vmatpush1.bf16.msra.mxu1 %v13889_v19  ;;  %v13980_v35 = vld [vmem:[%s14249_s29 + $0x2968] ss:$16 sps:$4 sm:$0xff]   ;;  %v13985_v19 = vld [vmem:[%s14249_s29 + $0x2984] ss:$16 sps:$4 sm:$0xff]  }
 0x52f   : > { %9302 = vmatprep.subr.bf16.mxu0 %v13894_v20  ;;  %10163 = vmatprep.subr.bf16.mxu1 %v13897_v13  ;;  %v13988_v20 = vld [vmem:[%s14249_s29 + $0x298c] ss:$16 sps:$4 sm:$0xff]   ;;  %v13983_v13 = vld [vmem:[%s14249_s29 + $0x2980] ss:$16 sps:$4 sm:$0xff]  }
 0x532   : > { %9303 = vmatpush1.bf16.msra.mxu0 %v13892_v26  ;;  %10164 = vmatpush1.bf16.msra.mxu1 %v13895_v41  ;;  %v13986_v26 = vld [vmem:[%s14249_s29 + $0x2988] ss:$16 sps:$4 sm:$0xff]   ;;  %v13991_v41 = vld [vmem:[%s14249_s29 + $0x29a4] ss:$16 sps:$4 sm:$0xff]  }
 0x533   : > { %9304 = vmatprep.subr.bf16.mxu0 %v13900_v28  ;;  %10165 = vmatprep.subr.bf16.mxu1 %v13903_v43  ;;  %v13994_v28 = vld [vmem:[%s14249_s29 + $0x29ac] ss:$16 sps:$4 sm:$0xff]   ;;  %v13989_v43 = vld [vmem:[%s14249_s29 + $0x29a0] ss:$16 sps:$4 sm:$0xff]  }
 0x536   : > { %9305 = vmatpush1.bf16.msra.mxu0 %v13898_v45  ;;  %10166 = vmatpush1.bf16.msra.mxu1 %v13901_v30  ;;  %v13992_v45 = vld [vmem:[%s14249_s29 + $0x29a8] ss:$16 sps:$4 sm:$0xff]   ;;  %v13997_v30 = vld [vmem:[%s14249_s29 + $0x29c4] ss:$16 sps:$4 sm:$0xff]  }
 0x537   : > { %9306 = vmatprep.subr.bf16.mxu0 %v13906_v46  ;;  %10167 = vmatprep.subr.bf16.mxu1 %v13909_v32  ;;  %v14000_v46 = vld [vmem:[%s14249_s29 + $0x29cc] ss:$16 sps:$4 sm:$0xff]   ;;  %v13995_v32 = vld [vmem:[%s14249_s29 + $0x29c0] ss:$16 sps:$4 sm:$0xff]  }
 0x53a   : > { %9307 = vmatpush1.bf16.msra.mxu0 %v13904_v37  ;;  %10168 = vmatpush1.bf16.msra.mxu1 %v13907_v51  ;;  %v13998_v37 = vld [vmem:[%s14249_s29 + $0x29c8] ss:$16 sps:$4 sm:$0xff]   ;;  %v14003_v51 = vld [vmem:[%s14249_s29 + $0x29e4] ss:$16 sps:$4 sm:$0xff]  }
 0x53b   : > { %9317 = vmatprep.subr.bf16.mxu0 %v13913_v39  ;;  %10178 = vmatprep.subr.bf16.mxu1 %v13916_v36  ;;  %v14006_v39 = vld [vmem:[%s14249_s29 + $0x29ec] ss:$16 sps:$4 sm:$0xff]   ;;  %v14001_v36 = vld [vmem:[%s14249_s29 + $0x29e0] ss:$16 sps:$4 sm:$0xff]  }
 0x53d   : > { %9309 = vmatmul.mubr.bf16.vlgmr.msra.gmra.mrb[0].mxu0 %v15666_v49  ;;  %10170 = vmatmul.mubr.bf16.vlgmr.msra.gmra.mrb[0].mxu1 %v15666_v49  ;;  %v13926_v49 = vld [vmem:[%s14249_s29 + $0x2848] ss:$16 sps:$4 sm:$0xff]  }
 0x53e   : > { %9318 = vmatpush1.bf16.msra.mxu0 %v13911_v38  ;;  %10179 = vmatpush1.bf16.msra.mxu1 %v13914_v50  ;;  %v14004_v38 = vld [vmem:[%s14249_s29 + $0x29e8] ss:$16 sps:$4 sm:$0xff]  }
 0x53f   : > { %9319 = vmatprep.subr.bf16.mxu0 %v13919_v54  ;;  %10180 = vmatprep.subr.bf16.mxu1 %v13922_v55  ;;  %v200_v55 = vld [vmem:[#allocation2] sm:$0xff] }
 0x540   : > { %9349 = vmatprep.mubr.bf16.mxu0 %v1734_v56  ;;  %10210 = vmatprep.mubr.bf16.mxu1 %v1734_v56 }
 0x542   : > { %9320 = vmatpush1.bf16.msra.mxu0 %v13917_v40  ;;  %10181 = vmatpush1.bf16.msra.mxu1 %v13920_v42  ;;  %v201_v40 = vld [vmem:[#allocation2 + $0x8] sm:$0xff] }
 0x543   : > { %9321 = vmatprep.subr.bf16.mxu0 %v13925_v57  ;;  %10182 = vmatprep.subr.bf16.mxu1 %v13928_v48 }
 0x546   : > { %9322 = vmatpush1.bf16.msra.mxu0 %v13923_v60  ;;  %10183 = vmatpush1.bf16.msra.mxu1 %v13926_v49 }
 0x547   : > { %9323 = vmatprep.subr.bf16.mxu0 %v13931_v61  ;;  %10184 = vmatprep.subr.bf16.mxu1 %v13934_v47 }
 0x54a   : > { %9324 = vmatpush1.bf16.msra.mxu0 %v13929_v63  ;;  %10185 = vmatpush1.bf16.msra.mxu1 %v13932_v0 }
 0x54b   : > { %9325 = vmatprep.subr.bf16.mxu0 %v13937_v1  ;;  %10186 = vmatprep.subr.bf16.mxu1 %v13940_v2 }
 0x54e   : > { %9326 = vmatpush1.bf16.msra.mxu0 %v13935_v52  ;;  %10187 = vmatpush1.bf16.msra.mxu1 %v13938_v3 }
 0x54f   : > { %9327 = vmatprep.subr.bf16.mxu0 %v13943_v59  ;;  %10188 = vmatprep.subr.bf16.mxu1 %v13946_v6 }
 0x552   : > { %9328 = vmatpush1.bf16.msra.mxu0 %v13941_v7  ;;  %10189 = vmatpush1.bf16.msra.mxu1 %v13944_v58 }
 0x553   : > { %9329 = vmatprep.subr.bf16.mxu0 %v13949_v9  ;;  %10190 = vmatprep.subr.bf16.mxu1 %v13952_v10 }
 0x556   : > { %9330 = vmatpush1.bf16.msra.mxu0 %v13947_v11  ;;  %10191 = vmatpush1.bf16.msra.mxu1 %v13950_v12 }
 0x557   : > { %9331 = vmatprep.subr.bf16.mxu0 %v13955_v62  ;;  %10192 = vmatprep.subr.bf16.mxu1 %v13958_v14 }
 0x55a   : > { %9332 = vmatpush1.bf16.msra.mxu0 %v13953_v5  ;;  %10193 = vmatpush1.bf16.msra.mxu1 %v13956_v17  ;;  %v14140_v5 = vmov (!%p11749_p7), 839922192  }
 0x55b   : > { %9333 = vmatprep.subr.bf16.mxu0 %v13961_v18  ;;  %10194 = vmatprep.subr.bf16.mxu1 %v13964_v4  ;;  %v10259_v17 = vunpack.c.l.s4 (!%p11749_p7), %v14140_v5 }
 0x55d   : > { %v10260_v18 = vunpack.c.0.s8 (!%p11749_p7), %v10259_v17 }
 0x55e   : > { %9334 = vmatpush1.bf16.msra.mxu0 %v13959_v21  ;;  %10195 = vmatpush1.bf16.msra.mxu1 %v13962_v22 }
 0x55f   : > { %9335 = vmatprep.subr.bf16.mxu0 %v13967_v24  ;;  %10196 = vmatprep.subr.bf16.mxu1 %v13970_v25  ;;  %v10263_v4 = vsub.s32 (!%p11749_p7), %v10260_v18, %v14296_v44 }
 0x562   : > { %9336 = vmatpush1.bf16.msra.mxu0 %v13965_v8  ;;  %10197 = vmatpush1.bf16.msra.mxu1 %v13968_v27 }
 0x563   : > { %9337 = vmatprep.subr.bf16.mxu0 %v13973_v16  ;;  %10198 = vmatprep.subr.bf16.mxu1 %v13976_v29 }
 0x566   : > { %9338 = vmatpush1.bf16.msra.mxu0 %v13971_v31  ;;  %10199 = vmatpush1.bf16.msra.mxu1 %v13974_v15 }
 0x567   : > { %9339 = vmatprep.subr.bf16.mxu0 %v13979_v33  ;;  %10200 = vmatprep.subr.bf16.mxu1 %v13982_v34 }
 0x56a   : > { %9340 = vmatpush1.bf16.msra.mxu0 %v13977_v23  ;;  %10201 = vmatpush1.bf16.msra.mxu1 %v13980_v35 }
 0x56b   : > { %9341 = vmatprep.subr.bf16.mxu0 %v13985_v19  ;;  %10202 = vmatprep.subr.bf16.mxu1 %v13988_v20 }
 0x56e   : > { %9342 = vmatpush1.bf16.msra.mxu0 %v13983_v13  ;;  %10203 = vmatpush1.bf16.msra.mxu1 %v13986_v26 }
 0x56f   : > { %9343 = vmatprep.subr.bf16.mxu0 %v13991_v41  ;;  %10204 = vmatprep.subr.bf16.mxu1 %v13994_v28 }
 0x572   : > { %9344 = vmatpush1.bf16.msra.mxu0 %v13989_v43  ;;  %10205 = vmatpush1.bf16.msra.mxu1 %v13992_v45 }
 0x573   : > { %9345 = vmatprep.subr.bf16.mxu0 %v13997_v30  ;;  %10206 = vmatprep.subr.bf16.mxu1 %v14000_v46 }
 0x576   : > { %9346 = vmatpush1.bf16.msra.mxu0 %v13995_v32  ;;  %10207 = vmatpush1.bf16.msra.mxu1 %v13998_v37 }
 0x577   : > { %9347 = vmatprep.subr.bf16.mxu0 %v14003_v51  ;;  %10208 = vmatprep.subr.bf16.mxu1 %v14006_v39 }
 0x57a   : > { %9348 = vmatpush1.bf16.msra.mxu0 %v14001_v36  ;;  %10209 = vmatpush1.bf16.msra.mxu1 %v14004_v38 }
 0x57d   : > { %9350 = vmatmul.mubr.bf16.vlgmr.msra.gmra.mrb[0].mxu0 %v15737_v53  ;;  %10211 = vmatmul.mubr.bf16.vlgmr.msra.gmra.mrb[0].mxu1 %v15737_v53 }
 0x650   : > { %v9351_v50 = vpop.f32.mrb[0].mxu0  ;;  %v10212_v54 = vpop.f32.mrb[0].mxu1  ;;  %10234 = sbr.rel (%p11749_p7) target bundleno = 1975 (0x7b7), region = 40 }
 0x651   : > { %v9353_v56 = vpop.f32.mrb[1].mxu0  ;;  %v10214_v42 = vpop.f32.mrb[1].mxu1 }
 0x652   : > { %v10223_v57 = vcombine.low %v9351_v50, %v9353_v56  ;;  %v10224_v48 = vcombine.low %v10212_v54, %v10214_v42  ;;  %v9355_v60 = vpop.f32.mrb[2].mxu0  ;;  %v10216_v49 = vpop.f32.mrb[2].mxu1 }
 0x653   : > { %v9356_v61 = vpop.f32.mrb[3].mxu0  ;;  %v10217_v47 = vpop.f32.mrb[3].mxu1 }
 0x654   : > { %v10227_v63 = vadd.f32 %v10223_v57, %v200_v55  ;;  %v10228_v0 = vadd.f32 %v10224_v48, %v201_v40 }
 0x656   : > { %10229 = vst [vmem:[#allocation2] sm:$0xff] %v10227_v63  ;;  %10230 = vst [vmem:[#allocation2 + $0x8] sm:$0xff] %v10228_v0 }
 0x65d   : > { %v10235_v53 = vld [vmem:[#allocation2] sm:$0xff]  ;;  %v10236_v1 = vld [vmem:[#allocation2 + $0x8] sm:$0xff] }
 0x65e   : > { %v10237_v2 = vmul.f32 %v10235_v53, %v10235_v53  ;;  %v10238_v52 = vmul.f32 %v10236_v1, %v10236_v1 }
 0x660   : > { %v10241_v3 = vcombine.high %v10237_v2, %v10237_v2  ;;  %v10242_v59 = vcombine.high %v10238_v52, %v10238_v52  ;;  %v10246_v6 = vsel %vm10245_vm0, %v10237_v2, 0.0  ;;  %v10249_v58 = vsel %vm10245_vm0, %v10238_v52, 0.0 }
 0x662   : > { %v10247_v7 = vsel %vm10245_vm0, %v10241_v3, 0.0  ;;  %v10251_v10 = vsel %vm10245_vm0, %v10242_v59, 0.0 }
 0x663   : > { %v10248_v9 = vadd.f32 %v10247_v7, %v10246_v6 }
 0x665   : > { %v10250_v11 = vadd.f32 %v10249_v58, %v10248_v9 }
 0x667   : > { %v10252_v12 = vadd.f32 %v10251_v10, %v10250_v11 }
 0x669   : > { %10253 = vadd.xlane.f32.xlu0 %v10252_v12 }
 0x6f6   : > { %v10254_v62 = vpop.xlane.xlu0 %10253 }
 0x6f7   : > { %v10255_v14 = vmax.f32 %v10254_v62, 1e-12 }
 0x6f9   : > { %14007 = vrsqrt.f32 %v10255_v14 }
 0x703   : > { %v14008_v21 = vpop.eup %14007 }
 0x704   : > { %v10264_v22 = vrot.slane %v14008_v21, %v10263_v4 }
 0x706   : > { %v10266_v24 = vmul.f32 %v10264_v22, %v10235_v53  ;;  %v10267_v25 = vmul.f32 %v10264_v22, %v10236_v1 }
 0x708   : > { %v11750_v8 = vrot.slane %v10266_v24, 10  ;;  %v11751_v27 = vrot.slane %v10267_v25, 10 }
 0x70a   : > { %v10276_v16 = vmul.f32 %v11750_v8, %v10266_v24  ;;  %v10277_v29 = vmul.f32 %v11751_v27, %v10267_v25 }
 0x70c   : > { %v10280_v31 = vcombine.high %v10276_v16, %v10276_v16  ;;  %v10281_v15 = vcombine.high %v10277_v29, %v10277_v29  ;;  %v10285_v33 = vsel %vm10284_vm1, %v10276_v16, 0.0  ;;  %v10288_v35 = vsel %vm10284_vm1, %v10277_v29, 0.0 }
 0x70e   : > { %v10286_v34 = vsel %vm10284_vm1, %v10280_v31, 0.0  ;;  %v10290_v44 = vsel %vm10284_vm1, %v10281_v15, 0.0 }
 0x70f   : > { %v10287_v23 = vadd.f32 %v10286_v34, %v10285_v33 }
 0x711   : > { %v10289_v19 = vadd.f32 %v10288_v35, %v10287_v23 }
 0x713   : > { %v10291_v20 = vadd.f32 %v10290_v44, %v10289_v19 }
 0x715   : > { %10292 = vadd.xlane.f32.xlu0 %v10291_v20 }
 0x7a2   : > { %v10293_v13 = vpop.xlane.xlu0 %10292 }
 0x7a3   : > { %v10294_v26 = vmax.f32 %v10293_v13, 0.1 }
 0x7a5   : > { %v10295_v41 = vsel %vm10284_vm1, %v10294_v26, 0.0  ;;  %v10305_v28 = vsub.f32 1.0, %v10294_v26 }
 0x7a6   : > { %v10296_v43 = vrot.slane %v10295_v41, 4 }
 0x7a7   : > { %v10306_v45 = vsel %vm10284_vm1, %v10305_v28, 0.0 }
 0x7a8   : > { %v10297_v30 = vadd.f32 %v10296_v43, %v10295_v41  ;;  %v10307_v46 = vrot.slane %v10306_v45, 4 }
 0x7aa   : > { %v10298_v32 = vrot.slane %v10297_v30, 2  ;;  %v10308_v37 = vadd.f32 %v10307_v46, %v10306_v45 }
 0x7ac   : > { %v10299_v51 = vadd.f32 %v10298_v32, %v10297_v30  ;;  %v10309_v39 = vrot.slane %v10308_v37, 2 }
 0x7ae   : > { %v10300_v36 = vrot.slane %v10299_v51, 1  ;;  %v10310_v38 = vadd.f32 %v10309_v39, %v10308_v37 }
 0x7b0   : > { %v10301_v50 = vadd.f32 %v10300_v36, %v10299_v51  ;;  %v10311_v54 = vrot.slane %v10310_v38, 1 }
 0x7b2   : > { %v10302_v55 = vmul.f32 0.5, %v10301_v50  ;;  %v10312_v56 = vadd.f32 %v10311_v54, %v10310_v38 }
 0x7b4   : > { %10304 = vst.msk [vmem:[#allocation7] sm:$0x1] %vm10303_vm2, %v10302_v55  ;;  %v10313_v40 = vmul.f32 0.5, %v10312_v56 }
 0x7b6   : > { %10314 = vst.msk [vmem:[#allocation6] sm:$0x1] %vm10303_vm2, %v10313_v40 }
 0x7b7 PF: > { %p11938_p8 = scmp.eq.s32.totalorder %s14182_s16, 6  ;;  %s14141_s5 = smov [#allocation6]  }
 0x7b8   : > { %s10322_s6 = sshll.u32 %s14141_s5, 4  ;;  %s14142_s7 = smov [#allocation7]   ;;  %s10323_s6 = int_to_ptr.vmem [resolvable:$true] %s10322_s6 }
 0x7b9   : > { %s10333_s8 = sshll.u32 %s14142_s7, 4  ;;  %s14039_s9 = scalar_lea.vmem %s10323_s6, 16  ;;  %s10334_s8 = int_to_ptr.vmem [resolvable:$true] %s10333_s8 }
 0x7ba   : > { %p14040_p4 = scmp.ne.s32.totalorder %s10323_s6, %s14039_s9  ;;  %s14045_s10 = scalar_lea.vmem %s10323_s6, 32 }
 0x7bb   : > { %p14046_p10 = scmp.lt.s32.totalorder %s10323_s6, %s10323_s6  ;;  %p14047_p12 = scmp.lt.s32.totalorder %s14045_s10, %s14039_s9 }
 0x7bc   : > { %p14041_p5 = pnand %p14040_p4, %p11938_p8 }
 0x7bd   : > { %p14048_p0 = por %p14047_p12, %p14046_p10 }
 0x7be   : > { %p14042_p6 = pneg %p14041_p5 }
 0x7c0   : > { %p14049_p1 = pnand %p14048_p0, %p14042_p6 }
 0x7c2   : > { %14052 = shalt.err (!%p14049_p1)
}
 0x7c3   : > { %s14053_s18 = scalar_lea.hbm %s15875_s2, 16 }
 0x7c4   : > { %p14054_p2 = scmp.ne.s32.totalorder %s15875_s2, %s14053_s18  ;;  %p14059_p3 = scmp.lt.u32.totalorder %s14053_s18, %s15875_s2 }
 0x7c6   : > { %p14055_p11 = pnand %p14054_p2, %p11938_p8 }
 0x7c8   : > { %p14056_p13 = pneg %p14055_p11 }
 0x7ca   : > { %p14061_p9 = pnand %p14059_p3, %p14056_p13 }
 0x7cc   : > { %14064 = shalt.err (!%p14061_p9)
}
 0x7cd   : > { %11926 = dma.vmem_to_hbm [thread:$0]  (%p11938_p8), %s10323_s6, 16, %s15875_s2, [#allocation5]  }
 0x7ce   : > { %s14065_s29 = scalar_lea.vmem %s10334_s8, 16  ;;  %s14071_s15 = scalar_lea.vmem %s10334_s8, 32 }
 0x7cf   : > { %p14066_p7 = scmp.ne.s32.totalorder %s10334_s8, %s14065_s29  ;;  %p14072_p6 = scmp.lt.s32.totalorder %s10334_s8, %s10334_s8 }
 0x7d0   : > { %p14073_p10 = scmp.lt.s32.totalorder %s14071_s15, %s14065_s29 }
 0x7d1   : > { %p14067_p4 = pnand %p14066_p7, %p11938_p8 }
 0x7d2   : > { %p14074_p12 = por %p14073_p10, %p14072_p6 }
 0x7d3   : > { %p14068_p5 = pneg %p14067_p4 }
 0x7d5   : > { %p14075_p0 = pnand %p14074_p12, %p14068_p5 }
 0x7d7   : > { %14078 = shalt.err (!%p14075_p0)
}
 0x7d8   : > { %s14079_s28 = scalar_lea.hbm %s15876_s3, 16 }
 0x7d9   : > { %p14080_p1 = scmp.ne.s32.totalorder %s15876_s3, %s14079_s28  ;;  %p14085_p13 = scmp.lt.u32.totalorder %s14079_s28, %s15876_s3 }
 0x7db   : > { %p14081_p2 = pnand %p14080_p1, %p11938_p8 }
 0x7dd   : > { %p14082_p11 = pneg %p14081_p2 }
 0x7df   : > { %p14087_p3 = pnand %p14085_p13, %p14082_p11 }
 0x7e1   : > { %14090 = shalt.err (!%p14087_p3)
}
 0x7e2   : > { %11928 = dma.vmem_to_hbm [thread:$0]  (%p11938_p8), %s10334_s8, 16, %s15876_s3, [#allocation8]  }
 0x7e3   : > { %14112 = dma.done.wait (%p11938_p8), [#allocation5], 16  }
 0x7e4   : > { %14114 = vsyncadd (%p11938_p8), [#allocation5], 4294967280 }
 0x7e5   : > { %14116 = dma.done.wait (%p11938_p8), [#allocation8], 16  }
 0x7e6   : > { %14118 = vsyncadd (%p11938_p8), [#allocation8], 4294967280 }
 0x7e7 PF: > { %p16_p9 = scmp.ge.s32.totalorder %s14185_s17, 9   ;;  %s15880_s12 = smov %s14125_s13 }
 0x7e8   : > { %s15881_s13 = smov %s14129_s14  ;;  %s15882_s14 = smov %s14195_s20 }
 0x7e9   : > { %s15883_s15 = smov %s14185_s17  ;;  %18 = sbr.rel (!%p16_p9) target bundleno = 5 (0x5), region = 82 }
 0x7f0   :  { %10350 = vsyncpa [#allocation4], 1 }
 0x7f1   :  { %10352 = vsyncpa [#allocation4 + $0x1], 1 }
 0x7f2   :  { %10353 = vsyncpa [#allocation5], 1 }
 0x7f3   :  { %10355 = vsyncpa [#allocation5 + $0x1], 1 }
 0x7f4   :  { %10356 = vsyncpa [#allocation8], 1 }

</bundles_post_ra>
